<compile_context>
chip_gen: v7x
topology: tpu7x:2x2x1
jax: 0.10.0
libtpu: 0.0.40
codegen_flags: <defaults>
</compile_context>

<pallas_src>
import jax
import jax.numpy as jnp
import numpy as np
from jax.experimental import pallas as pl
from jax.experimental.pallas import tpu as pltpu


# --------------------------------------------------------------------------- #
# compile-time constant helpers (numpy, built once in the wrapper)             #
# --------------------------------------------------------------------------- #
def _reflect_idx(i, n):
    if i < 0:
        return -i
    if i >= n:
        return 2 * n - 2 - i
    return i


def _mean_matrix(n_imgs, h, w):
    """(N*Hp*Wp, N) matrix: 1/(H*W) at the valid (non-border) positions of image n."""
    hp, wp = h + 2, w + 2
    m = np.zeros((n_imgs * hp * wp, n_imgs), np.float32)
    for n in range(n_imgs):
        for i in range(h):
            for j in range(w):
                m[n * hp * wp + (i + 1) * wp + (j + 1), n] = 1.0 / (h * w)
    return m


def _image_indicator(n_imgs, h, w):
    """(N, N*Hp*Wp) matrix: 1 at every padded position belonging to image n."""
    hp, wp = h + 2, w + 2
    m = np.zeros((n_imgs, n_imgs * hp * wp), np.float32)
    for n in range(n_imgs):
        m[n, n * hp * wp:(n + 1) * hp * wp] = 1.0
    return m


def _pool_matrix(n_imgs, h, w):
    """0/1 selection matrix implementing MaxPool2d(2) gather + reflect re-pad.

    Source geometry: padded (h+2, w+2); the 2x2 block max is available at every
    block top-left position (1+2i, 1+2j).  Target geometry: padded
    (h//2+2, w//2+2) with a reflect border.
    """
    hp, wp = h + 2, w + 2
    ho, wo = h // 2, w // 2
    hop, wop = ho + 2, wo + 2
    g = np.zeros((n_imgs * hp * wp, n_imgs * hop * wop), np.float32)
    for n in range(n_imgs):
        for pi in range(hop):
            for pj in range(wop):
                i = _reflect_idx(pi - 1, ho)
                j = _reflect_idx(pj - 1, wo)
                src = n * hp * wp + (1 + 2 * i) * wp + (1 + 2 * j)
                dst = n * hop * wop + pi * wop + pj
                g[src, dst] = 1.0
    return g


def _border_code(n_imgs, h, w):
    """(1, N*Hp*Wp) int32 codes: 0 interior, 1 top row, 2 bottom row (both excluding
    corners), 3 left column, 4 right column (including corners)."""
    hp, wp = h + 2, w + 2
    code = np.zeros((1, n_imgs * hp * wp), np.int32)
    for n in range(n_imgs):
        base = n * hp * wp
        for pj in range(1, wp - 1):
            code[0, base + pj] = 1
            code[0, base + (hp - 1) * wp + pj] = 2
        for pi in range(hp):
            code[0, base + pi * wp] = 3
            code[0, base + pi * wp + (wp - 1)] = 4
    return code


def _fold_conv_bn(w_oihw, gamma, beta, mean, var, eps=1e-5):
    """Fold eval-mode BatchNorm into a (bias-free) 3x3 conv and stack the 9 taps.

    Returns a (cout, 9*cin) weight (tap-major order kh*3+kw, cin inner) and a
    (cout, 1) bias so that the kernel's single matmul over the rolled im2col
    matrix reproduces Conv -> BatchNorm exactly.
    """
    cout, cin = w_oihw.shape[0], w_oihw.shape[1]
    scale = gamma / jnp.sqrt(var + eps)                                # (cout,)
    w_taps = jnp.transpose(w_oihw, (2, 3, 1, 0)).reshape(9 * cin, cout)
    w_stack = w_taps.T * scale[:, None]                                # (cout, 9*cin)
    bias = (beta - mean * scale).reshape(cout, 1)
    return w_stack.astype(jnp.float32), bias.astype(jnp.float32)


# --------------------------------------------------------------------------- #
# the Pallas kernel                                                             #
# --------------------------------------------------------------------------- #
def _build_register_kernel(n_imgs, h0, w0):
    # per-block geometry: (Wp, L = N*Hp*Wp) in flattened padded coordinates
    geoms = []
    h, w = h0, w0
    for _ in range(4):
        geoms.append((w + 2, n_imgs * (h + 2) * (w + 2)))
        h, w = h // 2, w // 2

    def kernel(*refs):
        (x_ref,
         w11, b11, w12, b12, w21, b21, w22, b22,
         w31, b31, w32, b32, w41, b41, w42, b42,
         g1, g2, g3, gmean, mmean, mimg, wfc,
         code1, code2, code3, code4, alpha_ref, out_ref) = refs

        conv_params = ((w11, b11, w12, b12), (w21, b21, w22, b22),
                       (w31, b31, w32, b32), (w41, b41, w42, b42))
        codes = (code1, code2, code3, code4)
        pools = (g1, g2, g3)

        def fetch(a, delta, length):
            # fetch(a, d)[:, p] == a[:, p + d]  -- a lane rotation on the XLU.
            # Wrap-around values only land on border/padding lanes that are later
            # overwritten (repad) or never selected (pool / mean matrices).
            shift = (-delta) % length
            if shift == 0:
                return a
            return pltpu.roll(a, shift=shift, axis=1)

        def conv_bn_prelu(a, w_ref, b_ref, alpha, wp, length):
            # 3x3 reflect-padded conv as ONE stacked MXU matmul over an im2col
            # matrix built from 9 lane rolls (BN scale is pre-folded into w_ref).
            taps = []
            for kh in range(3):
                for kw in range(3):
                    taps.append(fetch(a, (kh - 1) * wp + (kw - 1), length))
            s = jnp.concatenate(taps, axis=0)                       # (9*Cin, L)
            o = jnp.dot(w_ref[...], s, preferred_element_type=jnp.float32)
            o = o + b_ref[...]                                      # folded BN bias
            return jnp.where(o >= 0.0, o, alpha * o)                # PReLU

        def repad(a, code_ref, wp, length):
            # Rebuild the 1-pixel reflect border in padded coordinates: rows first,
            # then columns (so corners pick up row-fixed values -> exact reflect).
            code = code_ref[...]
            a = jnp.where(code == 1, fetch(a, 2 * wp, length), a)    # top row
            a = jnp.where(code == 2, fetch(a, -2 * wp, length), a)   # bottom row
            a = jnp.where(code == 3, fetch(a, 2, length), a)         # left column
            a = jnp.where(code == 4, fetch(a, -2, length), a)        # right column
            return a

        x = x_ref[...]
        # register(): remove the per-image, per-channel spatial mean.  Two tiny
        # selection matmuls keep everything in the lane-dense layout.
        means = jnp.dot(x, mmean[...], preferred_element_type=jnp.float32)    # (C0, N)
        act = x - jnp.dot(means, mimg[...], preferred_element_type=jnp.float32)

        for blk in range(4):
            wp, length = geoms[blk]
            w1_ref, b1_ref, w2_ref, b2_ref = conv_params[blk]
            y = conv_bn_prelu(act, w1_ref, b1_ref, alpha_ref[2 * blk], wp, length)
            y = repad(y, codes[blk], wp, length)
            y = conv_bn_prelu(y, w2_ref, b2_ref, alpha_ref[2 * blk + 1], wp, length)
            if blk < 3:
                # Fused MaxPool2d(2) + reflect re-pad of the pooled map:
                # two rolls + two max build the 2x2 block max at every top-left
                # position; a 0/1 selection matmul gathers the strided positions
                # (plus the reflected border) into the next padded layout.
                m = jnp.maximum(y, fetch(y, 1, length))
                m = jnp.maximum(m, fetch(m, wp, length))
                act = jnp.dot(m, pools[blk][...],
                              preferred_element_type=jnp.float32)
            else:
                act = y

        # global average over the valid spatial positions per image -> (fc_size, N)
        feat = jnp.dot(act, gmean[...], preferred_element_type=jnp.float32)
        # TODO(synk): Dropout(p=0.5) after the spatial mean uses eval (identity) semantics.
        logits = jnp.dot(wfc[...], feat, preferred_element_type=jnp.float32)   # (2, N)
        out_ref[...] = jax.nn.sigmoid(logits) * 2.0 - 1.0

    return kernel


# --------------------------------------------------------------------------- #
# wrappers                                                                      #
# --------------------------------------------------------------------------- #
def homography_register(image1, image2, params):
    """HomographyNet.register() (eval mode) via one fused Pallas kernel -> (N, 2)."""
    assert image1.shape == image2.shape
    n, cin, h, w = image1.shape
    assert h % 8 == 0 and w % 8 == 0, "three MaxPool2d(2) layers need H,W % 8 == 0"
    c0 = 2 * cin

    # fold eval-mode BatchNorm into the stacked conv weights / biases
    wstacks, biases = [], []
    for p in params["convs"]:
        w_s, b_s = _fold_conv_bn(p["w"], p["gamma"], p["beta"], p["mean"], p["var"])
        wstacks.append(w_s)
        biases.append(b_s)
    alphas = jnp.asarray([p["alpha"] for p in params["convs"]], jnp.float32)   # SMEM

    # compile-time constant selection matrices / border codes
    hs_list = [h, h // 2, h // 4, h // 8]
    ws_list = [w, w // 2, w // 4, w // 8]
    pool_mats = [jnp.asarray(_pool_matrix(n, hs_list[k], ws_list[k])) for k in range(3)]
    gmean = jnp.asarray(_mean_matrix(n, hs_list[3], ws_list[3]))
    mmean = jnp.asarray(_mean_matrix(n, hs_list[0], ws_list[0]))
    mimg = jnp.asarray(_image_indicator(n, hs_list[0], ws_list[0]))
    codes = [jnp.asarray(_border_code(n, hs_list[k], ws_list[k])) for k in range(4)]

    # lane-dense input layout: (channels, batch * padded spatial), reflect pre-padded
    x = jnp.concatenate([image1, image2], axis=1)                        # (N, 2Cin, H, W)
    xp = jnp.pad(x, ((0, 0), (0, 0), (1, 1), (1, 1)), mode="reflect")
    x2d = jnp.transpose(xp, (1, 0, 2, 3)).reshape(c0, n * (h + 2) * (w + 2))
    x2d = x2d.astype(jnp.float32)

    kernel = _build_register_kernel(n, h, w)
    n_inputs = 29
    in_specs = ([pl.BlockSpec(memory_space=pltpu.MemorySpace.VMEM)] * (n_inputs - 1)
                + [pl.BlockSpec(memory_space=pltpu.MemorySpace.SMEM)])      # alphas

    out = pl.pallas_call(
        kernel,
        out_shape=jax.ShapeDtypeStruct((2, n), jnp.float32),
        in_specs=in_specs,
        out_specs=pl.BlockSpec(memory_space=pltpu.MemorySpace.VMEM),
    )(x2d,
      wstacks[0], biases[0], wstacks[1], biases[1],
      wstacks[2], biases[2], wstacks[3], biases[3],
      wstacks[4], biases[4], wstacks[5], biases[5],
      wstacks[6], biases[6], wstacks[7], biases[7],
      pool_mats[0], pool_mats[1], pool_mats[2],
      gmean, mmean, mimg, params["wfc"].astype(jnp.float32),
      codes[0], codes[1], codes[2], codes[3], alphas)
    return out.T                                                          # (N, 2)


def _shift_bilinear(images, shifts):
    # TODO(synk): the Shift() transform module is not included in the provided spec;
    # we apply a standard bilinear sub-pixel translation (shift interpreted as
    # (dy, dx) pixel offsets, border-clamped), the usual MISR choice for 'translation'.
    n, c, h, w = images.shape
    yy = jnp.arange(h, dtype=jnp.float32)[:, None]
    xx = jnp.arange(w, dtype=jnp.float32)[None, :]

    def shift_one(img_chw, s):
        sy = jnp.clip(yy - s[0], 0.0, h - 1.0)
        sx = jnp.clip(xx - s[1], 0.0, w - 1.0)
        y0 = jnp.floor(sy)
        x0 = jnp.floor(sx)
        y1 = jnp.minimum(y0 + 1.0, h - 1.0)
        x1 = jnp.minimum(x0 + 1.0, w - 1.0)
        wy, wx = sy - y0, sx - x0
        y0i, y1i = y0.astype(jnp.int32), y1.astype(jnp.int32)
        x0i, x1i = x0.astype(jnp.int32), x1.astype(jnp.int32)

        def one_channel(ch):
            v00, v01 = ch[y0i, x0i], ch[y0i, x1i]
            v10, v11 = ch[y1i, x0i], ch[y1i, x1i]
            return ((1.0 - wy) * (1.0 - wx) * v00 + (1.0 - wy) * wx * v01
                    + wy * (1.0 - wx) * v10 + wy * wx * v11)

        return jax.vmap(one_channel)(img_chw)

    return jax.vmap(shift_one)(images, shifts)


def homography_forward(image1, image2, params):
    """HomographyNet.forward(): register, then translate image1 by the prediction."""
    shifts = homography_register(image1, image2, params)                 # (N, 2)
    return _shift_bilinear(image1, shifts)


# --------------------------------------------------------------------------- #
# pure-JAX reference for the register() path (correctness check)               #
# --------------------------------------------------------------------------- #
def _register_reference(image1, image2, params, eps=1e-5):
    x1 = image1 - jnp.mean(image1, axis=(2, 3), keepdims=True)
    x2 = image2 - jnp.mean(image2, axis=(2, 3), keepdims=True)
    x = jnp.concatenate([x1, x2], axis=1)

    def conv_bn_prelu(x, p):
        xp = jnp.pad(x, ((0, 0), (0, 0), (1, 1), (1, 1)), mode="reflect")
        y = jax.lax.conv_general_dilated(
            xp, p["w"], window_strides=(1, 1), padding="VALID",
            dimension_numbers=("NCHW", "OIHW", "NCHW"),
            precision=jax.lax.Precision.HIGHEST)
        scale = p["gamma"] / jnp.sqrt(p["var"] + eps)
        y = (y - p["mean"][None, :, None, None]) * scale[None, :, None, None] \
            + p["beta"][None, :, None, None]
        return jnp.where(y >= 0, y, p["alpha"] * y)

    for blk in range(4):
        x = conv_bn_prelu(x, params["convs"][2 * blk])
        x = conv_bn_prelu(x, params["convs"][2 * blk + 1])
        if blk < 3:
            nb, c, hc, wc = x.shape
            x = x.reshape(nb, c, hc // 2, 2, wc // 2, 2).max(axis=(3, 5))
    feat = x.mean(axis=(2, 3))
    logits = jnp.dot(feat, params["wfc"].T, precision=jax.lax.Precision.HIGHEST)
    return jax.nn.sigmoid(logits) * 2.0 - 1.0


# --------------------------------------------------------------------------- #
# demo                                                                          #
# --------------------------------------------------------------------------- #
if __name__ == "__main__":
    N, CIN, H, W = 2, 4, 16, 16        # batch=2, in_channels=4, input_size=(16,16)
    FC = 32                            # fc_size -> hidden_channels = 16
    hidden = FC // 2

    key = jax.random.PRNGKey(0)
    k_img1, k_img2, key = jax.random.split(key, 3)
    image1 = jax.random.normal(k_img1, (N, CIN, H, W), jnp.float32)
    image2 = jax.random.normal(k_img2, (N, CIN, H, W), jnp.float32)

    # channel plan of the HomographyNet CNN (4 blocks x 2 convs)
    c_in = [2 * CIN, hidden, hidden, hidden, hidden, 2 * hidden, 2 * hidden, 2 * hidden]
    c_out = [hidden, hidden, hidden, hidden, 2 * hidden, 2 * hidden, 2 * hidden, 2 * hidden]

    convs = []
    for i in range(8):
        key, kw_, kg, kb, km, kv = jax.random.split(key, 6)
        fan_in = 9 * c_in[i]
        convs.append(dict(
            w=jax.random.normal(kw_, (c_out[i], c_in[i], 3, 3), jnp.float32)
              * np.sqrt(2.0 / fan_in),
            gamma=jax.random.uniform(kg, (c_out[i],), jnp.float32, 0.8, 1.2),
            beta=0.1 * jax.random.normal(kb, (c_out[i],), jnp.float32),
            mean=0.1 * jax.random.normal(km, (c_out[i],), jnp.float32),
            var=jax.random.uniform(kv, (c_out[i],), jnp.float32, 0.5, 1.5),
            alpha=jnp.float32(0.10 + 0.05 * i),        # distinct PReLU slopes
        ))
    key, kfc = jax.random.split(key)
    params = dict(convs=convs,
                  wfc=jax.random.normal(kfc, (2, FC), jnp.float32) / np.sqrt(FC))

    pred = jax.block_until_ready(homography_register(image1, image2, params))
    ref = jax.block_until_ready(_register_reference(image1, image2, params))
    assert pred.shape == (N, 2)
    np.testing.assert_allclose(np.asarray(pred), np.asarray(ref), atol=1e-3, rtol=1e-3)

    warped = jax.block_until_ready(homography_forward(image1, image2, params))
    assert warped.shape == (N, CIN, H, W)

    print("KERNEL_OK")
</pallas_src>

<mosaic_0001>
module attributes {stable_mosaic.version = 11 : i64} {
  func.func @kernel(%arg0: memref<8x648xf32, #tpu.memory_space<vmem>>, %arg1: memref<16x72xf32, #tpu.memory_space<vmem>>, %arg2: memref<16x1xf32, #tpu.memory_space<vmem>>, %arg3: memref<16x144xf32, #tpu.memory_space<vmem>>, %arg4: memref<16x1xf32, #tpu.memory_space<vmem>>, %arg5: memref<16x144xf32, #tpu.memory_space<vmem>>, %arg6: memref<16x1xf32, #tpu.memory_space<vmem>>, %arg7: memref<16x144xf32, #tpu.memory_space<vmem>>, %arg8: memref<16x1xf32, #tpu.memory_space<vmem>>, %arg9: memref<32x144xf32, #tpu.memory_space<vmem>>, %arg10: memref<32x1xf32, #tpu.memory_space<vmem>>, %arg11: memref<32x288xf32, #tpu.memory_space<vmem>>, %arg12: memref<32x1xf32, #tpu.memory_space<vmem>>, %arg13: memref<32x288xf32, #tpu.memory_space<vmem>>, %arg14: memref<32x1xf32, #tpu.memory_space<vmem>>, %arg15: memref<32x288xf32, #tpu.memory_space<vmem>>, %arg16: memref<32x1xf32, #tpu.memory_space<vmem>>, %arg17: memref<648x200xf32, #tpu.memory_space<vmem>>, %arg18: memref<200x72xf32, #tpu.memory_space<vmem>>, %arg19: memref<72x32xf32, #tpu.memory_space<vmem>>, %arg20: memref<32x2xf32, #tpu.memory_space<vmem>>, %arg21: memref<648x2xf32, #tpu.memory_space<vmem>>, %arg22: memref<2x648xf32, #tpu.memory_space<vmem>>, %arg23: memref<2x32xf32, #tpu.memory_space<vmem>>, %arg24: memref<1x648xi32, #tpu.memory_space<vmem>>, %arg25: memref<1x200xi32, #tpu.memory_space<vmem>>, %arg26: memref<1x72xi32, #tpu.memory_space<vmem>>, %arg27: memref<1x32xi32, #tpu.memory_space<vmem>>, %arg28: memref<8xf32, #tpu.memory_space<smem>>, %arg29: memref<2x2xf32, #tpu.memory_space<vmem>>) attributes {dimension_semantics = [], scalar_prefetch = 0 : i64, scratch_operands = 0 : i64, tpu.core_type = #tpu.core_type<tc>} {
    %c0 = arith.constant 0 : index
    %c0_0 = arith.constant 0 : index
    %0 = vector.load %arg0[%c0, %c0_0] : memref<8x648xf32, #tpu.memory_space<vmem>>, vector<8x648xf32>
    %c0_1 = arith.constant 0 : index
    %c0_2 = arith.constant 0 : index
    %1 = vector.load %arg21[%c0_1, %c0_2] : memref<648x2xf32, #tpu.memory_space<vmem>>, vector<648x2xf32>
    %cst = arith.constant dense<0.000000e+00> : vector<8x2xf32>
    %2 = tpu.matmul %0, %1, %cst {dimension_numbers = #tpu.dot_dimension_numbers<[1], [0], [0], [1], [0, 0, 1, 1], [], []>} : vector<8x648xf32>, vector<648x2xf32>, vector<8x2xf32> -> vector<8x2xf32>
    %c0_3 = arith.constant 0 : index
    %c0_4 = arith.constant 0 : index
    %3 = vector.load %arg22[%c0_3, %c0_4] : memref<2x648xf32, #tpu.memory_space<vmem>>, vector<2x648xf32>
    %cst_5 = arith.constant dense<0.000000e+00> : vector<8x648xf32>
    %4 = tpu.matmul %2, %3, %cst_5 {dimension_numbers = #tpu.dot_dimension_numbers<[1], [0], [0], [1], [0, 0, 1, 1], [], []>} : vector<8x2xf32>, vector<2x648xf32>, vector<8x648xf32> -> vector<8x648xf32>
    %5 = arith.subf %0, %4 : vector<8x648xf32>
    %c0_6 = arith.constant 0 : index
    %6 = memref.load %arg28[%c0_6] : memref<8xf32, #tpu.memory_space<smem>>
    %c19_i32 = arith.constant 19 : i32
    %7 = tpu.dynamic_rotate %5 by %c19_i32 dim 1 : vector<8x648xf32>, i32 -> vector<8x648xf32>
    %c18_i32 = arith.constant 18 : i32
    %8 = tpu.dynamic_rotate %5 by %c18_i32 dim 1 : vector<8x648xf32>, i32 -> vector<8x648xf32>
    %c17_i32 = arith.constant 17 : i32
    %9 = tpu.dynamic_rotate %5 by %c17_i32 dim 1 : vector<8x648xf32>, i32 -> vector<8x648xf32>
    %c1_i32 = arith.constant 1 : i32
    %10 = tpu.dynamic_rotate %5 by %c1_i32 dim 1 : vector<8x648xf32>, i32 -> vector<8x648xf32>
    %c647_i32 = arith.constant 647 : i32
    %11 = tpu.dynamic_rotate %5 by %c647_i32 dim 1 : vector<8x648xf32>, i32 -> vector<8x648xf32>
    %c631_i32 = arith.constant 631 : i32
    %12 = tpu.dynamic_rotate %5 by %c631_i32 dim 1 : vector<8x648xf32>, i32 -> vector<8x648xf32>
    %c630_i32 = arith.constant 630 : i32
    %13 = tpu.dynamic_rotate %5 by %c630_i32 dim 1 : vector<8x648xf32>, i32 -> vector<8x648xf32>
    %c629_i32 = arith.constant 629 : i32
    %14 = tpu.dynamic_rotate %5 by %c629_i32 dim 1 : vector<8x648xf32>, i32 -> vector<8x648xf32>
    %15 = tpu.concatenate %7, %8, %9, %10, %5, %11, %12, %13, %14 in 0 : vector<8x648xf32>, vector<8x648xf32>, vector<8x648xf32>, vector<8x648xf32>, vector<8x648xf32>, vector<8x648xf32>, vector<8x648xf32>, vector<8x648xf32>, vector<8x648xf32> -> vector<72x648xf32>
    %c0_7 = arith.constant 0 : index
    %c0_8 = arith.constant 0 : index
    %16 = vector.load %arg1[%c0_7, %c0_8] : memref<16x72xf32, #tpu.memory_space<vmem>>, vector<16x72xf32>
    %cst_9 = arith.constant dense<0.000000e+00> : vector<16x648xf32>
    %17 = tpu.matmul %16, %15, %cst_9 {dimension_numbers = #tpu.dot_dimension_numbers<[1], [0], [0], [1], [0, 0, 1, 1], [], []>} : vector<16x72xf32>, vector<72x648xf32>, vector<16x648xf32> -> vector<16x648xf32>
    %c0_10 = arith.constant 0 : index
    %c0_11 = arith.constant 0 : index
    %18 = vector.load %arg2[%c0_10, %c0_11] : memref<16x1xf32, #tpu.memory_space<vmem>>, vector<16x1xf32>
    %19 = vector.broadcast %18 : vector<16x1xf32> to vector<16x648xf32>
    %20 = arith.addf %17, %19 : vector<16x648xf32>
    %cst_12 = arith.constant 0.000000e+00 : f32
    %21 = vector.broadcast %cst_12 : f32 to vector<16x648xf32>
    %22 = arith.cmpf oge, %20, %21 : vector<16x648xf32>
    %23 = vector.broadcast %6 : f32 to vector<16x648xf32>
    %24 = arith.mulf %23, %20 : vector<16x648xf32>
    %25 = arith.select %22, %20, %24 : vector<16x648xi1>, vector<16x648xf32>
    %c0_13 = arith.constant 0 : index
    %c0_14 = arith.constant 0 : index
    %26 = vector.load %arg24[%c0_13, %c0_14] : memref<1x648xi32, #tpu.memory_space<vmem>>, vector<1x648xi32>
    %c1_i32_15 = arith.constant 1 : i32
    %27 = vector.broadcast %c1_i32_15 : i32 to vector<1x648xi32>
    %28 = arith.cmpi eq, %26, %27 : vector<1x648xi32>
    %c612_i32 = arith.constant 612 : i32
    %29 = tpu.dynamic_rotate %25 by %c612_i32 dim 1 : vector<16x648xf32>, i32 -> vector<16x648xf32>
    %30 = vector.shape_cast %28 : vector<1x648xi1> to vector<1x648xi1>
    %31 = vector.broadcast %30 : vector<1x648xi1> to vector<16x648xi1>
    %32 = arith.select %31, %29, %25 : vector<16x648xi1>, vector<16x648xf32>
    %c2_i32 = arith.constant 2 : i32
    %33 = vector.broadcast %c2_i32 : i32 to vector<1x648xi32>
    %34 = arith.cmpi eq, %26, %33 : vector<1x648xi32>
    %c36_i32 = arith.constant 36 : i32
    %35 = tpu.dynamic_rotate %32 by %c36_i32 dim 1 : vector<16x648xf32>, i32 -> vector<16x648xf32>
    %36 = vector.shape_cast %34 : vector<1x648xi1> to vector<1x648xi1>
    %37 = vector.broadcast %36 : vector<1x648xi1> to vector<16x648xi1>
    %38 = arith.select %37, %35, %32 : vector<16x648xi1>, vector<16x648xf32>
    %c3_i32 = arith.constant 3 : i32
    %39 = vector.broadcast %c3_i32 : i32 to vector<1x648xi32>
    %40 = arith.cmpi eq, %26, %39 : vector<1x648xi32>
    %c646_i32 = arith.constant 646 : i32
    %41 = tpu.dynamic_rotate %38 by %c646_i32 dim 1 : vector<16x648xf32>, i32 -> vector<16x648xf32>
    %42 = vector.shape_cast %40 : vector<1x648xi1> to vector<1x648xi1>
    %43 = vector.broadcast %42 : vector<1x648xi1> to vector<16x648xi1>
    %44 = arith.select %43, %41, %38 : vector<16x648xi1>, vector<16x648xf32>
    %c4_i32 = arith.constant 4 : i32
    %45 = vector.broadcast %c4_i32 : i32 to vector<1x648xi32>
    %46 = arith.cmpi eq, %26, %45 : vector<1x648xi32>
    %c2_i32_16 = arith.constant 2 : i32
    %47 = tpu.dynamic_rotate %44 by %c2_i32_16 dim 1 : vector<16x648xf32>, i32 -> vector<16x648xf32>
    %48 = vector.shape_cast %46 : vector<1x648xi1> to vector<1x648xi1>
    %49 = vector.broadcast %48 : vector<1x648xi1> to vector<16x648xi1>
    %50 = arith.select %49, %47, %44 : vector<16x648xi1>, vector<16x648xf32>
    %c1 = arith.constant 1 : index
    %51 = memref.load %arg28[%c1] : memref<8xf32, #tpu.memory_space<smem>>
    %c19_i32_17 = arith.constant 19 : i32
    %52 = tpu.dynamic_rotate %50 by %c19_i32_17 dim 1 : vector<16x648xf32>, i32 -> vector<16x648xf32>
    %c18_i32_18 = arith.constant 18 : i32
    %53 = tpu.dynamic_rotate %50 by %c18_i32_18 dim 1 : vector<16x648xf32>, i32 -> vector<16x648xf32>
    %c17_i32_19 = arith.constant 17 : i32
    %54 = tpu.dynamic_rotate %50 by %c17_i32_19 dim 1 : vector<16x648xf32>, i32 -> vector<16x648xf32>
    %c1_i32_20 = arith.constant 1 : i32
    %55 = tpu.dynamic_rotate %50 by %c1_i32_20 dim 1 : vector<16x648xf32>, i32 -> vector<16x648xf32>
    %c647_i32_21 = arith.constant 647 : i32
    %56 = tpu.dynamic_rotate %50 by %c647_i32_21 dim 1 : vector<16x648xf32>, i32 -> vector<16x648xf32>
    %c631_i32_22 = arith.constant 631 : i32
    %57 = tpu.dynamic_rotate %50 by %c631_i32_22 dim 1 : vector<16x648xf32>, i32 -> vector<16x648xf32>
    %c630_i32_23 = arith.constant 630 : i32
    %58 = tpu.dynamic_rotate %50 by %c630_i32_23 dim 1 : vector<16x648xf32>, i32 -> vector<16x648xf32>
    %c629_i32_24 = arith.constant 629 : i32
    %59 = tpu.dynamic_rotate %50 by %c629_i32_24 dim 1 : vector<16x648xf32>, i32 -> vector<16x648xf32>
    %60 = tpu.concatenate %52, %53, %54, %55, %50, %56, %57, %58, %59 in 0 : vector<16x648xf32>, vector<16x648xf32>, vector<16x648xf32>, vector<16x648xf32>, vector<16x648xf32>, vector<16x648xf32>, vector<16x648xf32>, vector<16x648xf32>, vector<16x648xf32> -> vector<144x648xf32>
    %c0_25 = arith.constant 0 : index
    %c0_26 = arith.constant 0 : index
    %61 = vector.load %arg3[%c0_25, %c0_26] : memref<16x144xf32, #tpu.memory_space<vmem>>, vector<16x144xf32>
    %cst_27 = arith.constant dense<0.000000e+00> : vector<16x648xf32>
    %62 = tpu.matmul %61, %60, %cst_27 {dimension_numbers = #tpu.dot_dimension_numbers<[1], [0], [0], [1], [0, 0, 1, 1], [], []>} : vector<16x144xf32>, vector<144x648xf32>, vector<16x648xf32> -> vector<16x648xf32>
    %c0_28 = arith.constant 0 : index
    %c0_29 = arith.constant 0 : index
    %63 = vector.load %arg4[%c0_28, %c0_29] : memref<16x1xf32, #tpu.memory_space<vmem>>, vector<16x1xf32>
    %64 = vector.broadcast %63 : vector<16x1xf32> to vector<16x648xf32>
    %65 = arith.addf %62, %64 : vector<16x648xf32>
    %cst_30 = arith.constant 0.000000e+00 : f32
    %66 = vector.broadcast %cst_30 : f32 to vector<16x648xf32>
    %67 = arith.cmpf oge, %65, %66 : vector<16x648xf32>
    %68 = vector.broadcast %51 : f32 to vector<16x648xf32>
    %69 = arith.mulf %68, %65 : vector<16x648xf32>
    %70 = arith.select %67, %65, %69 : vector<16x648xi1>, vector<16x648xf32>
    %c647_i32_31 = arith.constant 647 : i32
    %71 = tpu.dynamic_rotate %70 by %c647_i32_31 dim 1 : vector<16x648xf32>, i32 -> vector<16x648xf32>
    %72 = arith.maximumf %70, %71 : vector<16x648xf32>
    %c630_i32_32 = arith.constant 630 : i32
    %73 = tpu.dynamic_rotate %72 by %c630_i32_32 dim 1 : vector<16x648xf32>, i32 -> vector<16x648xf32>
    %74 = arith.maximumf %72, %73 : vector<16x648xf32>
    %c0_33 = arith.constant 0 : index
    %c0_34 = arith.constant 0 : index
    %75 = vector.load %arg17[%c0_33, %c0_34] : memref<648x200xf32, #tpu.memory_space<vmem>>, vector<648x200xf32>
    %cst_35 = arith.constant dense<0.000000e+00> : vector<16x200xf32>
    %76 = tpu.matmul %74, %75, %cst_35 {dimension_numbers = #tpu.dot_dimension_numbers<[1], [0], [0], [1], [0, 0, 1, 1], [], []>} : vector<16x648xf32>, vector<648x200xf32>, vector<16x200xf32> -> vector<16x200xf32>
    %c2 = arith.constant 2 : index
    %77 = memref.load %arg28[%c2] : memref<8xf32, #tpu.memory_space<smem>>
    %c11_i32 = arith.constant 11 : i32
    %78 = tpu.dynamic_rotate %76 by %c11_i32 dim 1 : vector<16x200xf32>, i32 -> vector<16x200xf32>
    %c10_i32 = arith.constant 10 : i32
    %79 = tpu.dynamic_rotate %76 by %c10_i32 dim 1 : vector<16x200xf32>, i32 -> vector<16x200xf32>
    %c9_i32 = arith.constant 9 : i32
    %80 = tpu.dynamic_rotate %76 by %c9_i32 dim 1 : vector<16x200xf32>, i32 -> vector<16x200xf32>
    %c1_i32_36 = arith.constant 1 : i32
    %81 = tpu.dynamic_rotate %76 by %c1_i32_36 dim 1 : vector<16x200xf32>, i32 -> vector<16x200xf32>
    %c199_i32 = arith.constant 199 : i32
    %82 = tpu.dynamic_rotate %76 by %c199_i32 dim 1 : vector<16x200xf32>, i32 -> vector<16x200xf32>
    %c191_i32 = arith.constant 191 : i32
    %83 = tpu.dynamic_rotate %76 by %c191_i32 dim 1 : vector<16x200xf32>, i32 -> vector<16x200xf32>
    %c190_i32 = arith.constant 190 : i32
    %84 = tpu.dynamic_rotate %76 by %c190_i32 dim 1 : vector<16x200xf32>, i32 -> vector<16x200xf32>
    %c189_i32 = arith.constant 189 : i32
    %85 = tpu.dynamic_rotate %76 by %c189_i32 dim 1 : vector<16x200xf32>, i32 -> vector<16x200xf32>
    %86 = tpu.concatenate %78, %79, %80, %81, %76, %82, %83, %84, %85 in 0 : vector<16x200xf32>, vector<16x200xf32>, vector<16x200xf32>, vector<16x200xf32>, vector<16x200xf32>, vector<16x200xf32>, vector<16x200xf32>, vector<16x200xf32>, vector<16x200xf32> -> vector<144x200xf32>
    %c0_37 = arith.constant 0 : index
    %c0_38 = arith.constant 0 : index
    %87 = vector.load %arg5[%c0_37, %c0_38] : memref<16x144xf32, #tpu.memory_space<vmem>>, vector<16x144xf32>
    %cst_39 = arith.constant dense<0.000000e+00> : vector<16x200xf32>
    %88 = tpu.matmul %87, %86, %cst_39 {dimension_numbers = #tpu.dot_dimension_numbers<[1], [0], [0], [1], [0, 0, 1, 1], [], []>} : vector<16x144xf32>, vector<144x200xf32>, vector<16x200xf32> -> vector<16x200xf32>
    %c0_40 = arith.constant 0 : index
    %c0_41 = arith.constant 0 : index
    %89 = vector.load %arg6[%c0_40, %c0_41] : memref<16x1xf32, #tpu.memory_space<vmem>>, vector<16x1xf32>
    %90 = vector.broadcast %89 : vector<16x1xf32> to vector<16x200xf32>
    %91 = arith.addf %88, %90 : vector<16x200xf32>
    %cst_42 = arith.constant 0.000000e+00 : f32
    %92 = vector.broadcast %cst_42 : f32 to vector<16x200xf32>
    %93 = arith.cmpf oge, %91, %92 : vector<16x200xf32>
    %94 = vector.broadcast %77 : f32 to vector<16x200xf32>
    %95 = arith.mulf %94, %91 : vector<16x200xf32>
    %96 = arith.select %93, %91, %95 : vector<16x200xi1>, vector<16x200xf32>
    %c0_43 = arith.constant 0 : index
    %c0_44 = arith.constant 0 : index
    %97 = vector.load %arg25[%c0_43, %c0_44] : memref<1x200xi32, #tpu.memory_space<vmem>>, vector<1x200xi32>
    %c1_i32_45 = arith.constant 1 : i32
    %98 = vector.broadcast %c1_i32_45 : i32 to vector<1x200xi32>
    %99 = arith.cmpi eq, %97, %98 : vector<1x200xi32>
    %c180_i32 = arith.constant 180 : i32
    %100 = tpu.dynamic_rotate %96 by %c180_i32 dim 1 : vector<16x200xf32>, i32 -> vector<16x200xf32>
    %101 = vector.shape_cast %99 : vector<1x200xi1> to vector<1x200xi1>
    %102 = vector.broadcast %101 : vector<1x200xi1> to vector<16x200xi1>
    %103 = arith.select %102, %100, %96 : vector<16x200xi1>, vector<16x200xf32>
    %c2_i32_46 = arith.constant 2 : i32
    %104 = vector.broadcast %c2_i32_46 : i32 to vector<1x200xi32>
    %105 = arith.cmpi eq, %97, %104 : vector<1x200xi32>
    %c20_i32 = arith.constant 20 : i32
    %106 = tpu.dynamic_rotate %103 by %c20_i32 dim 1 : vector<16x200xf32>, i32 -> vector<16x200xf32>
    %107 = vector.shape_cast %105 : vector<1x200xi1> to vector<1x200xi1>
    %108 = vector.broadcast %107 : vector<1x200xi1> to vector<16x200xi1>
    %109 = arith.select %108, %106, %103 : vector<16x200xi1>, vector<16x200xf32>
    %c3_i32_47 = arith.constant 3 : i32
    %110 = vector.broadcast %c3_i32_47 : i32 to vector<1x200xi32>
    %111 = arith.cmpi eq, %97, %110 : vector<1x200xi32>
    %c198_i32 = arith.constant 198 : i32
    %112 = tpu.dynamic_rotate %109 by %c198_i32 dim 1 : vector<16x200xf32>, i32 -> vector<16x200xf32>
    %113 = vector.shape_cast %111 : vector<1x200xi1> to vector<1x200xi1>
    %114 = vector.broadcast %113 : vector<1x200xi1> to vector<16x200xi1>
    %115 = arith.select %114, %112, %109 : vector<16x200xi1>, vector<16x200xf32>
    %c4_i32_48 = arith.constant 4 : i32
    %116 = vector.broadcast %c4_i32_48 : i32 to vector<1x200xi32>
    %117 = arith.cmpi eq, %97, %116 : vector<1x200xi32>
    %c2_i32_49 = arith.constant 2 : i32
    %118 = tpu.dynamic_rotate %115 by %c2_i32_49 dim 1 : vector<16x200xf32>, i32 -> vector<16x200xf32>
    %119 = vector.shape_cast %117 : vector<1x200xi1> to vector<1x200xi1>
    %120 = vector.broadcast %119 : vector<1x200xi1> to vector<16x200xi1>
    %121 = arith.select %120, %118, %115 : vector<16x200xi1>, vector<16x200xf32>
    %c3 = arith.constant 3 : index
    %122 = memref.load %arg28[%c3] : memref<8xf32, #tpu.memory_space<smem>>
    %c11_i32_50 = arith.constant 11 : i32
    %123 = tpu.dynamic_rotate %121 by %c11_i32_50 dim 1 : vector<16x200xf32>, i32 -> vector<16x200xf32>
    %c10_i32_51 = arith.constant 10 : i32
    %124 = tpu.dynamic_rotate %121 by %c10_i32_51 dim 1 : vector<16x200xf32>, i32 -> vector<16x200xf32>
    %c9_i32_52 = arith.constant 9 : i32
    %125 = tpu.dynamic_rotate %121 by %c9_i32_52 dim 1 : vector<16x200xf32>, i32 -> vector<16x200xf32>
    %c1_i32_53 = arith.constant 1 : i32
    %126 = tpu.dynamic_rotate %121 by %c1_i32_53 dim 1 : vector<16x200xf32>, i32 -> vector<16x200xf32>
    %c199_i32_54 = arith.constant 199 : i32
    %127 = tpu.dynamic_rotate %121 by %c199_i32_54 dim 1 : vector<16x200xf32>, i32 -> vector<16x200xf32>
    %c191_i32_55 = arith.constant 191 : i32
    %128 = tpu.dynamic_rotate %121 by %c191_i32_55 dim 1 : vector<16x200xf32>, i32 -> vector<16x200xf32>
    %c190_i32_56 = arith.constant 190 : i32
    %129 = tpu.dynamic_rotate %121 by %c190_i32_56 dim 1 : vector<16x200xf32>, i32 -> vector<16x200xf32>
    %c189_i32_57 = arith.constant 189 : i32
    %130 = tpu.dynamic_rotate %121 by %c189_i32_57 dim 1 : vector<16x200xf32>, i32 -> vector<16x200xf32>
    %131 = tpu.concatenate %123, %124, %125, %126, %121, %127, %128, %129, %130 in 0 : vector<16x200xf32>, vector<16x200xf32>, vector<16x200xf32>, vector<16x200xf32>, vector<16x200xf32>, vector<16x200xf32>, vector<16x200xf32>, vector<16x200xf32>, vector<16x200xf32> -> vector<144x200xf32>
    %c0_58 = arith.constant 0 : index
    %c0_59 = arith.constant 0 : index
    %132 = vector.load %arg7[%c0_58, %c0_59] : memref<16x144xf32, #tpu.memory_space<vmem>>, vector<16x144xf32>
    %cst_60 = arith.constant dense<0.000000e+00> : vector<16x200xf32>
    %133 = tpu.matmul %132, %131, %cst_60 {dimension_numbers = #tpu.dot_dimension_numbers<[1], [0], [0], [1], [0, 0, 1, 1], [], []>} : vector<16x144xf32>, vector<144x200xf32>, vector<16x200xf32> -> vector<16x200xf32>
    %c0_61 = arith.constant 0 : index
    %c0_62 = arith.constant 0 : index
    %134 = vector.load %arg8[%c0_61, %c0_62] : memref<16x1xf32, #tpu.memory_space<vmem>>, vector<16x1xf32>
    %135 = vector.broadcast %134 : vector<16x1xf32> to vector<16x200xf32>
    %136 = arith.addf %133, %135 : vector<16x200xf32>
    %cst_63 = arith.constant 0.000000e+00 : f32
    %137 = vector.broadcast %cst_63 : f32 to vector<16x200xf32>
    %138 = arith.cmpf oge, %136, %137 : vector<16x200xf32>
    %139 = vector.broadcast %122 : f32 to vector<16x200xf32>
    %140 = arith.mulf %139, %136 : vector<16x200xf32>
    %141 = arith.select %138, %136, %140 : vector<16x200xi1>, vector<16x200xf32>
    %c199_i32_64 = arith.constant 199 : i32
    %142 = tpu.dynamic_rotate %141 by %c199_i32_64 dim 1 : vector<16x200xf32>, i32 -> vector<16x200xf32>
    %143 = arith.maximumf %141, %142 : vector<16x200xf32>
    %c190_i32_65 = arith.constant 190 : i32
    %144 = tpu.dynamic_rotate %143 by %c190_i32_65 dim 1 : vector<16x200xf32>, i32 -> vector<16x200xf32>
    %145 = arith.maximumf %143, %144 : vector<16x200xf32>
    %c0_66 = arith.constant 0 : index
    %c0_67 = arith.constant 0 : index
    %146 = vector.load %arg18[%c0_66, %c0_67] : memref<200x72xf32, #tpu.memory_space<vmem>>, vector<200x72xf32>
    %cst_68 = arith.constant dense<0.000000e+00> : vector<16x72xf32>
    %147 = tpu.matmul %145, %146, %cst_68 {dimension_numbers = #tpu.dot_dimension_numbers<[1], [0], [0], [1], [0, 0, 1, 1], [], []>} : vector<16x200xf32>, vector<200x72xf32>, vector<16x72xf32> -> vector<16x72xf32>
    %c4 = arith.constant 4 : index
    %148 = memref.load %arg28[%c4] : memref<8xf32, #tpu.memory_space<smem>>
    %c7_i32 = arith.constant 7 : i32
    %149 = tpu.dynamic_rotate %147 by %c7_i32 dim 1 : vector<16x72xf32>, i32 -> vector<16x72xf32>
    %c6_i32 = arith.constant 6 : i32
    %150 = tpu.dynamic_rotate %147 by %c6_i32 dim 1 : vector<16x72xf32>, i32 -> vector<16x72xf32>
    %c5_i32 = arith.constant 5 : i32
    %151 = tpu.dynamic_rotate %147 by %c5_i32 dim 1 : vector<16x72xf32>, i32 -> vector<16x72xf32>
    %c1_i32_69 = arith.constant 1 : i32
    %152 = tpu.dynamic_rotate %147 by %c1_i32_69 dim 1 : vector<16x72xf32>, i32 -> vector<16x72xf32>
    %c71_i32 = arith.constant 71 : i32
    %153 = tpu.dynamic_rotate %147 by %c71_i32 dim 1 : vector<16x72xf32>, i32 -> vector<16x72xf32>
    %c67_i32 = arith.constant 67 : i32
    %154 = tpu.dynamic_rotate %147 by %c67_i32 dim 1 : vector<16x72xf32>, i32 -> vector<16x72xf32>
    %c66_i32 = arith.constant 66 : i32
    %155 = tpu.dynamic_rotate %147 by %c66_i32 dim 1 : vector<16x72xf32>, i32 -> vector<16x72xf32>
    %c65_i32 = arith.constant 65 : i32
    %156 = tpu.dynamic_rotate %147 by %c65_i32 dim 1 : vector<16x72xf32>, i32 -> vector<16x72xf32>
    %157 = tpu.concatenate %149, %150, %151, %152, %147, %153, %154, %155, %156 in 0 : vector<16x72xf32>, vector<16x72xf32>, vector<16x72xf32>, vector<16x72xf32>, vector<16x72xf32>, vector<16x72xf32>, vector<16x72xf32>, vector<16x72xf32>, vector<16x72xf32> -> vector<144x72xf32>
    %c0_70 = arith.constant 0 : index
    %c0_71 = arith.constant 0 : index
    %158 = vector.load %arg9[%c0_70, %c0_71] : memref<32x144xf32, #tpu.memory_space<vmem>>, vector<32x144xf32>
    %cst_72 = arith.constant dense<0.000000e+00> : vector<32x72xf32>
    %159 = tpu.matmul %158, %157, %cst_72 {dimension_numbers = #tpu.dot_dimension_numbers<[1], [0], [0], [1], [0, 0, 1, 1], [], []>} : vector<32x144xf32>, vector<144x72xf32>, vector<32x72xf32> -> vector<32x72xf32>
    %c0_73 = arith.constant 0 : index
    %c0_74 = arith.constant 0 : index
    %160 = vector.load %arg10[%c0_73, %c0_74] : memref<32x1xf32, #tpu.memory_space<vmem>>, vector<32x1xf32>
    %161 = vector.broadcast %160 : vector<32x1xf32> to vector<32x72xf32>
    %162 = arith.addf %159, %161 : vector<32x72xf32>
    %cst_75 = arith.constant 0.000000e+00 : f32
    %163 = vector.broadcast %cst_75 : f32 to vector<32x72xf32>
    %164 = arith.cmpf oge, %162, %163 : vector<32x72xf32>
    %165 = vector.broadcast %148 : f32 to vector<32x72xf32>
    %166 = arith.mulf %165, %162 : vector<32x72xf32>
    %167 = arith.select %164, %162, %166 : vector<32x72xi1>, vector<32x72xf32>
    %c0_76 = arith.constant 0 : index
    %c0_77 = arith.constant 0 : index
    %168 = vector.load %arg26[%c0_76, %c0_77] : memref<1x72xi32, #tpu.memory_space<vmem>>, vector<1x72xi32>
    %c1_i32_78 = arith.constant 1 : i32
    %169 = vector.broadcast %c1_i32_78 : i32 to vector<1x72xi32>
    %170 = arith.cmpi eq, %168, %169 : vector<1x72xi32>
    %c60_i32 = arith.constant 60 : i32
    %171 = tpu.dynamic_rotate %167 by %c60_i32 dim 1 : vector<32x72xf32>, i32 -> vector<32x72xf32>
    %172 = vector.shape_cast %170 : vector<1x72xi1> to vector<1x72xi1>
    %173 = vector.broadcast %172 : vector<1x72xi1> to vector<32x72xi1>
    %174 = arith.select %173, %171, %167 : vector<32x72xi1>, vector<32x72xf32>
    %c2_i32_79 = arith.constant 2 : i32
    %175 = vector.broadcast %c2_i32_79 : i32 to vector<1x72xi32>
    %176 = arith.cmpi eq, %168, %175 : vector<1x72xi32>
    %c12_i32 = arith.constant 12 : i32
    %177 = tpu.dynamic_rotate %174 by %c12_i32 dim 1 : vector<32x72xf32>, i32 -> vector<32x72xf32>
    %178 = vector.shape_cast %176 : vector<1x72xi1> to vector<1x72xi1>
    %179 = vector.broadcast %178 : vector<1x72xi1> to vector<32x72xi1>
    %180 = arith.select %179, %177, %174 : vector<32x72xi1>, vector<32x72xf32>
    %c3_i32_80 = arith.constant 3 : i32
    %181 = vector.broadcast %c3_i32_80 : i32 to vector<1x72xi32>
    %182 = arith.cmpi eq, %168, %181 : vector<1x72xi32>
    %c70_i32 = arith.constant 70 : i32
    %183 = tpu.dynamic_rotate %180 by %c70_i32 dim 1 : vector<32x72xf32>, i32 -> vector<32x72xf32>
    %184 = vector.shape_cast %182 : vector<1x72xi1> to vector<1x72xi1>
    %185 = vector.broadcast %184 : vector<1x72xi1> to vector<32x72xi1>
    %186 = arith.select %185, %183, %180 : vector<32x72xi1>, vector<32x72xf32>
    %c4_i32_81 = arith.constant 4 : i32
    %187 = vector.broadcast %c4_i32_81 : i32 to vector<1x72xi32>
    %188 = arith.cmpi eq, %168, %187 : vector<1x72xi32>
    %c2_i32_82 = arith.constant 2 : i32
    %189 = tpu.dynamic_rotate %186 by %c2_i32_82 dim 1 : vector<32x72xf32>, i32 -> vector<32x72xf32>
    %190 = vector.shape_cast %188 : vector<1x72xi1> to vector<1x72xi1>
    %191 = vector.broadcast %190 : vector<1x72xi1> to vector<32x72xi1>
    %192 = arith.select %191, %189, %186 : vector<32x72xi1>, vector<32x72xf32>
    %c5 = arith.constant 5 : index
    %193 = memref.load %arg28[%c5] : memref<8xf32, #tpu.memory_space<smem>>
    %c7_i32_83 = arith.constant 7 : i32
    %194 = tpu.dynamic_rotate %192 by %c7_i32_83 dim 1 : vector<32x72xf32>, i32 -> vector<32x72xf32>
    %c6_i32_84 = arith.constant 6 : i32
    %195 = tpu.dynamic_rotate %192 by %c6_i32_84 dim 1 : vector<32x72xf32>, i32 -> vector<32x72xf32>
    %c5_i32_85 = arith.constant 5 : i32
    %196 = tpu.dynamic_rotate %192 by %c5_i32_85 dim 1 : vector<32x72xf32>, i32 -> vector<32x72xf32>
    %c1_i32_86 = arith.constant 1 : i32
    %197 = tpu.dynamic_rotate %192 by %c1_i32_86 dim 1 : vector<32x72xf32>, i32 -> vector<32x72xf32>
    %c71_i32_87 = arith.constant 71 : i32
    %198 = tpu.dynamic_rotate %192 by %c71_i32_87 dim 1 : vector<32x72xf32>, i32 -> vector<32x72xf32>
    %c67_i32_88 = arith.constant 67 : i32
    %199 = tpu.dynamic_rotate %192 by %c67_i32_88 dim 1 : vector<32x72xf32>, i32 -> vector<32x72xf32>
    %c66_i32_89 = arith.constant 66 : i32
    %200 = tpu.dynamic_rotate %192 by %c66_i32_89 dim 1 : vector<32x72xf32>, i32 -> vector<32x72xf32>
    %c65_i32_90 = arith.constant 65 : i32
    %201 = tpu.dynamic_rotate %192 by %c65_i32_90 dim 1 : vector<32x72xf32>, i32 -> vector<32x72xf32>
    %202 = tpu.concatenate %194, %195, %196, %197, %192, %198, %199, %200, %201 in 0 : vector<32x72xf32>, vector<32x72xf32>, vector<32x72xf32>, vector<32x72xf32>, vector<32x72xf32>, vector<32x72xf32>, vector<32x72xf32>, vector<32x72xf32>, vector<32x72xf32> -> vector<288x72xf32>
    %c0_91 = arith.constant 0 : index
    %c0_92 = arith.constant 0 : index
    %203 = vector.load %arg11[%c0_91, %c0_92] : memref<32x288xf32, #tpu.memory_space<vmem>>, vector<32x288xf32>
    %cst_93 = arith.constant dense<0.000000e+00> : vector<32x72xf32>
    %204 = tpu.matmul %203, %202, %cst_93 {dimension_numbers = #tpu.dot_dimension_numbers<[1], [0], [0], [1], [0, 0, 1, 1], [], []>} : vector<32x288xf32>, vector<288x72xf32>, vector<32x72xf32> -> vector<32x72xf32>
    %c0_94 = arith.constant 0 : index
    %c0_95 = arith.constant 0 : index
    %205 = vector.load %arg12[%c0_94, %c0_95] : memref<32x1xf32, #tpu.memory_space<vmem>>, vector<32x1xf32>
    %206 = vector.broadcast %205 : vector<32x1xf32> to vector<32x72xf32>
    %207 = arith.addf %204, %206 : vector<32x72xf32>
    %cst_96 = arith.constant 0.000000e+00 : f32
    %208 = vector.broadcast %cst_96 : f32 to vector<32x72xf32>
    %209 = arith.cmpf oge, %207, %208 : vector<32x72xf32>
    %210 = vector.broadcast %193 : f32 to vector<32x72xf32>
    %211 = arith.mulf %210, %207 : vector<32x72xf32>
    %212 = arith.select %209, %207, %211 : vector<32x72xi1>, vector<32x72xf32>
    %c71_i32_97 = arith.constant 71 : i32
    %213 = tpu.dynamic_rotate %212 by %c71_i32_97 dim 1 : vector<32x72xf32>, i32 -> vector<32x72xf32>
    %214 = arith.maximumf %212, %213 : vector<32x72xf32>
    %c66_i32_98 = arith.constant 66 : i32
    %215 = tpu.dynamic_rotate %214 by %c66_i32_98 dim 1 : vector<32x72xf32>, i32 -> vector<32x72xf32>
    %216 = arith.maximumf %214, %215 : vector<32x72xf32>
    %c0_99 = arith.constant 0 : index
    %c0_100 = arith.constant 0 : index
    %217 = vector.load %arg19[%c0_99, %c0_100] : memref<72x32xf32, #tpu.memory_space<vmem>>, vector<72x32xf32>
    %cst_101 = arith.constant dense<0.000000e+00> : vector<32x32xf32>
    %218 = tpu.matmul %216, %217, %cst_101 {dimension_numbers = #tpu.dot_dimension_numbers<[1], [0], [0], [1], [0, 0, 1, 1], [], []>} : vector<32x72xf32>, vector<72x32xf32>, vector<32x32xf32> -> vector<32x32xf32>
    %c6 = arith.constant 6 : index
    %219 = memref.load %arg28[%c6] : memref<8xf32, #tpu.memory_space<smem>>
    %c5_i32_102 = arith.constant 5 : i32
    %220 = tpu.dynamic_rotate %218 by %c5_i32_102 dim 1 : vector<32x32xf32>, i32 -> vector<32x32xf32>
    %c4_i32_103 = arith.constant 4 : i32
    %221 = tpu.dynamic_rotate %218 by %c4_i32_103 dim 1 : vector<32x32xf32>, i32 -> vector<32x32xf32>
    %c3_i32_104 = arith.constant 3 : i32
    %222 = tpu.dynamic_rotate %218 by %c3_i32_104 dim 1 : vector<32x32xf32>, i32 -> vector<32x32xf32>
    %c1_i32_105 = arith.constant 1 : i32
    %223 = tpu.dynamic_rotate %218 by %c1_i32_105 dim 1 : vector<32x32xf32>, i32 -> vector<32x32xf32>
    %c31_i32 = arith.constant 31 : i32
    %224 = tpu.dynamic_rotate %218 by %c31_i32 dim 1 : vector<32x32xf32>, i32 -> vector<32x32xf32>
    %c29_i32 = arith.constant 29 : i32
    %225 = tpu.dynamic_rotate %218 by %c29_i32 dim 1 : vector<32x32xf32>, i32 -> vector<32x32xf32>
    %c28_i32 = arith.constant 28 : i32
    %226 = tpu.dynamic_rotate %218 by %c28_i32 dim 1 : vector<32x32xf32>, i32 -> vector<32x32xf32>
    %c27_i32 = arith.constant 27 : i32
    %227 = tpu.dynamic_rotate %218 by %c27_i32 dim 1 : vector<32x32xf32>, i32 -> vector<32x32xf32>
    %228 = tpu.concatenate %220, %221, %222, %223, %218, %224, %225, %226, %227 in 0 : vector<32x32xf32>, vector<32x32xf32>, vector<32x32xf32>, vector<32x32xf32>, vector<32x32xf32>, vector<32x32xf32>, vector<32x32xf32>, vector<32x32xf32>, vector<32x32xf32> -> vector<288x32xf32>
    %c0_106 = arith.constant 0 : index
    %c0_107 = arith.constant 0 : index
    %229 = vector.load %arg13[%c0_106, %c0_107] : memref<32x288xf32, #tpu.memory_space<vmem>>, vector<32x288xf32>
    %cst_108 = arith.constant dense<0.000000e+00> : vector<32x32xf32>
    %230 = tpu.matmul %229, %228, %cst_108 {dimension_numbers = #tpu.dot_dimension_numbers<[1], [0], [0], [1], [0, 0, 1, 1], [], []>} : vector<32x288xf32>, vector<288x32xf32>, vector<32x32xf32> -> vector<32x32xf32>
    %c0_109 = arith.constant 0 : index
    %c0_110 = arith.constant 0 : index
    %231 = vector.load %arg14[%c0_109, %c0_110] : memref<32x1xf32, #tpu.memory_space<vmem>>, vector<32x1xf32>
    %232 = vector.broadcast %231 : vector<32x1xf32> to vector<32x32xf32>
    %233 = arith.addf %230, %232 : vector<32x32xf32>
    %cst_111 = arith.constant 0.000000e+00 : f32
    %234 = vector.broadcast %cst_111 : f32 to vector<32x32xf32>
    %235 = arith.cmpf oge, %233, %234 : vector<32x32xf32>
    %236 = vector.broadcast %219 : f32 to vector<32x32xf32>
    %237 = arith.mulf %236, %233 : vector<32x32xf32>
    %238 = arith.select %235, %233, %237 : vector<32x32xi1>, vector<32x32xf32>
    %c0_112 = arith.constant 0 : index
    %c0_113 = arith.constant 0 : index
    %239 = vector.load %arg27[%c0_112, %c0_113] : memref<1x32xi32, #tpu.memory_space<vmem>>, vector<1x32xi32>
    %c1_i32_114 = arith.constant 1 : i32
    %240 = vector.broadcast %c1_i32_114 : i32 to vector<1x32xi32>
    %241 = arith.cmpi eq, %239, %240 : vector<1x32xi32>
    %c24_i32 = arith.constant 24 : i32
    %242 = tpu.dynamic_rotate %238 by %c24_i32 dim 1 : vector<32x32xf32>, i32 -> vector<32x32xf32>
    %243 = vector.shape_cast %241 : vector<1x32xi1> to vector<1x32xi1>
    %244 = vector.broadcast %243 : vector<1x32xi1> to vector<32x32xi1>
    %245 = arith.select %244, %242, %238 : vector<32x32xi1>, vector<32x32xf32>
    %c2_i32_115 = arith.constant 2 : i32
    %246 = vector.broadcast %c2_i32_115 : i32 to vector<1x32xi32>
    %247 = arith.cmpi eq, %239, %246 : vector<1x32xi32>
    %c8_i32 = arith.constant 8 : i32
    %248 = tpu.dynamic_rotate %245 by %c8_i32 dim 1 : vector<32x32xf32>, i32 -> vector<32x32xf32>
    %249 = vector.shape_cast %247 : vector<1x32xi1> to vector<1x32xi1>
    %250 = vector.broadcast %249 : vector<1x32xi1> to vector<32x32xi1>
    %251 = arith.select %250, %248, %245 : vector<32x32xi1>, vector<32x32xf32>
    %c3_i32_116 = arith.constant 3 : i32
    %252 = vector.broadcast %c3_i32_116 : i32 to vector<1x32xi32>
    %253 = arith.cmpi eq, %239, %252 : vector<1x32xi32>
    %c30_i32 = arith.constant 30 : i32
    %254 = tpu.dynamic_rotate %251 by %c30_i32 dim 1 : vector<32x32xf32>, i32 -> vector<32x32xf32>
    %255 = vector.shape_cast %253 : vector<1x32xi1> to vector<1x32xi1>
    %256 = vector.broadcast %255 : vector<1x32xi1> to vector<32x32xi1>
    %257 = arith.select %256, %254, %251 : vector<32x32xi1>, vector<32x32xf32>
    %c4_i32_117 = arith.constant 4 : i32
    %258 = vector.broadcast %c4_i32_117 : i32 to vector<1x32xi32>
    %259 = arith.cmpi eq, %239, %258 : vector<1x32xi32>
    %c2_i32_118 = arith.constant 2 : i32
    %260 = tpu.dynamic_rotate %257 by %c2_i32_118 dim 1 : vector<32x32xf32>, i32 -> vector<32x32xf32>
    %261 = vector.shape_cast %259 : vector<1x32xi1> to vector<1x32xi1>
    %262 = vector.broadcast %261 : vector<1x32xi1> to vector<32x32xi1>
    %263 = arith.select %262, %260, %257 : vector<32x32xi1>, vector<32x32xf32>
    %c7 = arith.constant 7 : index
    %264 = memref.load %arg28[%c7] : memref<8xf32, #tpu.memory_space<smem>>
    %c5_i32_119 = arith.constant 5 : i32
    %265 = tpu.dynamic_rotate %263 by %c5_i32_119 dim 1 : vector<32x32xf32>, i32 -> vector<32x32xf32>
    %c4_i32_120 = arith.constant 4 : i32
    %266 = tpu.dynamic_rotate %263 by %c4_i32_120 dim 1 : vector<32x32xf32>, i32 -> vector<32x32xf32>
    %c3_i32_121 = arith.constant 3 : i32
    %267 = tpu.dynamic_rotate %263 by %c3_i32_121 dim 1 : vector<32x32xf32>, i32 -> vector<32x32xf32>
    %c1_i32_122 = arith.constant 1 : i32
    %268 = tpu.dynamic_rotate %263 by %c1_i32_122 dim 1 : vector<32x32xf32>, i32 -> vector<32x32xf32>
    %c31_i32_123 = arith.constant 31 : i32
    %269 = tpu.dynamic_rotate %263 by %c31_i32_123 dim 1 : vector<32x32xf32>, i32 -> vector<32x32xf32>
    %c29_i32_124 = arith.constant 29 : i32
    %270 = tpu.dynamic_rotate %263 by %c29_i32_124 dim 1 : vector<32x32xf32>, i32 -> vector<32x32xf32>
    %c28_i32_125 = arith.constant 28 : i32
    %271 = tpu.dynamic_rotate %263 by %c28_i32_125 dim 1 : vector<32x32xf32>, i32 -> vector<32x32xf32>
    %c27_i32_126 = arith.constant 27 : i32
    %272 = tpu.dynamic_rotate %263 by %c27_i32_126 dim 1 : vector<32x32xf32>, i32 -> vector<32x32xf32>
    %273 = tpu.concatenate %265, %266, %267, %268, %263, %269, %270, %271, %272 in 0 : vector<32x32xf32>, vector<32x32xf32>, vector<32x32xf32>, vector<32x32xf32>, vector<32x32xf32>, vector<32x32xf32>, vector<32x32xf32>, vector<32x32xf32>, vector<32x32xf32> -> vector<288x32xf32>
    %c0_127 = arith.constant 0 : index
    %c0_128 = arith.constant 0 : index
    %274 = vector.load %arg15[%c0_127, %c0_128] : memref<32x288xf32, #tpu.memory_space<vmem>>, vector<32x288xf32>
    %cst_129 = arith.constant dense<0.000000e+00> : vector<32x32xf32>
    %275 = tpu.matmul %274, %273, %cst_129 {dimension_numbers = #tpu.dot_dimension_numbers<[1], [0], [0], [1], [0, 0, 1, 1], [], []>} : vector<32x288xf32>, vector<288x32xf32>, vector<32x32xf32> -> vector<32x32xf32>
    %c0_130 = arith.constant 0 : index
    %c0_131 = arith.constant 0 : index
    %276 = vector.load %arg16[%c0_130, %c0_131] : memref<32x1xf32, #tpu.memory_space<vmem>>, vector<32x1xf32>
    %277 = vector.broadcast %276 : vector<32x1xf32> to vector<32x32xf32>
    %278 = arith.addf %275, %277 : vector<32x32xf32>
    %cst_132 = arith.constant 0.000000e+00 : f32
    %279 = vector.broadcast %cst_132 : f32 to vector<32x32xf32>
    %280 = arith.cmpf oge, %278, %279 : vector<32x32xf32>
    %281 = vector.broadcast %264 : f32 to vector<32x32xf32>
    %282 = arith.mulf %281, %278 : vector<32x32xf32>
    %283 = arith.select %280, %278, %282 : vector<32x32xi1>, vector<32x32xf32>
    %c0_133 = arith.constant 0 : index
    %c0_134 = arith.constant 0 : index
    %284 = vector.load %arg20[%c0_133, %c0_134] : memref<32x2xf32, #tpu.memory_space<vmem>>, vector<32x2xf32>
    %cst_135 = arith.constant dense<0.000000e+00> : vector<32x2xf32>
    %285 = tpu.matmul %283, %284, %cst_135 {dimension_numbers = #tpu.dot_dimension_numbers<[1], [0], [0], [1], [0, 0, 1, 1], [], []>} : vector<32x32xf32>, vector<32x2xf32>, vector<32x2xf32> -> vector<32x2xf32>
    %c0_136 = arith.constant 0 : index
    %c0_137 = arith.constant 0 : index
    %286 = vector.load %arg23[%c0_136, %c0_137] : memref<2x32xf32, #tpu.memory_space<vmem>>, vector<2x32xf32>
    %cst_138 = arith.constant dense<0.000000e+00> : vector<2x2xf32>
    %287 = tpu.matmul %286, %285, %cst_138 {dimension_numbers = #tpu.dot_dimension_numbers<[1], [0], [0], [1], [0, 0, 1, 1], [], []>} : vector<2x32xf32>, vector<32x2xf32>, vector<2x2xf32> -> vector<2x2xf32>
    %288 = arith.negf %287 : vector<2x2xf32>
    %289 = math.exp %288 : vector<2x2xf32>
    %cst_139 = arith.constant 1.000000e+00 : f32
    %290 = vector.broadcast %cst_139 : f32 to vector<2x2xf32>
    %291 = arith.addf %290, %289 : vector<2x2xf32>
    %292 = arith.divf %290, %291 : vector<2x2xf32>
    %cst_140 = arith.constant 2.000000e+00 : f32
    %293 = vector.broadcast %cst_140 : f32 to vector<2x2xf32>
    %294 = arith.mulf %292, %293 : vector<2x2xf32>
    %cst_141 = arith.constant 1.000000e+00 : f32
    %295 = vector.broadcast %cst_141 : f32 to vector<2x2xf32>
    %296 = arith.subf %294, %295 : vector<2x2xf32>
    %c0_142 = arith.constant 0 : index
    %c0_143 = arith.constant 0 : index
    %297 = vector.load %arg29[%c0_142, %c0_143] : memref<2x2xf32, #tpu.memory_space<vmem>>, vector<2x2xf32>
    tpu.vector_store %arg29[%c0_142, %c0_143], %296 {strides = array<i32>} : memref<2x2xf32, #tpu.memory_space<vmem>>, vector<2x2xf32>,
    return
  }
}

</mosaic_0001>

<bundles_post_ra>
// kernel: tpu_custom_call.1
= control target key start
LH: loop header
LB: loop body
LE: loop exit
PB: predicated region body
PF: predicated region fallthrough
CT: control target
= control target key end

     0   :  { %s10963_s6 = smov 1   ;;  %s10964_s10 = smov 2   ;;  %s14622_s0 = inlined_call_operand.smem [shape: u32[30], index: -1, kind: input, shape index: {}] }
   0x1   :  { %s11046_s5 = sld [smem:[%s14622_s0]]   ;;  %s10965_s14 = smov 3  }
   0x2   :  { %s11051_s9 = sld [smem:[%s14622_s0 + %s10963_s6]]   ;;  %s10966_s18 = smov 4  }
   0x3   :  { %s11056_s13 = sld [smem:[%s14622_s0 + %s10964_s10]]   ;;  %s10967_s22 = smov 5  }
   0x4   :  { %s11061_s17 = sld [smem:[%s14622_s0 + %s10965_s14]]   ;;  %s10968_s26 = smov 6  }
   0x5   :  { %s11066_s21 = sld [smem:[%s14622_s0 + %s10966_s18]]   ;;  %s10969_s30 = smov 7  }
   0x6   :  { %s11071_s25 = sld [smem:[%s14622_s0 + %s10967_s22]]   ;;  %s10970_s4 = smov 8  }
   0x7   :  { %s11076_s29 = sld [smem:[%s14622_s0 + %s10968_s26]]   ;;  %s10971_s10 = smov 9  }
   0x8   :  { %s11081_s3 = sld [smem:[%s14622_s0 + %s10969_s30]]   ;;  %s10972_s15 = smov 10  }
   0x9   :  { %s11086_s8 = sld [smem:[%s14622_s0 + %s10970_s4]]   ;;  %s10973_s20 = smov 11  }
   0xa   :  { %s11091_s14 = sld [smem:[%s14622_s0 + %s10971_s10]]   ;;  %s10974_s26 = smov 12  }
   0xb   :  { %s11096_s19 = sld [smem:[%s14622_s0 + %s10972_s15]]   ;;  %s10975_s1 = smov 13  }
   0xc   :  { %s11101_s24 = sld [smem:[%s14622_s0 + %s10973_s20]]   ;;  %s10976_s7 = smov 14  }
   0xd   :  { %s11106_s30 = sld [smem:[%s14622_s0 + %s10974_s26]]   ;;  %s10977_s15 = smov 15  }
   0xe   :  { %s11111_s6 = sld [smem:[%s14622_s0 + %s10975_s1]]   ;;  %s10978_s22 = smov 16  }
   0xf   :  { %s11116_s12 = sld [smem:[%s14622_s0 + %s10976_s7]]   ;;  %s10979_s28 = smov 17  }
  0x10   :  { %14670 = sst [smem:[#allocation8_spill]] %s11091_s14  ;;  %s10980_s7 = smov 18  }
  0x11   :  { %14671 = sst [smem:[#allocation9_spill]] %s11096_s19  ;;  %s10991_s1 = smov 29  }
  0x12   :  { %14672 = sst [smem:[#allocation10_spill]] %s11101_s24 }
  0x13   :  { %14673 = sst [smem:[#allocation11_spill]] %s11106_s30 }
  0x14   :  { %14674 = sst [smem:[#allocation12_spill]] %s11111_s6 }
  0x15   :  { %14675 = sst [smem:[#allocation13_spill]] %s11116_s12 }
  0x16   :  { %s11121_s20 = sld [smem:[%s14622_s0 + %s10977_s15]]   ;;  %s10981_s15 = smov 19  }
  0x17   :  { %s11126_s27 = sld [smem:[%s14622_s0 + %s10978_s22]]   ;;  %s10982_s22 = smov 20  }
  0x18   :  { %s11131_s4 = sld [smem:[%s14622_s0 + %s10979_s28]]   ;;  %s10983_s28 = smov 21  }
  0x19   :  { %s11136_s12 = sld [smem:[%s14622_s0 + %s10980_s7]]   ;;  %s10984_s7 = smov 22  }
  0x1a   :  { %s11151_s6 = sld [smem:[%s14622_s0 + %s10983_s28]]   ;;  %s10987_s28 = smov 25  }
  0x1b   :  { %s11156_s30 = sld [smem:[%s14622_s0 + %s10984_s7]]   ;;  %s10988_s7 = smov 26  }
  0x1c   :  { %14676 = sst [smem:[#allocation14_spill]] %s11121_s20 }
  0x1d   :  { %14677 = sst [smem:[#allocation15_spill]] %s11126_s27 }
  0x1e   :  { %s11141_s20 = sld [smem:[%s14622_s0 + %s10981_s15]]   ;;  %s10985_s15 = smov 23  }
  0x1f   :  { %14678 = sst [smem:[#allocation16_spill]] %s11136_s12 }
  0x20   :  { %s11146_s27 = sld [smem:[%s14622_s0 + %s10982_s22]]   ;;  %s10986_s22 = smov 24  }
  0x21   :  { %s11171_s24 = sld [smem:[%s14622_s0 + %s10987_s28]]  }
  0x22   :  { %s11176_s14 = sld [smem:[%s14622_s0 + %s10988_s7]]  }
  0x23   :  { %s11189_s12 = sld [smem:[%s14622_s0 + %s10991_s1]]  }
  0x24   :  { %14679 = sst [smem:[#allocation17_spill]] %s11141_s20 }
  0x25   :  { %s11161_s20 = sld [smem:[%s14622_s0 + %s10985_s15]]   ;;  %s10989_s15 = smov 27  }
  0x26   :  { %14680 = sst [smem:[#allocation18_spill]] %s11146_s27 }
  0x27   :  { %s11166_s27 = sld [smem:[%s14622_s0 + %s10986_s22]]   ;;  %s10990_s22 = smov 28  }
  0x28   :  { %s7186_s19 = sld [smem:[%s14622_s0 + %s10990_s22]]  }
  0x2b   :  { %14681 = sst [smem:[#allocation19_spill]] %s11161_s20 }
  0x2c   :  { %s11181_s20 = sld [smem:[%s14622_s0 + %s10989_s15]]  }
  0x2d   :  { %64 = vsyncpa [#allocation4], 0 }
  0x2e   :  { %65 = vsyncpa [#allocation3], 0  ;;  %s128_s7 = sshll.u32 %s7186_s19, 4  ;;  %s129_s7 = int_to_ptr.vmem [resolvable:$true] %s128_s7 }
  0x2f   :  { %s10925_s10 = scalar_lea.vmem %s129_s7, 16  ;;  %p10930_p1 = scmp.lt.s32.totalorder %s129_s7, %s129_s7 }
  0x30   :  { %p10926_p0 = scmp.ne.s32.totalorder %s129_s7, %s10925_s10  ;;  %p10931_p2 = scmp.lt.s32.totalorder %s10925_s10, %s10925_s10 }
  0x32   :  { %p10932_p3 = por %p10931_p2, %p10930_p1 }
  0x34   :  { %p10933_p4 = pnand %p10932_p3, %p10926_p0 }
  0x36   :  { %10936 = shalt.err (!%p10933_p4)
}
  0x37   :  { %s10992_s11 = smov [#allocation2]  }
  0x38   :  { %131 = dma.vmem_to_smem %s129_s7, 16, %s10992_s11, [#allocation4]  }
  0x39   :  { %10959 = dma.done.wait [#allocation4], 16  }
  0x3a   :  { %10960 = vsyncadd [#allocation4], 4294967280 }
  0x3b   :  { %135 = sfence }
  0x3c   :  { %v158_v0 = vld [vmem:[%s11151_s6 + $0x80] sm:$0xff]  ;;  %v159_v1 = vld [vmem:[%s11151_s6 + $0x88] sm:$0xff]  ;;  %v160_v11 = vld [vmem:[%s11151_s6 + $0x90] sm:$0xff]  ;;  %vm223_vm0 = vcmask 64512   ;;  %vm470_vm1 = vcmask 1041408   ;;  %vm466_vm2 = vcmask 15360  }
  0x3d   :  { %v190_v2 = vld [vmem:[%s11151_s6 + $0x180] sm:$0xff]  ;;  %v7596_v3 = vpack.c.bf16 %v159_v1, %v158_v0  ;;  %v191_v4 = vld [vmem:[%s11151_s6 + $0x188] sm:$0xff]  ;;  %v161_v13 = vld [vmem:[%s11151_s6 + $0x98] sm:$0xff]  ;;  %s10996_s0 = smov 8   ;;  %s10998_s19 = smov 116   ;;  %vm703_vm3 = vcmask 1047616  }
  0x3e   :  { %v142_v5 = vld [vmem:[%s11151_s6] sm:$0xff]  ;;  %v143_v6 = vld [vmem:[%s11151_s6 + $0x8] sm:$0xff]  ;;  %v7628_v7 = vpack.c.bf16 %v191_v4, %v190_v2  ;;  %v192_v14 = vld [vmem:[%s11151_s6 + $0x190] sm:$0xff]  ;;  %v7600_v16 = vpack.c.bf16 %v161_v13, %v160_v11  ;;  %s11001_s15 = smov 126   ;;  %s11002_s16 = smov 110   ;;  %vm800_vm4 = vcmask 957440  }
  0x3f   :  { %v7598_v8 = vpack.c.bf16 %v143_v6, %v142_v5  ;;  %v174_v9 = vld [vmem:[%s11151_s6 + $0x100] sm:$0xff]  ;;  %v175_v10 = vld [vmem:[%s11151_s6 + $0x108] sm:$0xff]  ;;  %7597 = vmatprep.subr.bf16.mxu0 %v7596_v3  ;;  %v193_v15 = vld [vmem:[%s11151_s6 + $0x198] sm:$0xff]  ;;  %s11003_s18 = smov 99   ;;  %s11004_s22 = smov 98   ;;  %vm818_vm5 = vcmask 949248  }
  0x40   :  { %v7630_v12 = vpack.c.bf16 %v175_v10, %v174_v9  ;;  %7629 = vmatprep.subr.bf16.mxu1 %v7628_v7  ;;  %v7632_v17 = vpack.c.bf16 %v193_v15, %v192_v14  ;;  %v144_v18 = vld [vmem:[%s11151_s6 + $0x10] sm:$0xff]  ;;  %v145_v19 = vld [vmem:[%s11151_s6 + $0x18] sm:$0xff]  ;;  %v162_v23 = vld [vmem:[%s11151_s6 + $0xa0] sm:$0xff]  ;;  %s11005_s23 = smov 11   ;;  %vm836_vm6 = vcmask 818176   ;;  %vm854_vm7 = vcmask 809984  }
  0x41   :  { %7599 = vmatpush3.bf16.msra.mxu0 %v7598_v8  ;;  %v176_v20 = vld [vmem:[%s11151_s6 + $0x110] sm:$0xff]  ;;  %v7602_v21 = vpack.c.bf16 %v145_v19, %v144_v18  ;;  %v177_v22 = vld [vmem:[%s11151_s6 + $0x118] sm:$0xff]  ;;  %v163_v24 = vld [vmem:[%s11151_s6 + $0xa8] sm:$0xff]  ;;  %vm758_vm8 = vcmask 1031168   ;;  %vm740_vm9 = vcmask 1039360   ;;  %vm872_vm10 = vcmask 801792  }
  0x42   :  { %7631 = vmatpush3.bf16.msra.mxu1 %v7630_v12  ;;  %7601 = vmatprep.subr.bf16.mxu0 %v7600_v16  ;;  %v7634_v25 = vpack.c.bf16 %v177_v22, %v176_v20  ;;  %v7604_v26 = vpack.c.bf16 %v163_v24, %v162_v23  ;;  %v194_v27 = vld [vmem:[%s11151_s6 + $0x1a0] sm:$0xff]  ;;  %v195_v28 = vld [vmem:[%s11151_s6 + $0x1a8] sm:$0xff]  ;;  %v164_v35 = vld [vmem:[%s11151_s6 + $0xb0] sm:$0xff]  ;;  %vm777_vm11 = vcmask 900096   ;;  %vm1000_vm12 = vcmask 89088   ;;  %s11009_s26 = smov 122  }
  0x43   :  { %7633 = vmatprep.subr.bf16.mxu1 %v7632_v17  ;;  %v146_v29 = vld [vmem:[%s11151_s6 + $0x20] sm:$0xff]  ;;  %v7636_v30 = vpack.c.bf16 %v195_v28, %v194_v27  ;;  %v147_v31 = vld [vmem:[%s11151_s6 + $0x28] sm:$0xff]  ;;  %v165_v36 = vld [vmem:[%s11151_s6 + $0xb8] sm:$0xff]  ;;  %vm14634_vm13 = vcmask 588800   ;;  %s11012_s1 = smov 61   ;;  %s11013_s28 = smov 60  }
  0x44   :  { %v178_v32 = vld [vmem:[%s11151_s6 + $0x120] sm:$0xff]  ;;  %v179_v33 = vld [vmem:[%s11151_s6 + $0x128] sm:$0xff]  ;;  %v7606_v34 = vpack.c.bf16 %v147_v31, %v146_v29  ;;  %v196_v37 = vld [vmem:[%s11151_s6 + $0x1b0] sm:$0xff]  ;;  %v7608_v39 = vpack.c.bf16 %v165_v36, %v164_v35  ;;  %s11014_s2 = smov 52   ;;  %s11015_s7 = smov 51  }
  0x45   :  { %7603 = vmatpush3.bf16.msra.mxu0 %v7602_v21  ;;  %v7638_v38 = vpack.c.bf16 %v179_v33, %v178_v32  ;;  %v197_v40 = vld [vmem:[%s11151_s6 + $0x1b8] sm:$0xff]  ;;  %v148_v41 = vld [vmem:[%s11151_s6 + $0x30] sm:$0xff]  ;;  %v166_v46 = vld [vmem:[%s11151_s6 + $0xc0] sm:$0xff]  ;;  %s11016_s10 = smov 50   ;;  %s11017_s11 = smov 67  }
  0x46   :  { %7635 = vmatpush3.bf16.msra.mxu1 %v7634_v25  ;;  %7605 = vmatprep.subr.bf16.mxu0 %v7604_v26  ;;  %v149_v42 = vld [vmem:[%s11151_s6 + $0x38] sm:$0xff]  ;;  %v7640_v43 = vpack.c.bf16 %v197_v40, %v196_v37  ;;  %v180_v44 = vld [vmem:[%s11151_s6 + $0x130] sm:$0xff]  ;;  %v167_v47 = vld [vmem:[%s11151_s6 + $0xc8] sm:$0xff] }
  0x47   :  { %7637 = vmatprep.subr.bf16.mxu1 %v7636_v30  ;;  %v181_v45 = vld [vmem:[%s11151_s6 + $0x138] sm:$0xff]  ;;  %v198_v48 = vld [vmem:[%s11151_s6 + $0x1c0] sm:$0xff]  ;;  %v199_v49 = vld [vmem:[%s11151_s6 + $0x1c8] sm:$0xff]  ;;  %v7610_v50 = vpack.c.bf16 %v149_v42, %v148_v41  ;;  %v7612_v52 = vpack.c.bf16 %v167_v47, %v166_v46  ;;  %v14635_v46 = vmov 0.0  }
  0x48   :  { %v7642_v51 = vpack.c.bf16 %v181_v45, %v180_v44  ;;  %v150_v53 = vld [vmem:[%s11151_s6 + $0x40] sm:$0xff]  ;;  %v151_v54 = vld [vmem:[%s11151_s6 + $0x48] sm:$0xff]  ;;  %v7644_v56 = vpack.c.bf16 %v199_v49, %v198_v48  ;;  %v168_v58 = vld [vmem:[%s11151_s6 + $0xd0] sm:$0xff] }
  0x49   :  { %7607 = vmatpush3.bf16.msra.mxu0 %v7606_v34  ;;  %v182_v55 = vld [vmem:[%s11151_s6 + $0x140] sm:$0xff]  ;;  %v183_v57 = vld [vmem:[%s11151_s6 + $0x148] sm:$0xff]  ;;  %v169_v59 = vld [vmem:[%s11151_s6 + $0xd8] sm:$0xff]  ;;  %v7614_v62 = vpack.c.bf16 %v151_v54, %v150_v53 }
  0x4a   :  { %7639 = vmatpush3.bf16.msra.mxu1 %v7638_v38  ;;  %7609 = vmatprep.subr.bf16.mxu0 %v7608_v39  ;;  %v200_v60 = vld [vmem:[%s11151_s6 + $0x1d0] sm:$0xff]  ;;  %v201_v61 = vld [vmem:[%s11151_s6 + $0x1d8] sm:$0xff]  ;;  %v7646_v63 = vpack.c.bf16 %v183_v57, %v182_v55  ;;  %v7616_v0 = vpack.c.bf16 %v169_v59, %v168_v58  ;;  %v170_v6 = vld [vmem:[%s11151_s6 + $0xe0] sm:$0xff]  ;;  %v14637_v39 = vmov 0.0|0.0  }
  0x4b   :  { %7641 = vmatprep.subr.bf16.mxu1 %v7640_v43  ;;  %v152_v1 = vld [vmem:[%s11151_s6 + $0x50] sm:$0xff]  ;;  %v153_v2 = vld [vmem:[%s11151_s6 + $0x58] sm:$0xff]  ;;  %v7648_v4 = vpack.c.bf16 %v201_v61, %v200_v60  ;;  %v171_v7 = vld [vmem:[%s11151_s6 + $0xe8] sm:$0xff] }
  0x4c   :  { %v184_v3 = vld [vmem:[%s11151_s6 + $0x150] sm:$0xff]  ;;  %v185_v5 = vld [vmem:[%s11151_s6 + $0x158] sm:$0xff]  ;;  %v202_v8 = vld [vmem:[%s11151_s6 + $0x1e0] sm:$0xff]  ;;  %v7618_v10 = vpack.c.bf16 %v153_v2, %v152_v1  ;;  %v7620_v14 = vpack.c.bf16 %v171_v7, %v170_v6  ;;  %v10995_v1 = vmov 1983009808  }
  0x4d   :  { %7611 = vmatpush3.bf16.msra.mxu0 %v7610_v50  ;;  %v203_v9 = vld [vmem:[%s11151_s6 + $0x1e8] sm:$0xff]  ;;  %v154_v11 = vld [vmem:[%s11151_s6 + $0x60] sm:$0xff]  ;;  %v7650_v13 = vpack.c.bf16 %v185_v5, %v184_v3  ;;  %v11250_v17 = vld [vmem:[%s11046_s5 + $0x18] sm:$0xff]  ;;  %v443_v2 = vunpack.c.l.s4 %v10995_v1  ;;  %v445_v3 = vlaneseq }
  0x4e   :  { %7643 = vmatpush3.bf16.msra.mxu1 %v7642_v51  ;;  %7613 = vmatprep.subr.bf16.mxu0 %v7612_v52  ;;  %v155_v12 = vld [vmem:[%s11151_s6 + $0x68] sm:$0xff]  ;;  %v186_v15 = vld [vmem:[%s11151_s6 + $0x160] sm:$0xff]  ;;  %v7652_v18 = vpack.c.bf16 %v203_v9, %v202_v8  ;;  %v172_v20 = vld [vmem:[%s11151_s6 + $0xf0] sm:$0xff] }
  0x4f   :  { %7645 = vmatprep.subr.bf16.mxu1 %v7644_v56  ;;  %v11247_v16 = vld [vmem:[%s11046_s5 + $0x8] sm:$0xff]  ;;  %v173_v21 = vld [vmem:[%s11151_s6 + $0xf8] sm:$0xff]  ;;  %v204_v22 = vld [vmem:[%s11151_s6 + $0x1f0] sm:$0xff]  ;;  %361 = vmatprep.mubr.f32.mxu1 %v11250_v17  ;;  %v7622_v24 = vpack.c.bf16 %v155_v12, %v154_v11  ;;  %v11305_v5 = vshrl.u32 %v445_v3, 7 }
  0x50   :  { %v187_v19 = vld [vmem:[%s11151_s6 + $0x168] sm:$0xff]  ;;  %291 = vmatprep.mubr.f32.mxu0 %v11247_v16  ;;  %v205_v23 = vld [vmem:[%s11151_s6 + $0x1f8] sm:$0xff]  ;;  %v7624_v26 = vpack.c.bf16 %v173_v21, %v172_v20  ;;  %v156_v27 = vld [vmem:[%s11151_s6 + $0x70] sm:$0xff] }
  0x51   :  { %7615 = vmatpush3.bf16.msra.mxu0 %v7614_v62  ;;  %v7654_v25 = vpack.c.bf16 %v187_v19, %v186_v15  ;;  %v157_v28 = vld [vmem:[%s11151_s6 + $0x78] sm:$0xff]  ;;  %v7656_v29 = vpack.c.bf16 %v205_v23, %v204_v22  ;;  %v188_v30 = vld [vmem:[%s11151_s6 + $0x170] sm:$0xff]  ;;  %v206_v34 = vld [vmem:[%s11151_s6 + $0x200] sm:$0xff] }
  0x52   :  { %7647 = vmatpush3.bf16.msra.mxu1 %v7646_v63  ;;  %7617 = vmatprep.subr.bf16.mxu0 %v7616_v0  ;;  %v189_v31 = vld [vmem:[%s11151_s6 + $0x178] sm:$0xff]  ;;  %v7626_v32 = vpack.c.bf16 %v157_v28, %v156_v27  ;;  %v207_v35 = vld [vmem:[%s11151_s6 + $0x208] sm:$0xff]  ;;  %v11266_v36 = vld [vmem:[%s11046_s5] sm:$0xff] }
  0x53   :  { %7649 = vmatprep.subr.bf16.mxu1 %v7648_v4  ;;  %v7658_v33 = vpack.c.bf16 %v189_v31, %v188_v30  ;;  %v7661_v37 = vpack.c.bf16 %v207_v35, %v206_v34  ;;  %v11269_v38 = vld [vmem:[%s11046_s5 + $0x10] sm:$0xff]  ;;  %v209_v41 = vld [vmem:[%s11151_s6 + $0x218] sm:$0xff]  ;;  %v11275_v42 = vld [vmem:[%s11046_s5 + $0x28] sm:$0xff]  ;;  %v444_v4 = vunpack.c.0.s8 %v443_v2 }
  0x54   :  { %v208_v40 = vld [vmem:[%s11151_s6 + $0x210] sm:$0xff]  ;;  %v210_v44 = vld [vmem:[%s11151_s6 + $0x220] sm:$0xff]  ;;  %v211_v45 = vld [vmem:[%s11151_s6 + $0x228] sm:$0xff] }
  0x55   :  { %7619 = vmatpush3.bf16.msra.mxu0 %v7618_v10  ;;  %v7664_v43 = vpack.c.bf16 %v209_v41, %v208_v40  ;;  %v7667_v47 = vpack.c.bf16 %v211_v45, %v210_v44  ;;  %v212_v48 = vld [vmem:[%s11151_s6 + $0x230] sm:$0xff]  ;;  %v213_v49 = vld [vmem:[%s11151_s6 + $0x238] sm:$0xff]  ;;  %v214_v51 = vld [vmem:[%s11151_s6 + $0x240] sm:$0xff]  ;;  %v447_v6 = vsub.s32 %v444_v4, %v11305_v5 }
  0x56   :  { %7651 = vmatpush3.bf16.msra.mxu1 %v7650_v13  ;;  %7621 = vmatprep.subr.bf16.mxu0 %v7620_v14  ;;  %v7670_v50 = vpack.c.bf16 %v213_v49, %v212_v48  ;;  %v215_v52 = vld [vmem:[%s11151_s6 + $0x248] sm:$0xff]  ;;  %v216_v54 = vld [vmem:[%s11151_s6 + $0x250] sm:$0xff]  ;;  %v217_v55 = vld [vmem:[%s11151_s6 + $0x258] sm:$0xff] }
  0x57   :  { %7653 = vmatprep.subr.bf16.mxu1 %v7652_v18  ;;  %v7673_v53 = vpack.c.bf16 %v215_v52, %v214_v51  ;;  %v7676_v56 = vpack.c.bf16 %v217_v55, %v216_v54  ;;  %v218_v57 = vld [vmem:[%s11151_s6 + $0x260] sm:$0xff]  ;;  %v219_v58 = vld [vmem:[%s11151_s6 + $0x268] sm:$0xff]  ;;  %v220_v60 = vld [vmem:[%s11151_s6 + $0x270] sm:$0xff] }
  0x58   :  { %v7679_v59 = vpack.c.bf16 %v219_v58, %v218_v57  ;;  %v221_v61 = vld [vmem:[%s11151_s6 + $0x278] sm:$0xff]  ;;  %v222_v63 = vld [vmem:[%s11151_s6 + $0x280] sm:$0xff]  ;;  %v7189_v22 = vld.sshfl [vmem:[%s11156_s30 + $0x8] sm:$0x33 pattern:$0x76325410] }
  0x59   :  { %7623 = vmatpush3.bf16.msra.mxu0 %v7622_v24  ;;  %v7682_v62 = vpack.c.bf16 %v221_v61, %v220_v60  ;;  %v140_v0 = vld [vmem:[%s11046_s5 + $0x20] sm:$0xff]  ;;  %s10997_s5 = smov 117   ;;  %s11000_s6 = smov 127  }
  0x5a   :  { %7655 = vmatpush3.bf16.msra.mxu1 %v7654_v25  ;;  %7625 = vmatprep.subr.bf16.mxu0 %v7624_v26  ;;  %v437_v7 = vld [vmem:[%s11156_s30] sm:$0xff]  ;;  %v465_v26 = vcombine.high %v7189_v22, %v7189_v22  ;;  %s10999_s30 = smov 100  }
  0x5b   :  { %7657 = vmatprep.subr.bf16.mxu1 %v7656_v29  ;;  %v448_v8 = vrot.slane %v437_v7, %v447_v6  ;;  %v441_v10 = vcombine.high %v437_v7, %v437_v7 }
  0x5d   :  { %7627 = vmatpush3.bf16.msra.mxu0 %v7626_v32  ;;  %v456_v9 = vcombine.high %v448_v8, %v448_v8  ;;  %v455_v11 = vrot.slane %v441_v10, %v447_v6 }
  0x5e   :  { %7659 = vmatpush3.bf16.msra.mxu1 %v7658_v33  ;;  %7660 = vmatprep.subr.bf16.mxu0 %v14637_v39 }
  0x5f   :  { %7190 = vmatprep.subr.msk.mxu1 %vm470_vm1, %v456_v9  ;;  %v457_v12 = vcombine.high %v455_v11, %v455_v11 }
  0x60   :  { %292 = vmatmul.mubr.f32.vlgmr.msra.gmra.mrb[0].mxu0 %v11266_v36 }
  0x61   :  { %362 = vmatmul.mubr.f32.vlgmr.msra.gmra.mrb[0].mxu1 %v11269_v38  ;;  %7662 = vmatpush1.bf16.msra.mxu0 %v7661_v37 }
  0x62   :  { %7663 = vmatprep.subr.bf16.mxu0 %v14637_v39  ;;  %7188 = vmatprep.mubr.msk.f32.mxu0 %vm223_vm0, %v11275_v42 }
  0x63   :  { %547 = vmatprep.mubr.f32.mxu1 %v14635_v46  ;;  %7191 = vmatpush1.msk.msra.mxu1 %vm470_vm1, %v448_v8 }
  0x64   :  { %7193 = vmatprep.subr.msk.mxu1 %vm470_vm1, %v457_v12 }
  0x65   :  { %7665 = vmatpush1.bf16.msra.mxu0 %v7664_v43 }
  0x66   :  { %7666 = vmatprep.subr.bf16.mxu0 %v14637_v39 }
  0x69   :  { %7668 = vmatpush1.bf16.msra.mxu0 %v7667_v47 }
  0x6a   :  { %7669 = vmatprep.subr.bf16.mxu0 %v14637_v39 }
  0x6d   :  { %7671 = vmatpush1.bf16.msra.mxu0 %v7670_v50 }
  0x6e   :  { %7672 = vmatprep.subr.bf16.mxu0 %v14637_v39 }
  0x71   :  { %7674 = vmatpush1.bf16.msra.mxu0 %v7673_v53 }
  0x72   :  { %7675 = vmatprep.subr.bf16.mxu0 %v14637_v39 }
  0x75   :  { %7677 = vmatpush1.bf16.msra.mxu0 %v7676_v56 }
  0x76   :  { %7678 = vmatprep.subr.bf16.mxu0 %v14637_v39 }
  0x79   :  { %7680 = vmatpush1.bf16.msra.mxu0 %v7679_v59 }
  0x7a   :  { %7681 = vmatprep.subr.bf16.mxu0 %v14637_v39 }
  0x7d   :  { %7683 = vmatpush1.bf16.msra.mxu0 %v7682_v62 }
  0x7e   :  { %399 = vmatprep.subr.mxu0 %v14635_v46 }
  0x81   :  { %400 = vmatpush1.msra.mxu0 %v222_v63 }
  0x82   :  { %432 = vmatmul.mubr.f32.vlgmr.msra.gmra.mrb[2].mxu0 %v140_v0 }
  0x83   :  { %1325 = vmatprep.mubr.f32.mxu0 %v14635_v46 }
 0x133   :  { %v7285_v13 = vpop.f32.mrb[0].mxu0 }
 0x134   :  { %v7320_v14 = vpop.f32.mrb[0].mxu1  ;;  %v7286_v15 = vpop.f32.mrb[1].mxu0 }
 0x135   :  { %v7287_v18 = vadd.f32 %v7286_v15, %v7285_v13  ;;  %v7321_v19 = vpop.f32.mrb[1].mxu1 }
 0x136   :  { %v7322_v20 = vadd.f32 %v7321_v19, %v7320_v14 }
 0x138   :  { %v364_v21 = vadd.f32 %v7322_v20, %v7287_v18 }
 0x155   :  { %v433_v23 = vpop.f32.mrb[2].mxu0 }
 0x156   :  { %v434_v24 = vadd.f32 %v433_v23, %v364_v21  ;;  %v435_v25 = vpop.f32.mrb[3].mxu0 }
 0x158   :  { %7192 = vmatmul.mubr.msk.f32.vlgmr.msra.gmra.mrb[2].mxu1 %vm466_vm2, %v434_v24 }
 0x159   :  { %7194 = vmatpush1.msk.msra.mxu1 %vm470_vm1, %v455_v11  ;;  %618 = vmatprep.mubr.f32.mxu1 %v14635_v46 }
 0x15a   :  { %7196 = vmatprep.subr.msk.mxu1 %vm470_vm1, %v465_v26 }
 0x15c   :  { %7195 = vmatmul.mubr.msk.f32.vlgmr.msra.gmra.mrb[4].mxu1 %vm466_vm2, %v434_v24 }
 0x15d   :  { %7197 = vmatpush1.msk.msra.mxu1 %vm470_vm1, %v7189_v22  ;;  %689 = vmatprep.mubr.f32.mxu1 %v14635_v46 }
 0x160   :  { %7198 = vmatmul.mubr.msk.f32.vlgmr.msra.gmra.mrb[6].mxu1 %vm466_vm2, %v434_v24 }
 0x161   :  { %1171 = vmatprep.mubr.f32.mxu1 %v14635_v46 }
 0x22b   :  { %v549_v27 = vpop.f32.mrb[2].mxu1 }
 0x22c   :  { %v696_v28 = vsub.f32 %v11266_v36, %v549_v27  ;;  %v551_v29 = vpop.f32.mrb[3].mxu1 }
 0x22d   :  { %v697_v31 = vsub.f32 %v11247_v16, %v551_v29 }
 0x22e   :  { %704 = vrot.lane.b32.xlu0 %v696_v28, %s10996_s0 }
 0x22f   :  { %v620_v30 = vpop.f32.mrb[4].mxu1  ;;  %v8378_v16 = vpack.i.bf16 %v697_v31, %v696_v28 }
 0x230   :  { %v698_v32 = vsub.f32 %v11269_v38, %v620_v30  ;;  %v622_v33 = vpop.f32.mrb[5].mxu1 }
 0x231   :  { %v11324_v34 = vsub.f32 %v11250_v17, %v622_v33 }
 0x232   :  { %v8368_v35 = vpack.i.bf16 %v698_v32, %v697_v31 }
 0x233   :  { %v691_v37 = vpop.f32.mrb[6].mxu1  ;;  %v8383_v41 = vpack.i.bf16 %v11324_v34, %v698_v32 }
 0x234   :  { %v11326_v40 = vsub.f32 %v140_v0, %v691_v37  ;;  %8369 = vrot.lane.b32.xlu0 %v8368_v35, %s10996_s0  ;;  %v693_v36 = vpop.f32.mrb[7].mxu1 }
 0x235   :  { %v11340_v44 = vsub.f32 %v11275_v42, %v693_v36 }
 0x236   :  { %v8373_v43 = vpack.i.bf16 %v11326_v40, %v11324_v34 }
 0x238   :  { %8384 = vrot.lane.b32.xlu0 %v8383_v41, %s10997_s5  ;;  %8374 = vrot.lane.b32.xlu1 %v8373_v43, %s10996_s0 }
 0x23c   :  { %8394 = vrot.lane.b32.xlu0 %v8383_v41, %s10998_s19  ;;  %8379 = vrot.lane.b32.xlu1 %v8378_v16, %s10997_s5 }
 0x240   :  { %8404 = vrot.lane.b32.xlu0 %v8383_v41, %s10999_s30  ;;  %8389 = vrot.lane.b32.xlu1 %v8378_v16, %s10998_s19 }
 0x244   :  { %8399 = vrot.lane.b32.xlu1 %v8378_v16, %s10999_s30 }
 0x2a0   :  { %v705_v17 = vpop.permute.xlu0 %704 }
 0x2a1   :  { %v11344_v48 = vsel %vm703_vm3, %v705_v17, %v11340_v44 }
 0x2a6   :  { %v8370_v38 = vpop.permute.xlu0 %8369 }
 0x2a7   :  { %v8372_v45 = vunpack.i.h.bf16 %v8370_v38  ;;  %v8371_v47 = vunpack.i.l.bf16 %v8370_v38 }
 0x2a9   :  { %v716_v49 = vsel %vm703_vm3, %v8372_v45, %v8371_v47  ;;  %v715_v50 = vsel %vm703_vm3, %v8371_v47, %v705_v17 }
 0x2aa   :  { %v11348_v51 = vpop.permute.xlu1 %8374  ;;  %v8428_v52 = vpack.i.bf16 %v11326_v40, %v716_v49  ;;  %v8408_v53 = vpack.i.bf16 %v715_v50, %v11344_v48  ;;  %v11379_v60 = vpop.permute.xlu0 %8384 }
 0x2ab   :  { %v8376_v54 = vunpack.i.l.bf16 %v11348_v51  ;;  %v8377_v56 = vunpack.i.h.bf16 %v11348_v51  ;;  %v8386_v3 = vunpack.i.l.bf16 %v11379_v60 }
 0x2ac   :  { %8429 = vrot.lane.b32.xlu0 %v8428_v52, %s11000_s6  ;;  %8409 = vrot.lane.b32.xlu1 %v8408_v53, %s11000_s6 }
 0x2ad   :  { %v717_v42 = vsel %vm703_vm3, %v8376_v54, %v8372_v45  ;;  %v11371_v57 = vsel %vm703_vm3, %v8377_v56, %v8376_v54 }
 0x2ae   :  { %v11358_v55 = vpack.i.bf16 %v717_v42, %v716_v49  ;;  %v8453_v58 = vpack.i.bf16 %v11371_v57, %v717_v42  ;;  %v8380_v59 = vpop.permute.xlu1 %8379  ;;  %v11385_v62 = vpop.permute.xlu0 %8394 }
 0x2af   :  { %v8382_v63 = vunpack.i.h.bf16 %v8380_v59  ;;  %v8381_v0 = vunpack.i.l.bf16 %v8380_v59  ;;  %v8396_v6 = vunpack.i.l.bf16 %v11385_v62 }
 0x2b0   :  { %8434 = vrot.lane.b32.xlu0 %v8428_v52, %s11001_s15  ;;  %8414 = vrot.lane.b32.xlu1 %v8408_v53, %s11001_s15 }
 0x2b1   :  { %v801_v8 = vsel %vm800_vm4, %v8381_v0, %v8382_v63  ;;  %v802_v9 = vsel %vm800_vm4, %v8382_v63, %v8386_v3 }
 0x2b2   :  { %v8390_v61 = vpop.permute.xlu1 %8389  ;;  %v11397_v7 = vpop.permute.xlu0 %8404  ;;  %v8463_v15 = vpack.i.bf16 %v802_v9, %v801_v8 }
 0x2b3   :  { %v8392_v1 = vunpack.i.h.bf16 %v8390_v61  ;;  %v8391_v2 = vunpack.i.l.bf16 %v8390_v61  ;;  %v8406_v14 = vunpack.i.l.bf16 %v11397_v7 }
 0x2b4   :  { %8439 = vrot.lane.b32.xlu0 %v11358_v55, %s11002_s16  ;;  %8419 = vrot.lane.b32.xlu1 %v8408_v53, %s11002_s16 }
 0x2b5   :  { %v819_v12 = vsel %vm818_vm5, %v8391_v2, %v8392_v1  ;;  %v820_v13 = vsel %vm818_vm5, %v8392_v1, %v8396_v6  ;;  %v8473_v21 = vpack.i.bf16 %v8391_v2, %v8381_v0 }
 0x2b6   :  { %v8400_v4 = vpop.permute.xlu1 %8399  ;;  %v8468_v18 = vpack.i.bf16 %v820_v13, %v819_v12 }
 0x2b7   :  { %v8402_v10 = vunpack.i.h.bf16 %v8400_v4  ;;  %v8401_v11 = vunpack.i.l.bf16 %v8400_v4 }
 0x2b8   :  { %8444 = vrot.lane.b32.xlu0 %v8383_v41, %s11003_s18  ;;  %8424 = vrot.lane.b32.xlu1 %v8378_v16, %s11003_s18 }
 0x2b9   :  { %v837_v19 = vsel %vm836_vm6, %v8401_v11, %v8402_v10  ;;  %v838_v20 = vsel %vm836_vm6, %v8402_v10, %v8406_v14 }
 0x2ba   :  { %v8478_v22 = vpack.i.bf16 %v838_v20, %v837_v19 }
 0x2bc   :  { %860 = vrot.lane.b32.xlu0 %v696_v28, %s11004_s22  ;;  %862 = vrot.lane.b32.xlu1 %v697_v31, %s11004_s22 }
 0x2c0   :  { %864 = vrot.lane.b32.xlu0 %v698_v32, %s11004_s22  ;;  %719 = vrot.lane.b32.xlu1 %v11344_v48, %s10996_s0 }
 0x2c4   :  { %8454 = vrot.lane.b32.xlu0 %v8453_v58, %s11001_s15  ;;  %8449 = vrot.lane.b32.xlu1 %v8453_v58, %s11000_s6 }
 0x2c8   :  { %796 = vrot.lane.b32.xlu0 %v11326_v40, %s10997_s5  ;;  %773 = vrot.lane.b32.xlu1 %v11371_v57, %s11002_s16 }
 0x2cc   :  { %832 = vrot.lane.b32.xlu0 %v11326_v40, %s10999_s30  ;;  %814 = vrot.lane.b32.xlu1 %v11326_v40, %s10998_s19 }
 0x2d0   :  { %866 = vrot.lane.b32.xlu0 %v11324_v34, %s11004_s22  ;;  %850 = vrot.lane.b32.xlu1 %v11326_v40, %s11003_s18 }
 0x2d4   :  { %8459 = vrot.lane.b32.xlu0 %v8408_v53, %s11005_s23  ;;  %868 = vrot.lane.b32.xlu1 %v11326_v40, %s11004_s22 }
 0x2d8   :  { %8464 = vrot.lane.b32.xlu0 %v8463_v15, %s11005_s23  ;;  %8469 = vrot.lane.b32.xlu1 %v8468_v18, %s11005_s23 }
 0x2dc   :  { %8474 = vrot.lane.b32.xlu0 %v8473_v21, %s11005_s23  ;;  %8479 = vrot.lane.b32.xlu1 %v8478_v22, %s11005_s23 }
 0x31e   :  { %v11419_v23 = vpop.permute.xlu0 %8429  ;;  %v8410_v24 = vpop.permute.xlu1 %8409 }
 0x31f   :  { %v8412_v16 = vunpack.i.h.bf16 %v8410_v24  ;;  %v8411_v17 = vunpack.i.l.bf16 %v8410_v24  ;;  %v8432_v47 = vunpack.i.h.bf16 %v11419_v23  ;;  %v8431_v49 = vunpack.i.l.bf16 %v11419_v23 }
 0x320   :  { %v8387_v24 = vunpack.i.h.bf16 %v11379_v60 }
 0x321   :  { %v742_v58 = vsel %vm740_vm9, %v8411_v17, %v8412_v16  ;;  %v743_v63 = vsel %vm740_vm9, %v8412_v16, %v8431_v49  ;;  %v741_v0 = vsel %vm740_vm9, %v8432_v47, %v8411_v17  ;;  %v8407_v17 = vunpack.i.h.bf16 %v11397_v7 }
 0x322   :  { %v11421_v25 = vpop.permute.xlu0 %8434  ;;  %v8415_v26 = vpop.permute.xlu1 %8414  ;;  %v8508_v9 = vpack.i.bf16 %v743_v63, %v742_v58  ;;  %v8498_v10 = vpack.i.bf16 %v741_v0, %v11326_v40  ;;  %v14639_v63 = vmov 0  }
 0x323   :  { %v8437_v38 = vunpack.i.h.bf16 %v11421_v25  ;;  %v8416_v45 = vunpack.i.l.bf16 %v8415_v26  ;;  %v8436_v59 = vunpack.i.l.bf16 %v11421_v25  ;;  %v8417_v1 = vunpack.i.h.bf16 %v8415_v26  ;;  %8578 = vset.pattern.permute.xlu0 %v14639_v63  ;;  %8579 = vset.pattern.permute.xlu1 %v14639_v63 }
 0x324   :  { %v8397_v25 = vunpack.i.h.bf16 %v11385_v62 }
 0x325   :  { %v759_v42 = vsel %vm758_vm8, %v8437_v38, %v8416_v45  ;;  %v761_v12 = vsel %vm758_vm8, %v8417_v1, %v8436_v59 }
 0x326   :  { %v11423_v27 = vpop.permute.xlu0 %8439  ;;  %v8420_v28 = vpop.permute.xlu1 %8419 }
 0x327   :  { %v8421_v50 = vunpack.i.l.bf16 %v8420_v28  ;;  %v8441_v2 = vunpack.i.l.bf16 %v11423_v27  ;;  %v8422_v4 = vunpack.i.h.bf16 %v8420_v28  ;;  %v8442_v60 = vunpack.i.h.bf16 %v11423_v27 }
 0x329   :  { %v8503_v61 = vpack.i.bf16 %v8421_v50, %v759_v42  ;;  %v778_v13 = vsel %vm777_vm11, %v8421_v50, %v8422_v4  ;;  %v779_v15 = vsel %vm777_vm11, %v8422_v4, %v8441_v2  ;;  %v780_v38 = vsel %vm777_vm11, %v8441_v2, %v8442_v60 }
 0x32a   :  { %v11425_v29 = vpop.permute.xlu0 %8444  ;;  %v8425_v30 = vpop.permute.xlu1 %8424  ;;  %v8518_v21 = vpack.i.bf16 %v779_v15, %v778_v13  ;;  %v839_v50 = vsel %vm836_vm6, %v8406_v14, %v8407_v17 }
 0x32b   :  { %v8446_v31 = vunpack.i.l.bf16 %v11425_v29  ;;  %v8427_v32 = vunpack.i.h.bf16 %v8425_v30  ;;  %v8426_v33 = vunpack.i.l.bf16 %v8425_v30 }
 0x32d   :  { %v8488_v34 = vpack.i.bf16 %v8426_v33, %v8401_v11  ;;  %v855_v35 = vsel %vm854_vm7, %v8426_v33, %v8427_v32  ;;  %v856_v37 = vsel %vm854_vm7, %v8427_v32, %v8446_v31  ;;  %v760_v11 = vsel %vm758_vm8, %v8416_v45, %v8417_v1 }
 0x32e   :  { %v861_v36 = vpop.permute.xlu0 %860  ;;  %v863_v41 = vpop.permute.xlu1 %862  ;;  %v8483_v43 = vpack.i.bf16 %v856_v37, %v855_v35  ;;  %v8513_v20 = vpack.i.bf16 %v761_v12, %v760_v11  ;;  %v821_v33 = vsel %vm818_vm5, %v8396_v6, %v8397_v25 }
 0x32f   :  { %8489 = vrot.lane.b32.xlu1 %v8488_v34, %s11005_s23  ;;  %v873_v8 = vsel %vm872_vm10, %v861_v36, %v863_v41  ;;  %v803_v34 = vsel %vm800_vm4, %v8386_v3, %v8387_v24 }
 0x330   :  { %8484 = vrot.lane.b32.xlu0 %v8483_v43, %s11005_s23 }
 0x332   :  { %v11437_v52 = vpop.permute.xlu0 %864  ;;  %v720_v53 = vpop.permute.xlu1 %719 }
 0x333   :  { %v874_v54 = vsel %vm872_vm10, %v863_v41, %v11437_v52  ;;  %v721_v40 = vsel %vm703_vm3, %v720_v53, %v8377_v56 }
 0x334   :  { %8494 = vrot.lane.b32.xlu0 %v11358_v55, %s11005_s23  ;;  %992 = vrot.lane.b32.xlu1 %v874_v54, %s11005_s23 }
 0x336   :  { %v11451_v55 = vpop.permute.xlu1 %8449  ;;  %v11462_v18 = vpop.permute.xlu0 %8454 }
 0x337   :  { %v8457_v26 = vunpack.i.h.bf16 %v11462_v18  ;;  %v8456_v28 = vunpack.i.l.bf16 %v11462_v18  ;;  %v8452_v51 = vunpack.i.h.bf16 %v11451_v55  ;;  %v8451_v56 = vunpack.i.l.bf16 %v11451_v55 }
 0x338   :  { %990 = vrot.lane.b32.xlu0 %v873_v8, %s11005_s23  ;;  %8504 = vrot.lane.b32.xlu1 %v8503_v61, %s11005_s23 }
 0x339   :  { %v745_v41 = vsel %vm740_vm9, %v8451_v56, %v8452_v51  ;;  %v762_v43 = vsel %vm758_vm8, %v8436_v59, %v8456_v28 }
 0x33a   :  { %v11464_v19 = vpop.permute.xlu1 %773  ;;  %v11471_v22 = vpop.permute.xlu0 %796 }
 0x33b   :  { %v804_v30 = vsel %vm800_vm4, %v8387_v24, %v11471_v22  ;;  %v781_v6 = vsel %vm777_vm11, %v8442_v60, %v11464_v19 }
 0x33c   :  { %8509 = vrot.lane.b32.xlu1 %v8508_v9, %s11005_s23  ;;  %8499 = vrot.lane.b32.xlu0 %v8498_v10, %s11005_s23  ;;  %v8523_v37 = vpack.i.bf16 %v804_v30, %v803_v34  ;;  %v8543_v45 = vpack.i.bf16 %v781_v6, %v780_v38 }
 0x33e   :  { %v11473_v23 = vpop.permute.xlu1 %814  ;;  %v11508_v16 = vpop.permute.xlu0 %832 }
 0x33f   :  { %v822_v32 = vsel %vm818_vm5, %v8397_v25, %v11473_v23  ;;  %v840_v47 = vsel %vm836_vm6, %v8407_v17, %v11508_v16 }
 0x340   :  { %8514 = vrot.lane.b32.xlu1 %v8513_v20, %s11005_s23  ;;  %8519 = vrot.lane.b32.xlu0 %v8518_v21, %s11005_s23  ;;  %v8528_v35 = vpack.i.bf16 %v822_v32, %v821_v33  ;;  %v8548_v53 = vpack.i.bf16 %v840_v47, %v839_v50 }
 0x342   :  { %v11516_v27 = vpop.permute.xlu1 %850  ;;  %v867_v59 = vpop.permute.xlu0 %866 }
 0x343   :  { %v875_v7 = vsel %vm872_vm10, %v11437_v52, %v867_v59 }
 0x344   :  { %775 = vrot.lane.b32.xlu1 %v721_v40, %s11002_s16  ;;  %988 = vrot.lane.b32.xlu0 %v861_v36, %s11005_s23  ;;  %v744_v36 = vsel %vm740_vm9, %v8431_v49, %v8451_v56  ;;  %v8447_v49 = vunpack.i.h.bf16 %v11425_v29  ;;  %v8558_v29 = vpack.i.bf16 %v8452_v51, %v11371_v57 }
 0x345   :  { %v8533_v62 = vpack.i.bf16 %v745_v41, %v744_v36 }
 0x346   :  { %v858_v54 = vsel %vm854_vm7, %v8447_v49, %v11516_v27  ;;  %v857_v42 = vsel %vm854_vm7, %v8446_v31, %v8447_v49  ;;  %v11533_v61 = vpop.permute.xlu1 %868 }
 0x347   :  { %v8553_v58 = vpack.i.bf16 %v858_v54, %v857_v42  ;;  %v876_v14 = vsel %vm872_vm10, %v867_v59, %v11533_v61 }
 0x348   :  { %816 = vrot.lane.b32.xlu1 %v11344_v48, %s10998_s19  ;;  %798 = vrot.lane.b32.xlu0 %v11340_v44, %s10997_s5  ;;  %v763_v44 = vsel %vm758_vm8, %v8456_v28, %v8457_v26 }
 0x349   :  { %v8538_v3 = vpack.i.bf16 %v763_v44, %v762_v43 }
 0x34a   :  { %v11550_v31 = vpop.permute.xlu1 %8469 }
 0x34b   :  { %v8472_v15 = vunpack.i.h.bf16 %v11550_v31  ;;  %v8471_v20 = vunpack.i.l.bf16 %v11550_v31 }
 0x34c   :  { %8529 = vrot.lane.b32.xlu1 %v8528_v35, %s11005_s23  ;;  %8524 = vrot.lane.b32.xlu0 %v8523_v37, %s11005_s23 }
 0x34d   :  { %v1027_v32 = vsel %vm1000_vm12, %v8471_v20, %v8472_v15 }
 0x34e   :  { %v11554_v0 = vpop.permute.xlu1 %8479 }
 0x350   :  { %8534 = vrot.lane.b32.xlu1 %v8533_v62, %s11005_s23  ;;  %8539 = vrot.lane.b32.xlu0 %v8538_v3, %s11005_s23 }
 0x354   :  { %8544 = vrot.lane.b32.xlu1 %v8543_v45, %s11005_s23  ;;  %834 = vrot.lane.b32.xlu0 %v11344_v48, %s10999_s30 }
 0x358   :  { %852 = vrot.lane.b32.xlu1 %v11344_v48, %s11003_s18  ;;  %8549 = vrot.lane.b32.xlu0 %v8548_v53, %s11005_s23 }
 0x35c   :  { %8554 = vrot.lane.b32.xlu1 %v8553_v58, %s11005_s23  ;;  %870 = vrot.lane.b32.xlu0 %v11344_v48, %s11004_s22  ;;  %v11548_v48 = vpop.permute.xlu0 %8459 }
 0x35d   :  { %v8462_v10 = vunpack.i.h.bf16 %v11548_v48  ;;  %v8461_v11 = vunpack.i.l.bf16 %v11548_v48 }
 0x35f   :  { %v1002_v56 = vsel %vm1000_vm12, %v8461_v11, %v8462_v10 }
 0x360   :  { %994 = vrot.lane.b32.xlu1 %v875_v7, %s11005_s23  ;;  %996 = vrot.lane.b32.xlu0 %v876_v14, %s11005_s23  ;;  %v11552_v52 = vpop.permute.xlu0 %8464 }
 0x361   :  { %v8467_v12 = vunpack.i.h.bf16 %v11552_v52  ;;  %v8466_v13 = vunpack.i.l.bf16 %v11552_v52 }
 0x363   :  { %v1022_v30 = vsel %vm1000_vm12, %v8466_v13, %v8467_v12 }
 0x364   :  { %8559 = vrot.lane.b32.xlu1 %v8558_v29, %s11005_s23  ;;  %v8475_v1 = vpop.permute.xlu0 %8474  ;;  %v7692_v29 = vpack.c.bf16 %v1027_v32, %v1022_v30 }
 0x365   :  { %v8476_v33 = vunpack.i.l.bf16 %v8475_v1  ;;  %v8477_v45 = vunpack.i.h.bf16 %v8475_v1 }
 0x367   :  { %v1021_v1 = vsel %vm1000_vm12, %v8476_v33, %v8466_v13 }
 0x3a1   :  { %v11556_v2 = vpop.permute.xlu1 %8489 }
 0x3a2   :  { %v11558_v4 = vpop.permute.xlu0 %8484 }
 0x3a3   :  { %v8487_v47 = vunpack.i.h.bf16 %v11558_v4  ;;  %v8486_v49 = vunpack.i.l.bf16 %v11558_v4 }
 0x3a5   :  { %v1037_v13 = vsel %vm1000_vm12, %v8486_v49, %v8487_v47 }
 0x3a6   :  { %v11560_v8 = vpop.permute.xlu0 %8494  ;;  %v11562_v55 = vpop.permute.xlu1 %992 }
 0x3aa   :  { %v11564_v57 = vpop.permute.xlu0 %990  ;;  %v8505_v9 = vpop.permute.xlu1 %8504 }
 0x3ab   :  { %v8507_v36 = vunpack.i.h.bf16 %v8505_v9  ;;  %v8506_v41 = vunpack.i.l.bf16 %v8505_v9  ;;  %v8482_v9 = vunpack.i.h.bf16 %v11554_v0 }
 0x3ae   :  { %v11572_v21 = vpop.permute.xlu1 %8509  ;;  %v8500_v40 = vpop.permute.xlu0 %8499 }
 0x3af   :  { %v8512_v24 = vunpack.i.h.bf16 %v11572_v21  ;;  %v8511_v25 = vunpack.i.l.bf16 %v11572_v21  ;;  %v8502_v28 = vunpack.i.h.bf16 %v8500_v40  ;;  %v8501_v51 = vunpack.i.l.bf16 %v8500_v40 }
 0x3b1   :  { %v1006_v34 = vsel %vm1000_vm12, %v8502_v28, %v8511_v25  ;;  %v1001_v35 = vsel %vm1000_vm12, %v8501_v51, %v8461_v11  ;;  %v1007_v37 = vsel %vm1000_vm12, %v8511_v25, %v8512_v24  ;;  %v8481_v11 = vunpack.i.l.bf16 %v11554_v0 }
 0x3b2   :  { %v11590_v43 = vpop.permute.xlu1 %8514  ;;  %v11592_v44 = vpop.permute.xlu0 %8519  ;;  %v7684_v60 = vpack.c.bf16 %v1007_v37, %v1002_v56  ;;  %v7686_v62 = vpack.c.bf16 %v1006_v34, %v1001_v35  ;;  %v1026_v25 = vsel %vm1000_vm12, %v8477_v45, %v8471_v20  ;;  %v8492_v28 = vunpack.i.h.bf16 %v11556_v2 }
 0x3b3   :  { %v8517_v3 = vunpack.i.h.bf16 %v11590_v43  ;;  %v8516_v6 = vunpack.i.l.bf16 %v11590_v43  ;;  %v8522_v17 = vunpack.i.h.bf16 %v11592_v44  ;;  %v8521_v38 = vunpack.i.l.bf16 %v11592_v44 }
 0x3b4   :  { %7685 = vmatprep.subr.bf16.mxu1 %v7684_v60  ;;  %v8491_v51 = vunpack.i.l.bf16 %v11556_v2  ;;  %v7694_v20 = vpack.c.bf16 %v1026_v25, %v1021_v1  ;;  %v1032_v18 = vsel %vm1000_vm12, %v8481_v11, %v8482_v9  ;;  %v1036_v33 = vsel %vm1000_vm12, %v8492_v28, %v8486_v49  ;;  %v11678_v25 = vld [vmem:[%s11051_s9 + $0x8] sm:$0xff] }
 0x3b5   :  { %v1011_v50 = vsel %vm1000_vm12, %v8506_v41, %v8516_v6  ;;  %v1016_v53 = vsel %vm1000_vm12, %v8507_v36, %v8521_v38  ;;  %7687 = vmatpush1.bf16.msra.mxu1 %v7686_v62  ;;  %v1012_v54 = vsel %vm1000_vm12, %v8516_v6, %v8517_v3  ;;  %v1017_v42 = vsel %vm1000_vm12, %v8521_v38, %v8522_v17 }
 0x3b6   :  { %v776_v58 = vpop.permute.xlu1 %775  ;;  %v989_v59 = vpop.permute.xlu0 %988  ;;  %v7688_v7 = vpack.c.bf16 %v1017_v42, %v1012_v54  ;;  %v7690_v14 = vpack.c.bf16 %v1016_v53, %v1011_v50  ;;  %v7696_v35 = vpack.c.bf16 %v1037_v13, %v1032_v18  ;;  %v8496_v37 = vunpack.i.l.bf16 %v11560_v8  ;;  %v11653_v53 = vld [vmem:[%s11051_s9] sm:$0xff]  ;;  %s702_s9 = sld [smem:[#allocation2]] }
 0x3b7   :  { %v782_v40 = vsel %vm777_vm11, %v11464_v19, %v776_v58  ;;  %v1042_v60 = vsel %vm1000_vm12, %v11564_v57, %v11562_v55  ;;  %v1041_v45 = vsel %vm1000_vm12, %v989_v59, %v11564_v57 }
 0x3b8   :  { %v8563_v56 = vpack.i.bf16 %v782_v40, %v8457_v26  ;;  %7689 = vmatprep.subr.bf16.mxu1 %v7688_v7  ;;  %v1031_v26 = vsel %vm1000_vm12, %v8491_v51, %v8481_v11  ;;  %v1003_v62 = vsel %vm1000_vm12, %v8462_v10, %v8496_v37 }
 0x3b9   :  { %7691 = vmatpush1.bf16.msra.mxu1 %v7690_v14  ;;  %v7698_v41 = vpack.c.bf16 %v1036_v33, %v1031_v26 }
 0x3ba   :  { %v817_v30 = vpop.permute.xlu1 %816  ;;  %8564 = vrot.lane.b32.xlu0 %v8563_v56, %s11005_s23  ;;  %v799_v32 = vpop.permute.xlu0 %798  ;;  %7693 = vmatprep.subr.bf16.mxu1 %v7692_v29 }
 0x3bb   :  { %v823_v19 = vsel %vm818_vm5, %v11473_v23, %v817_v30  ;;  %v805_v2 = vsel %vm800_vm4, %v11471_v22, %v799_v32  ;;  %v8497_v23 = vunpack.i.h.bf16 %v11560_v8 }
 0x3bc   :  { %v8568_v34 = vpack.i.bf16 %v823_v19, %v805_v2 }
 0x3bd   :  { %7695 = vmatpush1.bf16.msra.mxu1 %v7694_v20  ;;  %v1004_v48 = vsel %vm1000_vm12, %v8496_v37, %v8497_v23  ;;  %v880_v37 = vld [vmem:[%s11056_s13] sm:$0xff] }
 0x3be   :  { %v11632_v36 = vpop.permute.xlu1 %8529  ;;  %8569 = vrot.lane.b32.xlu1 %v8568_v34, %s11005_s23  ;;  %v11635_v22 = vpop.permute.xlu0 %8524  ;;  %7697 = vmatprep.subr.bf16.mxu1 %v7696_v35 }
 0x3bf   :  { %v8532_v10 = vunpack.i.h.bf16 %v11632_v36  ;;  %v8531_v54 = vunpack.i.l.bf16 %v11632_v36  ;;  %v8527_v42 = vunpack.i.h.bf16 %v11635_v22  ;;  %v8526_v58 = vunpack.i.l.bf16 %v11635_v22 }
 0x3c1   :  { %7699 = vmatpush1.bf16.msra.mxu1 %v7698_v41  ;;  %v1024_v28 = vsel %vm1000_vm12, %v8526_v58, %v8527_v42  ;;  %v1029_v51 = vsel %vm1000_vm12, %v8531_v54, %v8532_v10  ;;  %v1028_v20 = vsel %vm1000_vm12, %v8472_v15, %v8531_v54  ;;  %v1023_v18 = vsel %vm1000_vm12, %v8467_v12, %v8526_v58 }
 0x3c2   :  { %v11644_v6 = vpop.permute.xlu1 %8534  ;;  %v11646_v38 = vpop.permute.xlu0 %8539  ;;  %1123 = vmatprep.subr.mxu1 %v1042_v60  ;;  %v7708_v33 = vpack.c.bf16 %v1029_v51, %v1024_v28  ;;  %v7710_v35 = vpack.c.bf16 %v1028_v20, %v1023_v18 }
 0x3c3   :  { %v8537_v49 = vunpack.i.h.bf16 %v11644_v6  ;;  %v8536_v50 = vunpack.i.l.bf16 %v11644_v6  ;;  %v8542_v59 = vunpack.i.h.bf16 %v11646_v38  ;;  %v8541_v7 = vunpack.i.l.bf16 %v11646_v38 }
 0x3c5   :  { %v1008_v57 = vsel %vm1000_vm12, %v8512_v24, %v8536_v50  ;;  %1124 = vmatpush1.msra.mxu1 %v1041_v45  ;;  %v1009_v14 = vsel %vm1000_vm12, %v8536_v50, %v8537_v49  ;;  %v1013_v56 = vsel %vm1000_vm12, %v8517_v3, %v8541_v7  ;;  %v1014_v30 = vsel %vm1000_vm12, %v8541_v7, %v8542_v59 }
 0x3c6   :  { %v11670_v29 = vpop.permute.xlu1 %8544  ;;  %v835_v1 = vpop.permute.xlu0 %834  ;;  %7199 = vmatmul.mubr.msk.f32.vlgmr.msra.gmra.mrb[8].mxu1 %vm14634_vm13, %v11653_v53  ;;  %v7700_v11 = vpack.c.bf16 %v1009_v14, %v1004_v48  ;;  %v7702_v40 = vpack.c.bf16 %v1008_v57, %v1003_v62 }
 0x3c7   :  { %v8547_v21 = vunpack.i.h.bf16 %v11670_v29  ;;  %v8546_v24 = vunpack.i.l.bf16 %v11670_v29  ;;  %1177 = vmatprep.mubr.f32.mxu1 %v14635_v46  ;;  %v841_v44 = vsel %vm836_vm6, %v11508_v16, %v835_v1 }
 0x3c8   :  { %7701 = vmatprep.subr.bf16.mxu1 %v7700_v11 }
 0x3c9   :  { %v1018_v13 = vsel %vm1000_vm12, %v8522_v17, %v8546_v24  ;;  %7703 = vmatpush1.bf16.msra.mxu1 %v7702_v40  ;;  %v1019_v32 = vsel %vm1000_vm12, %v8546_v24, %v8547_v21 }
 0x3ca   :  { %v853_v19 = vpop.permute.xlu1 %852  ;;  %v11698_v2 = vpop.permute.xlu0 %8549  ;;  %7200 = vmatmul.mubr.msk.f32.gmra.mrb[10].mxu1 %vm14634_vm13, %v11678_v25  ;;  %v7704_v43 = vpack.c.bf16 %v1019_v32, %v1014_v30  ;;  %v7706_v3 = vpack.c.bf16 %v1018_v13, %v1013_v56 }
 0x3cb   :  { %v859_v17 = vsel %vm854_vm7, %v11516_v27, %v853_v19  ;;  %1248 = vmatprep.mubr.f32.mxu1 %v14635_v46  ;;  %v8552_v34 = vunpack.i.h.bf16 %v11698_v2  ;;  %v8551_v16 = vunpack.i.l.bf16 %v11698_v2 }
 0x3cc   :  { %v8573_v26 = vpack.i.bf16 %v859_v17, %v841_v44  ;;  %7705 = vmatprep.subr.bf16.mxu1 %v7704_v43  ;;  %v11771_v44 = vstv %s702_s9  ;;  %s14763_s9 = sld [smem:[#allocation8_spill]] }
 0x3cd   :  { %7707 = vmatpush1.bf16.msra.mxu1 %v7706_v3  ;;  %v1033_v41 = vsel %vm1000_vm12, %v8482_v9, %v8551_v16  ;;  %v1034_v62 = vsel %vm1000_vm12, %v8551_v16, %v8552_v34 }
 0x3ce   :  { %v11715_v27 = vpop.permute.xlu1 %8554  ;;  %8574 = vrot.lane.b32.xlu0 %v8573_v26, %s11005_s23  ;;  %v871_v31 = vpop.permute.xlu0 %870  ;;  %7709 = vmatprep.subr.bf16.mxu1 %v7708_v33 }
 0x3cf   :  { %v8557_v52 = vunpack.i.h.bf16 %v11715_v27  ;;  %v8556_v15 = vunpack.i.l.bf16 %v11715_v27  ;;  %v877_v12 = vsel %vm872_vm10, %v11533_v61, %v871_v31  ;;  %v881_v61 = vld [vmem:[%s11056_s13 + $0x8] sm:$0xff]  ;;  %s11007_s13 = smov 92  }
 0x3d0   :  { %998 = vrot.lane.b32.xlu1 %v877_v12, %s11005_s23 }
 0x3d1   :  { %v1038_v60 = vsel %vm1000_vm12, %v8487_v47, %v8556_v15  ;;  %7711 = vmatpush1.bf16.msra.mxu1 %v7710_v35  ;;  %v1039_v45 = vsel %vm1000_vm12, %v8556_v15, %v8557_v52 }
 0x3d2   :  { %v995_v50 = vpop.permute.xlu1 %994  ;;  %v997_v48 = vpop.permute.xlu0 %996  ;;  %v7712_v54 = vpack.c.bf16 %v1039_v45, %v1034_v62  ;;  %v7714_v58 = vpack.c.bf16 %v1038_v60, %v1033_v41  ;;  %884 = vperm.xlu0 %8578, %v880_v37  }
 0x3d3   :  { %v1044_v0 = vsel %vm1000_vm12, %v995_v50, %v997_v48  ;;  %v1043_v57 = vsel %vm1000_vm12, %v11562_v55, %v995_v50 }
 0x3d4   :  { %7713 = vmatprep.subr.bf16.mxu1 %v7712_v54  ;;  %889 = vperm.xlu1 %8579, %v881_v61  }
 0x3d5   :  { %7715 = vmatpush1.bf16.msra.mxu1 %v7714_v58 }
 0x3d6   :  { %v8560_v4 = vpop.permute.xlu1 %8559  ;;  %1200 = vmatprep.subr.mxu1 %v1044_v0 }
 0x3d7   :  { %v8562_v47 = vunpack.i.h.bf16 %v8560_v4  ;;  %v8561_v9 = vunpack.i.l.bf16 %v8560_v4 }
 0x3d9   :  { %v1005_v7 = vsel %vm1000_vm12, %v8497_v23, %v8561_v9  ;;  %v1010_v14 = vsel %vm1000_vm12, %v8537_v49, %v8562_v47  ;;  %1201 = vmatpush1.msra.mxu1 %v1043_v57  ;;  %v7716_v1 = vpack.c.bf16 %v8562_v47, %v8561_v9 }
 0x3da   :  { %7201 = vmatmul.mubr.msk.f32.vlgmr.msra.gmra.mrb[12].mxu1 %vm14634_vm13, %v11653_v53  ;;  %v7718_v11 = vpack.c.bf16 %v1010_v14, %v1005_v7  ;;  %v11809_v14 = vld [vmem:[%s11166_s27] sm:$0x3f]  ;;  %s11008_s27 = smov 28  }
 0x3db   :  { %7717 = vmatprep.subr.bf16.mxu0 %v7716_v1  ;;  %1254 = vmatprep.mubr.f32.mxu1 %v14635_v46 }
 0x3dc   :  { %7719 = vmatpush1.bf16.msra.mxu0 %v7718_v11 }
 0x3de   :  { %7202 = vmatmul.mubr.msk.f32.gmra.mrb[14].mxu1 %vm14634_vm13, %v11678_v25 }
 0x42c   :  { %v8565_v8 = vpop.permute.xlu0 %8564 }
 0x42d   :  { %v8567_v55 = vunpack.i.h.bf16 %v8565_v8  ;;  %v8566_v23 = vunpack.i.l.bf16 %v8565_v8 }
 0x42f   :  { %v1020_v6 = vsel %vm1000_vm12, %v8547_v21, %v8567_v55  ;;  %v1015_v49 = vsel %vm1000_vm12, %v8542_v59, %v8566_v23  ;;  %v7720_v40 = vpack.c.bf16 %v8567_v55, %v8566_v23 }
 0x430   :  { %v8570_v24 = vpop.permute.xlu1 %8569  ;;  %v7722_v28 = vpack.c.bf16 %v1020_v6, %v1015_v49  ;;  %v11815_v6 = vsub.s32 0, %v11305_v5 }
 0x431   :  { %v8572_v51 = vunpack.i.h.bf16 %v8570_v24  ;;  %v8571_v56 = vunpack.i.l.bf16 %v8570_v24  ;;  %7721 = vmatprep.subr.bf16.mxu0 %v7720_v40 }
 0x432   :  { %7723 = vmatpush1.bf16.msra.mxu0 %v7722_v28  ;;  %14682 = vst [vmem:[#allocation20_spill] sm:$0xff] %v11815_v6 }
 0x433   :  { %v1030_v13 = vsel %vm1000_vm12, %v8532_v10, %v8572_v51  ;;  %v1025_v29 = vsel %vm1000_vm12, %v8527_v42, %v8571_v56  ;;  %v7724_v21 = vpack.c.bf16 %v8572_v51, %v8571_v56 }
 0x434   :  { %v7726_v30 = vpack.c.bf16 %v1030_v13, %v1025_v29  ;;  %v11824_v29 = vsub.s32 1, %v11305_v5 }
 0x435   :  { %7725 = vmatprep.subr.bf16.mxu0 %v7724_v21 }
 0x436   :  { %7727 = vmatpush1.bf16.msra.mxu0 %v7726_v30  ;;  %14683 = vst [vmem:[#allocation21_spill] sm:$0xff] %v11824_v29 }
 0x440   :  { %v8575_v38 = vpop.permute.xlu0 %8574 }
 0x441   :  { %v8577_v59 = vunpack.i.h.bf16 %v8575_v38  ;;  %v8576_v32 = vunpack.i.l.bf16 %v8575_v38 }
 0x442   :  { %v999_v10 = vpop.permute.xlu1 %998 }
 0x443   :  { %v1040_v19 = vsel %vm1000_vm12, %v8557_v52, %v8577_v59  ;;  %v1035_v43 = vsel %vm1000_vm12, %v8552_v34, %v8576_v32  ;;  %v7728_v36 = vpack.c.bf16 %v8577_v59, %v8576_v32  ;;  %v1045_v22 = vsel %vm1000_vm12, %v997_v48, %v999_v10 }
 0x444   :  { %v7730_v3 = vpack.c.bf16 %v1040_v19, %v1035_v43 }
 0x445   :  { %7729 = vmatprep.subr.bf16.mxu0 %v7728_v36 }
 0x446   :  { %7731 = vmatpush1.bf16.msra.mxu0 %v7730_v3 }
 0x447   :  { %1277 = vmatprep.subr.mxu0 %v999_v10 }
 0x44a   :  { %1278 = vmatpush1.msra.mxu0 %v1045_v22 }
 0x44b   :  { %7203 = vmatmul.mubr.msk.f32.vlgmr.msra.gmra.mrb[4].mxu0 %vm14634_vm13, %v11653_v53 }
 0x44c   :  { %1331 = vmatprep.mubr.f32.mxu0 %v14635_v46 }
 0x44f   :  { %7204 = vmatmul.mubr.msk.f32.gmra.mrb[6].mxu0 %vm14634_vm13, %v11678_v25 }
 0x451   :  { %v885_v42 = vpop.permute.xlu0 %884 }
 0x453   :  { %v11773_v26 = vpop.permute.xlu1 %889 }
 0x499   :  { %v1173_v2 = vpop.f32.mrb[8].mxu1 }
 0x49a   :  { %v1175_v17 = vpop.f32.mrb[9].mxu1  ;;  %v1174_v20 = vadd.f32 %v1173_v2, %v885_v42 }
 0x49b   :  { %v1176_v18 = vadd.f32 %v1175_v17, %v885_v42 }
 0x49c   :  { %vm1338_vm14 = vcmp.ge.f32.partialorder %v1174_v20, 0.0  ;;  %v1351_v33 = vmul.f32 %v11771_v44, %v1174_v20 }
 0x49d   :  { %vm1339_vm15 = vcmp.ge.f32.partialorder %v1176_v18, 0.0  ;;  %v1352_v53 = vmul.f32 %v11771_v44, %v1176_v18  ;;  %v1179_v34 = vpop.f32.mrb[10].mxu1 }
 0x49e   :  { %v1180_v16 = vadd.f32 %v1179_v34, %v11773_v26  ;;  %v11778_v25 = vsel %vm1338_vm14, %v1174_v20, %v1351_v33  ;;  %v1181_v27 = vpop.f32.mrb[11].mxu1 }
 0x49f   :  { %v11780_v31 = vsel %vm1339_vm15, %v1176_v18, %v1352_v53  ;;  %v1182_v41 = vadd.f32 %v1181_v27, %v11773_v26 }
 0x4a0   :  { %vm1344_vm1 = vcmp.ge.f32.partialorder %v1180_v16, 0.0  ;;  %v1357_v52 = vmul.f32 %v11771_v44, %v1180_v16  ;;  %v8580_v15 = vpack.i.bf16 %v11780_v31, %v11778_v25 }
 0x4a1   :  { %v1358_v50 = vmul.f32 %v11771_v44, %v1182_v41  ;;  %vm1345_vm14 = vcmp.ge.f32.partialorder %v1182_v41, 0.0 }
 0x4a2   :  { %v11785_v12 = vsel %vm1344_vm1, %v1180_v16, %v1357_v52  ;;  %8581 = vrot.lane.b32.xlu0 %v8580_v15, %s11007_s13  ;;  %vm1376_vm1 = vcmp.eq.s32.totalorder %v11809_v14, 1 }
 0x4a3   :  { %v8585_v35 = vpack.i.bf16 %v11785_v12, %v11778_v25  ;;  %v11801_v47 = vsel %vm1345_vm14, %v1182_v41, %v1358_v50  ;;  %v11820_v51 = vsel %vm1376_vm1, 1, %v14639_v63 }
 0x4a4   :  { %v1387_v2 = vrot.slane %v11820_v51, %v11815_v6  ;;  %v1391_v34 = vrot.slane %v11820_v51, %v11824_v29 }
 0x4a5   :  { %8586 = vrot.lane.b32.xlu1 %v8585_v35, %s10996_s0 }
 0x4ad   :  { %v1250_v37 = vpop.f32.mrb[12].mxu1 }
 0x4ae   :  { %v1251_v60 = vadd.f32 %v1250_v37, %v885_v42  ;;  %v1252_v62 = vpop.f32.mrb[13].mxu1 }
 0x4af   :  { %v1253_v7 = vadd.f32 %v1252_v62, %v885_v42 }
 0x4b0   :  { %vm1340_vm2 = vcmp.ge.f32.partialorder %v1251_v60, 0.0  ;;  %v1353_v45 = vmul.f32 %v11771_v44, %v1251_v60 }
 0x4b1   :  { %v1256_v61 = vpop.f32.mrb[14].mxu1  ;;  %v1354_v8 = vmul.f32 %v11771_v44, %v1253_v7 }
 0x4b2   :  { %v1257_v48 = vadd.f32 %v1256_v61, %v11773_v26  ;;  %v1258_v54 = vpop.f32.mrb[15].mxu1  ;;  %v11795_v58 = vsel %vm1340_vm2, %v1251_v60, %v1353_v45  ;;  %vm1341_vm2 = vcmp.ge.f32.partialorder %v1253_v7, 0.0 }
 0x4b3   :  { %v8590_v0 = vpack.i.bf16 %v11785_v12, %v11795_v58  ;;  %v1259_v1 = vadd.f32 %v1258_v54, %v11773_v26  ;;  %v11827_v59 = vsel %vm1341_vm2, %v1253_v7, %v1354_v8 }
 0x4b4   :  { %vm1346_vm15 = vcmp.ge.f32.partialorder %v1257_v48, 0.0  ;;  %v1359_v4 = vmul.f32 %v11771_v44, %v1257_v48 }
 0x4b5   :  { %8591 = vrot.lane.b32.xlu1 %v8590_v0, %s11007_s13  ;;  %v1360_v24 = vmul.f32 %v11771_v44, %v1259_v1 }
 0x4b6   :  { %v11803_v9 = vsel %vm1346_vm15, %v1257_v48, %v1359_v4  ;;  %vm1347_vm15 = vcmp.ge.f32.partialorder %v1259_v1, 0.0 }
 0x4b7   :  { %v8595_v57 = vpack.i.bf16 %v11803_v9, %v11801_v47  ;;  %v11837_v22 = vsel %vm1347_vm15, %v1259_v1, %v1360_v24  ;;  %vm1408_vm15 = vcmp.eq.s32.totalorder %v1387_v2, 1 }
 0x4b9   :  { %8596 = vrot.lane.b32.xlu0 %v8595_v57, %s11007_s13 }
 0x514   :  { %v8582_v19 = vpop.permute.xlu0 %8581 }
 0x515   :  { %v8584_v18 = vunpack.i.h.bf16 %v8582_v19 }
 0x517   :  { %v8587_v49 = vpop.permute.xlu1 %8586 }
 0x518   :  { %v8588_v21 = vunpack.i.l.bf16 %v8587_v49  ;;  %v8589_v33 = vunpack.i.h.bf16 %v8587_v49 }
 0x51e   :  { %v1327_v11 = vpop.f32.mrb[4].mxu0 }
 0x51f   :  { %v1328_v55 = vadd.f32 %v1327_v11, %v885_v42  ;;  %v1329_v23 = vpop.f32.mrb[5].mxu0 }
 0x520   :  { %v1330_v40 = vadd.f32 %v1329_v23, %v885_v42 }
 0x521   :  { %vm1342_vm14 = vcmp.ge.f32.partialorder %v1328_v55, 0.0  ;;  %v1355_v28 = vmul.f32 %v11771_v44, %v1328_v55 }
 0x522   :  { %vm1343_vm13 = vcmp.ge.f32.partialorder %v1330_v40, 0.0  ;;  %v1356_v56 = vmul.f32 %v11771_v44, %v1330_v40  ;;  %v1333_v13 = vpop.f32.mrb[6].mxu0 }
 0x523   :  { %v1334_v30 = vadd.f32 %v1333_v13, %v11773_v26  ;;  %v1335_v38 = vpop.f32.mrb[7].mxu0  ;;  %v11829_v32 = vsel %vm1342_vm14, %v1328_v55, %v1355_v28  ;;  %vm1409_vm14 = vcmp.eq.s32.totalorder %v1391_v34, 1  ;;  %v11890_v55 = vsub.s32 5, %v11305_v5 }
 0x524   :  { %v11831_v43 = vsel %vm1343_vm13, %v1330_v40, %v1356_v56  ;;  %v1336_v36 = vadd.f32 %v1335_v38, %v11773_v26  ;;  %v8600_v3 = vpack.i.bf16 %v11829_v32, %v11827_v59  ;;  %v8583_v26 = vunpack.i.l.bf16 %v8582_v19 }
 0x525   :  { %v1361_v10 = vmul.f32 %v11771_v44, %v1334_v30  ;;  %v1381_v42 = vsel %vm703_vm3, %v8588_v21, %v11831_v43  ;;  %vm1348_vm1 = vcmp.ge.f32.partialorder %v1334_v30, 0.0  ;;  %vm1450_vm13 = vcmask 752640  }
 0x526   :  { %vm1349_vm2 = vcmp.ge.f32.partialorder %v1336_v36, 0.0  ;;  %v1362_v17 = vmul.f32 %v11771_v44, %v1336_v36  ;;  %8601 = vrot.lane.b32.xlu1 %v8600_v3, %s11007_s13  ;;  %v8605_v20 = vpack.i.bf16 %v11837_v22, %v1381_v42  ;;  %v1451_v37 = vsel %vm1450_vm13, %v8583_v26, %v8584_v18 }
 0x527   :  { %v8592_v53 = vpop.permute.xlu1 %8591  ;;  %v1373_v52 = vsel %vm1348_vm1, %v1334_v30, %v1361_v10  ;;  %v11865_v0 = vsel %vm1408_vm15, %v1451_v37, %v11778_v25  ;;  %v11883_v25 = vsub.s32 4, %v11305_v5  ;;  %v1407_v21 = vrot.slane %v11820_v51, %v11890_v55 }
 0x528   :  { %v11848_v16 = vsel %vm1349_vm2, %v1336_v36, %v1362_v17  ;;  %v8593_v27 = vunpack.i.l.bf16 %v8592_v53  ;;  %8606 = vrot.lane.b32.xlu0 %v8605_v20, %s11007_s13  ;;  %v8594_v41 = vunpack.i.h.bf16 %v8592_v53 }
 0x529   :  { %v1382_v44 = vsel %vm703_vm3, %v8589_v33, %v11848_v16  ;;  %v1403_v40 = vrot.slane %v11820_v51, %v11883_v25 }
 0x52a   :  { %v8610_v15 = vpack.i.bf16 %v1382_v44, %v1373_v52  ;;  %v1452_v45 = vsel %vm1450_vm13, %v8584_v18, %v8593_v27 }
 0x52b   :  { %v8597_v35 = vpop.permute.xlu0 %8596  ;;  %v11859_v48 = vsel %vm1409_vm14, %v1452_v45, %v11780_v31  ;;  %v11877_v31 = vsub.s32 2, %v11305_v5 }
 0x52c   :  { %v8599_v60 = vunpack.i.h.bf16 %v8597_v35  ;;  %v8598_v62 = vunpack.i.l.bf16 %v8597_v35  ;;  %8611 = vrot.lane.b32.xlu1 %v8610_v15, %s11007_s13  ;;  %s7222_s13 = sld [smem:[#allocation2 + $0x4]] }
 0x52e   :  { %v1457_v61 = vsel %vm1450_vm13, %v8598_v62, %v8599_v60  ;;  %v1456_v50 = vsel %vm1450_vm13, %v8594_v41, %v8598_v62 }
 0x52f   :  { %v11862_v54 = vsel %vm1409_vm14, %v1457_v61, %v11801_v47  ;;  %v11868_v4 = vsel %vm1408_vm15, %v1456_v50, %v11785_v12  ;;  %v11880_v47 = vsub.s32 3, %v11305_v5  ;;  %v1395_v12 = vrot.slane %v11820_v51, %v11877_v31 }
 0x530   :  { %v8620_v57 = vpack.i.bf16 %v11862_v54, %v11859_v48  ;;  %v8615_v7 = vpack.i.bf16 %v11868_v4, %v11865_v0  ;;  %vm1412_vm14 = vcmp.eq.s32.totalorder %v1403_v40, 1  ;;  %vm1413_vm15 = vcmp.eq.s32.totalorder %v1407_v21, 1 }
 0x531   :  { %v1399_v8 = vrot.slane %v11820_v51, %v11880_v47  ;;  %vm1410_vm1 = vcmp.eq.s32.totalorder %v1395_v12, 1 }
 0x532   :  { %8621 = vrot.lane.b32.xlu1 %v8620_v57, %s10996_s0  ;;  %8616 = vrot.lane.b32.xlu0 %v8615_v7, %s10996_s0 }
 0x533   :  { %vm1411_vm2 = vcmp.eq.s32.totalorder %v1399_v8, 1 }
 0x598   :  { %v8602_v1 = vpop.permute.xlu1 %8601 }
 0x599   :  { %v8603_v11 = vunpack.i.l.bf16 %v8602_v1  ;;  %v8604_v23 = vunpack.i.h.bf16 %v8602_v1 }
 0x59a   :  { %v8607_v49 = vpop.permute.xlu0 %8606 }
 0x59b   :  { %v8609_v24 = vunpack.i.h.bf16 %v8607_v49  ;;  %v8608_v28 = vunpack.i.l.bf16 %v8607_v49  ;;  %v1453_v56 = vsel %vm1450_vm13, %v8593_v27, %v8603_v11  ;;  %v1454_v19 = vsel %vm1450_vm13, %v8603_v11, %v8604_v23 }
 0x59c   :  { %v11899_v5 = vsel %vm1410_vm1, %v1453_v56, %v11795_v58  ;;  %v11912_v51 = vsel %vm1411_vm2, %v1454_v19, %v11827_v59 }
 0x59d   :  { %v1458_v13 = vsel %vm1450_vm13, %v8599_v60, %v8609_v24  ;;  %v1455_v36 = vsel %vm1450_vm13, %v8604_v23, %v8608_v28 }
 0x59e   :  { %v8612_v30 = vpop.permute.xlu1 %8611  ;;  %v11902_v38 = vsel %vm1410_vm1, %v1458_v13, %v11803_v9  ;;  %v11918_v17 = vsel %vm1412_vm14, %v1455_v36, %v11829_v32  ;;  %v11929_v32 = vsel %vm1413_vm15, %v8608_v28, %v11831_v43  ;;  %vm1583_vm1 = vcmask 228352  }
 0x59f   :  { %v8614_v3 = vunpack.i.h.bf16 %v8612_v30  ;;  %v8613_v10 = vunpack.i.l.bf16 %v8612_v30  ;;  %v8625_v42 = vpack.i.bf16 %v11902_v38, %v11899_v5 }
 0x5a1   :  { %v1460_v2 = vsel %vm1450_vm13, %v8613_v10, %v8614_v3  ;;  %8626 = vrot.lane.b32.xlu0 %v8625_v42, %s10996_s0  ;;  %v1459_v58 = vsel %vm1450_vm13, %v8609_v24, %v8613_v10  ;;  %v11937_v37 = vsel %vm1413_vm15, %v8614_v3, %v11848_v16  ;;  %vm1485_vm13 = vcmp.eq.s32.totalorder %v11809_v14, 2 }
 0x5a2   :  { %v11915_v9 = vsel %vm1411_vm2, %v1459_v58, %v11837_v22  ;;  %v11920_v20 = vsel %vm1412_vm14, %v1460_v2, %v1373_v52  ;;  %v11947_v45 = vsel %vm1485_vm13, 1, %v14639_v63 }
 0x5a3   :  { %v8630_v18 = vpack.i.bf16 %v11915_v9, %v11912_v51  ;;  %v8640_v26 = vpack.i.bf16 %v11920_v20, %v11918_v17  ;;  %v1520_v7 = vrot.slane %v11947_v45, %v11815_v6  ;;  %v1524_v23 = vrot.slane %v11947_v45, %v11824_v29 }
 0x5a4   :  { %v8622_v33 = vpop.permute.xlu1 %8621  ;;  %v8617_v53 = vpop.permute.xlu0 %8616 }
 0x5a5   :  { %v8624_v34 = vunpack.i.h.bf16 %v8622_v33  ;;  %v8623_v59 = vunpack.i.l.bf16 %v8622_v33  ;;  %v8619_v27 = vunpack.i.h.bf16 %v8617_v53  ;;  %v8618_v44 = vunpack.i.l.bf16 %v8617_v53  ;;  %8631 = vrot.lane.b32.xlu1 %v8630_v18, %s10996_s0  ;;  %8641 = vrot.lane.b32.xlu0 %v8640_v26, %s10996_s0 }
 0x5a6   :  { %vm11959_vm2 = vcmp.eq.s32.totalorder %v1520_v7, 1  ;;  %vm11965_vm14 = vcmp.eq.s32.totalorder %v1524_v23, 1 }
 0x5a7   :  { %v1508_v22 = vsel %vm703_vm3, %v8623_v59, %v8618_v44  ;;  %v1506_v52 = vsel %vm703_vm3, %v8618_v44, %v11929_v32  ;;  %v1507_v41 = vsel %vm703_vm3, %v8619_v27, %v11937_v37  ;;  %v1509_v60 = vsel %vm703_vm3, %v8624_v34, %v8619_v27 }
 0x5a8   :  { %v8645_v15 = vpack.i.bf16 %v11920_v20, %v1508_v22  ;;  %v8635_v35 = vpack.i.bf16 %v1506_v52, %v11918_v17  ;;  %v8650_v43 = vpack.i.bf16 %v1509_v60, %v1507_v41 }
 0x5aa   :  { %8646 = vrot.lane.b32.xlu0 %v8645_v15, %s11008_s27  ;;  %8636 = vrot.lane.b32.xlu1 %v8635_v35, %s11008_s27 }
 0x5ae   :  { %8651 = vrot.lane.b32.xlu1 %v8650_v43, %s11008_s27  ;;  %v1532_v43 = vrot.slane %v11947_v45, %v11880_v47 }
 0x5b0   :  { %vm12011_vm13 = vcmp.eq.s32.totalorder %v1532_v43, 1 }
 0x613   :  { %v8627_v62 = vpop.permute.xlu0 %8626 }
 0x614   :  { %v8629_v16 = vunpack.i.h.bf16 %v8627_v62  ;;  %v8628_v61 = vunpack.i.l.bf16 %v8627_v62 }
 0x616   :  { %v1510_v49 = vsel %vm703_vm3, %v8628_v61, %v8623_v59  ;;  %v1511_v24 = vsel %vm703_vm3, %v8629_v16, %v8624_v34 }
 0x617   :  { %v8632_v50 = vpop.permute.xlu1 %8631  ;;  %v8642_v57 = vpop.permute.xlu0 %8641 }
 0x618   :  { %v8634_v12 = vunpack.i.h.bf16 %v8632_v50  ;;  %v8633_v1 = vunpack.i.l.bf16 %v8632_v50  ;;  %v8644_v11 = vunpack.i.h.bf16 %v8642_v57  ;;  %v8643_v8 = vunpack.i.l.bf16 %v8642_v57 }
 0x61a   :  { %v1512_v40 = vsel %vm703_vm3, %v8633_v1, %v8628_v61  ;;  %v1514_v28 = vsel %vm703_vm3, %v8643_v8, %v8633_v1  ;;  %v1513_v19 = vsel %vm703_vm3, %v8634_v12, %v8629_v16  ;;  %v1515_v36 = vsel %vm703_vm3, %v8644_v11, %v8634_v12 }
 0x61b   :  { %v8655_v56 = vpack.i.bf16 %v1512_v40, %v1510_v49  ;;  %v8660_v13 = vpack.i.bf16 %v1511_v24, %v1514_v28  ;;  %v8665_v26 = vpack.i.bf16 %v1515_v36, %v1513_v19  ;;  %v1540_v28 = vrot.slane %v11947_v45, %v11890_v55 }
 0x61c   :  { %v8647_v21 = vpop.permute.xlu0 %8646  ;;  %v8637_v30 = vpop.permute.xlu1 %8636 }
 0x61d   :  { %v8648_v10 = vunpack.i.l.bf16 %v8647_v21  ;;  %v8639_v42 = vunpack.i.h.bf16 %v8637_v30  ;;  %v8638_v2 = vunpack.i.l.bf16 %v8637_v30  ;;  %8656 = vrot.lane.b32.xlu0 %v8655_v56, %s11008_s27  ;;  %8661 = vrot.lane.b32.xlu1 %v8660_v13, %s11008_s27  ;;  %v8649_v27 = vunpack.i.h.bf16 %v8647_v21 }
 0x61f   :  { %v1584_v18 = vsel %vm1583_vm1, %v8638_v2, %v8639_v42  ;;  %v1585_v33 = vsel %vm1583_vm1, %v8639_v42, %v8648_v10 }
 0x620   :  { %v8652_v53 = vpop.permute.xlu1 %8651  ;;  %v11974_v34 = vsel %vm11959_vm2, %v1584_v18, %v11865_v0  ;;  %v11979_v59 = vsel %vm11965_vm14, %v1585_v33, %v11859_v48 }
 0x621   :  { %v8654_v44 = vunpack.i.h.bf16 %v8652_v53  ;;  %v8653_v22 = vunpack.i.l.bf16 %v8652_v53  ;;  %8666 = vrot.lane.b32.xlu0 %v8665_v26, %s11008_s27  ;;  %v8675_v15 = vpack.i.bf16 %v11979_v59, %v11974_v34  ;;  %s14769_s27 = sld [smem:[#allocation11_spill]] }
 0x623   :  { %v1589_v52 = vsel %vm1583_vm1, %v8649_v27, %v8653_v22  ;;  %v1590_v35 = vsel %vm1583_vm1, %v8653_v22, %v8654_v44 }
 0x624   :  { %v11989_v0 = vsel %vm11959_vm2, %v1589_v52, %v11868_v4  ;;  %v11997_v41 = vsel %vm11965_vm14, %v1590_v35, %v11862_v54  ;;  %v1528_v4 = vrot.slane %v11947_v45, %v11877_v31  ;;  %vm1618_vm2 = vcmp.eq.s32.totalorder %v11809_v14, 3 }
 0x625   :  { %8676 = vrot.lane.b32.xlu0 %v8675_v15, %s11001_s15  ;;  %v8670_v48 = vpack.i.bf16 %v11989_v0, %v11974_v34  ;;  %v8680_v60 = vpack.i.bf16 %v11997_v41, %v11989_v0  ;;  %v12038_v13 = vsel %vm1618_vm2, 1, %v14639_v63  ;;  %vm12049_vm14 = vcmp.eq.s32.totalorder %v1540_v28, 1 }
 0x626   :  { %vm12007_vm15 = vcmp.eq.s32.totalorder %v1528_v4, 1 }
 0x627   :  { %8671 = vrot.lane.b32.xlu1 %v8670_v48, %s10996_s0 }
 0x62b   :  { %8681 = vrot.lane.b32.xlu1 %v8680_v60, %s11001_s15 }
 0x68f   :  { %v8657_v62 = vpop.permute.xlu0 %8656  ;;  %v8662_v16 = vpop.permute.xlu1 %8661 }
 0x690   :  { %v8659_v54 = vunpack.i.h.bf16 %v8657_v62  ;;  %v8658_v50 = vunpack.i.l.bf16 %v8657_v62  ;;  %v8664_v57 = vunpack.i.h.bf16 %v8662_v16  ;;  %v8663_v56 = vunpack.i.l.bf16 %v8662_v16 }
 0x692   :  { %v1586_v12 = vsel %vm1583_vm1, %v8648_v10, %v8658_v50  ;;  %v1587_v1 = vsel %vm1583_vm1, %v8658_v50, %v8659_v54  ;;  %v1591_v24 = vsel %vm1583_vm1, %v8654_v44, %v8664_v57  ;;  %v1588_v2 = vsel %vm1583_vm1, %v8659_v54, %v8663_v56 }
 0x693   :  { %v8667_v11 = vpop.permute.xlu0 %8666  ;;  %v12020_v8 = vsel %vm12007_vm15, %v1586_v12, %v11899_v5  ;;  %v12025_v23 = vsel %vm12011_vm13, %v1587_v1, %v11912_v51  ;;  %v1536_v5 = vrot.slane %v11947_v45, %v11883_v25  ;;  %v1614_v30 = vsel %vm12007_vm15, %v1591_v24, %v11902_v38 }
 0x694   :  { %v8668_v49 = vunpack.i.l.bf16 %v8667_v11  ;;  %v8685_v40 = vpack.i.bf16 %v12025_v23, %v12020_v8  ;;  %v8669_v3 = vunpack.i.h.bf16 %v8667_v11  ;;  %v1629_v38 = vrot.slane %v12038_v13, %v11815_v6 }
 0x695   :  { %vm12053_vm2 = vcmp.eq.s32.totalorder %v1536_v5, 1  ;;  %v12064_v33 = vsel %vm12049_vm14, %v8663_v56, %v11929_v32  ;;  %v1633_v54 = vrot.slane %v12038_v13, %v11824_v29 }
 0x696   :  { %8686 = vrot.lane.b32.xlu0 %v8685_v40, %s11001_s15  ;;  %v1592_v51 = vsel %vm1583_vm1, %v8664_v57, %v8668_v49  ;;  %v12069_v53 = vsel %vm12053_vm2, %v1588_v2, %v11918_v17  ;;  %v1593_v52 = vsel %vm1583_vm1, %v8668_v49, %v8669_v3  ;;  %v1617_v15 = vsel %vm12049_vm14, %v8669_v3, %v11937_v37 }
 0x697   :  { %v8677_v21 = vpop.permute.xlu0 %8676  ;;  %v12046_v19 = vsel %vm12011_vm13, %v1592_v51, %v11915_v9  ;;  %vm1650_vm15 = vcmp.eq.s32.totalorder %v1629_v38, 1  ;;  %v1616_v60 = vsel %vm12053_vm2, %v1593_v52, %v11920_v20  ;;  %v1637_v20 = vrot.slane %v12038_v13, %v11877_v31 }
 0x698   :  { %v8690_v36 = vpack.i.bf16 %v12046_v19, %v1614_v30  ;;  %v8679_v58 = vunpack.i.h.bf16 %v8677_v21  ;;  %v8678_v9 = vunpack.i.l.bf16 %v8677_v21  ;;  %vm1651_vm13 = vcmp.eq.s32.totalorder %v1633_v54, 1 }
 0x699   :  { %v8672_v10 = vpop.permute.xlu1 %8671  ;;  %vm1652_vm1 = vcmp.eq.s32.totalorder %v1637_v20, 1 }
 0x69a   :  { %v8674_v18 = vunpack.i.h.bf16 %v8672_v10  ;;  %v8673_v26 = vunpack.i.l.bf16 %v8672_v10  ;;  %8691 = vrot.lane.b32.xlu0 %v8690_v36, %s11001_s15  ;;  %v1692_v17 = vsel %vm758_vm8, %v8678_v9, %v8679_v58  ;;  %v1645_v36 = vrot.slane %v12038_v13, %v11883_v25 }
 0x69b   :  { %v12086_v62 = vsel %vm1650_vm15, %v1692_v17, %v11974_v34 }
 0x69c   :  { %v1623_v27 = vsel %vm703_vm3, %v8673_v26, %v12064_v33  ;;  %v1624_v48 = vsel %vm703_vm3, %v8674_v18, %v1617_v15  ;;  %vm1654_vm14 = vcmp.eq.s32.totalorder %v1645_v36, 1 }
 0x69d   :  { %v8682_v44 = vpop.permute.xlu1 %8681  ;;  %v8695_v22 = vpack.i.bf16 %v1623_v27, %v12069_v53  ;;  %v8700_v43 = vpack.i.bf16 %v1624_v48, %v1616_v60 }
 0x69e   :  { %v8684_v32 = vunpack.i.h.bf16 %v8682_v44  ;;  %v8683_v35 = vunpack.i.l.bf16 %v8682_v44 }
 0x69f   :  { %8696 = vrot.lane.b32.xlu1 %v8695_v22, %s11001_s15 }
 0x6a0   :  { %v1697_v4 = vsel %vm758_vm8, %v8683_v35, %v8684_v32 }
 0x6a1   :  { %v12089_v37 = vsel %vm1650_vm15, %v1697_v4, %v11989_v0 }
 0x6a2   :  { %v8705_v16 = vpack.i.bf16 %v12089_v37, %v12086_v62 }
 0x6a3   :  { %8701 = vrot.lane.b32.xlu1 %v8700_v43, %s11001_s15 }
 0x6a4   :  { %8706 = vrot.lane.b32.xlu0 %v8705_v16, %s10996_s0 }
 0x708   :  { %v8687_v61 = vpop.permute.xlu0 %8686 }
 0x709   :  { %v8689_v50 = vunpack.i.h.bf16 %v8687_v61  ;;  %v8688_v34 = vunpack.i.l.bf16 %v8687_v61 }
 0x70b   :  { %v1694_v12 = vsel %vm758_vm8, %v8688_v34, %v8689_v50  ;;  %v1693_v1 = vsel %vm758_vm8, %v8679_v58, %v8688_v34 }
 0x70c   :  { %v8692_v57 = vpop.permute.xlu0 %8691  ;;  %v12104_v40 = vsel %vm1652_vm1, %v1694_v12, %v12020_v8  ;;  %v12109_v28 = vsel %vm1651_vm13, %v1693_v1, %v11979_v59  ;;  %v1641_v8 = vrot.slane %v12038_v13, %v11880_v47  ;;  %v1649_v59 = vrot.slane %v12038_v13, %v11890_v55 }
 0x70d   :  { %v8694_v0 = vunpack.i.h.bf16 %v8692_v57  ;;  %v8693_v7 = vunpack.i.l.bf16 %v8692_v57 }
 0x70e   :  { %vm1653_vm2 = vcmp.eq.s32.totalorder %v1641_v8, 1  ;;  %vm1655_vm15 = vcmp.eq.s32.totalorder %v1649_v59, 1 }
 0x70f   :  { %v1699_v11 = vsel %vm758_vm8, %v8693_v7, %v8694_v0  ;;  %v1698_v49 = vsel %vm758_vm8, %v8684_v32, %v8693_v7 }
 0x710   :  { %v12106_v24 = vsel %vm1652_vm1, %v1699_v11, %v1614_v30  ;;  %v12112_v56 = vsel %vm1651_vm13, %v1698_v49, %v11997_v41  ;;  %vm1726_vm1 = vcmp.eq.s32.totalorder %v11809_v14, 4 }
 0x711   :  { %v8697_v5 = vpop.permute.xlu1 %8696  ;;  %v8715_v51 = vpack.i.bf16 %v12106_v24, %v12104_v40  ;;  %v8710_v21 = vpack.i.bf16 %v12112_v56, %v12109_v28 }
 0x712   :  { %v8699_v30 = vunpack.i.h.bf16 %v8697_v5  ;;  %v8698_v45 = vunpack.i.l.bf16 %v8697_v5 }
 0x713   :  { %8716 = vrot.lane.b32.xlu0 %v8715_v51, %s10996_s0  ;;  %8711 = vrot.lane.b32.xlu1 %v8710_v21, %s10996_s0 }
 0x714   :  { %v1696_v2 = vsel %vm758_vm8, %v8698_v45, %v8699_v30  ;;  %v1695_v38 = vsel %vm758_vm8, %v8689_v50, %v8698_v45  ;;  %v12144_v32 = vsel %vm1655_vm15, %v8699_v30, %v12064_v33 }
 0x715   :  { %v8702_v41 = vpop.permute.xlu1 %8701  ;;  %v12133_v27 = vsel %vm1654_vm14, %v1696_v2, %v12069_v53  ;;  %v12138_v22 = vsel %vm1653_vm2, %v1695_v38, %v12025_v23  ;;  %v12175_v2 = vsel %vm1726_vm1, 1, %v14639_v63 }
 0x716   :  { %v8704_v3 = vunpack.i.h.bf16 %v8702_v41  ;;  %v8703_v10 = vunpack.i.l.bf16 %v8702_v41  ;;  %v8707_v42 = vpop.permute.xlu0 %8706  ;;  %v1767_v38 = vrot.slane %v12175_v2, %v11815_v6 }
 0x717   :  { %v8709_v58 = vunpack.i.h.bf16 %v8707_v42  ;;  %v8708_v9 = vunpack.i.l.bf16 %v8707_v42 }
 0x718   :  { %v12128_v18 = vsel %vm1655_vm15, %v8704_v3, %v1617_v15  ;;  %v1701_v13 = vsel %vm758_vm8, %v8703_v10, %v8704_v3  ;;  %v1700_v26 = vsel %vm758_vm8, %v8694_v0, %v8703_v10  ;;  %vm1788_vm13 = vcmp.eq.s32.totalorder %v1767_v38, 1 }
 0x719   :  { %v12135_v44 = vsel %vm1654_vm14, %v1701_v13, %v1616_v60  ;;  %v12141_v52 = vsel %vm1653_vm2, %v1700_v26, %v12046_v19  ;;  %v1729_v53 = vsel %vm703_vm3, %v8708_v9, %v12144_v32  ;;  %v1732_v48 = vsel %vm703_vm3, %v8709_v58, %v12128_v18 }
 0x71a   :  { %v8725_v15 = vpack.i.bf16 %v12135_v44, %v12133_v27  ;;  %v8720_v35 = vpack.i.bf16 %v12141_v52, %v12138_v22  ;;  %v8730_v23 = vpack.i.bf16 %v1732_v48, %v1729_v53  ;;  %vm1830_vm14 = vcmask 998400  }
 0x71c   :  { %8726 = vrot.lane.b32.xlu0 %v8725_v15, %s10996_s0  ;;  %8721 = vrot.lane.b32.xlu1 %v8720_v35, %s10996_s0 }
 0x720   :  { %8731 = vrot.lane.b32.xlu1 %v8730_v23, %s10996_s0 }
 0x785   :  { %v8712_v19 = vpop.permute.xlu1 %8711  ;;  %v8717_v43 = vpop.permute.xlu0 %8716 }
 0x786   :  { %v8714_v33 = vunpack.i.h.bf16 %v8712_v19  ;;  %v8713_v17 = vunpack.i.l.bf16 %v8712_v19  ;;  %v8718_v20 = vunpack.i.l.bf16 %v8717_v43  ;;  %v8719_v21 = vunpack.i.h.bf16 %v8717_v43 }
 0x788   :  { %v1754_v60 = vsel %vm703_vm3, %v8714_v33, %v8709_v58  ;;  %v1753_v4 = vsel %vm703_vm3, %v8713_v17, %v8708_v9  ;;  %v1755_v57 = vsel %vm703_vm3, %v8718_v20, %v8713_v17  ;;  %v1756_v10 = vsel %vm703_vm3, %v8719_v21, %v8714_v33 }
 0x789   :  { %v8735_v16 = vpack.i.bf16 %v1753_v4, %v1729_v53  ;;  %v8740_v61 = vpack.i.bf16 %v1754_v60, %v1732_v48  ;;  %v1771_v33 = vrot.slane %v12175_v2, %v11824_v29 }
 0x78b   :  { %8736 = vrot.lane.b32.xlu0 %v8735_v16, %s11009_s26  ;;  %8741 = vrot.lane.b32.xlu1 %v8740_v61, %s11009_s26  ;;  %vm12186_vm2 = vcmp.eq.s32.totalorder %v1771_v33, 1  ;;  %v1779_v61 = vrot.slane %v12175_v2, %v11880_v47 }
 0x78d   :  { %vm12203_vm15 = vcmp.eq.s32.totalorder %v1779_v61, 1 }
 0x78e   :  { %v8727_v54 = vpop.permute.xlu0 %8726  ;;  %v8722_v50 = vpop.permute.xlu1 %8721 }
 0x78f   :  { %v8723_v34 = vunpack.i.l.bf16 %v8722_v50  ;;  %v8729_v0 = vunpack.i.h.bf16 %v8727_v54  ;;  %v8728_v7 = vunpack.i.l.bf16 %v8727_v54  ;;  %v8724_v12 = vunpack.i.h.bf16 %v8722_v50 }
 0x791   :  { %v1757_v1 = vsel %vm703_vm3, %v8723_v34, %v8718_v20  ;;  %v1760_v36 = vsel %vm703_vm3, %v8729_v0, %v8724_v12  ;;  %v1759_v8 = vsel %vm703_vm3, %v8728_v7, %v8723_v34  ;;  %v1758_v3 = vsel %vm703_vm3, %v8724_v12, %v8719_v21 }
 0x792   :  { %v8732_v11 = vpop.permute.xlu1 %8731  ;;  %v8745_v49 = vpack.i.bf16 %v1757_v1, %v1755_v57  ;;  %v8755_v42 = vpack.i.bf16 %v1758_v3, %v1756_v10  ;;  %v1787_v20 = vrot.slane %v12175_v2, %v11890_v55 }
 0x793   :  { %v8734_v5 = vunpack.i.h.bf16 %v8732_v11  ;;  %v8733_v51 = vunpack.i.l.bf16 %v8732_v11 }
 0x794   :  { %8746 = vrot.lane.b32.xlu1 %v8745_v49, %s11009_s26  ;;  %vm1793_vm1 = vcmp.eq.s32.totalorder %v1787_v20, 1 }
 0x795   :  { %v1762_v30 = vsel %vm703_vm3, %v8734_v5, %v8729_v0  ;;  %v1761_v45 = vsel %vm703_vm3, %v8733_v51, %v8728_v7  ;;  %v1775_v0 = vrot.slane %v12175_v2, %v11877_v31 }
 0x796   :  { %v8750_v59 = vpack.i.bf16 %v1761_v45, %v1759_v8  ;;  %v8760_v41 = vpack.i.bf16 %v1762_v30, %v1760_v36 }
 0x798   :  { %8751 = vrot.lane.b32.xlu0 %v8750_v59, %s11009_s26  ;;  %8761 = vrot.lane.b32.xlu1 %v8760_v41, %s11009_s26 }
 0x79c   :  { %8756 = vrot.lane.b32.xlu0 %v8755_v42, %s11009_s26 }
 0x7fd   :  { %v8737_v58 = vpop.permute.xlu0 %8736  ;;  %v8742_v9 = vpop.permute.xlu1 %8741 }
 0x7fe   :  { %v8739_v13 = vunpack.i.h.bf16 %v8737_v58  ;;  %v8738_v26 = vunpack.i.l.bf16 %v8737_v58  ;;  %v8744_v15 = vunpack.i.h.bf16 %v8742_v9  ;;  %v8743_v35 = vunpack.i.l.bf16 %v8742_v9 }
 0x800   :  { %v1831_v53 = vsel %vm1830_vm14, %v8738_v26, %v8739_v13  ;;  %v1836_v48 = vsel %vm1830_vm14, %v8743_v35, %v8744_v15 }
 0x801   :  { %v1853_v14 = vsel %vm1788_vm13, %v1831_v53, %v12086_v62  ;;  %v1859_v23 = vsel %vm1788_vm13, %v1836_v48, %v12089_v37  ;;  %vm1790_vm13 = vcmp.eq.s32.totalorder %v1775_v0, 1 }
 0x802   :  { %v8765_v19 = vpack.i.bf16 %v1859_v23, %v1853_v14 }
 0x804   :  { %8766 = vrot.lane.b32.xlu0 %v8765_v19, %s10996_s0 }
 0x806   :  { %v8747_v17 = vpop.permute.xlu1 %8746 }
 0x807   :  { %v8748_v4 = vunpack.i.l.bf16 %v8747_v17 }
 0x809   :  { %v1832_v43 = vsel %vm1830_vm14, %v8739_v13, %v8748_v4 }
 0x80a   :  { %v1854_v62 = vsel %vm12186_vm2, %v1832_v43, %v12109_v28  ;;  %v8752_v16 = vpop.permute.xlu0 %8751  ;;  %v8762_v50 = vpop.permute.xlu1 %8761  ;;  %v8749_v28 = vunpack.i.h.bf16 %v8747_v17 }
 0x80b   :  { %v8780_v37 = vpack.i.bf16 %v1854_v62, %v1853_v14  ;;  %v8753_v54 = vunpack.i.l.bf16 %v8752_v16  ;;  %v8754_v7 = vunpack.i.h.bf16 %v8752_v16  ;;  %v8764_v12 = vunpack.i.h.bf16 %v8762_v50 }
 0x80c   :  { %v1833_v49 = vsel %vm1830_vm14, %v8748_v4, %v8749_v28 }
 0x80d   :  { %8781 = vrot.lane.b32.xlu1 %v8780_v37, %s10999_s30  ;;  %8771 = vrot.lane.b32.xlu0 %v8780_v37, %s10997_s5  ;;  %v1834_v55 = vsel %vm1830_vm14, %v8749_v28, %v8753_v54  ;;  %v12215_v5 = vsel %vm1793_vm1, %v8754_v7, %v12144_v32  ;;  %v12221_v21 = vsel %vm1793_vm1, %v8764_v12, %v12128_v18 }
 0x80e   :  { %v8757_v34 = vpop.permute.xlu0 %8756  ;;  %v1856_v51 = vsel %vm12203_vm15, %v1834_v55, %v12138_v22  ;;  %v9010_v30 = vpack.i.bf16 %v12221_v21, %v12215_v5  ;;  %v1783_v22 = vrot.slane %v12175_v2, %v11883_v25  ;;  %v1835_v59 = vsel %vm1830_vm14, %v8753_v54, %v8754_v7 }
 0x80f   :  { %v8758_v57 = vunpack.i.l.bf16 %v8757_v34  ;;  %v8759_v36 = vunpack.i.h.bf16 %v8757_v34 }
 0x811   :  { %v1837_v1 = vsel %vm1830_vm14, %v8744_v15, %v8758_v57  ;;  %8791 = vrot.lane.b32.xlu1 %v8780_v37, %s11004_s22  ;;  %8776 = vrot.lane.b32.xlu0 %v8780_v37, %s10998_s19  ;;  %v1838_v32 = vsel %vm1830_vm14, %v8758_v57, %v8759_v36 }
 0x812   :  { %v1860_v11 = vsel %vm12186_vm2, %v1837_v1, %v12112_v56  ;;  %v1855_v56 = vsel %vm1790_vm13, %v1833_v49, %v12104_v40  ;;  %v1861_v18 = vsel %vm1790_vm13, %v1838_v32, %v12106_v24  ;;  %vm12236_vm2 = vcmp.eq.s32.totalorder %v1783_v22, 1 }
 0x813   :  { %v8795_v31 = vpack.i.bf16 %v1860_v11, %v1854_v62  ;;  %v8800_v8 = vpack.i.bf16 %v1856_v51, %v1855_v56  ;;  %v8825_v40 = vpack.i.bf16 %v1861_v18, %v1855_v56  ;;  %v8830_v41 = vpack.i.bf16 %v1861_v18, %v1860_v11 }
 0x814   :  { %v1857_v25 = vsel %vm12236_vm2, %v1835_v59, %v12133_v27  ;;  %v8763_v24 = vunpack.i.l.bf16 %v8762_v50 }
 0x815   :  { %8796 = vrot.lane.b32.xlu1 %v8795_v31, %s10996_s0  ;;  %8786 = vrot.lane.b32.xlu0 %v8780_v37, %s11003_s18  ;;  %v8855_v3 = vpack.i.bf16 %v1859_v23, %v1857_v25 }
 0x816   :  { %v1839_v10 = vsel %vm1830_vm14, %v8759_v36, %v8763_v24  ;;  %v1840_v2 = vsel %vm1830_vm14, %v8763_v24, %v8764_v12 }
 0x817   :  { %v1862_v42 = vsel %vm12203_vm15, %v1839_v10, %v12141_v52  ;;  %v1863_v38 = vsel %vm12236_vm2, %v1840_v2, %v12135_v44  ;;  %vm2628_vm15 = vcmask 130048  }
 0x818   :  { %v8850_v27 = vpack.i.bf16 %v1862_v42, %v1856_v51  ;;  %v8880_v58 = vpack.i.bf16 %v1863_v38, %v1857_v25  ;;  %v8910_v52 = vpack.i.bf16 %v1863_v38, %v1862_v42 }
 0x819   :  { %8801 = vrot.lane.b32.xlu1 %v8800_v8, %s10997_s5  ;;  %8811 = vrot.lane.b32.xlu0 %v8800_v8, %s10999_s30 }
 0x81d   :  { %8806 = vrot.lane.b32.xlu1 %v8800_v8, %s10998_s19  ;;  %8821 = vrot.lane.b32.xlu0 %v8800_v8, %s11004_s22 }
 0x821   :  { %8816 = vrot.lane.b32.xlu1 %v8800_v8, %s11003_s18  ;;  %8826 = vrot.lane.b32.xlu0 %v8825_v40, %s10996_s0 }
 0x825   :  { %8831 = vrot.lane.b32.xlu1 %v8830_v41, %s10997_s5  ;;  %8841 = vrot.lane.b32.xlu0 %v8830_v41, %s10999_s30 }
 0x829   :  { %8836 = vrot.lane.b32.xlu1 %v8830_v41, %s10998_s19  ;;  %8856 = vrot.lane.b32.xlu0 %v8855_v3, %s10997_s5 }
 0x82d   :  { %8846 = vrot.lane.b32.xlu1 %v8830_v41, %s11003_s18  ;;  %8861 = vrot.lane.b32.xlu0 %v8855_v3, %s10998_s19 }
 0x831   :  { %8851 = vrot.lane.b32.xlu1 %v8850_v27, %s10996_s0  ;;  %8871 = vrot.lane.b32.xlu0 %v8855_v3, %s11003_s18 }
 0x835   :  { %8866 = vrot.lane.b32.xlu1 %v8855_v3, %s10999_s30  ;;  %8881 = vrot.lane.b32.xlu0 %v8880_v58, %s10996_s0 }
 0x839   :  { %8876 = vrot.lane.b32.xlu1 %v8855_v3, %s11004_s22  ;;  %8886 = vrot.lane.b32.xlu0 %v8830_v41, %s11004_s22 }
 0x83d   :  { %8911 = vrot.lane.b32.xlu1 %v8910_v52, %s10999_s30  ;;  %8891 = vrot.lane.b32.xlu0 %v8880_v58, %s11000_s6 }
 0x841   :  { %8921 = vrot.lane.b32.xlu1 %v8910_v52, %s11004_s22  ;;  %8896 = vrot.lane.b32.xlu0 %v8880_v58, %s11001_s15 }
 0x845   :  { %8901 = vrot.lane.b32.xlu0 %v8910_v52, %s10997_s5 }
 0x849   :  { %8906 = vrot.lane.b32.xlu0 %v8910_v52, %s10998_s19 }
 0x84d   :  { %8916 = vrot.lane.b32.xlu0 %v8910_v52, %s11003_s18 }
 0x851   :  { %8926 = vrot.lane.b32.xlu0 %v8880_v58, %s11005_s23 }
 0x876   :  { %v8767_v44 = vpop.permute.xlu0 %8766 }
 0x877   :  { %v8769_v9 = vunpack.i.h.bf16 %v8767_v44  ;;  %v8768_v13 = vunpack.i.l.bf16 %v8767_v44 }
 0x879   :  { %v1886_v26 = vsel %vm703_vm3, %v8768_v13, %v12215_v5  ;;  %v12278_v15 = vsel %vm703_vm3, %v8769_v9, %v12221_v21 }
 0x87a   :  { %v12281_v35 = vpack.i.bf16 %v12278_v15, %v1886_v26 }
 0x87f   :  { %v12283_v53 = vpop.permute.xlu1 %8781  ;;  %v8772_v48 = vpop.permute.xlu0 %8771 }
 0x880   :  { %v8774_v20 = vunpack.i.h.bf16 %v8772_v48  ;;  %v8773_v54 = vunpack.i.l.bf16 %v8772_v48  ;;  %v8783_v38 = vunpack.i.l.bf16 %v12283_v53 }
 0x882   :  { %v2052_v7 = vsel %vm800_vm4, %v8773_v54, %v8774_v20 }
 0x883   :  { %v12285_v14 = vpop.permute.xlu1 %8791  ;;  %v12287_v23 = vpop.permute.xlu0 %8776 }
 0x884   :  { %v8779_v12 = vunpack.i.h.bf16 %v12287_v23  ;;  %v8778_v1 = vunpack.i.l.bf16 %v12287_v23 }
 0x886   :  { %v2086_v49 = vsel %vm818_vm5, %v8778_v1, %v8779_v12 }
 0x887   :  { %v12289_v19 = vpop.permute.xlu1 %8796  ;;  %v12291_v33 = vpop.permute.xlu0 %8786 }
 0x888   :  { %v8799_v17 = vunpack.i.h.bf16 %v12289_v19  ;;  %v8798_v60 = vunpack.i.l.bf16 %v12289_v19 }
 0x88a   :  { %v1888_v4 = vsel %vm703_vm3, %v8798_v60, %v8768_v13  ;;  %v1889_v37 = vsel %vm703_vm3, %v8799_v17, %v8769_v9 }
 0x88b   :  { %v12296_v43 = vpop.permute.xlu1 %8801  ;;  %v12298_v62 = vpop.permute.xlu0 %8811  ;;  %v8955_v16 = vpack.i.bf16 %v1888_v4, %v1886_v26  ;;  %v8960_v57 = vpack.i.bf16 %v1889_v37, %v12278_v15 }
 0x88c   :  { %v8803_v61 = vunpack.i.l.bf16 %v12296_v43 }
 0x88d   :  { %8956 = vrot.lane.b32.xlu0 %v8955_v16, %s11005_s23 }
 0x88e   :  { %v2053_v0 = vsel %vm800_vm4, %v8774_v20, %v8803_v61 }
 0x88f   :  { %v12303_v50 = vpop.permute.xlu1 %8806  ;;  %v12305_v34 = vpop.permute.xlu0 %8821  ;;  %v8965_v11 = vpack.i.bf16 %v2053_v0, %v2052_v7 }
 0x890   :  { %v8808_v28 = vunpack.i.l.bf16 %v12303_v50 }
 0x891   :  { %8961 = vrot.lane.b32.xlu0 %v8960_v57, %s11005_s23 }
 0x892   :  { %v2087_v31 = vsel %vm818_vm5, %v8779_v12, %v8808_v28 }
 0x893   :  { %v12316_v47 = vpop.permute.xlu1 %8816  ;;  %v8827_v55 = vpop.permute.xlu0 %8826  ;;  %v8970_v56 = vpack.i.bf16 %v2087_v31, %v2086_v49 }
 0x894   :  { %v8828_v59 = vunpack.i.l.bf16 %v8827_v55  ;;  %v8829_v26 = vunpack.i.h.bf16 %v8827_v55  ;;  %v8804_v55 = vunpack.i.h.bf16 %v12296_v43 }
 0x895   :  { %8966 = vrot.lane.b32.xlu0 %v8965_v11, %s11005_s23 }
 0x896   :  { %v1890_v3 = vsel %vm703_vm3, %v8828_v59, %v8798_v60  ;;  %v1891_v4 = vsel %vm703_vm3, %v8829_v26, %v8799_v17  ;;  %v2054_v21 = vsel %vm800_vm4, %v8803_v61, %v8804_v55 }
 0x897   :  { %v12325_v51 = vpop.permute.xlu1 %8831  ;;  %v12327_v36 = vpop.permute.xlu0 %8841 }
 0x898   :  { %v8834_v17 = vunpack.i.h.bf16 %v12325_v51 }
 0x899   :  { %8971 = vrot.lane.b32.xlu0 %v8970_v56, %s11005_s23 }
 0x89b   :  { %v12330_v8 = vpop.permute.xlu1 %8836  ;;  %v12332_v32 = vpop.permute.xlu0 %8856 }
 0x89c   :  { %v8859_v18 = vunpack.i.h.bf16 %v12332_v32  ;;  %v8839_v11 = vunpack.i.h.bf16 %v12330_v8  ;;  %v8838_v31 = vunpack.i.l.bf16 %v12330_v8 }
 0x89e   :  { %v8930_v22 = vpack.i.bf16 %v8859_v18, %v8773_v54  ;;  %v8995_v54 = vpack.i.bf16 %v1891_v4, %v1889_v37  ;;  %v14645_v37 = vunpack.i.l.bf16 %v12332_v32 }
 0x89f   :  { %v12335_v40 = vpop.permute.xlu1 %8846  ;;  %v12337_v45 = vpop.permute.xlu0 %8861 }
 0x8a0   :  { %8931 = vrot.lane.b32.xlu1 %v8930_v22, %s11005_s23  ;;  %v8864_v12 = vunpack.i.h.bf16 %v12337_v45  ;;  %v2055_v49 = vsel %vm800_vm4, %v8804_v55, %v14645_v37  ;;  %v14642_v56 = vunpack.i.l.bf16 %v12337_v45  ;;  %v8813_v22 = vunpack.i.l.bf16 %v12298_v62 }
 0x8a2   :  { %v2091_v5 = vsel %vm818_vm5, %v8864_v12, %v8838_v31 }
 0x8a3   :  { %v8852_v41 = vpop.permute.xlu1 %8851  ;;  %v12340_v25 = vpop.permute.xlu0 %8871 }
 0x8a4   :  { %v8853_v24 = vunpack.i.l.bf16 %v8852_v41  ;;  %8936 = vrot.lane.b32.xlu1 %v12281_v35, %s10996_s0  ;;  %v8854_v9 = vunpack.i.h.bf16 %v8852_v41  ;;  %v2092_v41 = vsel %vm818_vm5, %v8838_v31, %v8839_v11 }
 0x8a6   :  { %v1892_v10 = vsel %vm703_vm3, %v8853_v24, %v8828_v59  ;;  %v1893_v20 = vsel %vm703_vm3, %v8854_v9, %v8829_v26  ;;  %v8784_v59 = vunpack.i.h.bf16 %v12283_v53 }
 0x8a7   :  { %v12346_v42 = vpop.permute.xlu1 %8866  ;;  %v12348_v2 = vpop.permute.xlu0 %8881  ;;  %v8975_v27 = vpack.i.bf16 %v1892_v10, %v1890_v3  ;;  %v9025_v57 = vpack.i.bf16 %v1893_v20, %v1891_v4  ;;  %v9020_v10 = vpack.i.bf16 %v2092_v41, %v2091_v5 }
 0x8a8   :  { %v8869_v58 = vunpack.i.h.bf16 %v12346_v42  ;;  %v8884_v52 = vunpack.i.h.bf16 %v12348_v2  ;;  %v8883_v44 = vunpack.i.l.bf16 %v12348_v2  ;;  %8941 = vrot.lane.b32.xlu1 %v8955_v16, %s11000_s6  ;;  %v2121_v43 = vsel %vm836_vm6, %v8784_v59, %v8813_v22 }
 0x8a9   :  { %8976 = vrot.lane.b32.xlu0 %v8975_v27, %s11000_s6  ;;  %v2120_v53 = vsel %vm836_vm6, %v8783_v38, %v8784_v59 }
 0x8aa   :  { %v12356_v13 = vpack.i.bf16 %v8869_v58, %v8783_v38  ;;  %v12361_v48 = vsel %vm703_vm3, %v8884_v52, %v8854_v9  ;;  %v12366_v19 = vsel %vm703_vm3, %v8883_v44, %v8853_v24  ;;  %v9045_v24 = vpack.i.bf16 %v2055_v49, %v2054_v21 }
 0x8ab   :  { %v9030_v0 = vpack.i.bf16 %v12278_v15, %v12366_v19  ;;  %v8843_v9 = vunpack.i.l.bf16 %v12327_v36  ;;  %v9075_v4 = vpack.i.bf16 %v2121_v43, %v2120_v53  ;;  %v14641_v38 = vunpack.i.l.bf16 %v12346_v42 }
 0x8ac   :  { %8946 = vrot.lane.b32.xlu1 %v8955_v16, %s11001_s15 }
 0x8ad   :  { %8981 = vrot.lane.b32.xlu0 %v8975_v27, %s11001_s15 }
 0x8b0   :  { %8951 = vrot.lane.b32.xlu1 %v8955_v16, %s11002_s16  ;;  %v8833_v16 = vunpack.i.l.bf16 %v12325_v51 }
 0x8b1   :  { %8986 = vrot.lane.b32.xlu0 %v8975_v27, %s11002_s16 }
 0x8b2   :  { %v2057_v7 = vsel %vm800_vm4, %v8859_v18, %v8833_v16  ;;  %v2058_v15 = vsel %vm800_vm4, %v8833_v16, %v8834_v17  ;;  %v9070_v16 = vpack.i.bf16 %v8864_v12, %v8778_v1 }
 0x8b3   :  { %v9015_v18 = vpack.i.bf16 %v2058_v15, %v2057_v7 }
 0x8b4   :  { %8991 = vrot.lane.b32.xlu1 %v8975_v27, %s11005_s23  ;;  %v8844_v27 = vunpack.i.h.bf16 %v12327_v36 }
 0x8b5   :  { %8996 = vrot.lane.b32.xlu0 %v8995_v54, %s11000_s6 }
 0x8b8   :  { %9026 = vrot.lane.b32.xlu1 %v9025_v57, %s11005_s23 }
 0x8b9   :  { %9001 = vrot.lane.b32.xlu0 %v8995_v54, %s11001_s15 }
 0x8bc   :  { %9031 = vrot.lane.b32.xlu1 %v9030_v0, %s11000_s6 }
 0x8bd   :  { %9006 = vrot.lane.b32.xlu0 %v8995_v54, %s11002_s16  ;;  %v2125_v54 = vsel %vm836_vm6, %v8869_v58, %v8843_v9  ;;  %v12439_v58 = vpop.permute.xlu0 %8886 }
 0x8c0   :  { %9036 = vrot.lane.b32.xlu1 %v9030_v0, %s11001_s15 }
 0x8c1   :  { %9011 = vrot.lane.b32.xlu0 %v9010_v30, %s10997_s5  ;;  %v8809_v30 = vunpack.i.h.bf16 %v12303_v50  ;;  %v2126_v50 = vsel %vm836_vm6, %v8843_v9, %v8844_v27  ;;  %v12450_v55 = vpop.permute.xlu0 %8891  ;;  %s11021_s5 = smov 64  }
 0x8c2   :  { %v9085_v57 = vpack.i.bf16 %v2126_v50, %v2125_v54  ;;  %v8894_v36 = vunpack.i.h.bf16 %v12450_v55 }
 0x8c3   :  { %v2089_v3 = vsel %vm818_vm5, %v8809_v30, %v14642_v56  ;;  %v2088_v61 = vsel %vm818_vm5, %v8808_v28, %v8809_v30  ;;  %v9055_v28 = vpack.i.bf16 %v12361_v48, %v1893_v20 }
 0x8c4   :  { %9041 = vrot.lane.b32.xlu1 %v9030_v0, %s11002_s16  ;;  %v9050_v26 = vpack.i.bf16 %v2089_v3, %v2088_v61  ;;  %v8814_v0 = vunpack.i.h.bf16 %v12298_v62 }
 0x8c5   :  { %9016 = vrot.lane.b32.xlu0 %v9015_v18, %s11005_s23  ;;  %v8897_v31 = vpop.permute.xlu0 %8896  ;;  %v12459_v18 = vpop.permute.xlu1 %8876 }
 0x8c6   :  { %v2123_v20 = vsel %vm836_vm6, %v8814_v0, %v14641_v38  ;;  %v2122_v7 = vsel %vm836_vm6, %v8813_v22, %v8814_v0  ;;  %v8899_v38 = vunpack.i.h.bf16 %v8897_v31  ;;  %v8898_v56 = vunpack.i.l.bf16 %v8897_v31 }
 0x8c7   :  { %v9080_v15 = vpack.i.bf16 %v2123_v20, %v2122_v7 }
 0x8c8   :  { %9046 = vrot.lane.b32.xlu1 %v9045_v24, %s11005_s23 }
 0x8c9   :  { %9021 = vrot.lane.b32.xlu0 %v9020_v10, %s11005_s23  ;;  %v12453_v49 = vpop.permute.xlu0 %8901 }
 0x8cc   :  { %9051 = vrot.lane.b32.xlu1 %v9050_v26, %s11005_s23  ;;  %v12465_v26 = vpop.permute.xlu1 %8911 }
 0x8cd   :  { %9076 = vrot.lane.b32.xlu0 %v9075_v4, %s11005_s23  ;;  %v12455_v62 = vpop.permute.xlu0 %8906  ;;  %v8913_v60 = vunpack.i.l.bf16 %v12465_v26  ;;  %v14721_v29 = vunpack.i.h.bf16 %v12465_v26 }
 0x8d0   :  { %9056 = vrot.lane.b32.xlu1 %v9055_v28, %s11000_s6  ;;  %v12467_v4 = vpop.permute.xlu1 %8921 }
 0x8d1   :  { %9086 = vrot.lane.b32.xlu0 %v9085_v57, %s11005_s23  ;;  %v12457_v23 = vpop.permute.xlu0 %8916 }
 0x8d4   :  { %9061 = vrot.lane.b32.xlu1 %v9055_v28, %s11001_s15 }
 0x8d5   :  { %v8927_v1 = vpop.permute.xlu0 %8926 }
 0x8d6   :  { %v8929_v22 = vunpack.i.h.bf16 %v8927_v1  ;;  %v8928_v59 = vunpack.i.l.bf16 %v8927_v1 }
 0x8d8   :  { %9066 = vrot.lane.b32.xlu1 %v9055_v28, %s11002_s16 }
 0x8dc   :  { %9071 = vrot.lane.b32.xlu1 %v9070_v16, %s11005_s23 }
 0x8e0   :  { %9081 = vrot.lane.b32.xlu1 %v9080_v15, %s11005_s23 }
 0x8ff   :  { %v8957_v12 = vpop.permute.xlu0 %8956 }
 0x900   :  { %v8959_v5 = vunpack.i.h.bf16 %v8957_v12  ;;  %v8958_v21 = vunpack.i.l.bf16 %v8957_v12 }
 0x902   :  { %v2430_v3 = vsel %vm1000_vm12, %v8928_v59, %v8958_v21  ;;  %v2431_v43 = vsel %vm1000_vm12, %v8958_v21, %v8959_v5 }
 0x903   :  { %v8962_v30 = vpop.permute.xlu0 %8961 }
 0x904   :  { %v8964_v41 = vunpack.i.h.bf16 %v8962_v30  ;;  %v8963_v24 = vunpack.i.l.bf16 %v8962_v30 }
 0x906   :  { %v2435_v10 = vsel %vm1000_vm12, %v8929_v22, %v8963_v24  ;;  %v2436_v61 = vsel %vm1000_vm12, %v8963_v24, %v8964_v41 }
 0x907   :  { %v7732_v53 = vpack.c.bf16 %v2436_v61, %v2431_v43  ;;  %v7734_v9 = vpack.c.bf16 %v2435_v10, %v2430_v3  ;;  %v12471_v28 = vpop.permute.xlu0 %8966 }
 0x909   :  { %7733 = vmatprep.subr.bf16.mxu1 %v7732_v53 }
 0x90a   :  { %7735 = vmatpush1.bf16.msra.mxu1 %v7734_v9 }
 0x90b   :  { %v12475_v0 = vpop.permute.xlu0 %8971 }
 0x912   :  { %v12469_v54 = vpop.permute.xlu1 %8931 }
 0x916   :  { %v8937_v50 = vpop.permute.xlu1 %8936 }
 0x917   :  { %v8938_v63 = vunpack.i.l.bf16 %v8937_v50 }
 0x919   :  { %v1900_v31 = vsel %vm703_vm3, %v8938_v63, %v8883_v44  ;;  %v14648_v44 = vunpack.i.h.bf16 %v12455_v62 }
 0x91a   :  { %v12473_v57 = vpop.permute.xlu1 %8941 }
 0x91b   :  { %v12477_v20 = vpop.permute.xlu0 %8976 }
 0x91c   :  { %v8978_v8 = vunpack.i.l.bf16 %v12477_v20 }
 0x91e   :  { %v8947_v16 = vpop.permute.xlu1 %8946 }
 0x91f   :  { %v12483_v1 = vpop.permute.xlu0 %8981  ;;  %v8948_v39 = vunpack.i.l.bf16 %v8947_v16 }
 0x922   :  { %v12479_v7 = vpop.permute.xlu1 %8951 }
 0x923   :  { %v12499_v61 = vpop.permute.xlu0 %8986 }
 0x926   :  { %v12481_v15 = vpop.permute.xlu1 %8991 }
 0x927   :  { %v14643_v12 = vunpack.i.h.bf16 %v12481_v15  ;;  %v8993_v21 = vunpack.i.l.bf16 %v12481_v15 }
 0x929   :  { %v2432_v24 = vsel %vm1000_vm12, %v8959_v5, %v8993_v21  ;;  %v2433_v10 = vsel %vm1000_vm12, %v8993_v21, %v14643_v12  ;;  %v8939_v5 = vunpack.i.h.bf16 %v8937_v50  ;;  %v12506_v12 = vpop.permute.xlu0 %8996 }
 0x92a   :  { %v12487_v30 = vpop.permute.xlu1 %9026 }
 0x92b   :  { %v14644_v22 = vunpack.i.h.bf16 %v12487_v30  ;;  %v9028_v59 = vunpack.i.l.bf16 %v12487_v30 }
 0x92d   :  { %v2437_v3 = vsel %vm1000_vm12, %v8964_v41, %v9028_v59  ;;  %v2438_v43 = vsel %vm1000_vm12, %v9028_v59, %v14644_v22  ;;  %v8903_v59 = vunpack.i.l.bf16 %v12453_v49  ;;  %v1972_v22 = vsel %vm758_vm8, %v8898_v56, %v8948_v39 }
 0x92e   :  { %v12501_v53 = vpop.permute.xlu1 %9031  ;;  %v7768_v9 = vpack.c.bf16 %v2438_v43, %v2433_v10  ;;  %v7770_v46 = vpack.c.bf16 %v2437_v3, %v2432_v24  ;;  %v14646_v24 = vunpack.i.h.bf16 %v12453_v49  ;;  %v8949_v43 = vunpack.i.h.bf16 %v8947_v16 }
 0x92f   :  { %v8953_v56 = vunpack.i.l.bf16 %v12479_v7  ;;  %v8908_v16 = vunpack.i.l.bf16 %v12455_v62 }
 0x930   :  { %7769 = vmatprep.subr.bf16.mxu0 %v7768_v9  ;;  %v8983_v9 = vunpack.i.l.bf16 %v12483_v1  ;;  %v2060_v2 = vsel %vm800_vm4, %v8903_v59, %v14646_v24 }
 0x931   :  { %7771 = vmatpush1.bf16.msra.mxu0 %v7770_v46  ;;  %v1901_v46 = vsel %vm703_vm3, %v8939_v5, %v8884_v52  ;;  %v2059_v52 = vsel %vm800_vm4, %v8834_v17, %v8903_v59  ;;  %v1973_v17 = vsel %vm758_vm8, %v8948_v39, %v8949_v43  ;;  %v14647_v59 = vunpack.i.h.bf16 %v12465_v26 }
 0x932   :  { %v12503_v41 = vpop.permute.xlu1 %9036  ;;  %v9120_v51 = vpack.i.bf16 %v1901_v46, %v1900_v31  ;;  %v9095_v24 = vpack.i.bf16 %v2060_v2, %v2059_v52  ;;  %v2093_v39 = vsel %vm818_vm5, %v8839_v11, %v8908_v16  ;;  %v2094_v46 = vsel %vm818_vm5, %v8908_v16, %v14648_v44 }
 0x933   :  { %v9039_v21 = vunpack.i.h.bf16 %v12503_v41  ;;  %v8979_v52 = vunpack.i.h.bf16 %v12477_v20  ;;  %v9100_v2 = vpack.i.bf16 %v2094_v46, %v2093_v39  ;;  %v2127_v16 = vsel %vm836_vm6, %v8844_v27, %v8913_v60 }
 0x934   :  { %v8943_v27 = vunpack.i.l.bf16 %v12473_v57  ;;  %v8989_v39 = vunpack.i.h.bf16 %v12499_v61  ;;  %v8988_v46 = vunpack.i.l.bf16 %v12499_v61 }
 0x935   :  { %v1977_v10 = vsel %vm758_vm8, %v8899_v38, %v9039_v21 }
 0x936   :  { %v12518_v50 = vpop.permute.xlu1 %9041  ;;  %v9115_v3 = vpack.i.bf16 %v1977_v10, %v1972_v22  ;;  %v12536_v22 = vpop.permute.xlu0 %9001  ;;  %v1974_v10 = vsel %vm758_vm8, %v8949_v43, %v8983_v9 }
 0x937   :  { %v9044_v38 = vunpack.i.h.bf16 %v12518_v50  ;;  %v9003_v37 = vunpack.i.l.bf16 %v12536_v22  ;;  %v9130_v43 = vpack.i.bf16 %v1974_v10, %v1973_v17 }
 0x938   :  { %9116 = vrot.lane.b32.xlu0 %v9115_v3, %s11005_s23  ;;  %v9004_v3 = vunpack.i.h.bf16 %v12536_v22  ;;  %v14655_v22 = vunpack.i.l.bf16 %v12340_v25 }
 0x939   :  { %v9090_v63 = vpack.i.bf16 %v9044_v38, %v8953_v56 }
 0x93a   :  { %v12538_v5 = vpop.permute.xlu1 %9046  ;;  %v1979_v11 = vsel %vm758_vm8, %v9003_v37, %v9004_v3 }
 0x93b   :  { %9091 = vrot.lane.b32.xlu1 %v9090_v63, %s11005_s23  ;;  %v14649_v63 = vunpack.i.l.bf16 %v12501_v53 }
 0x93c   :  { %9121 = vrot.lane.b32.xlu0 %v9120_v51, %s11002_s16  ;;  %v1978_v51 = vsel %vm758_vm8, %v9039_v21, %v9003_v37  ;;  %v2128_v21 = vsel %vm836_vm6, %v8913_v60, %v14647_v59  ;;  %v14650_v37 = vunpack.i.l.bf16 %v12518_v50  ;;  %v1941_v60 = vsel %vm740_vm9, %v8978_v8, %v8979_v52 }
 0x93d   :  { %v9145_v10 = vpack.i.bf16 %v1979_v11, %v1978_v51  ;;  %v1942_v20 = vsel %vm740_vm9, %v8979_v52, %v14649_v63  ;;  %v8893_v51 = vunpack.i.l.bf16 %v12450_v55  ;;  %v8944_v11 = vunpack.i.h.bf16 %v12473_v57 }
 0x93e   :  { %v12556_v31 = vpop.permute.xlu1 %9051  ;;  %v9155_v44 = vpack.i.bf16 %v1942_v20, %v1941_v60  ;;  %v2010_v55 = vsel %vm777_vm11, %v8988_v46, %v8989_v39  ;;  %v8999_v57 = vunpack.i.h.bf16 %v12506_v12 }
 0x93f   :  { %9096 = vrot.lane.b32.xlu1 %v9095_v24, %s11005_s23  ;;  %v9034_v24 = vunpack.i.h.bf16 %v12501_v53  ;;  %v1938_v61 = vsel %vm740_vm9, %v8893_v51, %v8943_v27  ;;  %v1940_v20 = vsel %vm740_vm9, %v8944_v11, %v8978_v8 }
 0x940   :  { %9131 = vrot.lane.b32.xlu0 %v9130_v43, %s11005_s23  ;;  %v9105_v43 = vpack.i.bf16 %v2128_v21, %v2127_v16  ;;  %v1939_v21 = vsel %vm740_vm9, %v8943_v27, %v8944_v11 }
 0x941   :  { %v1943_v59 = vsel %vm740_vm9, %v8894_v36, %v9034_v24  ;;  %v8954_v36 = vunpack.i.h.bf16 %v12479_v7 }
 0x942   :  { %v12574_v17 = vpop.permute.xlu1 %9056  ;;  %v9110_v16 = vpack.i.bf16 %v1943_v59, %v1938_v61  ;;  %v9125_v59 = vpack.i.bf16 %v1940_v20, %v1939_v21 }
 0x943   :  { %9101 = vrot.lane.b32.xlu1 %v9100_v2, %s11005_s23  ;;  %v9059_v52 = vunpack.i.h.bf16 %v12574_v17  ;;  %v9058_v63 = vunpack.i.l.bf16 %v12574_v17  ;;  %v2008_v8 = vsel %vm777_vm11, %v8953_v56, %v8954_v36  ;;  %v2009_v27 = vsel %vm777_vm11, %v8954_v36, %v8988_v46 }
 0x944   :  { %9146 = vrot.lane.b32.xlu0 %v9145_v10, %s11005_s23  ;;  %v2011_v10 = vsel %vm777_vm11, %v8989_v39, %v14650_v37  ;;  %v9007_v39 = vpop.permute.xlu0 %9006  ;;  %v8818_v56 = vunpack.i.l.bf16 %v12316_v47  ;;  %v9038_v36 = vunpack.i.l.bf16 %v12503_v41 }
 0x945   :  { %v9165_v60 = vpack.i.bf16 %v2011_v10, %v2010_v55  ;;  %v1946_v37 = vsel %vm740_vm9, %v8999_v57, %v9058_v63  ;;  %v9009_v61 = vunpack.i.h.bf16 %v9007_v39  ;;  %v9135_v55 = vpack.i.bf16 %v2009_v27, %v2008_v8 }
 0x946   :  { %v12590_v2 = vpop.permute.xlu1 %9061  ;;  %v9008_v21 = vunpack.i.l.bf16 %v9007_v39  ;;  %v8984_v8 = vunpack.i.h.bf16 %v12483_v1  ;;  %v8794_v1 = vunpack.i.h.bf16 %v12285_v14 }
 0x947   :  { %9106 = vrot.lane.b32.xlu1 %v9105_v43, %s11005_s23  ;;  %v1947_v43 = vsel %vm740_vm9, %v9058_v63, %v9059_v52  ;;  %v8998_v63 = vunpack.i.l.bf16 %v12506_v12  ;;  %v8789_v12 = vunpack.i.h.bf16 %v12291_v33 }
 0x948   :  { %9156 = vrot.lane.b32.xlu0 %v9155_v44, %s11005_s23  ;;  %v9170_v51 = vpack.i.bf16 %v1947_v43, %v1946_v37  ;;  %v2014_v27 = vsel %vm777_vm11, %v9008_v21, %v9009_v61 }
 0x949   :  { %v1944_v7 = vsel %vm740_vm9, %v9034_v24, %v8998_v63  ;;  %v8788_v24 = vunpack.i.l.bf16 %v12291_v33 }
 0x94a   :  { %v12610_v44 = vpop.permute.xlu1 %9066 }
 0x94b   :  { %9111 = vrot.lane.b32.xlu1 %v9110_v16, %s11005_s23  ;;  %v9069_v11 = vunpack.i.h.bf16 %v12610_v44  ;;  %v9068_v10 = vunpack.i.l.bf16 %v12610_v44  ;;  %v1945_v16 = vsel %vm740_vm9, %v8998_v63, %v8999_v57  ;;  %v8874_v57 = vunpack.i.h.bf16 %v12340_v25 }
 0x94c   :  { %9166 = vrot.lane.b32.xlu0 %v9165_v60, %s11005_s23  ;;  %v9140_v20 = vpack.i.bf16 %v1945_v16, %v1944_v7  ;;  %v2013_v60 = vsel %vm777_vm11, %v9044_v38, %v9008_v21  ;;  %v2154_v39 = vsel %vm854_vm7, %v8788_v24, %v8789_v12  ;;  %v8848_v38 = vunpack.i.l.bf16 %v12335_v40 }
 0x94d   :  { %v2015_v46 = vsel %vm777_vm11, %v9009_v61, %v9068_v10  ;;  %v2016_v37 = vsel %vm777_vm11, %v9068_v10, %v9069_v11  ;;  %v9150_v10 = vpack.i.bf16 %v2014_v27, %v2013_v60  ;;  %v1976_v63 = vsel %vm758_vm8, %v8984_v8, %v9038_v36 }
 0x94e   :  { %v9190_v43 = vpack.i.bf16 %v2016_v37, %v2015_v46  ;;  %v9063_v7 = vunpack.i.l.bf16 %v12590_v2  ;;  %v2159_v46 = vsel %vm854_vm7, %v8874_v57, %v8848_v38  ;;  %v1975_v37 = vsel %vm758_vm8, %v8983_v9, %v8984_v8 }
 0x94f   :  { %9126 = vrot.lane.b32.xlu1 %v9125_v59, %s11005_s23  ;;  %v2155_v59 = vsel %vm854_vm7, %v8789_v12, %v8818_v56  ;;  %v9160_v16 = vpack.i.bf16 %v1976_v63, %v1975_v37  ;;  %v8823_v60 = vunpack.i.l.bf16 %v12305_v34  ;;  %v8793_v9 = vunpack.i.l.bf16 %v12285_v14 }
 0x950   :  { %9171 = vrot.lane.b32.xlu0 %v9170_v51, %s11005_s23  ;;  %v8849_v51 = vunpack.i.h.bf16 %v12335_v40  ;;  %v9195_v61 = vpack.i.bf16 %v2155_v59, %v2154_v39  ;;  %v1980_v21 = vsel %vm758_vm8, %v9004_v3, %v9063_v7  ;;  %v8879_v59 = vunpack.i.h.bf16 %v12459_v18 }
 0x951   :  { %v2189_v3 = vsel %vm872_vm10, %v8794_v1, %v8823_v60  ;;  %v8889_v8 = vunpack.i.h.bf16 %v12439_v58  ;;  %v8888_v27 = vunpack.i.l.bf16 %v12439_v58  ;;  %v8819_v39 = vunpack.i.h.bf16 %v12316_v47 }
 0x952   :  { %v2160_v40 = vsel %vm854_vm7, %v8848_v38, %v8849_v51  ;;  %v2188_v14 = vsel %vm872_vm10, %v8793_v9, %v8794_v1  ;;  %v8918_v63 = vunpack.i.l.bf16 %v12457_v23  ;;  %v8923_v1 = vunpack.i.l.bf16 %v12467_v4 }
 0x953   :  { %9136 = vrot.lane.b32.xlu1 %v9135_v55, %s11005_s23  ;;  %v9064_v55 = vunpack.i.h.bf16 %v12590_v2  ;;  %v2157_v38 = vsel %vm854_vm7, %v8819_v39, %v14655_v22  ;;  %v2193_v58 = vsel %vm872_vm10, %v8879_v59, %v8888_v27  ;;  %v2156_v47 = vsel %vm854_vm7, %v8818_v56, %v8819_v39  ;;  %v12756_v2 = vpop.permute.xlu1 %9071 }
 0x954   :  { %9176 = vrot.lane.b32.xlu0 %v12281_v35, %s10998_s19  ;;  %v2161_v37 = vsel %vm854_vm7, %v8849_v51, %v8918_v63  ;;  %v9220_v56 = vpack.i.bf16 %v8874_v57, %v8788_v24  ;;  %v14702_v24 = vunpack.i.l.bf16 %v12501_v53  ;;  %v9250_v53 = vpack.i.bf16 %v8879_v59, %v8793_v9 }
 0x955   :  { %v1981_v12 = vsel %vm758_vm8, %v9063_v7, %v9064_v55  ;;  %v9225_v7 = vpack.i.bf16 %v2189_v3, %v2188_v14  ;;  %v2195_v3 = vsel %vm872_vm10, %v8889_v8, %v8923_v1  ;;  %v9270_v39 = vpack.i.bf16 %v9064_v55, %v9038_v36 }
 0x956   :  { %v9265_v57 = vpack.i.bf16 %v9059_v52, %v14702_v24  ;;  %v14704_v14 = vunpack.i.h.bf16 %v12453_v49  ;;  %v14705_v9 = vunpack.i.l.bf16 %v12332_v32  ;;  %v14657_v24 = vunpack.i.h.bf16 %v12475_v0 }
 0x957   :  { %9141 = vrot.lane.b32.xlu1 %v9140_v20, %s11005_s23  ;;  %v9205_v20 = vpack.i.bf16 %v2160_v40, %v2159_v46  ;;  %v9200_v46 = vpack.i.bf16 %v2157_v38, %v2156_v47  ;;  %v12760_v36 = vpop.permute.xlu1 %9081 }
 0x958   :  { %9191 = vrot.lane.b32.xlu0 %v9190_v43, %s11005_s23  ;;  %v9180_v43 = vpack.i.bf16 %v1981_v12, %v1980_v21  ;;  %v14652_v12 = vunpack.i.l.bf16 %v12459_v18 }
 0x95b   :  { %9151 = vrot.lane.b32.xlu1 %v9150_v10, %s11005_s23  ;;  %v14656_v10 = vunpack.i.h.bf16 %v12457_v23 }
 0x95c   :  { %9196 = vrot.lane.b32.xlu0 %v9195_v61, %s11005_s23  ;;  %v2194_v61 = vsel %vm872_vm10, %v8888_v27, %v8889_v8  ;;  %v9012_v8 = vpop.permute.xlu0 %9011  ;;  %v14703_v27 = vpack.i.bf16 %v12361_v48, %v12366_v19 }
 0x95d   :  { %v2162_v40 = vsel %vm854_vm7, %v8918_v63, %v14656_v10  ;;  %v9014_v17 = vunpack.i.h.bf16 %v9012_v8  ;;  %v9013_v52 = vunpack.i.l.bf16 %v9012_v8  ;;  %v14660_v8 = vunpack.i.h.bf16 %v12538_v5 }
 0x95e   :  { %v9210_v21 = vpack.i.bf16 %v2162_v40, %v2161_v37 }
 0x95f   :  { %9161 = vrot.lane.b32.xlu1 %v9160_v16, %s11005_s23  ;;  %v9235_v16 = vpack.i.bf16 %v2194_v61, %v2193_v58  ;;  %v2061_v38 = vsel %vm800_vm4, %v14704_v14, %v9014_v17  ;;  %v2056_v59 = vsel %vm800_vm4, %v14705_v9, %v9013_v52  ;;  %v9048_v17 = vunpack.i.l.bf16 %v12538_v5 }
 0x960   :  { %9206 = vrot.lane.b32.xlu0 %v9205_v20, %s11005_s23  ;;  %v14654_v20 = vunpack.i.h.bf16 %v12467_v4  ;;  %v9280_v63 = vpack.i.bf16 %v2061_v38, %v2056_v59  ;;  %v12750_v48 = vpop.permute.xlu0 %9016 }
 0x962   :  { %v2196_v33 = vsel %vm872_vm10, %v8923_v1, %v14654_v20 }
 0x963   :  { %9181 = vrot.lane.b32.xlu1 %v9180_v43, %s11005_s23 }
 0x964   :  { %9216 = vrot.lane.b32.xlu0 %v12281_v35, %s10999_s30  ;;  %v12752_v19 = vpop.permute.xlu0 %9021  ;;  %s11022_s30 = smov 65  }
 0x967   :  { %9186 = vrot.lane.b32.xlu1 %v12356_v13, %s11005_s23  ;;  %v8824_v13 = vunpack.i.h.bf16 %v12305_v34 }
 0x968   :  { %9226 = vrot.lane.b32.xlu0 %v9225_v7, %s11005_s23  ;;  %v12754_v41 = vpop.permute.xlu0 %9076 }
 0x969   :  { %v2191_v51 = vsel %vm872_vm10, %v8824_v13, %v14652_v12  ;;  %v2190_v43 = vsel %vm872_vm10, %v8823_v60, %v8824_v13  ;;  %v12726_v60 = vld [vmem:[%s11061_s17 + $0x8] sm:$0xff] }
 0x96a   :  { %v9230_v34 = vpack.i.bf16 %v2191_v51, %v2190_v43  ;;  %7208 = vmatprep.mubr.msk.f32.mxu0 %vm2628_vm15, %v12726_v60  ;;  %7206 = vmatprep.mubr.msk.f32.mxu1 %vm2628_vm15, %v12726_v60  ;;  %v8969_v43 = vunpack.i.h.bf16 %v12471_v28 }
 0x96b   :  { %9201 = vrot.lane.b32.xlu1 %v9200_v46, %s11005_s23  ;;  %v14706_v46 = vunpack.i.l.bf16 %v12518_v50  ;;  %v9018_v50 = vunpack.i.l.bf16 %v12750_v48 }
 0x96c   :  { %9236 = vrot.lane.b32.xlu0 %v9235_v16, %s11005_s23  ;;  %v12758_v49 = vpop.permute.xlu0 %9086 }
 0x96f   :  { %9211 = vrot.lane.b32.xlu1 %v9210_v21, %s11005_s23 }
 0x970   :  { %9246 = vrot.lane.b32.xlu0 %v12281_v35, %s11003_s18  ;;  %s11024_s18 = smov 63  }
 0x973   :  { %9221 = vrot.lane.b32.xlu1 %v9220_v56, %s11005_s23 }
 0x974   :  { %9256 = vrot.lane.b32.xlu0 %v12281_v35, %s11004_s22  ;;  %v9240_v35 = vpack.i.bf16 %v2196_v33, %v2195_v3  ;;  %v8968_v33 = vunpack.i.l.bf16 %v12471_v28  ;;  %v14658_v28 = vunpack.i.h.bf16 %v12752_v19 }
 0x977   :  { %9231 = vrot.lane.b32.xlu1 %v9230_v34, %s11005_s23  ;;  %v8934_v34 = vunpack.i.h.bf16 %v12469_v54 }
 0x978   :  { %9266 = vrot.lane.b32.xlu0 %v9265_v57, %s11005_s23  ;;  %v14661_v57 = vunpack.i.l.bf16 %v12475_v0 }
 0x97b   :  { %9241 = vrot.lane.b32.xlu1 %v9240_v35, %s11005_s23  ;;  %v8933_v35 = vunpack.i.l.bf16 %v12469_v54 }
 0x97d   :  { %v12812_v9 = vsel %vm1000_vm12, %v8933_v35, %v8968_v33 }
 0x97f   :  { %9251 = vrot.lane.b32.xlu1 %v9250_v53, %s11005_s23  ;;  %v12796_v53 = vsel %vm1000_vm12, %v8934_v34, %v9018_v50  ;;  %v12851_v34 = vsel %vm1000_vm12, %v9048_v17, %v14660_v8 }
 0x983   :  { %9261 = vrot.lane.b32.xlu1 %v14703_v27, %s11005_s23  ;;  %v14662_v27 = vunpack.i.l.bf16 %v12752_v19 }
 0x987   :  { %9271 = vrot.lane.b32.xlu1 %v9270_v39, %s11005_s23 }
 0x98b   :  { %9281 = vrot.lane.b32.xlu1 %v9280_v63, %s11005_s23 }
 0x9aa   :  { %v12762_v32 = vpop.permute.xlu0 %9116 }
 0x9ad   :  { %v12764_v55 = vpop.permute.xlu1 %9091 }
 0x9ae   :  { %v9122_v7 = vpop.permute.xlu0 %9121 }
 0x9af   :  { %v9124_v58 = vunpack.i.h.bf16 %v9122_v7  ;;  %v9123_v61 = vunpack.i.l.bf16 %v9122_v7  ;;  %v12817_v7 = vsel %vm1000_vm12, %v8968_v33, %v8969_v43 }
 0x9b1   :  { %v2017_v47 = vsel %vm777_vm11, %v9069_v11, %v9124_v58  ;;  %v2012_v37 = vsel %vm777_vm11, %v14706_v46, %v9123_v61  ;;  %v12772_v40 = vpop.permute.xlu1 %9096  ;;  %v14659_v11 = vunpack.i.h.bf16 %v12750_v48  ;;  %v12820_v58 = vsel %vm1000_vm12, %v8969_v43, %v9048_v17 }
 0x9b2   :  { %v12774_v16 = vpop.permute.xlu0 %9131  ;;  %v9275_v21 = vpack.i.bf16 %v2017_v47, %v2012_v37  ;;  %v12831_v46 = vsel %vm1000_vm12, %v14661_v57, %v14657_v24  ;;  %v12846_v43 = vsel %vm1000_vm12, %v14662_v27, %v14658_v28  ;;  %v14707_v57 = vunpack.i.h.bf16 %v12455_v62 }
 0x9b3   :  { %v12803_v52 = vsel %vm1000_vm12, %v9018_v50, %v14659_v11  ;;  %v9133_v8 = vunpack.i.l.bf16 %v12774_v16 }
 0x9b4   :  { %9276 = vrot.lane.b32.xlu0 %v9275_v21, %s11005_s23 }
 0x9b5   :  { %v12777_v13 = vpop.permute.xlu1 %9101 }
 0x9b6   :  { %v12779_v56 = vpop.permute.xlu0 %9146 }
 0x9b7   :  { %v14709_v62 = vunpack.i.h.bf16 %v12779_v56 }
 0x9b9   :  { %v12781_v51 = vpop.permute.xlu1 %9106 }
 0x9ba   :  { %v12783_v44 = vpop.permute.xlu0 %9156 }
 0x9bb   :  { %v14651_v39 = vunpack.i.h.bf16 %v12783_v44  ;;  %v9158_v54 = vunpack.i.l.bf16 %v12783_v44 }
 0x9bd   :  { %v9112_v1 = vpop.permute.xlu1 %9111  ;;  %v2443_v21 = vsel %vm1000_vm12, %v9158_v54, %v14651_v39  ;;  %v9148_v39 = vunpack.i.l.bf16 %v12779_v56 }
 0x9be   :  { %v12789_v3 = vpop.permute.xlu0 %9166  ;;  %v9113_v61 = vunpack.i.l.bf16 %v9112_v1  ;;  %v9114_v27 = vunpack.i.h.bf16 %v9112_v1 }
 0x9c1   :  { %v9127_v14 = vpop.permute.xlu1 %9126 }
 0x9c2   :  { %v12809_v38 = vpop.permute.xlu0 %9171  ;;  %v9129_v20 = vunpack.i.h.bf16 %v9127_v14  ;;  %v9128_v22 = vunpack.i.l.bf16 %v9127_v14  ;;  %v14708_v14 = vunpack.i.l.bf16 %v12337_v45 }
 0x9c3   :  { %v14653_v59 = vunpack.i.h.bf16 %v12809_v38  ;;  %v9173_v63 = vunpack.i.l.bf16 %v12809_v38 }
 0x9c4   :  { %v2440_v17 = vsel %vm1000_vm12, %v9113_v61, %v9128_v22  ;;  %v2442_v35 = vsel %vm1000_vm12, %v9129_v20, %v9158_v54  ;;  %v2441_v1 = vsel %vm1000_vm12, %v9128_v22, %v9129_v20  ;;  %v14710_v54 = vunpack.i.h.bf16 %v12774_v16 }
 0x9c5   :  { %v12833_v37 = vpop.permute.xlu1 %9136  ;;  %v2448_v50 = vsel %vm1000_vm12, %v9173_v63, %v14653_v59 }
 0x9c6   :  { %v9177_v12 = vpop.permute.xlu0 %9176  ;;  %v7772_v59 = vpack.c.bf16 %v2448_v50, %v2443_v21 }
 0x9c7   :  { %v9179_v10 = vunpack.i.h.bf16 %v9177_v12  ;;  %v9178_v24 = vunpack.i.l.bf16 %v9177_v12 }
 0x9c8   :  { %7773 = vmatprep.subr.bf16.mxu0 %v7772_v59  ;;  %v9119_v59 = vunpack.i.h.bf16 %v12762_v32 }
 0x9c9   :  { %v2095_v21 = vsel %vm818_vm5, %v14707_v57, %v9179_v10  ;;  %v2090_v12 = vsel %vm818_vm5, %v14708_v14, %v9178_v24  ;;  %v9142_v50 = vpop.permute.xlu1 %9141  ;;  %v2456_v10 = vsel %vm1000_vm12, %v9148_v39, %v14709_v62  ;;  %v14663_v62 = vunpack.i.h.bf16 %v12833_v37 }
 0x9ca   :  { %v9144_v28 = vunpack.i.h.bf16 %v9142_v50  ;;  %v9143_v11 = vunpack.i.l.bf16 %v9142_v50  ;;  %v12867_v33 = vpop.permute.xlu0 %9191  ;;  %v9285_v47 = vpack.i.bf16 %v2095_v21, %v2090_v12  ;;  %v2451_v50 = vsel %vm1000_vm12, %v9133_v8, %v14710_v54 }
 0x9cc   :  { %v2445_v45 = vsel %vm1000_vm12, %v9114_v27, %v9143_v11  ;;  %v2447_v24 = vsel %vm1000_vm12, %v9144_v28, %v9173_v63  ;;  %9286 = vrot.lane.b32.xlu0 %v9285_v47, %s11005_s23  ;;  %v2446_v57 = vsel %vm1000_vm12, %v9143_v11, %v9144_v28  ;;  %v9138_v27 = vunpack.i.l.bf16 %v12833_v37 }
 0x9cd   :  { %v12880_v21 = vpop.permute.xlu1 %9151  ;;  %v7736_v14 = vpack.c.bf16 %v2446_v57, %v2441_v1  ;;  %v7774_v61 = vpack.c.bf16 %v2447_v24, %v2442_v35  ;;  %v7738_v12 = vpack.c.bf16 %v2445_v45, %v2440_v17  ;;  %v9118_v11 = vunpack.i.l.bf16 %v12762_v32 }
 0x9ce   :  { %v14664_v63 = vunpack.i.h.bf16 %v12880_v21  ;;  %v9153_v47 = vunpack.i.l.bf16 %v12880_v21  ;;  %v12889_v22 = vpop.permute.xlu0 %9196  ;;  %v2455_v28 = vsel %vm1000_vm12, %v9119_v59, %v9148_v39  ;;  %v7740_v35 = vpack.c.bf16 %v2456_v10, %v2451_v50 }
 0x9cf   :  { %7737 = vmatprep.subr.bf16.mxu1 %v7736_v14  ;;  %7775 = vmatpush1.bf16.msra.mxu0 %v7774_v61  ;;  %v9074_v45 = vunpack.i.h.bf16 %v12756_v2  ;;  %v9073_v24 = vunpack.i.l.bf16 %v12756_v2  ;;  %v9094_v57 = vunpack.i.h.bf16 %v12764_v55  ;;  %v2450_v32 = vsel %vm1000_vm12, %v9118_v11, %v9133_v8 }
 0x9d0   :  { %7739 = vmatpush1.bf16.msra.mxu1 %v7738_v12  ;;  %v2466_v1 = vsel %vm1000_vm12, %v9153_v47, %v14664_v63  ;;  %v7752_v39 = vpack.c.bf16 %v12846_v43, %v12831_v46  ;;  %v14711_v59 = vunpack.i.h.bf16 %v12754_v41  ;;  %v14712_v10 = vunpack.i.l.bf16 %v12754_v41 }
 0x9d1   :  { %v12902_v54 = vpop.permute.xlu1 %9161  ;;  %7741 = vmatprep.subr.bf16.mxu1 %v7740_v35  ;;  %v9093_v14 = vunpack.i.l.bf16 %v12764_v55  ;;  %v7742_v12 = vpack.c.bf16 %v2455_v28, %v2450_v32  ;;  %v2461_v8 = vsel %vm1000_vm12, %v9138_v27, %v14663_v62  ;;  %v14713_v50 = vunpack.i.h.bf16 %v12758_v49 }
 0x9d2   :  { %v12911_v2 = vsel %vm1000_vm12, %v14712_v10, %v14711_v59  ;;  %v12914_v61 = vpop.permute.xlu0 %9206  ;;  %v14714_v46 = vunpack.i.l.bf16 %v12758_v49  ;;  %v14667_v11 = vunpack.i.h.bf16 %v12867_v33  ;;  %v9193_v35 = vunpack.i.l.bf16 %v12867_v33 }
 0x9d3   :  { %v2465_v55 = vsel %vm1000_vm12, %v9094_v57, %v9153_v47  ;;  %v7744_v59 = vpack.c.bf16 %v2466_v1, %v2461_v8  ;;  %v14715_v28 = vunpack.i.l.bf16 %v12752_v19  ;;  %v14716_v10 = vunpack.i.l.bf16 %v12475_v0 }
 0x9d4   :  { %v12924_v43 = vsel %vm1000_vm12, %v14714_v46, %v14713_v50  ;;  %v9163_v46 = vunpack.i.l.bf16 %v12902_v54  ;;  %7743 = vmatpush1.bf16.msra.mxu1 %v7742_v12  ;;  %v9098_v47 = vunpack.i.l.bf16 %v12772_v40  ;;  %v9103_v1 = vunpack.i.l.bf16 %v12777_v13 }
 0x9d5   :  { %v12932_v32 = vsel %vm1000_vm12, %v9074_v45, %v14715_v28  ;;  %v12937_v20 = vsel %vm1000_vm12, %v9073_v24, %v14716_v10  ;;  %v2460_v57 = vsel %vm1000_vm12, %v9093_v14, %v9138_v27  ;;  %v12945_v45 = vpop.permute.xlu1 %9181  ;;  %7745 = vmatprep.subr.bf16.mxu1 %v7744_v59  ;;  %v9168_v12 = vunpack.i.l.bf16 %v12789_v3 }
 0x9d6   :  { %v9183_v28 = vunpack.i.l.bf16 %v12945_v45  ;;  %v9217_v10 = vpop.permute.xlu0 %9216  ;;  %v7746_v62 = vpack.c.bf16 %v2465_v55, %v2460_v57  ;;  %v2468_v50 = vsel %vm1000_vm12, %v9193_v35, %v14667_v11  ;;  %v14717_v27 = vunpack.i.h.bf16 %v12774_v16 }
 0x9d7   :  { %v9219_v17 = vunpack.i.h.bf16 %v9217_v10  ;;  %v9218_v63 = vunpack.i.l.bf16 %v9217_v10  ;;  %v14718_v59 = vunpack.i.h.bf16 %v12779_v56  ;;  %v14719_v24 = vunpack.i.h.bf16 %v12902_v54 }
 0x9d8   :  { %v2452_v14 = vsel %vm1000_vm12, %v14717_v27, %v9163_v46  ;;  %7747 = vmatpush1.bf16.msra.mxu1 %v7746_v62  ;;  %v14720_v57 = vunpack.i.h.bf16 %v12945_v45  ;;  %v14722_v16 = vunpack.i.l.bf16 %v12346_v42  ;;  %v14723_v62 = vpack.c.bf16 %v12803_v52, %v12817_v7 }
 0x9d9   :  { %v2457_v8 = vsel %vm1000_vm12, %v14718_v59, %v9183_v28  ;;  %v2453_v55 = vsel %vm1000_vm12, %v9163_v46, %v14719_v24  ;;  %v2129_v11 = vsel %vm836_vm6, %v14721_v29, %v9219_v17  ;;  %v9187_v56 = vpop.permute.xlu1 %9186  ;;  %v9104_v46 = vunpack.i.h.bf16 %v12777_v13 }
 0x9da   :  { %v2458_v10 = vsel %vm1000_vm12, %v9183_v28, %v14720_v57  ;;  %v2124_v27 = vsel %vm836_vm6, %v14722_v16, %v9218_v63  ;;  %7749 = vmatprep.subr.bf16.mxu1 %v14723_v62  ;;  %v7778_v6 = vpack.c.bf16 %v2457_v8, %v2452_v14  ;;  %v12976_v24 = vpop.permute.xlu0 %9226  ;;  %v7754_v26 = vpack.c.bf16 %v12932_v32, %v12937_v20 }
 0x9db   :  { %v7776_v59 = vpack.c.bf16 %v2458_v10, %v2453_v55  ;;  %v9290_v28 = vpack.i.bf16 %v2129_v11, %v2124_v27  ;;  %v7756_v29 = vpack.c.bf16 %v12924_v43, %v12911_v2  ;;  %v9084_v42 = vunpack.i.h.bf16 %v12760_v36 }
 0x9dc   :  { %v9189_v63 = vunpack.i.h.bf16 %v9187_v56  ;;  %v9188_v17 = vunpack.i.l.bf16 %v9187_v56  ;;  %v14724_v52 = vunpack.i.h.bf16 %v12789_v3  ;;  %v14725_v8 = vunpack.i.h.bf16 %v12880_v21 }
 0x9dd   :  { %7777 = vmatprep.subr.bf16.mxu0 %v7776_v59  ;;  %v9209_v11 = vunpack.i.h.bf16 %v12914_v61  ;;  %v9208_v20 = vunpack.i.l.bf16 %v12914_v61  ;;  %9291 = vrot.lane.b32.xlu1 %v9290_v28, %s11005_s23  ;;  %v14726_v2 = vpack.c.bf16 %v12796_v53, %v12812_v9  ;;  %v9083_v32 = vunpack.i.l.bf16 %v12760_v36  ;;  %v13004_v10 = vpop.permute.xlu1 %9201 }
 0x9de   :  { %v2463_v7 = vsel %vm1000_vm12, %v9168_v12, %v14724_v52  ;;  %v2467_v14 = vsel %vm1000_vm12, %v14725_v8, %v9193_v35  ;;  %v14727_v55 = vunpack.i.h.bf16 %v12750_v48  ;;  %v14728_v21 = vunpack.i.h.bf16 %v12752_v19  ;;  %7779 = vmatpush1.bf16.msra.mxu0 %v7778_v6  ;;  %v13014_v19 = vpop.permute.xlu0 %9236 }
 0x9df   :  { %7751 = vmatpush1.bf16.msra.mxu1 %v14726_v2  ;;  %v7780_v43 = vpack.c.bf16 %v2468_v50, %v2463_v7  ;;  %v14729_v16 = vunpack.i.h.bf16 %v12772_v40  ;;  %v14730_v9 = vunpack.i.h.bf16 %v12833_v37  ;;  %v9199_v48 = vunpack.i.h.bf16 %v12889_v22 }
 0x9e0   :  { %v2477_v57 = vsel %vm1000_vm12, %v14727_v55, %v9098_v47  ;;  %v13002_v35 = vsel %vm1000_vm12, %v14728_v21, %v9103_v1  ;;  %7753 = vmatprep.subr.bf16.mxu1 %v7752_v39  ;;  %v9198_v27 = vunpack.i.l.bf16 %v12889_v22  ;;  %v2488_v6 = vsel %vm1000_vm12, %v9103_v1, %v9104_v46 }
 0x9e1   :  { %v2478_v53 = vsel %vm1000_vm12, %v9098_v47, %v14729_v16  ;;  %v2462_v50 = vsel %vm1000_vm12, %v14730_v9, %v9168_v12  ;;  %7781 = vmatprep.subr.bf16.mxu0 %v7780_v43  ;;  %v9108_v39 = vunpack.i.l.bf16 %v12781_v51  ;;  %v14731_v56 = vunpack.i.l.bf16 %v12758_v49 }
 0x9e2   :  { %v14732_v37 = vunpack.i.l.bf16 %v12754_v41  ;;  %v7782_v62 = vpack.c.bf16 %v2467_v14, %v2462_v50  ;;  %v14733_v59 = vunpack.i.l.bf16 %v12556_v31  ;;  %v14734_v28 = vunpack.i.h.bf16 %v12475_v0  ;;  %v9247_v2 = vpop.permute.xlu0 %9246 }
 0x9e3   :  { %v2495_v47 = vsel %vm1000_vm12, %v9189_v63, %v14731_v56  ;;  %v9109_v7 = vunpack.i.h.bf16 %v12781_v51  ;;  %7755 = vmatpush1.bf16.msra.mxu1 %v7754_v26  ;;  %v7784_v1 = vpack.c.bf16 %v2478_v53, %v12851_v34  ;;  %v2506_v63 = vsel %vm1000_vm12, %v9208_v20, %v9209_v11 }
 0x9e4   :  { %v2490_v12 = vsel %vm1000_vm12, %v9188_v17, %v14732_v37  ;;  %v2482_v52 = vsel %vm1000_vm12, %v14734_v28, %v14733_v59  ;;  %7783 = vmatpush1.bf16.msra.mxu0 %v7782_v62  ;;  %v13038_v17 = vpop.permute.xlu1 %9211  ;;  %7757 = vmatprep.subr.bf16.mxu1 %v7756_v29  ;;  %v7786_v8 = vpack.c.bf16 %v2477_v57, %v12820_v58  ;;  %v14735_v0 = vunpack.i.h.bf16 %v12556_v31 }
 0x9e5   :  { %v14736_v14 = vmov %v14733_v59  ;;  %v2493_v34 = vsel %vm1000_vm12, %v9083_v32, %v9084_v42  ;;  %7785 = vmatprep.subr.bf16.mxu0 %v7784_v1  ;;  %v7758_v43 = vpack.c.bf16 %v2495_v47, %v2490_v12  ;;  %v2501_v29 = vsel %vm1000_vm12, %v9198_v27, %v9199_v48 }
 0x9e6   :  { %v2483_v26 = vsel %vm1000_vm12, %v14736_v14, %v14735_v0  ;;  %v7790_v55 = vpack.c.bf16 %v13002_v35, %v2482_v52  ;;  %v14737_v57 = vunpack.i.h.bf16 %v12758_v49  ;;  %v9249_v16 = vunpack.i.h.bf16 %v9247_v2 }
 0x9e7   :  { %v7788_v58 = vpack.c.bf16 %v2488_v6, %v2483_v26  ;;  %v9248_v53 = vunpack.i.l.bf16 %v9247_v2  ;;  %v7760_v9 = vpack.c.bf16 %v2506_v63, %v2501_v29  ;;  %v9229_v50 = vunpack.i.h.bf16 %v12976_v24  ;;  %7759 = vmatpush1.bf16.msra.mxu1 %v7758_v43 }
 0x9e8   :  { %v2497_v21 = vsel %vm1000_vm12, %v14737_v57, %v9108_v39  ;;  %v9239_v56 = vunpack.i.h.bf16 %v13014_v19  ;;  %v9238_v47 = vunpack.i.l.bf16 %v13014_v19  ;;  %v2498_v6 = vsel %vm1000_vm12, %v9108_v39, %v9109_v7  ;;  %7787 = vmatpush1.bf16.msra.mxu0 %v7786_v8  ;;  %v9222_v28 = vpop.permute.xlu1 %9221  ;;  %v9257_v39 = vpop.permute.xlu0 %9256 }
 0x9e9   :  { %v9214_v35 = vunpack.i.h.bf16 %v13038_v17  ;;  %v9213_v49 = vunpack.i.l.bf16 %v13038_v17  ;;  %v14738_v37 = vunpack.i.h.bf16 %v12457_v23  ;;  %v14739_v62 = vunpack.i.l.bf16 %v12340_v25  ;;  %7761 = vmatprep.subr.bf16.mxu1 %v7760_v9  ;;  %7789 = vmatprep.subr.bf16.mxu0 %v7788_v58 }
 0x9ea   :  { %v9228_v52 = vunpack.i.l.bf16 %v12976_v24  ;;  %v9224_v1 = vunpack.i.h.bf16 %v9222_v28  ;;  %v9223_v63 = vunpack.i.l.bf16 %v9222_v28  ;;  %v9204_v14 = vunpack.i.h.bf16 %v13004_v10  ;;  %v2203_v28 = vld [vmem:[%s11066_s21 + $0x8] sm:$0xff] }
 0x9eb   :  { %v2163_v12 = vsel %vm854_vm7, %v14738_v37, %v9249_v16  ;;  %v2158_v59 = vsel %vm854_vm7, %v14739_v62, %v9248_v53  ;;  %v9203_v23 = vunpack.i.l.bf16 %v13004_v10  ;;  %v9259_v26 = vunpack.i.h.bf16 %v9257_v39 }
 0x9ec   :  { %v9295_v0 = vpack.i.bf16 %v2163_v12, %v2158_v59  ;;  %v9258_v2 = vunpack.i.l.bf16 %v9257_v39  ;;  %v2500_v25 = vsel %vm1000_vm12, %v9223_v63, %v9198_v27  ;;  %v2505_v8 = vsel %vm1000_vm12, %v9224_v1, %v9208_v20  ;;  %7791 = vmatpush1.bf16.msra.mxu0 %v7790_v55  ;;  %v13089_v27 = vpop.permute.xlu1 %9231  ;;  %v2202_v20 = vld [vmem:[%s11066_s21] sm:$0xff]  ;;  %s11010_s21 = smov 72  }
 0x9ed   :  { %v7792_v24 = vpack.c.bf16 %v2498_v6, %v2493_v34  ;;  %v2516_v43 = vsel %vm1000_vm12, %v9238_v47, %v9239_v56  ;;  %v14740_v29 = vunpack.i.h.bf16 %v12467_v4  ;;  %v14741_v57 = vunpack.i.l.bf16 %v12459_v18 }
 0x9ee   :  { %9296 = vrot.lane.b32.xlu0 %v9295_v0, %s11005_s23  ;;  %v7762_v53 = vpack.c.bf16 %v2505_v8, %v2500_v25  ;;  %v2508_v34 = vsel %vm1000_vm12, %v9213_v49, %v9214_v35  ;;  %v14742_v9 = vunpack.i.h.bf16 %v12754_v41  ;;  %v2511_v6 = vsel %vm1000_vm12, %v9228_v52, %v9229_v50 }
 0x9ef   :  { %v2197_v58 = vsel %vm872_vm10, %v14740_v29, %v9259_v26  ;;  %v2192_v16 = vsel %vm872_vm10, %v14741_v57, %v9258_v2  ;;  %7793 = vmatprep.subr.bf16.mxu0 %v7792_v24  ;;  %v7764_v37 = vpack.c.bf16 %v2516_v43, %v2511_v6  ;;  %v2503_v12 = vsel %vm1000_vm12, %v9203_v23, %v9204_v14  ;;  %v9267_v2 = vpop.permute.xlu0 %9266 }
 0x9f0   :  { %v2492_v4 = vsel %vm1000_vm12, %v14742_v9, %v9083_v32  ;;  %v9300_v18 = vpack.i.bf16 %v2197_v58, %v2192_v16  ;;  %7763 = vmatpush1.bf16.msra.mxu1 %v7762_v53  ;;  %v2507_v62 = vsel %vm1000_vm12, %v9209_v11, %v9213_v49  ;;  %v9234_v41 = vunpack.i.h.bf16 %v13089_v27  ;;  %v13131_v58 = vld [vmem:[%s11061_s17] sm:$0xff] }
 0x9f1   :  { %v7794_v55 = vpack.c.bf16 %v2497_v21, %v2492_v4  ;;  %v9233_v32 = vunpack.i.l.bf16 %v13089_v27  ;;  %v7796_v59 = vpack.c.bf16 %v2508_v34, %v2503_v12  ;;  %7765 = vmatprep.subr.bf16.mxu1 %v7764_v37  ;;  %v13110_v21 = vpop.permute.xlu1 %9241  ;;  %v2502_v1 = vsel %vm1000_vm12, %v9199_v48, %v9203_v23 }
 0x9f2   :  { %9301 = vrot.lane.b32.xlu1 %v9300_v18, %s11005_s23  ;;  %2206 = vperm.xlu0 %8578, %v2202_v20   ;;  %v9244_v61 = vunpack.i.h.bf16 %v13110_v21  ;;  %v9243_v11 = vunpack.i.l.bf16 %v13110_v21  ;;  %v7798_v49 = vpack.c.bf16 %v2507_v62, %v2502_v1  ;;  %v9268_v24 = vunpack.i.l.bf16 %v9267_v2  ;;  %v13134_v20 = vld [vmem:[%s11061_s17 + $0x18] sm:$0xff]  ;;  %s14762_s23 = sld [smem:[#allocation9_spill]] }
 0x9f3   :  { %7795 = vmatpush1.bf16.msra.mxu0 %v7794_v55  ;;  %v2512_v63 = vsel %vm1000_vm12, %v9229_v50, %v9233_v32  ;;  %v2513_v0 = vsel %vm1000_vm12, %v9233_v32, %v9234_v41  ;;  %v9269_v57 = vunpack.i.h.bf16 %v9267_v2  ;;  %v14743_v34 = vunpack.i.h.bf16 %v12487_v30  ;;  %v13149_v55 = vld [vmem:[%s11061_s17 + $0x10] sm:$0xff]  ;;  %s7205_s17 = sld [smem:[#allocation2 + $0x1]] }
 0x9f4   :  { %7797 = vmatprep.subr.bf16.mxu0 %v7796_v59  ;;  %v2517_v39 = vsel %vm1000_vm12, %v9239_v56, %v9243_v11  ;;  %v2518_v22 = vsel %vm1000_vm12, %v9243_v11, %v9244_v61  ;;  %v14744_v19 = vunpack.i.h.bf16 %v12481_v15  ;;  %v14745_v4 = vunpack.i.h.bf16 %v12783_v44 }
 0x9f5   :  { %v9252_v48 = vpop.permute.xlu1 %9251  ;;  %v7800_v23 = vpack.c.bf16 %v2518_v22, %v2513_v0  ;;  %v7802_v26 = vpack.c.bf16 %v2517_v39, %v2512_v63  ;;  %v14746_v37 = vunpack.i.h.bf16 %v12809_v38  ;;  %v7808_v32 = vpack.c.bf16 %v9269_v57, %v9268_v24 }
 0x9f6   :  { %2211 = vperm.xlu1 %8579, %v2203_v28   ;;  %v9254_v25 = vunpack.i.h.bf16 %v9252_v48  ;;  %v9253_v50 = vunpack.i.l.bf16 %v9252_v48  ;;  %v2444_v18 = vsel %vm1000_vm12, %v14745_v4, %v9268_v24  ;;  %v14747_v59 = vunpack.i.h.bf16 %v12902_v54 }
 0x9f7   :  { %7799 = vmatpush1.bf16.msra.mxu0 %v7798_v49  ;;  %v2449_v15 = vsel %vm1000_vm12, %v14746_v37, %v9269_v57  ;;  %v14748_v28 = vunpack.i.h.bf16 %v12945_v45  ;;  %v14749_v45 = vunpack.i.h.bf16 %v12867_v33 }
 0x9f8   :  { %7801 = vmatprep.subr.bf16.mxu0 %v7800_v23  ;;  %v2510_v56 = vsel %vm1000_vm12, %v9253_v50, %v9228_v52  ;;  %v2515_v8 = vsel %vm1000_vm12, %v9254_v25, %v9238_v47  ;;  %v7810_v44 = vpack.c.bf16 %v2449_v15, %v2444_v18 }
 0x9f9   :  { %v9262_v43 = vpop.permute.xlu1 %9261  ;;  %v7766_v29 = vpack.c.bf16 %v2515_v8, %v2510_v56  ;;  %v14752_v8 = vunpack.i.h.bf16 %v12538_v5  ;;  %v13209_v21 = vstv %s7205_s17  ;;  %s7227_s17 = sld [smem:[#allocation2 + $0x5]] }
 0x9fa   :  { %v9264_v16 = vunpack.i.h.bf16 %v9262_v43  ;;  %v9263_v53 = vunpack.i.l.bf16 %v9262_v43 }
 0x9fb   :  { %7803 = vmatpush1.bf16.msra.mxu0 %v7802_v26  ;;  %7767 = vmatpush1.bf16.msra.mxu1 %v7766_v29  ;;  %v14750_v26 = vunpack.i.h.bf16 %v12789_v3 }
 0x9fc   :  { %v2439_v52 = vsel %vm1000_vm12, %v14743_v34, %v9264_v16  ;;  %v2434_v47 = vsel %vm1000_vm12, %v14744_v19, %v9263_v53  ;;  %v7804_v9 = vpack.c.bf16 %v9264_v16, %v9263_v53 }
 0x9fd   :  { %v9272_v6 = vpop.permute.xlu1 %9271  ;;  %v7806_v30 = vpack.c.bf16 %v2439_v52, %v2434_v47 }
 0x9fe   :  { %2777 = vmatmul.mubr.f32.vlgmr.msra.gmra.mrb[8].mxu0 %v13131_v58  ;;  %v9274_v12 = vunpack.i.h.bf16 %v9272_v6  ;;  %v9273_v62 = vunpack.i.l.bf16 %v9272_v6  ;;  %2700 = vmatmul.mubr.f32.vlgmr.msra.gmra.mrb[16].mxu1 %v13131_v58 }
 0x9ff   :  { %7209 = vmatprep.mubr.msk.f32.mxu0 %vm2628_vm15, %v13134_v20  ;;  %7805 = vmatprep.subr.bf16.mxu1 %v7804_v9 }
 0xa00   :  { %7807 = vmatpush1.bf16.msra.mxu1 %v7806_v30  ;;  %7207 = vmatprep.mubr.msk.f32.mxu1 %vm2628_vm15, %v13134_v20  ;;  %v2454_v38 = vsel %vm1000_vm12, %v14747_v59, %v9273_v62  ;;  %v2459_v1 = vsel %vm1000_vm12, %v14748_v28, %v9274_v12  ;;  %v7812_v11 = vpack.c.bf16 %v9274_v12, %v9273_v62 }
 0xa01   :  { %7809 = vmatprep.subr.bf16.mxu1 %v7808_v32  ;;  %v7814_v49 = vpack.c.bf16 %v2459_v1, %v2454_v38  ;;  %v9282_v63 = vpop.permute.xlu1 %9281 }
 0xa02   :  { %2783 = vmatmul.mubr.f32.gmra.mrb[10].mxu0 %v13149_v55  ;;  %2706 = vmatmul.mubr.f32.gmra.mrb[18].mxu1 %v13149_v55  ;;  %v9284_v0 = vunpack.i.h.bf16 %v9282_v63  ;;  %v9283_v54 = vunpack.i.l.bf16 %v9282_v63 }
 0xa03   :  { %7210 = vmatprep.mubr.msk.f32.mxu1 %vm2628_vm15, %v12726_v60  ;;  %v14751_v60 = vunpack.i.h.bf16 %v12772_v40  ;;  %v14753_v40 = vunpack.i.h.bf16 %v12556_v31 }
 0xa04   :  { %7811 = vmatpush1.bf16.msra.mxu1 %v7810_v44  ;;  %v2474_v24 = vsel %vm1000_vm12, %v14752_v8, %v9283_v54  ;;  %v7820_v43 = vpack.c.bf16 %v9284_v0, %v9283_v54 }
 0xa05   :  { %7813 = vmatprep.subr.bf16.mxu1 %v7812_v11  ;;  %v2479_v56 = vsel %vm1000_vm12, %v14751_v60, %v9284_v0 }
 0xa06   :  { %v7822_v33 = vpack.c.bf16 %v2479_v56, %v2474_v24 }
 0xa08   :  { %7815 = vmatpush1.bf16.msra.mxu1 %v7814_v49 }
 0xa26   :  { %v9277_v39 = vpop.permute.xlu0 %9276 }
 0xa27   :  { %v9279_v22 = vunpack.i.h.bf16 %v9277_v39  ;;  %v9278_v48 = vunpack.i.l.bf16 %v9277_v39 }
 0xa29   :  { %v2469_v23 = vsel %vm1000_vm12, %v14749_v45, %v9279_v22  ;;  %v2464_v2 = vsel %vm1000_vm12, %v14750_v26, %v9278_v48  ;;  %v7816_v25 = vpack.c.bf16 %v9279_v22, %v9278_v48 }
 0xa2a   :  { %v7818_v50 = vpack.c.bf16 %v2469_v23, %v2464_v2 }
 0xa2b   :  { %7817 = vmatprep.subr.bf16.mxu1 %v7816_v25 }
 0xa2c   :  { %7819 = vmatpush1.bf16.msra.mxu1 %v7818_v50 }
 0xa2d   :  { %7821 = vmatprep.subr.bf16.mxu1 %v7820_v43 }
 0xa30   :  { %7823 = vmatpush1.bf16.msra.mxu1 %v7822_v33 }
 0xa3e   :  { %v9287_v29 = vpop.permute.xlu0 %9286 }
 0xa3f   :  { %v9289_v3 = vunpack.i.h.bf16 %v9287_v29  ;;  %v9288_v57 = vunpack.i.l.bf16 %v9287_v29 }
 0xa41   :  { %v2489_v16 = vsel %vm1000_vm12, %v9104_v46, %v9289_v3  ;;  %v2484_v53 = vsel %vm1000_vm12, %v14753_v40, %v9288_v57  ;;  %v7824_v5 = vpack.c.bf16 %v9289_v3, %v9288_v57  ;;  %v3056_v3 = vld [vmem:[%s11131_s4 + $0x8] sm:$0xff]  ;;  %v3058_v57 = vld [vmem:[%s11131_s4 + $0x18] sm:$0xff] }
 0xa42   :  { %v7826_v34 = vpack.c.bf16 %v2489_v16, %v2484_v53  ;;  %v3055_v16 = vld [vmem:[%s11131_s4] sm:$0xff]  ;;  %v7840_v53 = vpack.c.bf16 %v3058_v57, %v3056_v3  ;;  %v3092_v3 = vld [vmem:[%s11131_s4 + $0x128] sm:$0xff]  ;;  %v3094_v57 = vld [vmem:[%s11131_s4 + $0x138] sm:$0xff] }
 0xa43   :  { %7825 = vmatprep.subr.bf16.mxu1 %v7824_v5  ;;  %v3057_v5 = vld [vmem:[%s11131_s4 + $0x10] sm:$0xff] }
 0xa44   :  { %7827 = vmatpush1.bf16.msra.mxu1 %v7826_v34  ;;  %v3060_v34 = vld [vmem:[%s11131_s4 + $0x28] sm:$0xff]  ;;  %7841 = vmatprep.subr.bf16.mxu0 %v7840_v53  ;;  %v7876_v53 = vpack.c.bf16 %v3094_v57, %v3092_v3 }
 0xa4f   :  { %v9292_v52 = vpop.permute.xlu1 %9291 }
 0xa50   :  { %v9294_v19 = vunpack.i.h.bf16 %v9292_v52  ;;  %v9293_v47 = vunpack.i.l.bf16 %v9292_v52  ;;  %v3062_v52 = vld [vmem:[%s11131_s4 + $0x38] sm:$0xff] }
 0xa52   :  { %v2499_v9 = vsel %vm1000_vm12, %v9109_v7, %v9294_v19  ;;  %v2494_v13 = vsel %vm1000_vm12, %v9084_v42, %v9293_v47  ;;  %v7828_v46 = vpack.c.bf16 %v9294_v19, %v9293_v47  ;;  %v7842_v19 = vpack.c.bf16 %v3057_v5, %v3055_v16  ;;  %v3091_v5 = vld [vmem:[%s11131_s4 + $0x120] sm:$0xff] }
 0xa53   :  { %v7830_v4 = vpack.c.bf16 %v2499_v9, %v2494_v13  ;;  %v7844_v47 = vpack.c.bf16 %v3062_v52, %v3060_v34  ;;  %v3059_v9 = vld [vmem:[%s11131_s4 + $0x20] sm:$0xff]  ;;  %v3061_v13 = vld [vmem:[%s11131_s4 + $0x30] sm:$0xff]  ;;  %v3096_v52 = vld [vmem:[%s11131_s4 + $0x148] sm:$0xff] }
 0xa54   :  { %7829 = vmatprep.subr.bf16.mxu1 %v7828_v46  ;;  %v3064_v46 = vld [vmem:[%s11131_s4 + $0x48] sm:$0xff]  ;;  %7843 = vmatpush1.bf16.msra.mxu0 %v7842_v19  ;;  %v3093_v34 = vld [vmem:[%s11131_s4 + $0x130] sm:$0xff]  ;;  %v3098_v19 = vld [vmem:[%s11131_s4 + $0x158] sm:$0xff] }
 0xa55   :  { %7831 = vmatpush1.bf16.msra.mxu1 %v7830_v4  ;;  %v3066_v4 = vld [vmem:[%s11131_s4 + $0x58] sm:$0xff]  ;;  %7845 = vmatprep.subr.bf16.mxu0 %v7844_v47  ;;  %v7878_v47 = vpack.c.bf16 %v3093_v34, %v3091_v5 }
 0xa60   :  { %v9297_v31 = vpop.permute.xlu0 %9296 }
 0xa61   :  { %v9299_v18 = vunpack.i.h.bf16 %v9297_v31  ;;  %v9298_v6 = vunpack.i.l.bf16 %v9297_v31  ;;  %v7846_v31 = vpack.c.bf16 %v3061_v13, %v3059_v9  ;;  %v7880_v9 = vpack.c.bf16 %v3098_v19, %v3096_v52  ;;  %v3095_v13 = vld [vmem:[%s11131_s4 + $0x140] sm:$0xff] }
 0xa63   :  { %v2509_v30 = vsel %vm1000_vm12, %v9214_v35, %v9299_v18  ;;  %v2504_v51 = vsel %vm1000_vm12, %v9204_v14, %v9298_v6  ;;  %v7832_v7 = vpack.c.bf16 %v9299_v18, %v9298_v6  ;;  %v7848_v18 = vpack.c.bf16 %v3066_v4, %v3064_v46  ;;  %v3063_v6 = vld [vmem:[%s11131_s4 + $0x40] sm:$0xff]  ;;  %7847 = vmatpush1.bf16.msra.mxu0 %v7846_v31  ;;  %v3097_v46 = vld [vmem:[%s11131_s4 + $0x150] sm:$0xff]  ;;  %v3100_v4 = vld [vmem:[%s11131_s4 + $0x168] sm:$0xff] }
 0xa64   :  { %v9302_v37 = vpop.permute.xlu1 %9301  ;;  %v7834_v36 = vpack.c.bf16 %v2509_v30, %v2504_v51  ;;  %v3065_v30 = vld [vmem:[%s11131_s4 + $0x50] sm:$0xff]  ;;  %v3068_v51 = vld [vmem:[%s11131_s4 + $0x68] sm:$0xff]  ;;  %v3102_v31 = vld [vmem:[%s11131_s4 + $0x178] sm:$0xff] }
 0xa65   :  { %v9304_v15 = vunpack.i.h.bf16 %v9302_v37  ;;  %v9303_v42 = vunpack.i.l.bf16 %v9302_v37  ;;  %7833 = vmatprep.subr.bf16.mxu1 %v7832_v7  ;;  %v3070_v7 = vld [vmem:[%s11131_s4 + $0x78] sm:$0xff]  ;;  %v7850_v37 = vpack.c.bf16 %v3065_v30, %v3063_v6  ;;  %7849 = vmatprep.subr.bf16.mxu0 %v7848_v18  ;;  %v7882_v18 = vpack.c.bf16 %v3097_v46, %v3095_v13  ;;  %v3099_v30 = vld [vmem:[%s11131_s4 + $0x160] sm:$0xff] }
 0xa66   :  { %7835 = vmatpush1.bf16.msra.mxu1 %v7834_v36  ;;  %v7852_v36 = vpack.c.bf16 %v3070_v7, %v3068_v51  ;;  %v7884_v6 = vpack.c.bf16 %v3102_v31, %v3100_v4  ;;  %v3101_v51 = vld [vmem:[%s11131_s4 + $0x170] sm:$0xff]  ;;  %v3104_v7 = vld [vmem:[%s11131_s4 + $0x188] sm:$0xff] }
 0xa67   :  { %v2519_v12 = vsel %vm1000_vm12, %v9244_v61, %v9304_v15  ;;  %v2514_v17 = vsel %vm1000_vm12, %v9234_v41, %v9303_v42  ;;  %v7836_v35 = vpack.c.bf16 %v9304_v15, %v9303_v42  ;;  %v3067_v15 = vld [vmem:[%s11131_s4 + $0x60] sm:$0xff]  ;;  %v3069_v42 = vld [vmem:[%s11131_s4 + $0x70] sm:$0xff]  ;;  %7851 = vmatpush1.bf16.msra.mxu0 %v7850_v37  ;;  %v3106_v37 = vld [vmem:[%s11131_s4 + $0x198] sm:$0xff] }
 0xa68   :  { %v7838_v62 = vpack.c.bf16 %v2519_v12, %v2514_v17  ;;  %v3072_v12 = vld [vmem:[%s11131_s4 + $0x88] sm:$0xff]  ;;  %v3074_v17 = vld [vmem:[%s11131_s4 + $0x98] sm:$0xff]  ;;  %7853 = vmatprep.subr.bf16.mxu0 %v7852_v36  ;;  %v7886_v36 = vpack.c.bf16 %v3101_v51, %v3099_v30 }
 0xa69   :  { %7837 = vmatprep.subr.bf16.mxu1 %v7836_v35  ;;  %v7854_v35 = vpack.c.bf16 %v3069_v42, %v3067_v15  ;;  %v7888_v15 = vpack.c.bf16 %v3106_v37, %v3104_v7  ;;  %v3103_v42 = vld [vmem:[%s11131_s4 + $0x180] sm:$0xff] }
 0xa6a   :  { %7839 = vmatpush1.bf16.msra.mxu1 %v7838_v62  ;;  %v7856_v62 = vpack.c.bf16 %v3074_v17, %v3072_v12  ;;  %v3105_v12 = vld [vmem:[%s11131_s4 + $0x190] sm:$0xff]  ;;  %v3108_v17 = vld [vmem:[%s11131_s4 + $0x1a8] sm:$0xff] }
 0xa6b   :  { %7855 = vmatpush1.bf16.msra.mxu0 %v7854_v35  ;;  %v3110_v35 = vld [vmem:[%s11131_s4 + $0x1b8] sm:$0xff] }
 0xa6c   :  { %7857 = vmatprep.subr.bf16.mxu0 %v7856_v62  ;;  %v7890_v62 = vpack.c.bf16 %v3105_v12, %v3103_v42 }
 0xa6d   :  { %2854 = vmatmul.mubr.f32.vlgmr.msra.gmra.mrb[20].mxu1 %v13131_v58 }
 0xa6e   :  { %7211 = vmatprep.mubr.msk.f32.mxu1 %vm2628_vm15, %v13134_v20 }
 0xa71   :  { %2860 = vmatmul.mubr.f32.gmra.mrb[22].mxu1 %v13149_v55  ;;  %v13207_v10 = vpop.permute.xlu0 %2206 }
 0xa75   :  { %v13219_v11 = vpop.permute.xlu1 %2211 }
 0xad1   :  { %v2778_v14 = vpop.f32.mrb[8].mxu0  ;;  %v2701_v32 = vpop.f32.mrb[16].mxu1 }
 0xad2   :  { %v2779_v27 = vadd.f32 %v2778_v14, %v13207_v10  ;;  %v2780_v41 = vpop.f32.mrb[9].mxu0  ;;  %v2703_v44 = vpop.f32.mrb[17].mxu1  ;;  %v2702_v55 = vadd.f32 %v2701_v32, %v13207_v10  ;;  %v3071_v14 = vld [vmem:[%s11131_s4 + $0x80] sm:$0xff] }
 0xad3   :  { %v2781_v61 = vadd.f32 %v2780_v41, %v13207_v10  ;;  %v2704_v59 = vadd.f32 %v2703_v44, %v13207_v10  ;;  %v3076_v41 = vld [vmem:[%s11131_s4 + $0xa8] sm:$0xff]  ;;  %v3075_v44 = vld [vmem:[%s11131_s4 + $0xa0] sm:$0xff] }
 0xad4   :  { %vm2868_vm4 = vcmp.ge.f32.partialorder %v2779_v27, 0.0  ;;  %v2881_v58 = vmul.f32 %v13209_v21, %v2779_v27  ;;  %v2879_v48 = vmul.f32 %v13209_v21, %v2702_v55  ;;  %vm2866_vm7 = vcmp.ge.f32.partialorder %v2702_v55, 0.0 }
 0xad5   :  { %vm2869_vm5 = vcmp.ge.f32.partialorder %v2781_v61, 0.0  ;;  %v2882_v20 = vmul.f32 %v13209_v21, %v2781_v61  ;;  %v2784_v38 = vpop.f32.mrb[10].mxu0  ;;  %vm2867_vm6 = vcmp.ge.f32.partialorder %v2704_v59, 0.0  ;;  %v2880_v63 = vmul.f32 %v13209_v21, %v2704_v59  ;;  %v2707_v39 = vpop.f32.mrb[18].mxu1 }
 0xad6   :  { %v13217_v28 = vsel %vm2868_vm4, %v2779_v27, %v2881_v58  ;;  %v2786_v1 = vpop.f32.mrb[11].mxu0  ;;  %v2785_v54 = vadd.f32 %v2784_v38, %v13219_v11  ;;  %v2709_v22 = vpop.f32.mrb[19].mxu1  ;;  %v2708_v23 = vadd.f32 %v2707_v39, %v13219_v11  ;;  %v13239_v56 = vsel %vm2866_vm7, %v2702_v55, %v2879_v48  ;;  %v3073_v27 = vld [vmem:[%s11131_s4 + $0x90] sm:$0xff]  ;;  %v3080_v55 = vld [vmem:[%s11131_s4 + $0xc8] sm:$0xff] }
 0xad7   :  { %v13221_v49 = vsel %vm2869_vm5, %v2781_v61, %v2882_v20  ;;  %v2787_v45 = vadd.f32 %v2786_v1, %v13219_v11  ;;  %v13230_v26 = vsel %vm2867_vm6, %v2704_v59, %v2880_v63  ;;  %v2710_v60 = vadd.f32 %v2709_v22, %v13219_v11  ;;  %v3078_v61 = vld [vmem:[%s11131_s4 + $0xb8] sm:$0xff]  ;;  %v3077_v20 = vld [vmem:[%s11131_s4 + $0xb0] sm:$0xff]  ;;  %v3079_v63 = vld [vmem:[%s11131_s4 + $0xc0] sm:$0xff] }
 0xad8   :  { %v9305_v0 = vpack.i.bf16 %v13221_v49, %v13217_v28  ;;  %2923 = vrot.lane.b32.xlu0 %v13230_v26, %s11000_s6  ;;  %v2887_v2 = vmul.f32 %v13209_v21, %v2785_v54  ;;  %v2885_v50 = vmul.f32 %v13209_v21, %v2708_v23  ;;  %vm2874_vm10 = vcmp.ge.f32.partialorder %v2785_v54, 0.0  ;;  %v3082_v59 = vld [vmem:[%s11131_s4 + $0xd8] sm:$0xff]  ;;  %v3081_v39 = vld [vmem:[%s11131_s4 + $0xd0] sm:$0xff] }
 0xad9   :  { %v2888_v25 = vmul.f32 %v13209_v21, %v2787_v45  ;;  %vm2875_vm12 = vcmp.ge.f32.partialorder %v2787_v45, 0.0  ;;  %vm2872_vm1 = vcmp.ge.f32.partialorder %v2708_v23, 0.0  ;;  %v2886_v43 = vmul.f32 %v13209_v21, %v2710_v60 }
 0xada   :  { %9306 = vrot.lane.b32.xlu1 %v9305_v0, %s11000_s6  ;;  %v13245_v8 = vsel %vm2874_vm10, %v2785_v54, %v2887_v2  ;;  %v13250_v33 = vsel %vm2872_vm1, %v2708_v23, %v2885_v50  ;;  %vm2873_vm13 = vcmp.ge.f32.partialorder %v2710_v60, 0.0  ;;  %v7858_v32 = vpack.c.bf16 %v3073_v27, %v3071_v14  ;;  %v3084_v0 = vld [vmem:[%s11131_s4 + $0xe8] sm:$0xff]  ;;  %v3086_v54 = vld [vmem:[%s11131_s4 + $0xf8] sm:$0xff]  ;;  %v3085_v23 = vld [vmem:[%s11131_s4 + $0xf0] sm:$0xff] }
 0xadb   :  { %v13247_v24 = vsel %vm2875_vm12, %v2787_v45, %v2888_v25  ;;  %v13261_v40 = vsel %vm2873_vm13, %v2710_v60, %v2886_v43  ;;  %v7860_v58 = vpack.c.bf16 %v3078_v61, %v3076_v41  ;;  %v7862_v38 = vpack.c.bf16 %v3077_v20, %v3075_v44  ;;  %v3083_v45 = vld [vmem:[%s11131_s4 + $0xe0] sm:$0xff]  ;;  %v3088_v2 = vld [vmem:[%s11131_s4 + $0x108] sm:$0xff]  ;;  %v3090_v25 = vld [vmem:[%s11131_s4 + $0x118] sm:$0xff] }
 0xadc   :  { %2921 = vrot.lane.b32.xlu0 %v13239_v56, %s11000_s6  ;;  %v9310_v29 = vpack.i.bf16 %v13247_v24, %v13245_v8  ;;  %7859 = vmatpush1.bf16.msra.mxu0 %v7858_v32  ;;  %v7864_v1 = vpack.c.bf16 %v3082_v59, %v3080_v55  ;;  %v7866_v22 = vpack.c.bf16 %v3081_v39, %v3079_v63  ;;  %v3087_v43 = vld [vmem:[%s11131_s4 + $0x100] sm:$0xff]  ;;  %v3109_v41 = vld [vmem:[%s11131_s4 + $0x1b0] sm:$0xff]  ;;  %v3112_v61 = vld [vmem:[%s11131_s4 + $0x1c8] sm:$0xff]  ;;  %vm3518_vm7 = vcmask 965632  }
 0xadd   :  { %7861 = vmatprep.subr.bf16.mxu0 %v7860_v58  ;;  %v7868_v48 = vpack.c.bf16 %v3086_v54, %v3084_v0  ;;  %v7870_v50 = vpack.c.bf16 %v3085_v23, %v3083_v45  ;;  %v7872_v60 = vpack.c.bf16 %v3090_v25, %v3088_v2  ;;  %v7892_v14 = vpack.c.bf16 %v3110_v35, %v3108_v17  ;;  %v3107_v27 = vld [vmem:[%s11131_s4 + $0x1a0] sm:$0xff]  ;;  %v3114_v32 = vld [vmem:[%s11131_s4 + $0x1d8] sm:$0xff]  ;;  %v3113_v55 = vld [vmem:[%s11131_s4 + $0x1d0] sm:$0xff] }
 0xade   :  { %2903 = vrot.lane.b32.xlu1 %v13239_v56, %s10996_s0  ;;  %v7894_v58 = vpack.c.bf16 %v3109_v41, %v3107_v27  ;;  %v7896_v44 = vpack.c.bf16 %v3114_v32, %v3112_v61  ;;  %v3111_v20 = vld [vmem:[%s11131_s4 + $0x1c0] sm:$0xff]  ;;  %v3116_v0 = vld [vmem:[%s11131_s4 + $0x1e8] sm:$0xff]  ;;  %v3118_v54 = vld [vmem:[%s11131_s4 + $0x1f8] sm:$0xff]  ;;  %vm3557_vm10 = vcmask 424960   ;;  %vm3568_vm12 = vcmask 416768  }
 0xadf   :  { %v7898_v59 = vpack.c.bf16 %v3113_v55, %v3111_v20  ;;  %v3117_v45 = vld [vmem:[%s11131_s4 + $0x1f0] sm:$0xff]  ;;  %v3120_v17 = vld [vmem:[%s11131_s4 + $0x208] sm:$0xff]  ;;  %v3122_v35 = vld [vmem:[%s11131_s4 + $0x218] sm:$0xff]  ;;  %vm3579_vm1 = vcmask 408576   ;;  %vm3706_vm13 = vcmask 547840  }
 0xae0   :  { %2905 = vrot.lane.b32.xlu0 %v13250_v33, %s10996_s0  ;;  %7863 = vmatpush1.bf16.msra.mxu0 %v7862_v38  ;;  %v3124_v20 = vld [vmem:[%s11131_s4 + $0x228] sm:$0xff]  ;;  %v3126_v55 = vld [vmem:[%s11131_s4 + $0x238] sm:$0xff] }
 0xae1   :  { %7865 = vmatprep.subr.bf16.mxu0 %v7864_v1 }
 0xae2   :  { %2933 = vrot.lane.b32.xlu1 %v13250_v33, %s11000_s6 }
 0xae4   :  { %2935 = vrot.lane.b32.xlu0 %v13261_v40, %s11000_s6  ;;  %7867 = vmatpush1.bf16.msra.mxu0 %v7866_v22  ;;  %v3115_v22 = vld [vmem:[%s11131_s4 + $0x1e0] sm:$0xff] }
 0xae5   :  { %7869 = vmatprep.subr.bf16.mxu0 %v7868_v48  ;;  %v7900_v48 = vpack.c.bf16 %v3118_v54, %v3116_v0  ;;  %v7902_v25 = vpack.c.bf16 %v3117_v45, %v3115_v22  ;;  %v7908_v45 = vpack.c.bf16 %v3126_v55, %v3124_v20  ;;  %v3141_v20 = vld [vmem:[%s11131_s4 + $0x2b0] sm:$0xff]  ;;  %v3144_v55 = vld [vmem:[%s11131_s4 + $0x2c8] sm:$0xff] }
 0xae6   :  { %9311 = vrot.lane.b32.xlu1 %v9310_v29, %s11000_s6  ;;  %v3089_v29 = vld [vmem:[%s11131_s4 + $0x110] sm:$0xff] }
 0xae7   :  { %v7874_v16 = vpack.c.bf16 %v3089_v29, %v3087_v43 }
 0xae8   :  { %7871 = vmatpush1.bf16.msra.mxu0 %v7870_v50 }
 0xae9   :  { %7873 = vmatprep.subr.bf16.mxu0 %v7872_v60 }
 0xaec   :  { %7875 = vmatpush1.bf16.msra.mxu0 %v7874_v16 }
 0xaed   :  { %7877 = vmatprep.subr.bf16.mxu0 %v7876_v53 }
 0xaf0   :  { %7879 = vmatpush1.bf16.msra.mxu0 %v7878_v47 }
 0xaf1   :  { %7881 = vmatprep.subr.bf16.mxu0 %v7880_v9 }
 0xaf4   :  { %7883 = vmatpush1.bf16.msra.mxu0 %v7882_v18 }
 0xaf5   :  { %7885 = vmatprep.subr.bf16.mxu0 %v7884_v6 }
 0xaf8   :  { %7887 = vmatpush1.bf16.msra.mxu0 %v7886_v36 }
 0xaf9   :  { %7889 = vmatprep.subr.bf16.mxu0 %v7888_v15 }
 0xafc   :  { %7891 = vmatpush1.bf16.msra.mxu0 %v7890_v62  ;;  %v7904_v62 = vpack.c.bf16 %v3122_v35, %v3120_v17  ;;  %v3135_v17 = vld [vmem:[%s11131_s4 + $0x280] sm:$0xff]  ;;  %v3140_v35 = vld [vmem:[%s11131_s4 + $0x2a8] sm:$0xff] }
 0xafd   :  { %7893 = vmatprep.subr.bf16.mxu0 %v7892_v14 }
 0xb00   :  { %7895 = vmatpush1.bf16.msra.mxu0 %v7894_v58  ;;  %v3119_v58 = vld [vmem:[%s11131_s4 + $0x200] sm:$0xff] }
 0xb01   :  { %7897 = vmatprep.subr.bf16.mxu0 %v7896_v44  ;;  %v3121_v44 = vld [vmem:[%s11131_s4 + $0x210] sm:$0xff] }
 0xb02   :  { %v7906_v54 = vpack.c.bf16 %v3121_v44, %v3119_v58  ;;  %v3139_v44 = vld [vmem:[%s11131_s4 + $0x2a0] sm:$0xff] }
 0xb04   :  { %7899 = vmatpush1.bf16.msra.mxu0 %v7898_v59 }
 0xb05   :  { %7901 = vmatprep.subr.bf16.mxu0 %v7900_v48 }
 0xb08   :  { %7903 = vmatpush1.bf16.msra.mxu0 %v7902_v25  ;;  %v3125_v25 = vld [vmem:[%s11131_s4 + $0x230] sm:$0xff] }
 0xb09   :  { %7905 = vmatprep.subr.bf16.mxu0 %v7904_v62  ;;  %v3142_v62 = vld [vmem:[%s11131_s4 + $0x2b8] sm:$0xff] }
 0xb0a   :  { %v7924_v58 = vpack.c.bf16 %v3142_v62, %v3140_v35  ;;  %v3172_v35 = vld [vmem:[%s11131_s4 + $0x3a8] sm:$0xff]  ;;  %v3174_v62 = vld [vmem:[%s11131_s4 + $0x3b8] sm:$0xff] }
 0xb40   :  { %v2855_v38 = vpop.f32.mrb[20].mxu1 }
 0xb41   :  { %v2857_v1 = vpop.f32.mrb[21].mxu1  ;;  %v2856_v29 = vadd.f32 %v2855_v38, %v13207_v10 }
 0xb42   :  { %v2858_v50 = vadd.f32 %v2857_v1, %v13207_v10 }
 0xb43   :  { %vm2870_vm4 = vcmp.ge.f32.partialorder %v2856_v29, 0.0 }
 0xb44   :  { %v2861_v63 = vpop.f32.mrb[22].mxu1  ;;  %v2884_v52 = vmul.f32 %v13209_v21, %v2858_v50  ;;  %vm2871_vm2 = vcmp.ge.f32.partialorder %v2858_v50, 0.0 }
 0xb45   :  { %v2863_v39 = vpop.f32.mrb[23].mxu1  ;;  %v2862_v10 = vadd.f32 %v2861_v63, %v13219_v11 }
 0xb46   :  { %v2864_v47 = vadd.f32 %v2863_v39, %v13219_v11  ;;  %v13358_v31 = vsel %vm2871_vm2, %v2858_v50, %v2884_v52  ;;  %v3127_v52 = vld [vmem:[%s11131_s4 + $0x240] sm:$0xff] }
 0xb47   :  { %v2889_v4 = vmul.f32 %v13209_v21, %v2862_v10  ;;  %vm2876_vm5 = vcmp.ge.f32.partialorder %v2862_v10, 0.0 }
 0xb48   :  { %v2890_v11 = vmul.f32 %v13209_v21, %v2864_v47  ;;  %vm2877_vm6 = vcmp.ge.f32.partialorder %v2864_v47, 0.0 }
 0xb4a   :  { %v2924_v2 = vpop.permute.xlu0 %2923  ;;  %v13364_v37 = vsel %vm2877_vm6, %v2864_v47, %v2890_v11 }
 0xb4c   :  { %v13327_v23 = vpop.permute.xlu1 %9306 }
 0xb4d   :  { %v9309_v60 = vunpack.i.h.bf16 %v13327_v23  ;;  %v9308_v43 = vunpack.i.l.bf16 %v13327_v23 }
 0xb4e   :  { %v2922_v34 = vpop.permute.xlu0 %2921 }
 0xb4f   :  { %v2947_v3 = vsel %vm740_vm9, %v9308_v43, %v9309_v60  ;;  %v2946_v57 = vsel %vm740_vm9, %v2924_v2, %v9308_v43  ;;  %v2945_v19 = vsel %vm740_vm9, %v2922_v34, %v2924_v2  ;;  %v3123_v2 = vld [vmem:[%s11131_s4 + $0x220] sm:$0xff] }
 0xb50   :  { %v13338_v16 = vmax.f32 %v13217_v28, %v2947_v3  ;;  %v13341_v53 = vmax.f32 %v13230_v26, %v2946_v57  ;;  %v2904_v5 = vpop.permute.xlu1 %2903  ;;  %v13350_v13 = vmax.f32 %v13239_v56, %v2945_v19  ;;  %v2883_v28 = vmul.f32 %v13209_v21, %v2856_v29  ;;  %v3130_v3 = vld [vmem:[%s11131_s4 + $0x258] sm:$0xff]  ;;  %v3129_v19 = vld [vmem:[%s11131_s4 + $0x250] sm:$0xff] }
 0xb51   :  { %v2907_v56 = vsel %vm703_vm3, %v2904_v5, %v13358_v31  ;;  %v2901_v21 = vsel %vm2876_vm5, %v2862_v10, %v2889_v4  ;;  %v7914_v4 = vpack.c.bf16 %v3129_v19, %v3127_v52  ;;  %v3157_v52 = vld [vmem:[%s11131_s4 + $0x330] sm:$0xff]  ;;  %v3160_v19 = vld [vmem:[%s11131_s4 + $0x348] sm:$0xff] }
 0xb52   :  { %v9315_v9 = vpack.i.bf16 %v13338_v16, %v13341_v53  ;;  %2997 = vrot.lane.b32.xlu1 %v13350_v13, %s11002_s16  ;;  %v2906_v46 = vpop.permute.xlu0 %2905  ;;  %v2895_v18 = vsel %vm2870_vm4, %v2856_v29, %v2883_v28  ;;  %v3128_v29 = vld [vmem:[%s11131_s4 + $0x248] sm:$0xff] }
 0xb53   :  { %v2908_v36 = vsel %vm703_vm3, %v2906_v46, %v13364_v37  ;;  %v7912_v34 = vpack.c.bf16 %v3130_v3, %v3128_v29 }
 0xb54   :  { %v2934_v26 = vpop.permute.xlu1 %2933  ;;  %9316 = vrot.lane.b32.xlu0 %v9315_v9, %s11002_s16  ;;  %v3132_v9 = vld [vmem:[%s11131_s4 + $0x268] sm:$0xff] }
 0xb56   :  { %2931 = vrot.lane.b32.xlu1 %v2907_v56, %s11000_s6  ;;  %v2936_v30 = vpop.permute.xlu0 %2935  ;;  %v3131_v56 = vld [vmem:[%s11131_s4 + $0x260] sm:$0xff] }
 0xb57   :  { %v2950_v12 = vsel %vm740_vm9, %v2934_v26, %v2936_v30 }
 0xb58   :  { %v9312_v6 = vpop.permute.xlu1 %9311  ;;  %2929 = vrot.lane.b32.xlu0 %v2895_v18, %s11000_s6  ;;  %v13382_v41 = vmax.f32 %v13250_v33, %v2950_v12 }
 0xb59   :  { %v9314_v51 = vunpack.i.h.bf16 %v9312_v6  ;;  %v9313_v7 = vunpack.i.l.bf16 %v9312_v6 }
 0xb5a   :  { %2943 = vrot.lane.b32.xlu1 %v2908_v36, %s11000_s6 }
 0xb5b   :  { %v2952_v15 = vsel %vm740_vm9, %v9313_v7, %v9314_v51  ;;  %v2951_v42 = vsel %vm740_vm9, %v2936_v30, %v9313_v7  ;;  %v3138_v30 = vld [vmem:[%s11131_s4 + $0x298] sm:$0xff] }
 0xb5c   :  { %2941 = vrot.lane.b32.xlu0 %v2901_v21, %s11000_s6  ;;  %v13376_v14 = vmax.f32 %v13245_v8, %v2952_v15  ;;  %v13379_v27 = vmax.f32 %v13261_v40, %v2951_v42 }
 0xb5e   :  { %2981 = vrot.lane.b32.xlu1 %v13382_v41, %s10996_s0  ;;  %v9320_v61 = vpack.i.bf16 %v13376_v14, %v13379_v27 }
 0xb60   :  { %2979 = vrot.lane.b32.xlu0 %v13350_v13, %s10996_s0  ;;  %s11020_s0 = smov 58  }
 0xb64   :  { %9321 = vrot.lane.b32.xlu0 %v9320_v61, %s11002_s16 }
 0xbc4   :  { %v2998_v32 = vpop.permute.xlu1 %2997 }
 0xbc6   :  { %v13391_v8 = vpop.permute.xlu0 %9316 }
 0xbc7   :  { %v9319_v40 = vunpack.i.h.bf16 %v13391_v8  ;;  %v9318_v33 = vunpack.i.l.bf16 %v13391_v8 }
 0xbc8   :  { %v2932_v39 = vpop.permute.xlu1 %2931 }
 0xbc9   :  { %v3021_v59 = vsel %vm777_vm11, %v2998_v32, %v9318_v33  ;;  %v3022_v38 = vsel %vm777_vm11, %v9318_v33, %v9319_v40  ;;  %v13435_v28 = vmax.f32 %v13358_v31, %v2932_v39  ;;  %v3136_v31 = vld [vmem:[%s11131_s4 + $0x288] sm:$0xff] }
 0xbca   :  { %v3043_v1 = vmax.f32 %v13350_v13, %v3021_v59  ;;  %v2930_v63 = vpop.permute.xlu0 %2929  ;;  %v3044_v0 = vmax.f32 %v13341_v53, %v3022_v38  ;;  %v3134_v13 = vld [vmem:[%s11131_s4 + $0x278] sm:$0xff]  ;;  %v7920_v12 = vpack.c.bf16 %v3138_v30, %v3136_v31  ;;  %v7926_v38 = vpack.c.bf16 %v3141_v20, %v3139_v44  ;;  %v3165_v31 = vld [vmem:[%s11131_s4 + $0x370] sm:$0xff]  ;;  %v3168_v30 = vld [vmem:[%s11131_s4 + $0x388] sm:$0xff] }
 0xbcb   :  { %v2948_v22 = vsel %vm740_vm9, %v9309_v60, %v2930_v63  ;;  %v2949_v48 = vsel %vm740_vm9, %v2930_v63, %v2932_v39  ;;  %v7916_v11 = vpack.c.bf16 %v3134_v13, %v3132_v9  ;;  %v3146_v59 = vld [vmem:[%s11131_s4 + $0x2d8] sm:$0xff]  ;;  %v3145_v63 = vld [vmem:[%s11131_s4 + $0x2d0] sm:$0xff]  ;;  %v3148_v39 = vld [vmem:[%s11131_s4 + $0x2e8] sm:$0xff] }
 0xbcc   :  { %v13412_v50 = vmax.f32 %v13221_v49, %v2948_v22  ;;  %v13414_v43 = vmax.f32 %v2895_v18, %v2949_v48  ;;  %3287 = vmatprep.mubr.f32.mxu0 %v3044_v0  ;;  %v2944_v57 = vpop.permute.xlu1 %2943  ;;  %v7910_v49 = vpack.c.bf16 %v3125_v25, %v3123_v2  ;;  %v3133_v18 = vld [vmem:[%s11131_s4 + $0x270] sm:$0xff]  ;;  %v3150_v0 = vld [vmem:[%s11131_s4 + $0x2f8] sm:$0xff]  ;;  %v3147_v48 = vld [vmem:[%s11131_s4 + $0x2e0] sm:$0xff] }
 0xbcd   :  { %3288 = vmatmul.mubr.f32.vlgmr.msra.gmra.mrb[12].mxu0 %v3043_v1  ;;  %v7928_v1 = vpack.c.bf16 %v3146_v59, %v3144_v55  ;;  %v7932_v22 = vpack.c.bf16 %v3150_v0, %v3148_v39  ;;  %v3152_v2 = vld [vmem:[%s11131_s4 + $0x308] sm:$0xff]  ;;  %v3154_v25 = vld [vmem:[%s11131_s4 + $0x318] sm:$0xff] }
 0xbce   :  { %v9325_v23 = vpack.i.bf16 %v13412_v50, %v13382_v41  ;;  %v2942_v60 = vpop.permute.xlu0 %2941  ;;  %3005 = vrot.lane.b32.xlu0 %v13414_v43, %s11002_s16  ;;  %7907 = vmatpush1.bf16.msra.mxu0 %v7906_v54  ;;  %v7936_v3 = vpack.c.bf16 %v3154_v25, %v3152_v2  ;;  %v3162_v9 = vld [vmem:[%s11131_s4 + $0x358] sm:$0xff]  ;;  %v3176_v44 = vld [vmem:[%s11131_s4 + $0x3c8] sm:$0xff] }
 0xbcf   :  { %v2953_v53 = vsel %vm740_vm9, %v9314_v51, %v2942_v60  ;;  %v2954_v5 = vsel %vm740_vm9, %v2942_v60, %v2944_v57  ;;  %7909 = vmatprep.subr.bf16.mxu0 %v7908_v45  ;;  %v13448_v51 = vmax.f32 %v13364_v37, %v2944_v57  ;;  %v3137_v37 = vld [vmem:[%s11131_s4 + $0x290] sm:$0xff]  ;;  %v3156_v57 = vld [vmem:[%s11131_s4 + $0x328] sm:$0xff]  ;;  %v3178_v20 = vld [vmem:[%s11131_s4 + $0x3d8] sm:$0xff] }
 0xbd0   :  { %v13427_v10 = vmax.f32 %v13247_v24, %v2953_v53  ;;  %v13429_v47 = vmax.f32 %v2901_v21, %v2954_v5  ;;  %9326 = vrot.lane.b32.xlu1 %v9325_v23, %s11002_s16  ;;  %v2982_v6 = vpop.permute.xlu1 %2981  ;;  %v7918_v21 = vpack.c.bf16 %v3133_v18, %v3131_v56  ;;  %v7922_v33 = vpack.c.bf16 %v3137_v37, %v3135_v17  ;;  %v3149_v45 = vld [vmem:[%s11131_s4 + $0x2f0] sm:$0xff]  ;;  %v3151_v23 = vld [vmem:[%s11131_s4 + $0x300] sm:$0xff] }
 0xbd1   :  { %v2984_v36 = vsel %vm703_vm3, %v2982_v6, %v13448_v51  ;;  %v7934_v29 = vpack.c.bf16 %v3149_v45, %v3147_v48  ;;  %v3153_v60 = vld [vmem:[%s11131_s4 + $0x310] sm:$0xff]  ;;  %v3163_v6 = vld [vmem:[%s11131_s4 + $0x360] sm:$0xff]  ;;  %v7960_v59 = vpack.c.bf16 %v3178_v20, %v3176_v44  ;;  %v3184_v48 = vld [vmem:[%s11131_s4 + $0x408] sm:$0xff] }
 0xbd2   :  { %v9330_v26 = vpack.i.bf16 %v13429_v47, %v13427_v10  ;;  %v2980_v46 = vpop.permute.xlu0 %2979  ;;  %7911 = vmatpush1.bf16.msra.mxu0 %v7910_v49  ;;  %v3158_v49 = vld [vmem:[%s11131_s4 + $0x338] sm:$0xff]  ;;  %v7938_v53 = vpack.c.bf16 %v3153_v60, %v3151_v23  ;;  %v3167_v17 = vld [vmem:[%s11131_s4 + $0x380] sm:$0xff]  ;;  %v3169_v37 = vld [vmem:[%s11131_s4 + $0x390] sm:$0xff] }
 0xbd3   :  { %v2983_v24 = vsel %vm703_vm3, %v2980_v46, %v13435_v28  ;;  %7913 = vmatprep.subr.bf16.mxu0 %v7912_v34  ;;  %v7940_v5 = vpack.c.bf16 %v3158_v49, %v3156_v57  ;;  %v3155_v34 = vld [vmem:[%s11131_s4 + $0x320] sm:$0xff]  ;;  %v3186_v45 = vld [vmem:[%s11131_s4 + $0x418] sm:$0xff]  ;;  %v3204_v44 = vld [vmem:[%s11131_s4 + $0x4a8] sm:$0xff]  ;;  %vm3455_vm3 = vcmask 1048128  }
 0xbd4   :  { %3007 = vrot.lane.b32.xlu0 %v2983_v24, %s11002_s16  ;;  %9331 = vrot.lane.b32.xlu1 %v9330_v26, %s11002_s16  ;;  %v7942_v13 = vpack.c.bf16 %v3157_v52, %v3155_v34  ;;  %v7944_v26 = vpack.c.bf16 %v3162_v9, %v3160_v19  ;;  %v3159_v46 = vld [vmem:[%s11131_s4 + $0x340] sm:$0xff]  ;;  %v3164_v24 = vld [vmem:[%s11131_s4 + $0x368] sm:$0xff]  ;;  %v7968_v25 = vpack.c.bf16 %v3186_v45, %v3184_v48 }
 0xbd5   :  { %v3183_v52 = vld [vmem:[%s11131_s4 + $0x400] sm:$0xff]  ;;  %v3185_v19 = vld [vmem:[%s11131_s4 + $0x410] sm:$0xff]  ;;  %v3206_v20 = vld [vmem:[%s11131_s4 + $0x4b8] sm:$0xff] }
 0xbd6   :  { %v13450_v7 = vpop.permute.xlu0 %9321  ;;  %7915 = vmatpush1.bf16.msra.mxu0 %v7914_v4  ;;  %v3161_v4 = vld [vmem:[%s11131_s4 + $0x350] sm:$0xff]  ;;  %v3212_v48 = vld [vmem:[%s11131_s4 + $0x4e8] sm:$0xff]  ;;  %v3214_v45 = vld [vmem:[%s11131_s4 + $0x4f8] sm:$0xff] }
 0xbd7   :  { %v9324_v15 = vunpack.i.h.bf16 %v13450_v7  ;;  %v9323_v42 = vunpack.i.l.bf16 %v13450_v7  ;;  %7917 = vmatprep.subr.bf16.mxu0 %v7916_v11  ;;  %v3166_v11 = vld [vmem:[%s11131_s4 + $0x378] sm:$0xff]  ;;  %v7946_v56 = vpack.c.bf16 %v3161_v4, %v3159_v46  ;;  %v3193_v7 = vld [vmem:[%s11131_s4 + $0x450] sm:$0xff] }
 0xbd8   :  { %3019 = vrot.lane.b32.xlu1 %v2984_v36, %s11002_s16  ;;  %v7948_v18 = vpack.c.bf16 %v3166_v11, %v3164_v24  ;;  %v7950_v36 = vpack.c.bf16 %v3165_v31, %v3163_v6  ;;  %v3190_v46 = vld [vmem:[%s11131_s4 + $0x438] sm:$0xff]  ;;  %v3187_v24 = vld [vmem:[%s11131_s4 + $0x420] sm:$0xff]  ;;  %v3189_v11 = vld [vmem:[%s11131_s4 + $0x430] sm:$0xff]  ;;  %s11023_s16 = smov 59  }
 0xbd9   :  { %v3027_v61 = vsel %vm777_vm11, %v9323_v42, %v9324_v15  ;;  %v3194_v6 = vld [vmem:[%s11131_s4 + $0x458] sm:$0xff] }
 0xbda   :  { %v3050_v32 = vmax.f32 %v13379_v27, %v3027_v61  ;;  %7919 = vmatpush1.bf16.msra.mxu0 %v7918_v21  ;;  %v3143_v27 = vld [vmem:[%s11131_s4 + $0x2c0] sm:$0xff]  ;;  %v3170_v21 = vld [vmem:[%s11131_s4 + $0x398] sm:$0xff]  ;;  %v7954_v61 = vpack.c.bf16 %v3169_v37, %v3167_v17 }
 0xbdb   :  { %7921 = vmatprep.subr.bf16.mxu0 %v7920_v12  ;;  %v7930_v54 = vpack.c.bf16 %v3145_v63, %v3143_v27  ;;  %v7952_v12 = vpack.c.bf16 %v3170_v21, %v3168_v30  ;;  %v3180_v27 = vld [vmem:[%s11131_s4 + $0x3e8] sm:$0xff]  ;;  %v3182_v63 = vld [vmem:[%s11131_s4 + $0x3f8] sm:$0xff]  ;;  %v3191_v21 = vld [vmem:[%s11131_s4 + $0x440] sm:$0xff] }
 0xbdc   :  { %3293 = vmatprep.mubr.f32.mxu0 %v3050_v32  ;;  %v7956_v32 = vpack.c.bf16 %v3174_v62, %v3172_v35  ;;  %v7964_v0 = vpack.c.bf16 %v3182_v63, %v3180_v27  ;;  %v7978_v17 = vpack.c.bf16 %v3193_v7, %v3191_v21  ;;  %v3197_v35 = vld [vmem:[%s11131_s4 + $0x470] sm:$0xff]  ;;  %v3200_v62 = vld [vmem:[%s11131_s4 + $0x488] sm:$0xff]  ;;  %v3210_v63 = vld [vmem:[%s11131_s4 + $0x4d8] sm:$0xff] }
 0xbdd   :  { %v3208_v27 = vld [vmem:[%s11131_s4 + $0x4c8] sm:$0xff] }
 0xbde   :  { %7923 = vmatpush1.bf16.msra.mxu0 %v7922_v33  ;;  %v3171_v33 = vld [vmem:[%s11131_s4 + $0x3a0] sm:$0xff] }
 0xbdf   :  { %7925 = vmatprep.subr.bf16.mxu0 %v7924_v58  ;;  %v3173_v58 = vld [vmem:[%s11131_s4 + $0x3b0] sm:$0xff] }
 0xbe0   :  { %v7958_v55 = vpack.c.bf16 %v3173_v58, %v3171_v33  ;;  %v3199_v33 = vld [vmem:[%s11131_s4 + $0x480] sm:$0xff]  ;;  %v3201_v58 = vld [vmem:[%s11131_s4 + $0x490] sm:$0xff] }
 0xbe2   :  { %7927 = vmatpush1.bf16.msra.mxu0 %v7926_v38  ;;  %v3175_v38 = vld [vmem:[%s11131_s4 + $0x3c0] sm:$0xff] }
 0xbe3   :  { %7929 = vmatprep.subr.bf16.mxu0 %v7928_v1  ;;  %v3177_v1 = vld [vmem:[%s11131_s4 + $0x3d0] sm:$0xff] }
 0xbe4   :  { %v7962_v39 = vpack.c.bf16 %v3177_v1, %v3175_v38  ;;  %v3203_v38 = vld [vmem:[%s11131_s4 + $0x4a0] sm:$0xff]  ;;  %v3205_v1 = vld [vmem:[%s11131_s4 + $0x4b0] sm:$0xff] }
 0xbe6   :  { %7931 = vmatpush1.bf16.msra.mxu0 %v7930_v54  ;;  %v3179_v54 = vld [vmem:[%s11131_s4 + $0x3e0] sm:$0xff] }
 0xbe7   :  { %7933 = vmatprep.subr.bf16.mxu0 %v7932_v22  ;;  %v3181_v22 = vld [vmem:[%s11131_s4 + $0x3f0] sm:$0xff] }
 0xbe8   :  { %v7966_v2 = vpack.c.bf16 %v3181_v22, %v3179_v54  ;;  %v3207_v54 = vld [vmem:[%s11131_s4 + $0x4c0] sm:$0xff]  ;;  %v3209_v22 = vld [vmem:[%s11131_s4 + $0x4d0] sm:$0xff] }
 0xbea   :  { %7935 = vmatpush1.bf16.msra.mxu0 %v7934_v29 }
 0xbeb   :  { %7937 = vmatprep.subr.bf16.mxu0 %v7936_v3 }
 0xbee   :  { %7939 = vmatpush1.bf16.msra.mxu0 %v7938_v53 }
 0xbef   :  { %7941 = vmatprep.subr.bf16.mxu0 %v7940_v5 }
 0xbf2   :  { %7943 = vmatpush1.bf16.msra.mxu0 %v7942_v13 }
 0xbf3   :  { %7945 = vmatprep.subr.bf16.mxu0 %v7944_v26  ;;  %v3188_v26 = vld [vmem:[%s11131_s4 + $0x428] sm:$0xff] }
 0xbf6   :  { %7947 = vmatpush1.bf16.msra.mxu0 %v7946_v56 }
 0xbf7   :  { %7949 = vmatprep.subr.bf16.mxu0 %v7948_v18  ;;  %v3192_v18 = vld [vmem:[%s11131_s4 + $0x448] sm:$0xff] }
 0xbf8   :  { %v7976_v30 = vpack.c.bf16 %v3194_v6, %v3192_v18 }
 0xbfa   :  { %7951 = vmatpush1.bf16.msra.mxu0 %v7950_v36 }
 0xbfb   :  { %7953 = vmatprep.subr.bf16.mxu0 %v7952_v12  ;;  %v3198_v12 = vld [vmem:[%s11131_s4 + $0x478] sm:$0xff] }
 0xbfe   :  { %7955 = vmatpush1.bf16.msra.mxu0 %v7954_v61 }
 0xbff   :  { %7957 = vmatprep.subr.bf16.mxu0 %v7956_v32 }
 0xc02   :  { %7959 = vmatpush1.bf16.msra.mxu0 %v7958_v55  ;;  %v7986_v55 = vpack.c.bf16 %v3201_v58, %v3199_v33 }
 0xc03   :  { %7961 = vmatprep.subr.bf16.mxu0 %v7960_v59  ;;  %v7988_v59 = vpack.c.bf16 %v3206_v20, %v3204_v44 }
 0xc06   :  { %7963 = vmatpush1.bf16.msra.mxu0 %v7962_v39  ;;  %v7990_v39 = vpack.c.bf16 %v3205_v1, %v3203_v38 }
 0xc07   :  { %7965 = vmatprep.subr.bf16.mxu0 %v7964_v0  ;;  %v7992_v0 = vpack.c.bf16 %v3210_v63, %v3208_v27 }
 0xc0a   :  { %7967 = vmatpush1.bf16.msra.mxu0 %v7966_v2  ;;  %v7994_v2 = vpack.c.bf16 %v3209_v22, %v3207_v54 }
 0xc0b   :  { %7969 = vmatprep.subr.bf16.mxu0 %v7968_v25  ;;  %v7996_v25 = vpack.c.bf16 %v3214_v45, %v3212_v48 }
 0xc40   :  { %v13511_v60 = vpop.permute.xlu0 %3005 }
 0xc42   :  { %v9327_v29 = vpop.permute.xlu1 %9326 }
 0xc43   :  { %v9329_v3 = vunpack.i.h.bf16 %v9327_v29  ;;  %v9328_v23 = vunpack.i.l.bf16 %v9327_v29  ;;  %v3211_v29 = vld [vmem:[%s11131_s4 + $0x4e0] sm:$0xff] }
 0xc45   :  { %v3026_v57 = vsel %vm777_vm11, %v9328_v23, %v9323_v42  ;;  %v3024_v49 = vsel %vm777_vm11, %v9329_v3, %v13511_v60  ;;  %v3023_v9 = vsel %vm777_vm11, %v9319_v40, %v9329_v3  ;;  %v7972_v40 = vpack.c.bf16 %v3190_v46, %v3188_v26  ;;  %v3213_v3 = vld [vmem:[%s11131_s4 + $0x4f0] sm:$0xff] }
 0xc46   :  { %v13518_v53 = vpop.permute.xlu1 %9331  ;;  %v3049_v5 = vmax.f32 %v13382_v41, %v3026_v57  ;;  %v3046_v34 = vmax.f32 %v13412_v50, %v3024_v49  ;;  %v7970_v41 = vpack.c.bf16 %v3185_v19, %v3183_v52  ;;  %v3045_v4 = vmax.f32 %v13338_v16, %v3023_v9  ;;  %v3008_v31 = vpop.permute.xlu0 %3007  ;;  %v3216_v57 = vld [vmem:[%s11131_s4 + $0x508] sm:$0xff] }
 0xc47   :  { %v9334_v42 = vunpack.i.h.bf16 %v13518_v53  ;;  %v9333_v13 = vunpack.i.l.bf16 %v13518_v53  ;;  %v7974_v16 = vpack.c.bf16 %v3189_v11, %v3187_v24  ;;  %v3048_v36 = vmax.f32 %v13435_v28, %v3008_v31  ;;  %v3202_v28 = vld [vmem:[%s11131_s4 + $0x498] sm:$0xff] }
 0xc48   :  { %3294 = vmatmul.mubr.f32.gmra.mrb[14].mxu0 %v3049_v5  ;;  %v7984_v32 = vpack.c.bf16 %v3202_v28, %v3200_v62  ;;  %v7998_v23 = vpack.c.bf16 %v3213_v3, %v3211_v29  ;;  %v3025_v49 = vsel %vm777_vm11, %v13511_v60, %v3008_v31 }
 0xc49   :  { %3364 = vmatprep.mubr.f32.mxu0 %v3046_v34  ;;  %v3029_v50 = vsel %vm777_vm11, %v9333_v13, %v9334_v42  ;;  %v3028_v56 = vsel %vm777_vm11, %v9324_v15, %v9333_v13  ;;  %v3196_v15 = vld [vmem:[%s11131_s4 + $0x468] sm:$0xff]  ;;  %v3215_v34 = vld [vmem:[%s11131_s4 + $0x500] sm:$0xff]  ;;  %v3047_v52 = vmax.f32 %v13414_v43, %v3025_v49 }
 0xc4a   :  { %v3052_v8 = vmax.f32 %v13427_v10, %v3029_v50  ;;  %v3051_v10 = vmax.f32 %v13376_v14, %v3028_v56  ;;  %v7980_v37 = vpack.c.bf16 %v3198_v12, %v3196_v15  ;;  %v3195_v14 = vld [vmem:[%s11131_s4 + $0x460] sm:$0xff]  ;;  %v3020_v5 = vpop.permute.xlu1 %3019  ;;  %s11011_s4 = smov 118  }
 0xc4b   :  { %v7982_v61 = vpack.c.bf16 %v3197_v35, %v3195_v14  ;;  %v3030_v19 = vsel %vm777_vm11, %v9334_v42, %v3020_v5  ;;  %v3054_v9 = vmax.f32 %v13448_v51, %v3020_v5  ;;  %vm3546_vm11 = vcmask 490496  }
 0xc4c   :  { %3365 = vmatmul.mubr.f32.vlgmr.msra.gmra.mrb[12].mxu0 %v3045_v4  ;;  %v3053_v13 = vmax.f32 %v13429_v47, %v3030_v19 }
 0xc4d   :  { %7971 = vmatpush1.bf16.msra.mxu0 %v7970_v41  ;;  %3370 = vmatprep.mubr.f32.mxu0 %v3052_v8 }
 0xc4e   :  { %7973 = vmatprep.subr.bf16.mxu0 %v7972_v40 }
 0xc50   :  { %3371 = vmatmul.mubr.f32.gmra.mrb[14].mxu0 %v3051_v10 }
 0xc51   :  { %7975 = vmatpush1.bf16.msra.mxu0 %v7974_v16  ;;  %7212 = vmatprep.mubr.msk.f32.mxu0 %vm223_vm0, %v3048_v36 }
 0xc52   :  { %7977 = vmatprep.subr.bf16.mxu0 %v7976_v30 }
 0xc55   :  { %7979 = vmatpush1.bf16.msra.mxu0 %v7978_v17 }
 0xc56   :  { %7981 = vmatprep.subr.bf16.mxu0 %v7980_v37 }
 0xc59   :  { %7983 = vmatpush1.bf16.msra.mxu0 %v7982_v61 }
 0xc5a   :  { %7985 = vmatprep.subr.bf16.mxu0 %v7984_v32 }
 0xc5d   :  { %7987 = vmatpush1.bf16.msra.mxu0 %v7986_v55 }
 0xc5e   :  { %7989 = vmatprep.subr.bf16.mxu0 %v7988_v59 }
 0xc61   :  { %7991 = vmatpush1.bf16.msra.mxu0 %v7990_v39 }
 0xc62   :  { %7993 = vmatprep.subr.bf16.mxu0 %v7992_v0 }
 0xc65   :  { %7995 = vmatpush1.bf16.msra.mxu0 %v7994_v2 }
 0xc66   :  { %7997 = vmatprep.subr.bf16.mxu0 %v7996_v25 }
 0xc69   :  { %7999 = vmatpush1.bf16.msra.mxu0 %v7998_v23 }
 0xc6a   :  { %3409 = vmatprep.subr.mxu0 %v3216_v57 }
 0xc6d   :  { %3410 = vmatpush1.msra.mxu0 %v3215_v34 }
 0xc6e   :  { %3442 = vmatmul.mubr.f32.vlgmr.msra.gmra.mrb[12].mxu0 %v3047_v52 }
 0xc6f   :  { %7213 = vmatprep.mubr.msk.f32.mxu0 %vm223_vm0, %v3054_v9  ;;  %vm3535_vm0 = vcmask 498688  }
 0xc72   :  { %3448 = vmatmul.mubr.f32.gmra.mrb[14].mxu0 %v3053_v13 }
 0xd41   :  { %v3443_v60 = vpop.f32.mrb[12].mxu0 }
 0xd42   :  { %v3445_v26 = vpop.f32.mrb[13].mxu0 }
 0xd43   :  { %v9390_v46 = vpack.i.bf16 %v3445_v26, %v3443_v60 }
 0xd45   :  { %v3449_v41 = vpop.f32.mrb[14].mxu0 }
 0xd46   :  { %v3451_v50 = vpop.f32.mrb[15].mxu0  ;;  %v9335_v4 = vpack.i.bf16 %v3449_v41, %v3443_v60 }
 0xd47   :  { %v9395_v43 = vpack.i.bf16 %v3451_v50, %v3449_v41 }
 0xd48   :  { %9336 = vrot.lane.b32.xlu0 %v9335_v4, %s11010_s21 }
 0xdba   :  { %v9337_v53 = vpop.permute.xlu0 %9336 }
 0xdbb   :  { %v9339_v51 = vunpack.i.h.bf16 %v9337_v53  ;;  %v9338_v42 = vunpack.i.l.bf16 %v9337_v53 }
 0xdbd   :  { %v3458_v8 = vsel %vm3455_vm3, %v9338_v42, %v3445_v26  ;;  %v3461_v40 = vsel %vm3455_vm3, %v9339_v51, %v3451_v50 }
 0xdbe   :  { %v9345_v47 = vpack.i.bf16 %v3461_v40, %v3458_v8  ;;  %v9400_v24 = vpack.i.bf16 %v3458_v8, %v3443_v60  ;;  %v9405_v11 = vpack.i.bf16 %v3461_v40, %v3449_v41 }
 0xdc0   :  { %9346 = vrot.lane.b32.xlu0 %v9345_v47, %s11000_s6  ;;  %9341 = vrot.lane.b32.xlu1 %v9345_v47, %s11010_s21 }
 0xe32   :  { %v9342_v56 = vpop.permute.xlu1 %9341  ;;  %v13611_v21 = vpop.permute.xlu0 %9346 }
 0xe33   :  { %v9344_v18 = vunpack.i.h.bf16 %v9342_v56  ;;  %v9343_v6 = vunpack.i.l.bf16 %v9342_v56  ;;  %v9348_v53 = vunpack.i.l.bf16 %v13611_v21 }
 0xe35   :  { %v3466_v31 = vsel %vm3455_vm3, %v9343_v6, %v9338_v42  ;;  %v3467_v16 = vsel %vm3455_vm3, %v9344_v18, %v9339_v51 }
 0xe36   :  { %v9355_v10 = vpack.i.bf16 %v9343_v6, %v3466_v31  ;;  %v13586_v30 = vpack.i.bf16 %v9344_v18, %v3467_v16 }
 0xe38   :  { %9356 = vrot.lane.b32.xlu1 %v9355_v10, %s11001_s15  ;;  %9351 = vrot.lane.b32.xlu0 %v9355_v10, %s11000_s6 }
 0xe3c   :  { %9361 = vrot.lane.b32.xlu1 %v13586_v30, %s11000_s6  ;;  %9371 = vrot.lane.b32.xlu0 %v9355_v10, %s11011_s4 }
 0xe40   :  { %9366 = vrot.lane.b32.xlu1 %v9345_v47, %s11001_s15  ;;  %9376 = vrot.lane.b32.xlu0 %v13586_v30, %s11001_s15 }
 0xe44   :  { %9386 = vrot.lane.b32.xlu1 %v13586_v30, %s11011_s4  ;;  %9381 = vrot.lane.b32.xlu0 %v9345_v47, %s11011_s4 }
 0xe48   :  { %9391 = vrot.lane.b32.xlu1 %v9390_v46, %s11012_s1  ;;  %9396 = vrot.lane.b32.xlu0 %v9395_v43, %s11012_s1  ;;  %v9349_v43 = vunpack.i.h.bf16 %v13611_v21 }
 0xe4c   :  { %9401 = vrot.lane.b32.xlu1 %v9400_v24, %s11013_s28  ;;  %9406 = vrot.lane.b32.xlu0 %v9405_v11, %s11013_s28 }
 0xe50   :  { %9411 = vrot.lane.b32.xlu1 %v9400_v24, %s11014_s2  ;;  %9416 = vrot.lane.b32.xlu0 %v9405_v11, %s11014_s2 }
 0xe54   :  { %9421 = vrot.lane.b32.xlu1 %v9400_v24, %s11015_s7  ;;  %9426 = vrot.lane.b32.xlu0 %v9405_v11, %s11015_s7 }
 0xe58   :  { %9431 = vrot.lane.b32.xlu1 %v9400_v24, %s11016_s10  ;;  %9436 = vrot.lane.b32.xlu0 %v9405_v11, %s11016_s10 }
 0xe5c   :  { %9441 = vrot.lane.b32.xlu1 %v9355_v10, %s11017_s11 }
 0xe60   :  { %9446 = vrot.lane.b32.xlu1 %v9345_v47, %s11017_s11 }
 0xeaa   :  { %v9357_v7 = vpop.permute.xlu1 %9356  ;;  %v13613_v36 = vpop.permute.xlu0 %9351 }
 0xeab   :  { %v9359_v1 = vunpack.i.h.bf16 %v9357_v7  ;;  %v9358_v27 = vunpack.i.l.bf16 %v9357_v7  ;;  %v9354_v54 = vunpack.i.h.bf16 %v13613_v36  ;;  %v9353_v22 = vunpack.i.l.bf16 %v13613_v36 }
 0xead   :  { %v3503_v2 = vsel %vm758_vm8, %v9358_v27, %v9359_v1  ;;  %v3487_v23 = vsel %vm740_vm9, %v9353_v22, %v9354_v54  ;;  %v3486_v18 = vsel %vm740_vm9, %v9348_v53, %v9353_v22 }
 0xeae   :  { %v13615_v15 = vpop.permute.xlu1 %9361  ;;  %v13617_v12 = vpop.permute.xlu0 %9371  ;;  %v9480_v3 = vpack.i.bf16 %v9359_v1, %v3503_v2  ;;  %v9475_v9 = vpack.i.bf16 %v9354_v54, %v3487_v23 }
 0xeaf   :  { %v9364_v25 = vunpack.i.h.bf16 %v13615_v15  ;;  %v9363_v29 = vunpack.i.l.bf16 %v13615_v15  ;;  %v9374_v57 = vunpack.i.h.bf16 %v13617_v12  ;;  %v9373_v49 = vunpack.i.l.bf16 %v13617_v12 }
 0xeb1   :  { %v3489_v5 = vsel %vm740_vm9, %v9363_v29, %v9364_v25  ;;  %v3520_v60 = vsel %vm3518_vm7, %v9373_v49, %v9374_v57  ;;  %v3488_v40 = vsel %vm740_vm9, %v9349_v43, %v9363_v29 }
 0xeb2   :  { %v9367_v17 = vpop.permute.xlu1 %9366  ;;  %v13619_v37 = vpop.permute.xlu0 %9376  ;;  %v9490_v13 = vpack.i.bf16 %v9364_v25, %v3489_v5  ;;  %v9485_v51 = vpack.i.bf16 %v9374_v57, %v3520_v60 }
 0xeb3   :  { %v9369_v34 = vunpack.i.h.bf16 %v9367_v17  ;;  %v9368_v52 = vunpack.i.l.bf16 %v9367_v17  ;;  %v9378_v19 = vunpack.i.l.bf16 %v13619_v37  ;;  %v9379_v42 = vunpack.i.h.bf16 %v13619_v37 }
 0xeb5   :  { %v3502_v26 = vsel %vm758_vm8, %v9368_v52, %v9358_v27  ;;  %v3504_v46 = vsel %vm758_vm8, %v9369_v34, %v9378_v19  ;;  %v3505_v6 = vsel %vm758_vm8, %v9378_v19, %v9379_v42  ;;  %v3587_v19 = vld [vmem:[%s11076_s29 + $0x8] sm:$0xff] }
 0xeb6   :  { %v13621_v14 = vpop.permute.xlu1 %9386  ;;  %v13623_v35 = vpop.permute.xlu0 %9381  ;;  %v9505_v8 = vpack.i.bf16 %v3504_v46, %v3502_v26  ;;  %v9500_v12 = vpack.i.bf16 %v9379_v42, %v3505_v6 }
 0xeb7   :  { %v9389_v41 = vunpack.i.h.bf16 %v13621_v14  ;;  %v9388_v50 = vunpack.i.l.bf16 %v13621_v14  ;;  %v9384_v16 = vunpack.i.h.bf16 %v13623_v35  ;;  %v9383_v21 = vunpack.i.l.bf16 %v13623_v35 }
 0xeb9   :  { %v3522_v47 = vsel %vm3518_vm7, %v9388_v50, %v9389_v41  ;;  %v3521_v14 = vsel %vm3518_vm7, %v9384_v16, %v9388_v50 }
 0xeba   :  { %v9392_v62 = vpop.permute.xlu1 %9391  ;;  %v9397_v28 = vpop.permute.xlu0 %9396  ;;  %v9510_v31 = vpack.i.bf16 %v9389_v41, %v3522_v47 }
 0xebb   :  { %v9394_v61 = vunpack.i.h.bf16 %v9392_v62  ;;  %v9393_v32 = vunpack.i.l.bf16 %v9392_v62  ;;  %v9399_v33 = vunpack.i.h.bf16 %v9397_v28  ;;  %v9398_v58 = vunpack.i.l.bf16 %v9397_v28 }
 0xebc   :  { %v3519_v62 = vsel %vm3518_vm7, %v9383_v21, %v9373_v49  ;;  %v3583_v49 = vld [vmem:[%s11071_s25 + $0x8] sm:$0xff] }
 0xebd   :  { %v3536_v44 = vsel %vm3535_vm0, %v9393_v32, %v9394_v61  ;;  %v3537_v20 = vsel %vm3535_vm0, %v9398_v58, %v9399_v33  ;;  %v9460_v48 = vpack.i.bf16 %v9398_v58, %v9393_v32  ;;  %v9520_v58 = vpack.i.bf16 %v3521_v14, %v3519_v62  ;;  %7215 = vmatprep.mubr.msk.f32.mxu1 %vm2628_vm15, %v3583_v49 }
 0xebe   :  { %v9450_v55 = vpack.i.bf16 %v9394_v61, %v3536_v44  ;;  %v9455_v59 = vpack.i.bf16 %v9399_v33, %v3537_v20  ;;  %v13627_v38 = vpop.permute.xlu1 %9401  ;;  %v9407_v4 = vpop.permute.xlu0 %9406 }
 0xebf   :  { %v9404_v63 = vunpack.i.h.bf16 %v13627_v38  ;;  %v9403_v39 = vunpack.i.l.bf16 %v13627_v38  ;;  %v9409_v24 = vunpack.i.h.bf16 %v9407_v4  ;;  %v9408_v11 = vunpack.i.l.bf16 %v9407_v4 }
 0xec0   :  { %9451 = vrot.lane.b32.xlu1 %v9450_v55, %s11017_s11  ;;  %9456 = vrot.lane.b32.xlu0 %v9455_v59, %s11017_s11 }
 0xec1   :  { %v3547_v0 = vsel %vm3546_vm11, %v9403_v39, %v9404_v63  ;;  %v3548_v7 = vsel %vm3546_vm11, %v9408_v11, %v9409_v24  ;;  %v9525_v59 = vpack.i.bf16 %v9408_v11, %v9403_v39 }
 0xec2   :  { %v9465_v45 = vpack.i.bf16 %v9404_v63, %v3547_v0  ;;  %v9412_v56 = vpop.permute.xlu1 %9411  ;;  %v9417_v10 = vpop.permute.xlu0 %9416  ;;  %v9515_v17 = vpack.i.bf16 %v9409_v24, %v3548_v7 }
 0xec3   :  { %v9414_v36 = vunpack.i.h.bf16 %v9412_v56  ;;  %v9413_v15 = vunpack.i.l.bf16 %v9412_v56  ;;  %v9419_v32 = vunpack.i.h.bf16 %v9417_v10  ;;  %v9418_v33 = vunpack.i.l.bf16 %v9417_v10 }
 0xec4   :  { %9466 = vrot.lane.b32.xlu0 %v9465_v45, %s11017_s11  ;;  %9461 = vrot.lane.b32.xlu1 %v9460_v48, %s11017_s11 }
 0xec5   :  { %v3558_v28 = vsel %vm3557_vm10, %v9413_v15, %v9414_v36  ;;  %v3559_v1 = vsel %vm3557_vm10, %v9418_v33, %v9419_v32  ;;  %v9540_v27 = vpack.i.bf16 %v9418_v33, %v9413_v15 }
 0xec6   :  { %v9422_v37 = vpop.permute.xlu1 %9421  ;;  %v9427_v61 = vpop.permute.xlu0 %9426  ;;  %v9530_v35 = vpack.i.bf16 %v9414_v36, %v3558_v28  ;;  %v9535_v45 = vpack.i.bf16 %v9419_v32, %v3559_v1 }
 0xec7   :  { %v9429_v44 = vunpack.i.h.bf16 %v9427_v61  ;;  %v9428_v20 = vunpack.i.l.bf16 %v9427_v61  ;;  %v9424_v63 = vunpack.i.h.bf16 %v9422_v37  ;;  %v9423_v0 = vunpack.i.l.bf16 %v9422_v37 }
 0xec8   :  { %9471 = vrot.lane.b32.xlu0 %v13586_v30, %s11017_s11  ;;  %9481 = vrot.lane.b32.xlu1 %v9480_v3, %s11017_s11  ;;  %v9495_v30 = vpack.i.bf16 %v3488_v40, %v3486_v18 }
 0xec9   :  { %v3570_v54 = vsel %vm3568_vm12, %v9428_v20, %v9429_v44  ;;  %v3569_v38 = vsel %vm3568_vm12, %v9423_v0, %v9424_v63  ;;  %v9555_v5 = vpack.i.bf16 %v9428_v20, %v9423_v0 }
 0xeca   :  { %v9432_v55 = vpop.permute.xlu1 %9431  ;;  %v9550_v2 = vpack.i.bf16 %v9429_v44, %v3570_v54  ;;  %v9437_v25 = vpop.permute.xlu0 %9436  ;;  %v9545_v29 = vpack.i.bf16 %v9424_v63, %v3569_v38 }
 0xecb   :  { %v9434_v22 = vunpack.i.h.bf16 %v9432_v55  ;;  %v9433_v48 = vunpack.i.l.bf16 %v9432_v55  ;;  %v9438_v23 = vunpack.i.l.bf16 %v9437_v25  ;;  %v9439_v57 = vunpack.i.h.bf16 %v9437_v25 }
 0xecc   :  { %9491 = vrot.lane.b32.xlu1 %v9490_v13, %s11017_s11  ;;  %9476 = vrot.lane.b32.xlu0 %v9475_v9, %s11017_s11  ;;  %v3586_v13 = vld [vmem:[%s11076_s29] sm:$0xff]  ;;  %s7214_s29 = sld [smem:[#allocation2 + $0x2]] }
 0xecd   :  { %v3580_v39 = vsel %vm3579_vm1, %v9433_v48, %v9434_v22  ;;  %v9570_v34 = vpack.i.bf16 %v9438_v23, %v9433_v48  ;;  %v3581_v52 = vsel %vm3579_vm1, %v9438_v23, %v9439_v57 }
 0xece   :  { %v9560_v3 = vpack.i.bf16 %v9434_v22, %v3580_v39  ;;  %v9565_v9 = vpack.i.bf16 %v9439_v57, %v3581_v52  ;;  %v9442_v60 = vpop.permute.xlu1 %9441 }
 0xecf   :  { %v9444_v43 = vunpack.i.h.bf16 %v9442_v60  ;;  %v9443_v53 = vunpack.i.l.bf16 %v9442_v60 }
 0xed0   :  { %9506 = vrot.lane.b32.xlu1 %v9505_v8, %s11017_s11  ;;  %9486 = vrot.lane.b32.xlu0 %v9485_v51, %s11017_s11 }
 0xed1   :  { %v3708_v18 = vsel %vm3706_vm13, %v9443_v53, %v9444_v43 }
 0xed2   :  { %v9447_v26 = vpop.permute.xlu1 %9446 }
 0xed3   :  { %v9448_v51 = vunpack.i.l.bf16 %v9447_v26  ;;  %v9449_v40 = vunpack.i.h.bf16 %v9447_v26 }
 0xed4   :  { %9511 = vrot.lane.b32.xlu1 %v9510_v31, %s11017_s11  ;;  %9496 = vrot.lane.b32.xlu0 %v9495_v30, %s11017_s11 }
 0xed5   :  { %v3707_v11 = vsel %vm3706_vm13, %v9448_v51, %v9443_v53 }
 0xed8   :  { %9516 = vrot.lane.b32.xlu1 %v9515_v17, %s11017_s11  ;;  %9501 = vrot.lane.b32.xlu0 %v9500_v12, %s11017_s11 }
 0xedc   :  { %9531 = vrot.lane.b32.xlu1 %v9530_v35, %s11017_s11  ;;  %9521 = vrot.lane.b32.xlu0 %v9520_v58, %s11017_s11 }
 0xee0   :  { %9541 = vrot.lane.b32.xlu1 %v9540_v27, %s11017_s11  ;;  %9526 = vrot.lane.b32.xlu0 %v9525_v59, %s11017_s11 }
 0xee4   :  { %9551 = vrot.lane.b32.xlu1 %v9550_v2, %s11017_s11  ;;  %9536 = vrot.lane.b32.xlu0 %v9535_v45, %s11017_s11 }
 0xee8   :  { %9561 = vrot.lane.b32.xlu1 %v9560_v3, %s11017_s11  ;;  %9546 = vrot.lane.b32.xlu0 %v9545_v29, %s11017_s11 }
 0xeec   :  { %9571 = vrot.lane.b32.xlu1 %v9570_v34, %s11017_s11  ;;  %9556 = vrot.lane.b32.xlu0 %v9555_v5, %s11017_s11 }
 0xef0   :  { %3595 = vperm.xlu1 %8579, %v3587_v19   ;;  %9566 = vrot.lane.b32.xlu0 %v9565_v9, %s11017_s11 }
 0xef4   :  { %3590 = vperm.xlu0 %8578, %v3586_v13  }
 0xf32   :  { %v13699_v46 = vpop.permute.xlu1 %9451  ;;  %v13701_v41 = vpop.permute.xlu0 %9456 }
 0xf33   :  { %v9454_v27 = vunpack.i.h.bf16 %v13699_v46  ;;  %v9453_v39 = vunpack.i.l.bf16 %v13699_v46  ;;  %v9459_v25 = vunpack.i.h.bf16 %v13701_v41  ;;  %v9458_v29 = vunpack.i.l.bf16 %v13701_v41 }
 0xf35   :  { %v3724_v53 = vsel %vm3706_vm13, %v9453_v39, %v9454_v27  ;;  %v3726_v51 = vsel %vm3706_vm13, %v9458_v29, %v9459_v25 }
 0xf36   :  { %v13703_v50 = vpop.permute.xlu0 %9466  ;;  %v13705_v4 = vpop.permute.xlu1 %9461 }
 0xf37   :  { %v9464_v34 = vunpack.i.h.bf16 %v13705_v4  ;;  %v9463_v60 = vunpack.i.l.bf16 %v13705_v4  ;;  %v9468_v4 = vunpack.i.l.bf16 %v13703_v50 }
 0xf3a   :  { %v9472_v42 = vpop.permute.xlu0 %9471  ;;  %v9482_v8 = vpop.permute.xlu1 %9481 }
 0xf3b   :  { %v9474_v47 = vunpack.i.h.bf16 %v9472_v42  ;;  %v9473_v24 = vunpack.i.l.bf16 %v9472_v42  ;;  %v9484_v33 = vunpack.i.h.bf16 %v9482_v8  ;;  %v9483_v58 = vunpack.i.l.bf16 %v9482_v8 }
 0xf3d   :  { %v3709_v56 = vsel %vm3706_vm13, %v9449_v40, %v9473_v24  ;;  %v3710_v6 = vsel %vm3706_vm13, %v9473_v24, %v9474_v47  ;;  %v3716_v3 = vsel %vm3706_vm13, %v9483_v58, %v9484_v33  ;;  %v9469_v24 = vunpack.i.h.bf16 %v13703_v50 }
 0xf3e   :  { %v9492_v31 = vpop.permute.xlu1 %9491  ;;  %v9477_v16 = vpop.permute.xlu0 %9476  ;;  %v8000_v10 = vpack.c.bf16 %v3710_v6, %v3708_v18  ;;  %v8002_v30 = vpack.c.bf16 %v3709_v56, %v3707_v11  ;;  %v3725_v6 = vsel %vm3706_vm13, %v9464_v34, %v9458_v29 }
 0xf3f   :  { %v9494_v21 = vunpack.i.h.bf16 %v9492_v31  ;;  %v9493_v7 = vunpack.i.l.bf16 %v9492_v31  ;;  %v9479_v36 = vunpack.i.h.bf16 %v9477_v16  ;;  %v9478_v15 = vunpack.i.l.bf16 %v9477_v16 }
 0xf40   :  { %8001 = vmatprep.subr.bf16.mxu1 %v8000_v10  ;;  %v3723_v31 = vsel %vm3706_vm13, %v9463_v60, %v9453_v39 }
 0xf41   :  { %8003 = vmatpush1.bf16.msra.mxu1 %v8002_v30  ;;  %v3712_v12 = vsel %vm3706_vm13, %v9478_v15, %v9479_v36  ;;  %v3714_v17 = vsel %vm3706_vm13, %v9493_v7, %v9494_v21  ;;  %v8016_v30 = vpack.c.bf16 %v3726_v51, %v3724_v53  ;;  %v8018_v50 = vpack.c.bf16 %v3725_v6, %v3723_v31 }
 0xf42   :  { %v9507_v37 = vpop.permute.xlu1 %9506  ;;  %v9487_v14 = vpop.permute.xlu0 %9486  ;;  %v8004_v62 = vpack.c.bf16 %v3714_v17, %v3712_v12  ;;  %v3728_v17 = vsel %vm3706_vm13, %v9468_v4, %v9469_v24 }
 0xf43   :  { %v9508_v44 = vunpack.i.l.bf16 %v9507_v37  ;;  %v9509_v63 = vunpack.i.h.bf16 %v9507_v37  ;;  %v9489_v48 = vunpack.i.h.bf16 %v9487_v14  ;;  %v9488_v45 = vunpack.i.l.bf16 %v9487_v14 }
 0xf44   :  { %8005 = vmatprep.subr.bf16.mxu1 %v8004_v62 }
 0xf45   :  { %v3715_v23 = vsel %vm3706_vm13, %v9508_v44, %v9483_v58  ;;  %v3720_v41 = vsel %vm3706_vm13, %v9488_v45, %v9489_v48 }
 0xf46   :  { %v9512_v28 = vpop.permute.xlu1 %9511  ;;  %v9497_v61 = vpop.permute.xlu0 %9496 }
 0xf47   :  { %v9499_v35 = vunpack.i.h.bf16 %v9497_v61  ;;  %v9498_v32 = vunpack.i.l.bf16 %v9497_v61  ;;  %v9514_v20 = vunpack.i.h.bf16 %v9512_v28  ;;  %v9513_v55 = vunpack.i.l.bf16 %v9512_v28 }
 0xf49   :  { %v3713_v59 = vsel %vm3706_vm13, %v9499_v35, %v9493_v7  ;;  %v3711_v1 = vsel %vm3706_vm13, %v9498_v32, %v9478_v15  ;;  %v3722_v5 = vsel %vm3706_vm13, %v9513_v55, %v9514_v20 }
 0xf4a   :  { %v9517_v0 = vpop.permute.xlu1 %9516  ;;  %v9502_v54 = vpop.permute.xlu0 %9501  ;;  %v8006_v22 = vpack.c.bf16 %v3713_v59, %v3711_v1  ;;  %v8012_v43 = vpack.c.bf16 %v3722_v5, %v3720_v41 }
 0xf4b   :  { %v9504_v2 = vunpack.i.h.bf16 %v9502_v54  ;;  %v9503_v38 = vunpack.i.l.bf16 %v9502_v54  ;;  %v9519_v42 = vunpack.i.h.bf16 %v9517_v0  ;;  %v9518_v8 = vunpack.i.l.bf16 %v9517_v0 }
 0xf4c   :  { %8007 = vmatpush1.bf16.msra.mxu1 %v8006_v22 }
 0xf4d   :  { %v3717_v57 = vsel %vm3706_vm13, %v9509_v63, %v9503_v38  ;;  %v3718_v49 = vsel %vm3706_vm13, %v9503_v38, %v9504_v2  ;;  %v3730_v21 = vsel %vm3706_vm13, %v9518_v8, %v9519_v42  ;;  %v3582_v42 = vld [vmem:[%s11071_s25] sm:$0xff] }
 0xf4e   :  { %v9532_v52 = vpop.permute.xlu1 %9531  ;;  %v9522_v19 = vpop.permute.xlu0 %9521  ;;  %v8008_v9 = vpack.c.bf16 %v3718_v49, %v3716_v3  ;;  %v8010_v13 = vpack.c.bf16 %v3717_v57, %v3715_v23  ;;  %v8020_v61 = vpack.c.bf16 %v3730_v21, %v3728_v17 }
 0xf4f   :  { %v9524_v26 = vunpack.i.h.bf16 %v9522_v19  ;;  %v9523_v46 = vunpack.i.l.bf16 %v9522_v19  ;;  %v9534_v7 = vunpack.i.h.bf16 %v9532_v52  ;;  %v9533_v36 = vunpack.i.l.bf16 %v9532_v52 }
 0xf50   :  { %8009 = vmatprep.subr.bf16.mxu1 %v8008_v9 }
 0xf51   :  { %v3721_v40 = vsel %vm3706_vm13, %v9524_v26, %v9513_v55  ;;  %v3719_v47 = vsel %vm3706_vm13, %v9523_v46, %v9488_v45  ;;  %8011 = vmatpush1.bf16.msra.mxu1 %v8010_v13  ;;  %v3732_v55 = vsel %vm3706_vm13, %v9533_v36, %v9534_v7 }
 0xf52   :  { %v9542_v11 = vpop.permute.xlu1 %9541  ;;  %v9527_v56 = vpop.permute.xlu0 %9526  ;;  %8013 = vmatprep.subr.bf16.mxu1 %v8012_v43  ;;  %v8014_v18 = vpack.c.bf16 %v3721_v40, %v3719_v47  ;;  %v3584_v40 = vld [vmem:[%s11071_s25 + $0x10] sm:$0xff] }
 0xf53   :  { %v9529_v16 = vunpack.i.h.bf16 %v9527_v56  ;;  %v9528_v10 = vunpack.i.l.bf16 %v9527_v56  ;;  %v9544_v32 = vunpack.i.h.bf16 %v9542_v11  ;;  %v9543_v33 = vunpack.i.l.bf16 %v9542_v11 }
 0xf54   :  { %v3866_v11 = vstv %s7214_s29  ;;  %s14775_s29 = sld [smem:[#allocation12_spill]] }
 0xf55   :  { %8015 = vmatpush1.bf16.msra.mxu1 %v8014_v18  ;;  %v3729_v37 = vsel %vm3706_vm13, %v9529_v16, %v9518_v8  ;;  %v3727_v14 = vsel %vm3706_vm13, %v9528_v10, %v9468_v4  ;;  %v3731_v48 = vsel %vm3706_vm13, %v9543_v33, %v9533_v36  ;;  %v3585_v8 = vld [vmem:[%s11071_s25 + $0x18] sm:$0xff]  ;;  %s11018_s25 = smov 108  }
 0xf56   :  { %v9552_v15 = vpop.permute.xlu1 %9551  ;;  %v9537_v12 = vpop.permute.xlu0 %9536  ;;  %8017 = vmatprep.subr.bf16.mxu1 %v8016_v30  ;;  %v8022_v20 = vpack.c.bf16 %v3729_v37, %v3727_v14 }
 0xf57   :  { %v9539_v62 = vunpack.i.h.bf16 %v9537_v12  ;;  %v9538_v28 = vunpack.i.l.bf16 %v9537_v12  ;;  %v9554_v59 = vunpack.i.h.bf16 %v9552_v15  ;;  %v9553_v1 = vunpack.i.l.bf16 %v9552_v15 }
 0xf59   :  { %8019 = vmatpush1.bf16.msra.mxu1 %v8018_v50  ;;  %v3734_v35 = vsel %vm3706_vm13, %v9538_v28, %v9539_v62  ;;  %v3733_v0 = vsel %vm3706_vm13, %v9544_v32, %v9538_v28  ;;  %v3738_v29 = vsel %vm3706_vm13, %v9553_v1, %v9554_v59  ;;  %v14755_v59 = vld [vmem:[#allocation20_spill] sm:$0xff] }
 0xf5a   :  { %v9562_v58 = vpop.permute.xlu1 %9561  ;;  %v9547_v44 = vpop.permute.xlu0 %9546  ;;  %8021 = vmatprep.subr.bf16.mxu1 %v8020_v61  ;;  %v8024_v54 = vpack.c.bf16 %v3734_v35, %v3732_v55  ;;  %v8026_v25 = vpack.c.bf16 %v3733_v0, %v3731_v48 }
 0xf5b   :  { %v9549_v27 = vunpack.i.h.bf16 %v9547_v44  ;;  %v9548_v63 = vunpack.i.l.bf16 %v9547_v44  ;;  %v9564_v3 = vunpack.i.h.bf16 %v9562_v58  ;;  %v9563_v57 = vunpack.i.l.bf16 %v9562_v58  ;;  %v13759_v44 = vld [vmem:[%s11171_s24] sm:$0x3]  ;;  %s11019_s24 = smov 76  }
 0xf5d   :  { %8023 = vmatpush1.bf16.msra.mxu1 %v8022_v20  ;;  %v3736_v22 = vsel %vm3706_vm13, %v9548_v63, %v9549_v27  ;;  %v3740_v41 = vsel %vm3706_vm13, %v9563_v57, %v9564_v3  ;;  %v14754_v20 = vmov 0  }
 0xf5e   :  { %v9572_v45 = vpop.permute.xlu1 %9571  ;;  %v9557_v2 = vpop.permute.xlu0 %9556  ;;  %8025 = vmatprep.subr.bf16.mxu1 %v8024_v54  ;;  %v8028_v23 = vpack.c.bf16 %v3738_v29, %v3736_v22  ;;  %v14756_v29 = vld [vmem:[#allocation21_spill] sm:$0xff] }
 0xf5f   :  { %v9559_v38 = vunpack.i.h.bf16 %v9557_v2  ;;  %v9558_v39 = vunpack.i.l.bf16 %v9557_v2  ;;  %v9573_v49 = vunpack.i.l.bf16 %v9572_v45  ;;  %v9574_v9 = vunpack.i.h.bf16 %v9572_v45 }
 0xf61   :  { %v3737_v5 = vsel %vm3706_vm13, %v9559_v38, %v9553_v1  ;;  %v3735_v34 = vsel %vm3706_vm13, %v9558_v39, %v9548_v63  ;;  %8027 = vmatpush1.bf16.msra.mxu1 %v8026_v25  ;;  %v3739_v26 = vsel %vm3706_vm13, %v9573_v49, %v9563_v57 }
 0xf62   :  { %v9567_v52 = vpop.permute.xlu0 %9566  ;;  %8029 = vmatprep.subr.bf16.mxu1 %v8028_v23  ;;  %v8030_v19 = vpack.c.bf16 %v3737_v5, %v3735_v34 }
 0xf63   :  { %v9569_v13 = vunpack.i.h.bf16 %v9567_v52  ;;  %v9568_v60 = vunpack.i.l.bf16 %v9567_v52 }
 0xf65   :  { %v3741_v46 = vsel %vm3706_vm13, %v9574_v9, %v9568_v60  ;;  %8031 = vmatpush1.bf16.msra.mxu1 %v8030_v19  ;;  %v3742_v43 = vsel %vm3706_vm13, %v9568_v60, %v9569_v13 }
 0xf66   :  { %v8032_v53 = vpack.c.bf16 %v3742_v43, %v3740_v41  ;;  %v8034_v51 = vpack.c.bf16 %v3741_v46, %v3739_v26 }
 0xf68   :  { %8033 = vmatprep.subr.bf16.mxu1 %v8032_v53 }
 0xf69   :  { %8035 = vmatpush1.bf16.msra.mxu1 %v8034_v51 }
 0xf6c   :  { %3850 = vmatmul.mubr.f32.vlgmr.msra.gmra.mrb[24].mxu1 %v3582_v42 }
 0xf6d   :  { %7216 = vmatprep.mubr.msk.f32.mxu1 %vm2628_vm15, %v3585_v8 }
 0xf6f   :  { %v3596_v6 = vpop.permute.xlu1 %3595 }
 0xf70   :  { %3856 = vmatmul.mubr.f32.gmra.mrb[26].mxu1 %v3584_v40 }
 0xf73   :  { %v3591_v47 = vpop.permute.xlu0 %3590 }
0x103f   :  { %v3851_v24 = vpop.f32.mrb[24].mxu1 }
0x1040   :  { %v3852_v4 = vadd.f32 %v3851_v24, %v3591_v47  ;;  %v3853_v56 = vpop.f32.mrb[25].mxu1 }
0x1041   :  { %v3854_v18 = vadd.f32 %v3853_v56, %v3591_v47 }
0x1042   :  { %v3867_v10 = vmul.f32 %v3866_v11, %v3852_v4  ;;  %vm3862_vm4 = vcmp.ge.f32.partialorder %v3852_v4, 0.0 }
0x1043   :  { %vm3863_vm2 = vcmp.ge.f32.partialorder %v3854_v18, 0.0  ;;  %v3868_v31 = vmul.f32 %v3866_v11, %v3854_v18  ;;  %v3857_v16 = vpop.f32.mrb[26].mxu1 }
0x1044   :  { %v3858_v30 = vadd.f32 %v3857_v16, %v3596_v6  ;;  %v3859_v21 = vpop.f32.mrb[27].mxu1  ;;  %v3871_v50 = vsel %vm3862_vm4, %v3852_v4, %v3867_v10  ;;  %vm3906_vm4 = vcmask 883712  }
0x1045   :  { %v3872_v7 = vsel %vm3863_vm2, %v3854_v18, %v3868_v31  ;;  %v3860_v36 = vadd.f32 %v3859_v21, %v3596_v6  ;;  %vm3876_vm2 = vcmp.eq.s32.totalorder %v13759_v44, 1 }
0x1046   :  { %vm3864_vm5 = vcmp.ge.f32.partialorder %v3858_v30, 0.0  ;;  %v3869_v15 = vmul.f32 %v3866_v11, %v3858_v30  ;;  %v3883_v55 = vsel %vm3876_vm2, 1, %v14754_v20  ;;  %vm3917_vm2 = vcmp.eq.s32.totalorder %v13759_v44, 2 }
0x1047   :  { %vm3865_vm6 = vcmp.ge.f32.partialorder %v3860_v36, 0.0  ;;  %v3870_v12 = vmul.f32 %v3866_v11, %v3860_v36  ;;  %v3887_v1 = vrot.slane %v3883_v55, %v14755_v59  ;;  %v3891_v3 = vrot.slane %v3883_v55, %v14756_v29 }
0x1048   :  { %v3873_v17 = vsel %vm3864_vm5, %v3858_v30, %v3869_v15  ;;  %v3930_v51 = vsel %vm3917_vm2, 1, %v14754_v20  ;;  %vm3964_vm2 = vcmp.eq.s32.totalorder %v13759_v44, 3 }
0x1049   :  { %v9575_v37 = vpack.i.bf16 %v3873_v17, %v3871_v50  ;;  %v3874_v14 = vsel %vm3865_vm6, %v3860_v36, %v3870_v12  ;;  %vm3892_vm5 = vcmp.eq.s32.totalorder %v3887_v1, 1  ;;  %vm3893_vm6 = vcmp.eq.s32.totalorder %v3891_v3, 1 }
0x104a   :  { %v3934_v42 = vrot.slane %v3930_v51, %v14755_v59  ;;  %v3938_v10 = vrot.slane %v3930_v51, %v14756_v29 }
0x104b   :  { %9576 = vrot.lane.b32.xlu0 %v9575_v37, %s11010_s21 }
0x10bd   :  { %v9577_v62 = vpop.permute.xlu0 %9576 }
0x10be   :  { %v9579_v28 = vunpack.i.h.bf16 %v9577_v62  ;;  %v9578_v61 = vunpack.i.l.bf16 %v9577_v62 }
0x10c0   :  { %v3882_v35 = vsel %vm3455_vm3, %v9579_v28, %v3874_v14  ;;  %v3881_v32 = vsel %vm3455_vm3, %v9578_v61, %v3872_v7 }
0x10c1   :  { %v9585_v33 = vpack.i.bf16 %v3882_v35, %v3873_v17  ;;  %v9580_v58 = vpack.i.bf16 %v3881_v32, %v3871_v50 }
0x10c3   :  { %9586 = vrot.lane.b32.xlu0 %v9585_v33, %s11018_s25  ;;  %9581 = vrot.lane.b32.xlu1 %v9580_v58, %s11018_s25  ;;  %s14776_s25 = sld [smem:[#allocation13_spill]] }
0x1135   :  { %v9587_v27 = vpop.permute.xlu0 %9586  ;;  %v9582_v63 = vpop.permute.xlu1 %9581 }
0x1136   :  { %v9589_v0 = vunpack.i.h.bf16 %v9587_v27  ;;  %v9588_v54 = vunpack.i.l.bf16 %v9587_v27  ;;  %v9584_v22 = vunpack.i.h.bf16 %v9582_v63  ;;  %v9583_v48 = vunpack.i.l.bf16 %v9582_v63 }
0x1138   :  { %v3908_v45 = vsel %vm3906_vm4, %v9588_v54, %v9589_v0  ;;  %v3907_v2 = vsel %vm3906_vm4, %v9583_v48, %v9584_v22  ;;  %v3916_v5 = vsel %vm3893_vm6, %v9589_v0, %v3874_v14  ;;  %v3914_v34 = vsel %vm3893_vm6, %v9584_v22, %v3872_v7 }
0x1139   :  { %v3913_v38 = vsel %vm3892_vm5, %v3907_v2, %v3871_v50  ;;  %v3915_v39 = vsel %vm3892_vm5, %v3908_v45, %v3873_v17  ;;  %vm3953_vm4 = vcmask 621568   ;;  %vm3939_vm5 = vcmp.eq.s32.totalorder %v3934_v42, 1 }
0x113a   :  { %v9590_v25 = vpack.i.bf16 %v3915_v39, %v3913_v38  ;;  %vm3940_vm6 = vcmp.eq.s32.totalorder %v3938_v10, 1  ;;  %v3971_v14 = vsel %vm3964_vm2, 1, %v14754_v20 }
0x113b   :  { %v3975_v62 = vrot.slane %v3971_v14, %v14755_v59  ;;  %v3979_v54 = vrot.slane %v3971_v14, %v14756_v29 }
0x113c   :  { %9591 = vrot.lane.b32.xlu1 %v9590_v25, %s11010_s21 }
0x11ae   :  { %v9592_v23 = vpop.permute.xlu1 %9591 }
0x11af   :  { %v9594_v57 = vunpack.i.h.bf16 %v9592_v23  ;;  %v9593_v49 = vunpack.i.l.bf16 %v9592_v23 }
0x11b1   :  { %v3923_v52 = vsel %vm3455_vm3, %v9594_v57, %v3916_v5  ;;  %v3920_v19 = vsel %vm3455_vm3, %v9593_v49, %v3914_v34 }
0x11b2   :  { %v9595_v9 = vpack.i.bf16 %v3923_v52, %v3920_v19 }
0x11b4   :  { %9596 = vrot.lane.b32.xlu0 %v9595_v9, %s11010_s21 }
0x1226   :  { %v9597_v13 = vpop.permute.xlu0 %9596 }
0x1227   :  { %v9599_v60 = vunpack.i.h.bf16 %v9597_v13  ;;  %v9598_v26 = vunpack.i.l.bf16 %v9597_v13 }
0x1229   :  { %v3929_v46 = vsel %vm3455_vm3, %v9599_v60, %v9594_v57  ;;  %v3928_v41 = vsel %vm3455_vm3, %v9598_v26, %v9593_v49 }
0x122a   :  { %v9605_v43 = vpack.i.bf16 %v3929_v46, %v3923_v52  ;;  %v9600_v53 = vpack.i.bf16 %v3928_v41, %v3920_v19 }
0x122c   :  { %9606 = vrot.lane.b32.xlu0 %v9605_v43, %s11019_s24  ;;  %9601 = vrot.lane.b32.xlu1 %v9600_v53, %s11019_s24  ;;  %s7236_s24 = sld [smem:[#allocation2 + $0x6]] }
0x129e   :  { %v9607_v8 = vpop.permute.xlu0 %9606  ;;  %v9602_v40 = vpop.permute.xlu1 %9601 }
0x129f   :  { %v9609_v47 = vunpack.i.h.bf16 %v9607_v8  ;;  %v9608_v24 = vunpack.i.l.bf16 %v9607_v8  ;;  %v9604_v4 = vunpack.i.h.bf16 %v9602_v40  ;;  %v9603_v11 = vunpack.i.l.bf16 %v9602_v40 }
0x12a1   :  { %v3955_v56 = vsel %vm3953_vm4, %v9608_v24, %v9609_v47  ;;  %v3954_v18 = vsel %vm3953_vm4, %v9603_v11, %v9604_v4  ;;  %v3963_v36 = vsel %vm3940_vm6, %v9609_v47, %v3916_v5  ;;  %v3961_v15 = vsel %vm3940_vm6, %v9604_v4, %v3914_v34 }
0x12a2   :  { %v3960_v6 = vsel %vm3939_vm5, %v3954_v18, %v3913_v38  ;;  %v3962_v31 = vsel %vm3939_vm5, %v3955_v56, %v3915_v39  ;;  %vm3980_vm4 = vcmp.eq.s32.totalorder %v3975_v62, 1  ;;  %vm3981_vm5 = vcmp.eq.s32.totalorder %v3979_v54, 1 }
0x12a3   :  { %v9610_v16 = vpack.i.bf16 %v3962_v31, %v3960_v6  ;;  %vm4004_vm6 = vcmp.eq.s32.totalorder %v13759_v44, 4 }
0x12a4   :  { %v4017_v9 = vsel %vm4004_vm6, 1, %v14754_v20 }
0x12a5   :  { %9611 = vrot.lane.b32.xlu1 %v9610_v16, %s11010_s21  ;;  %v4021_v13 = vrot.slane %v4017_v9, %v14755_v59  ;;  %v4025_v11 = vrot.slane %v4017_v9, %v14756_v29 }
0x12a7   :  { %vm4026_vm2 = vcmp.eq.s32.totalorder %v4021_v13, 1 }
0x1317   :  { %v9612_v30 = vpop.permute.xlu1 %9611 }
0x1318   :  { %v9614_v21 = vunpack.i.h.bf16 %v9612_v30  ;;  %v9613_v7 = vunpack.i.l.bf16 %v9612_v30 }
0x131a   :  { %v3970_v12 = vsel %vm3455_vm3, %v9614_v21, %v3963_v36  ;;  %v3969_v50 = vsel %vm3455_vm3, %v9613_v7, %v3961_v15 }
0x131b   :  { %v9620_v17 = vpack.i.bf16 %v3970_v12, %v3962_v31  ;;  %v9615_v37 = vpack.i.bf16 %v3969_v50, %v3960_v6 }
0x131d   :  { %9621 = vrot.lane.b32.xlu1 %v9620_v17, %s11001_s15  ;;  %9616 = vrot.lane.b32.xlu0 %v9615_v37, %s11001_s15 }
0x138f   :  { %v9622_v28 = vpop.permute.xlu1 %9621  ;;  %v9617_v61 = vpop.permute.xlu0 %9616 }
0x1390   :  { %v9624_v35 = vunpack.i.h.bf16 %v9622_v28  ;;  %v9623_v32 = vunpack.i.l.bf16 %v9622_v28  ;;  %v9619_v33 = vunpack.i.h.bf16 %v9617_v61  ;;  %v9618_v58 = vunpack.i.l.bf16 %v9617_v61 }
0x1392   :  { %v3995_v55 = vsel %vm758_vm8, %v9623_v32, %v9624_v35  ;;  %v3994_v1 = vsel %vm758_vm8, %v9618_v58, %v9619_v33  ;;  %v4003_v2 = vsel %vm3981_vm5, %v9624_v35, %v3963_v36  ;;  %v4001_v38 = vsel %vm3981_vm5, %v9619_v33, %v3961_v15 }
0x1393   :  { %v4000_v27 = vsel %vm3980_vm4, %v3994_v1, %v3960_v6  ;;  %v4002_v63 = vsel %vm3980_vm4, %v3995_v55, %v3962_v31  ;;  %vm4046_vm4 = vcmask 474112   ;;  %vm4027_vm5 = vcmp.eq.s32.totalorder %v4025_v11, 1 }
0x1394   :  { %v9625_v0 = vpack.i.bf16 %v4002_v63, %v4000_v27 }
0x1396   :  { %9626 = vrot.lane.b32.xlu0 %v9625_v0, %s11010_s21 }
0x1408   :  { %v9627_v22 = vpop.permute.xlu0 %9626 }
0x1409   :  { %v9629_v48 = vunpack.i.h.bf16 %v9627_v22  ;;  %v9628_v45 = vunpack.i.l.bf16 %v9627_v22 }
0x140b   :  { %v4010_v39 = vsel %vm3455_vm3, %v9629_v48, %v4003_v2  ;;  %v4007_v25 = vsel %vm3455_vm3, %v9628_v45, %v4001_v38 }
0x140c   :  { %v9630_v3 = vpack.i.bf16 %v4010_v39, %v4007_v25 }
0x140e   :  { %9631 = vrot.lane.b32.xlu1 %v9630_v3, %s11010_s21 }
0x1480   :  { %v9632_v23 = vpop.permute.xlu1 %9631 }
0x1481   :  { %v9634_v57 = vunpack.i.h.bf16 %v9632_v23  ;;  %v9633_v49 = vunpack.i.l.bf16 %v9632_v23 }
0x1483   :  { %v4016_v5 = vsel %vm3455_vm3, %v9634_v57, %v9629_v48  ;;  %v4015_v34 = vsel %vm3455_vm3, %v9633_v49, %v9628_v45 }
0x1484   :  { %v9640_v52 = vpack.i.bf16 %v4016_v5, %v4010_v39  ;;  %v9635_v19 = vpack.i.bf16 %v4015_v34, %v4007_v25 }
0x1486   :  { %9641 = vrot.lane.b32.xlu1 %v9640_v52, %s11020_s0  ;;  %9636 = vrot.lane.b32.xlu0 %v9635_v19, %s11020_s0 }
0x148a   :  { %9646 = vrot.lane.b32.xlu0 %v9632_v23, %s11020_s0 }
0x14f8   :  { %v9642_v60 = vpop.permute.xlu1 %9641  ;;  %v9637_v26 = vpop.permute.xlu0 %9636 }
0x14f9   :  { %v9644_v46 = vunpack.i.h.bf16 %v9642_v60  ;;  %v9643_v41 = vunpack.i.l.bf16 %v9642_v60  ;;  %v9639_v43 = vunpack.i.h.bf16 %v9637_v26  ;;  %v9638_v53 = vunpack.i.l.bf16 %v9637_v26 }
0x14fb   :  { %v4049_v51 = vsel %vm4046_vm4, %v9643_v41, %v9644_v46  ;;  %v4047_v42 = vsel %vm4046_vm4, %v9638_v53, %v9639_v43 }
0x14fc   :  { %v4057_v8 = vsel %vm4026_vm2, %v4049_v51, %v4002_v63  ;;  %v4055_v40 = vsel %vm4026_vm2, %v4047_v42, %v4000_v27  ;;  %v9647_v44 = vpop.permute.xlu0 %9646 }
0x14fd   :  { %v9650_v47 = vpack.i.bf16 %v4057_v8, %v4055_v40  ;;  %v9649_v24 = vunpack.i.h.bf16 %v9647_v44  ;;  %v9648_v4 = vunpack.i.l.bf16 %v9647_v44 }
0x14ff   :  { %9651 = vrot.lane.b32.xlu1 %v9650_v47, %s11010_s21  ;;  %v4050_v56 = vsel %vm4046_vm4, %v9644_v46, %v9649_v24  ;;  %v4048_v18 = vsel %vm4046_vm4, %v9639_v43, %v9648_v4 }
0x1500   :  { %v4056_v10 = vsel %vm4027_vm5, %v4048_v18, %v4001_v38  ;;  %v4058_v30 = vsel %vm4027_vm5, %v4050_v56, %v4003_v2 }
0x1501   :  { %v9705_v62 = vpack.i.bf16 %v4056_v10, %v4055_v40  ;;  %v9710_v28 = vpack.i.bf16 %v4058_v30, %v4057_v8 }
0x1571   :  { %v9652_v6 = vpop.permute.xlu1 %9651 }
0x1572   :  { %v9654_v31 = vunpack.i.h.bf16 %v9652_v6  ;;  %v9653_v16 = vunpack.i.l.bf16 %v9652_v6 }
0x1574   :  { %v4062_v21 = vsel %vm3455_vm3, %v9653_v16, %v4056_v10  ;;  %v4065_v7 = vsel %vm3455_vm3, %v9654_v31, %v4058_v30 }
0x1575   :  { %v9660_v36 = vpack.i.bf16 %v4065_v7, %v4062_v21  ;;  %v9715_v61 = vpack.i.bf16 %v4062_v21, %v4055_v40  ;;  %v9720_v35 = vpack.i.bf16 %v4065_v7, %v4057_v8 }
0x1577   :  { %9661 = vrot.lane.b32.xlu1 %v9660_v36, %s11000_s6  ;;  %9656 = vrot.lane.b32.xlu0 %v9660_v36, %s11010_s21 }
0x15e9   :  { %v9657_v29 = vpop.permute.xlu0 %9656  ;;  %v13835_v32 = vpop.permute.xlu1 %9661 }
0x15ea   :  { %v9659_v15 = vunpack.i.h.bf16 %v9657_v29  ;;  %v9658_v12 = vunpack.i.l.bf16 %v9657_v29  ;;  %v9664_v21 = vunpack.i.h.bf16 %v13835_v32  ;;  %v9663_v7 = vunpack.i.l.bf16 %v13835_v32 }
0x15ec   :  { %v4070_v50 = vsel %vm3455_vm3, %v9658_v12, %v9653_v16  ;;  %v4071_v17 = vsel %vm3455_vm3, %v9659_v15, %v9654_v31 }
0x15ed   :  { %v9670_v37 = vpack.i.bf16 %v9658_v12, %v4070_v50  ;;  %v13810_v14 = vpack.i.bf16 %v9659_v15, %v4071_v17 }
0x15ef   :  { %9671 = vrot.lane.b32.xlu0 %v9670_v37, %s11001_s15  ;;  %9666 = vrot.lane.b32.xlu1 %v9670_v37, %s11000_s6 }
0x15f3   :  { %9676 = vrot.lane.b32.xlu0 %v13810_v14, %s11000_s6  ;;  %9686 = vrot.lane.b32.xlu1 %v9670_v37, %s11011_s4 }
0x15f7   :  { %9681 = vrot.lane.b32.xlu0 %v9660_v36, %s11001_s15  ;;  %9691 = vrot.lane.b32.xlu1 %v13810_v14, %s11001_s15 }
0x15fb   :  { %9701 = vrot.lane.b32.xlu0 %v13810_v14, %s11011_s4  ;;  %9696 = vrot.lane.b32.xlu1 %v9660_v36, %s11011_s4 }
0x15ff   :  { %9706 = vrot.lane.b32.xlu0 %v9705_v62, %s11012_s1  ;;  %9711 = vrot.lane.b32.xlu1 %v9710_v28, %s11012_s1  ;;  %s11028_s1 = smov 26  }
0x1603   :  { %9716 = vrot.lane.b32.xlu0 %v9715_v61, %s11013_s28  ;;  %9721 = vrot.lane.b32.xlu1 %v9720_v35, %s11013_s28 }
0x1607   :  { %9726 = vrot.lane.b32.xlu0 %v9715_v61, %s11014_s2  ;;  %9731 = vrot.lane.b32.xlu1 %v9720_v35, %s11014_s2  ;;  %s11030_s2 = smov 124  }
0x160b   :  { %9736 = vrot.lane.b32.xlu0 %v9715_v61, %s11015_s7  ;;  %9741 = vrot.lane.b32.xlu1 %v9720_v35, %s11015_s7  ;;  %s11031_s7 = smov 23  }
0x160f   :  { %9746 = vrot.lane.b32.xlu0 %v9715_v61, %s11016_s10  ;;  %9751 = vrot.lane.b32.xlu1 %v9720_v35, %s11016_s10  ;;  %s11032_s10 = smov 22  }
0x1613   :  { %9756 = vrot.lane.b32.xlu0 %v9670_v37, %s11017_s11 }
0x1617   :  { %9761 = vrot.lane.b32.xlu0 %v9660_v36, %s11017_s11 }
0x1661   :  { %v9672_v33 = vpop.permute.xlu0 %9671  ;;  %v13837_v58 = vpop.permute.xlu1 %9666 }
0x1662   :  { %v9674_v5 = vunpack.i.h.bf16 %v9672_v33  ;;  %v9673_v34 = vunpack.i.l.bf16 %v9672_v33  ;;  %v9669_v13 = vunpack.i.h.bf16 %v13837_v58  ;;  %v9668_v60 = vunpack.i.l.bf16 %v13837_v58 }
0x1664   :  { %v4107_v41 = vsel %vm758_vm8, %v9673_v34, %v9674_v5  ;;  %v4091_v42 = vsel %vm740_vm9, %v9668_v60, %v9669_v13  ;;  %v4090_v62 = vsel %vm740_vm9, %v9663_v7, %v9668_v60 }
0x1665   :  { %v9677_v55 = vpop.permute.xlu0 %9676  ;;  %v13839_v1 = vpop.permute.xlu1 %9686  ;;  %v9795_v51 = vpack.i.bf16 %v9674_v5, %v4107_v41  ;;  %v9790_v11 = vpack.i.bf16 %v9669_v13, %v4091_v42 }
0x1666   :  { %v9679_v43 = vunpack.i.h.bf16 %v9677_v55  ;;  %v9678_v53 = vunpack.i.l.bf16 %v9677_v55  ;;  %v9689_v8 = vunpack.i.h.bf16 %v13839_v1  ;;  %v9688_v40 = vunpack.i.l.bf16 %v13839_v1 }
0x1668   :  { %v4093_v47 = vsel %vm740_vm9, %v9678_v53, %v9679_v43  ;;  %v4123_v18 = vsel %vm3518_vm7, %v9688_v40, %v9689_v8  ;;  %v4092_v12 = vsel %vm740_vm9, %v9664_v21, %v9678_v53 }
0x1669   :  { %v9682_v27 = vpop.permute.xlu0 %9681  ;;  %v13841_v63 = vpop.permute.xlu1 %9691  ;;  %v9805_v56 = vpack.i.bf16 %v9679_v43, %v4093_v47  ;;  %v9800_v36 = vpack.i.bf16 %v9689_v8, %v4123_v18  ;;  %v9810_v33 = vpack.i.bf16 %v4092_v12, %v4090_v62 }
0x166a   :  { %v9684_v44 = vunpack.i.h.bf16 %v9682_v27  ;;  %v9683_v24 = vunpack.i.l.bf16 %v9682_v27  ;;  %v9693_v4 = vunpack.i.l.bf16 %v13841_v63  ;;  %v9694_v29 = vunpack.i.h.bf16 %v13841_v63 }
0x166c   :  { %v4106_v6 = vsel %vm758_vm8, %v9683_v24, %v9673_v34  ;;  %v4108_v31 = vsel %vm758_vm8, %v9684_v44, %v9693_v4  ;;  %v4109_v28 = vsel %vm758_vm8, %v9693_v4, %v9694_v29  ;;  %v4181_v44 = vld [vmem:[%s11081_s3 + $0x8] sm:$0xff] }
0x166d   :  { %v13843_v0 = vpop.permute.xlu0 %9701  ;;  %v13845_v54 = vpop.permute.xlu1 %9696  ;;  %v9820_v15 = vpack.i.bf16 %v4108_v31, %v4106_v6  ;;  %v9815_v63 = vpack.i.bf16 %v9694_v29, %v4109_v28  ;;  %7218 = vmatprep.mubr.msk.f32.mxu1 %vm2628_vm15, %v4181_v44  ;;  %v4184_v6 = vld [vmem:[%s11086_s8] sm:$0xff] }
0x166e   :  { %v9704_v16 = vunpack.i.h.bf16 %v13843_v0  ;;  %v9703_v10 = vunpack.i.l.bf16 %v13843_v0  ;;  %v9699_v35 = vunpack.i.h.bf16 %v13845_v54  ;;  %v9698_v58 = vunpack.i.l.bf16 %v13845_v54 }
0x1670   :  { %v4125_v50 = vsel %vm3518_vm7, %v9703_v10, %v9704_v16 }
0x1671   :  { %v9707_v22 = vpop.permute.xlu0 %9706  ;;  %v9712_v48 = vpop.permute.xlu1 %9711  ;;  %v9825_v61 = vpack.i.bf16 %v9704_v16, %v4125_v50 }
0x1672   :  { %v9709_v45 = vunpack.i.h.bf16 %v9707_v22  ;;  %v9708_v2 = vunpack.i.l.bf16 %v9707_v22  ;;  %v9714_v38 = vunpack.i.h.bf16 %v9712_v48  ;;  %v9713_v39 = vunpack.i.l.bf16 %v9712_v48 }
0x1673   :  { %v4124_v48 = vsel %vm3518_vm7, %v9699_v35, %v9703_v10 }
0x1674   :  { %v4138_v25 = vsel %vm3535_vm0, %v9708_v2, %v9709_v45  ;;  %v4139_v3 = vsel %vm3535_vm0, %v9713_v39, %v9714_v38  ;;  %v9775_v26 = vpack.i.bf16 %v9713_v39, %v9708_v2 }
0x1675   :  { %v9765_v23 = vpack.i.bf16 %v9709_v45, %v4138_v25  ;;  %v9770_v57 = vpack.i.bf16 %v9714_v38, %v4139_v3  ;;  %v13849_v49 = vpop.permute.xlu0 %9716  ;;  %v9722_v30 = vpop.permute.xlu1 %9721  ;;  %v4122_v45 = vsel %vm3518_vm7, %v9698_v58, %v9688_v40 }
0x1676   :  { %v9719_v52 = vunpack.i.h.bf16 %v13849_v49  ;;  %v9718_v19 = vunpack.i.l.bf16 %v13849_v49  ;;  %v9724_v17 = vunpack.i.h.bf16 %v9722_v30  ;;  %v9723_v37 = vunpack.i.l.bf16 %v9722_v30 }
0x1677   :  { %9766 = vrot.lane.b32.xlu0 %v9765_v23, %s11017_s11  ;;  %9771 = vrot.lane.b32.xlu1 %v9770_v57, %s11017_s11  ;;  %v9835_v3 = vpack.i.bf16 %v4124_v48, %v4122_v45 }
0x1678   :  { %v4148_v9 = vsel %vm3546_vm11, %v9718_v19, %v9719_v52  ;;  %v4149_v55 = vsel %vm3546_vm11, %v9723_v37, %v9724_v17  ;;  %v9840_v34 = vpack.i.bf16 %v9723_v37, %v9718_v19 }
0x1679   :  { %v9780_v46 = vpack.i.bf16 %v9719_v52, %v4148_v9  ;;  %v9732_v32 = vpop.permute.xlu1 %9731  ;;  %v9830_v0 = vpack.i.bf16 %v9724_v17, %v4149_v55 }
0x167a   :  { %v9734_v39 = vunpack.i.h.bf16 %v9732_v32  ;;  %v9733_v25 = vunpack.i.l.bf16 %v9732_v32 }
0x167b   :  { %9781 = vrot.lane.b32.xlu1 %v9780_v46, %s11017_s11  ;;  %9776 = vrot.lane.b32.xlu0 %v9775_v26, %s11017_s11 }
0x167c   :  { %v4159_v52 = vsel %vm3557_vm10, %v9733_v25, %v9734_v39 }
0x167d   :  { %v9742_v38 = vpop.permute.xlu1 %9741  ;;  %v9850_v43 = vpack.i.bf16 %v9734_v39, %v4159_v52 }
0x167e   :  { %v9744_v23 = vunpack.i.h.bf16 %v9742_v38  ;;  %v9743_v57 = vunpack.i.l.bf16 %v9742_v38 }
0x167f   :  { %9786 = vrot.lane.b32.xlu1 %v13810_v14, %s11017_s11  ;;  %9796 = vrot.lane.b32.xlu0 %v9795_v51, %s11017_s11  ;;  %v9727_v14 = vpop.permute.xlu0 %9726 }
0x1680   :  { %v9729_v1 = vunpack.i.h.bf16 %v9727_v14  ;;  %v9728_v27 = vunpack.i.l.bf16 %v9727_v14  ;;  %v4169_v26 = vsel %vm3568_vm12, %v9743_v57, %v9744_v23 }
0x1681   :  { %v9865_v53 = vpack.i.bf16 %v9744_v23, %v4169_v26  ;;  %v9752_v19 = vpop.permute.xlu1 %9751 }
0x1682   :  { %v4158_v2 = vsel %vm3557_vm10, %v9728_v27, %v9729_v1  ;;  %v9855_v9 = vpack.i.bf16 %v9733_v25, %v9728_v27  ;;  %v9753_v40 = vunpack.i.l.bf16 %v9752_v19  ;;  %v9754_v47 = vunpack.i.h.bf16 %v9752_v19 }
0x1683   :  { %9806 = vrot.lane.b32.xlu0 %v9805_v56, %s11017_s11  ;;  %9791 = vrot.lane.b32.xlu1 %v9790_v11, %s11017_s11  ;;  %v9737_v22 = vpop.permute.xlu0 %9736  ;;  %v9845_v54 = vpack.i.bf16 %v9729_v1, %v4158_v2  ;;  %v4185_v56 = vld [vmem:[%s11086_s8 + $0x8] sm:$0xff]  ;;  %s7217_s8 = sld [smem:[#allocation2 + $0x3]] }
0x1684   :  { %v9739_v13 = vunpack.i.h.bf16 %v9737_v22  ;;  %v9738_v60 = vunpack.i.l.bf16 %v9737_v22  ;;  %v4179_v11 = vsel %vm3579_vm1, %v9753_v40, %v9754_v47 }
0x1685   :  { %v9880_v18 = vpack.i.bf16 %v9754_v47, %v4179_v11 }
0x1686   :  { %v4168_v51 = vsel %vm3568_vm12, %v9738_v60, %v9739_v13  ;;  %v9870_v24 = vpack.i.bf16 %v9743_v57, %v9738_v60 }
0x1687   :  { %9821 = vrot.lane.b32.xlu0 %v9820_v15, %s11017_s11  ;;  %9801 = vrot.lane.b32.xlu1 %v9800_v36, %s11017_s11  ;;  %v9747_v5 = vpop.permute.xlu0 %9746  ;;  %v9860_v42 = vpack.i.bf16 %v9739_v13, %v4168_v51 }
0x1688   :  { %v9749_v46 = vunpack.i.h.bf16 %v9747_v5  ;;  %v9748_v41 = vunpack.i.l.bf16 %v9747_v5 }
0x168a   :  { %v4178_v49 = vsel %vm3579_vm1, %v9748_v41, %v9749_v46  ;;  %v9885_v4 = vpack.i.bf16 %v9753_v40, %v9748_v41  ;;  %vm14760_vm1 = vcmask 588800  }
0x168b   :  { %9826 = vrot.lane.b32.xlu0 %v9825_v61, %s11017_s11  ;;  %9811 = vrot.lane.b32.xlu1 %v9810_v33, %s11017_s11  ;;  %v9875_v8 = vpack.i.bf16 %v9749_v46, %v4178_v49  ;;  %v9757_v31 = vpop.permute.xlu0 %9756 }
0x168c   :  { %v9759_v36 = vunpack.i.h.bf16 %v9757_v31  ;;  %v9758_v29 = vunpack.i.l.bf16 %v9757_v31 }
0x168e   :  { %v4305_v61 = vsel %vm3706_vm13, %v9758_v29, %v9759_v36 }
0x168f   :  { %9831 = vrot.lane.b32.xlu0 %v9830_v0, %s11017_s11  ;;  %9816 = vrot.lane.b32.xlu1 %v9815_v63, %s11017_s11  ;;  %v9762_v16 = vpop.permute.xlu0 %9761 }
0x1690   :  { %v9763_v15 = vunpack.i.l.bf16 %v9762_v16  ;;  %v9764_v17 = vunpack.i.h.bf16 %v9762_v16 }
0x1692   :  { %v4304_v62 = vsel %vm3706_vm13, %v9763_v15, %v9758_v29 }
0x1693   :  { %9846 = vrot.lane.b32.xlu0 %v9845_v54, %s11017_s11  ;;  %9836 = vrot.lane.b32.xlu1 %v9835_v3, %s11017_s11 }
0x1697   :  { %9856 = vrot.lane.b32.xlu0 %v9855_v9, %s11017_s11  ;;  %9841 = vrot.lane.b32.xlu1 %v9840_v34, %s11017_s11 }
0x169b   :  { %9866 = vrot.lane.b32.xlu0 %v9865_v53, %s11017_s11  ;;  %9851 = vrot.lane.b32.xlu1 %v9850_v43, %s11017_s11 }
0x169f   :  { %9876 = vrot.lane.b32.xlu0 %v9875_v8, %s11017_s11  ;;  %9861 = vrot.lane.b32.xlu1 %v9860_v42, %s11017_s11 }
0x16a3   :  { %9886 = vrot.lane.b32.xlu0 %v9885_v4, %s11017_s11  ;;  %9871 = vrot.lane.b32.xlu1 %v9870_v24, %s11017_s11 }
0x16a7   :  { %4193 = vperm.xlu0 %8578, %v4185_v56   ;;  %9881 = vrot.lane.b32.xlu1 %v9880_v18, %s11017_s11  ;;  %s11033_s11 = smov 101  }
0x16ab   :  { %4188 = vperm.xlu1 %8579, %v4184_v6  }
0x16e9   :  { %v13919_v10 = vpop.permute.xlu0 %9766  ;;  %v13921_v30 = vpop.permute.xlu1 %9771 }
0x16ea   :  { %v9769_v60 = vunpack.i.h.bf16 %v13919_v10  ;;  %v9768_v42 = vunpack.i.l.bf16 %v13919_v10  ;;  %v9774_v8 = vunpack.i.h.bf16 %v13921_v30  ;;  %v9773_v40 = vunpack.i.l.bf16 %v13921_v30 }
0x16ed   :  { %v13923_v21 = vpop.permute.xlu1 %9781  ;;  %v13925_v7 = vpop.permute.xlu0 %9776 }
0x16ee   :  { %v9779_v56 = vunpack.i.h.bf16 %v13925_v7  ;;  %v9778_v10 = vunpack.i.l.bf16 %v13925_v7  ;;  %v9783_v7 = vunpack.i.l.bf16 %v13923_v21 }
0x16f1   :  { %v9787_v12 = vpop.permute.xlu1 %9786  ;;  %v9797_v50 = vpop.permute.xlu0 %9796 }
0x16f2   :  { %v9789_v37 = vunpack.i.h.bf16 %v9787_v12  ;;  %v9788_v14 = vunpack.i.l.bf16 %v9787_v12  ;;  %v9799_v23 = vunpack.i.h.bf16 %v9797_v50  ;;  %v9798_v57 = vunpack.i.l.bf16 %v9797_v50 }
0x16f3   :  { %v4321_v12 = vsel %vm3706_vm13, %v9768_v42, %v9769_v60  ;;  %v4323_v50 = vsel %vm3706_vm13, %v9773_v40, %v9774_v8 }
0x16f4   :  { %v4306_v28 = vsel %vm3706_vm13, %v9764_v17, %v9788_v14  ;;  %v4307_v35 = vsel %vm3706_vm13, %v9788_v14, %v9789_v37  ;;  %v4313_v47 = vsel %vm3706_vm13, %v9798_v57, %v9799_v23 }
0x16f5   :  { %v9807_v32 = vpop.permute.xlu0 %9806  ;;  %v9792_v33 = vpop.permute.xlu1 %9791  ;;  %v8036_v58 = vpack.c.bf16 %v4307_v35, %v4305_v61  ;;  %v8038_v55 = vpack.c.bf16 %v4306_v28, %v4304_v62  ;;  %v9784_v28 = vunpack.i.h.bf16 %v13923_v21 }
0x16f6   :  { %v9809_v1 = vunpack.i.h.bf16 %v9807_v32  ;;  %v9808_v27 = vunpack.i.l.bf16 %v9807_v32  ;;  %v9794_v63 = vunpack.i.h.bf16 %v9792_v33  ;;  %v9793_v0 = vunpack.i.l.bf16 %v9792_v33 }
0x16f7   :  { %8037 = vmatprep.subr.bf16.mxu1 %v8036_v58  ;;  %v4322_v33 = vsel %vm3706_vm13, %v9779_v56, %v9773_v40  ;;  %v4320_v58 = vsel %vm3706_vm13, %v9778_v10, %v9768_v42 }
0x16f8   :  { %8039 = vmatpush1.bf16.msra.mxu1 %v8038_v55  ;;  %v4309_v22 = vsel %vm3706_vm13, %v9793_v0, %v9794_v63  ;;  %v4311_v48 = vsel %vm3706_vm13, %v9808_v27, %v9809_v1  ;;  %v8054_v21 = vpack.c.bf16 %v4322_v33, %v4320_v58 }
0x16f9   :  { %v9822_v45 = vpop.permute.xlu0 %9821  ;;  %v9802_v2 = vpop.permute.xlu1 %9801  ;;  %v8040_v38 = vpack.c.bf16 %v4311_v48, %v4309_v22 }
0x16fa   :  { %v9823_v5 = vunpack.i.l.bf16 %v9822_v45  ;;  %v9824_v26 = vunpack.i.h.bf16 %v9822_v45  ;;  %v9804_v53 = vunpack.i.h.bf16 %v9802_v2  ;;  %v9803_v51 = vunpack.i.l.bf16 %v9802_v2 }
0x16fb   :  { %8041 = vmatprep.subr.bf16.mxu1 %v8040_v38  ;;  %v4325_v2 = vsel %vm3706_vm13, %v9783_v7, %v9784_v28  ;;  %v14757_v28 = vmov 0.0|0.0  }
0x16fc   :  { %v4312_v44 = vsel %vm3706_vm13, %v9823_v5, %v9798_v57  ;;  %v4317_v29 = vsel %vm3706_vm13, %v9803_v51, %v9804_v53 }
0x16fd   :  { %v9827_v54 = vpop.permute.xlu0 %9826  ;;  %v9812_v39 = vpop.permute.xlu1 %9811 }
0x16fe   :  { %v9814_v25 = vunpack.i.h.bf16 %v9812_v39  ;;  %v9813_v3 = vunpack.i.l.bf16 %v9812_v39  ;;  %v9829_v34 = vunpack.i.h.bf16 %v9827_v54  ;;  %v9828_v52 = vunpack.i.l.bf16 %v9827_v54 }
0x1700   :  { %v4310_v9 = vsel %vm3706_vm13, %v9814_v25, %v9808_v27  ;;  %v4308_v13 = vsel %vm3706_vm13, %v9813_v3, %v9793_v0  ;;  %v4319_v11 = vsel %vm3706_vm13, %v9828_v52, %v9829_v34  ;;  %v8052_v27 = vpack.c.bf16 %v4323_v50, %v4321_v12 }
0x1701   :  { %v9832_v46 = vpop.permute.xlu0 %9831  ;;  %v9817_v41 = vpop.permute.xlu1 %9816  ;;  %v8042_v43 = vpack.c.bf16 %v4310_v9, %v4308_v13  ;;  %v8048_v15 = vpack.c.bf16 %v4319_v11, %v4317_v29 }
0x1702   :  { %v9819_v49 = vunpack.i.h.bf16 %v9817_v41  ;;  %v9818_v19 = vunpack.i.l.bf16 %v9817_v41  ;;  %v9834_v17 = vunpack.i.h.bf16 %v9832_v46  ;;  %v9833_v37 = vunpack.i.l.bf16 %v9832_v46 }
0x1703   :  { %8043 = vmatpush1.bf16.msra.mxu1 %v8042_v43 }
0x1704   :  { %v4314_v24 = vsel %vm3706_vm13, %v9824_v26, %v9818_v19  ;;  %v4315_v4 = vsel %vm3706_vm13, %v9818_v19, %v9819_v49  ;;  %v4327_v63 = vsel %vm3706_vm13, %v9833_v37, %v9834_v17 }
0x1705   :  { %v9847_v18 = vpop.permute.xlu0 %9846  ;;  %v9837_v6 = vpop.permute.xlu1 %9836  ;;  %v8044_v31 = vpack.c.bf16 %v4315_v4, %v4313_v47  ;;  %v8046_v16 = vpack.c.bf16 %v4314_v24, %v4312_v44  ;;  %v8056_v3 = vpack.c.bf16 %v4327_v63, %v4325_v2 }
0x1706   :  { %v9839_v30 = vunpack.i.h.bf16 %v9837_v6  ;;  %v9838_v36 = vunpack.i.l.bf16 %v9837_v6  ;;  %v9849_v0 = vunpack.i.h.bf16 %v9847_v18  ;;  %v9848_v22 = vunpack.i.l.bf16 %v9847_v18 }
0x1707   :  { %8045 = vmatprep.subr.bf16.mxu1 %v8044_v31 }
0x1708   :  { %v4318_v14 = vsel %vm3706_vm13, %v9839_v30, %v9828_v52  ;;  %v4316_v62 = vsel %vm3706_vm13, %v9838_v36, %v9803_v51  ;;  %8047 = vmatpush1.bf16.msra.mxu1 %v8046_v16  ;;  %v4329_v13 = vsel %vm3706_vm13, %v9848_v22, %v9849_v0 }
0x1709   :  { %v9857_v61 = vpop.permute.xlu0 %9856  ;;  %v9842_v35 = vpop.permute.xlu1 %9841  ;;  %8049 = vmatprep.subr.bf16.mxu1 %v8048_v15  ;;  %v8050_v32 = vpack.c.bf16 %v4318_v14, %v4316_v62  ;;  %v4180_v14 = vld [vmem:[%s11081_s3] sm:$0xff]  ;;  %v4183_v62 = vld [vmem:[%s11081_s3 + $0x18] sm:$0xff] }
0x170a   :  { %v9844_v55 = vunpack.i.h.bf16 %v9842_v35  ;;  %v9843_v1 = vunpack.i.l.bf16 %v9842_v35  ;;  %v9859_v57 = vunpack.i.h.bf16 %v9857_v61  ;;  %v9858_v5 = vunpack.i.l.bf16 %v9857_v61 }
0x170c   :  { %8051 = vmatpush1.bf16.msra.mxu1 %v8050_v32  ;;  %v4326_v38 = vsel %vm3706_vm13, %v9844_v55, %v9833_v37  ;;  %v4324_v54 = vsel %vm3706_vm13, %v9843_v1, %v9783_v7  ;;  %v4328_v49 = vsel %vm3706_vm13, %v9858_v5, %v9848_v22  ;;  %v4182_v7 = vld [vmem:[%s11081_s3 + $0x10] sm:$0xff]  ;;  %v4463_v32 = vstv %s7217_s8  ;;  %s14758_s3 = sld [smem:[#allocation16_spill]]  ;;  %s7241_s8 = sld [smem:[#allocation2 + $0x7]] }
0x170d   :  { %v9867_v48 = vpop.permute.xlu0 %9866  ;;  %v9852_v45 = vpop.permute.xlu1 %9851  ;;  %8053 = vmatprep.subr.bf16.mxu1 %v8052_v27  ;;  %v8058_v9 = vpack.c.bf16 %v4326_v38, %v4324_v54 }
0x170e   :  { %v9854_v39 = vunpack.i.h.bf16 %v9852_v45  ;;  %v9853_v25 = vunpack.i.l.bf16 %v9852_v45  ;;  %v9869_v60 = vunpack.i.h.bf16 %v9867_v48  ;;  %v9868_v26 = vunpack.i.l.bf16 %v9867_v48 }
0x1710   :  { %8055 = vmatpush1.bf16.msra.mxu1 %v8054_v21  ;;  %v4331_v23 = vsel %vm3706_vm13, %v9853_v25, %v9854_v39  ;;  %v4330_v43 = vsel %vm3706_vm13, %v9859_v57, %v9853_v25  ;;  %v4335_v44 = vsel %vm3706_vm13, %v9868_v26, %v9869_v60 }
0x1711   :  { %v9877_v34 = vpop.permute.xlu0 %9876  ;;  %v9862_v52 = vpop.permute.xlu1 %9861  ;;  %8057 = vmatprep.subr.bf16.mxu1 %v8056_v3  ;;  %v8060_v53 = vpack.c.bf16 %v4331_v23, %v4329_v13  ;;  %v8062_v47 = vpack.c.bf16 %v4330_v43, %v4328_v49 }
0x1712   :  { %v9864_v46 = vunpack.i.h.bf16 %v9862_v52  ;;  %v9863_v41 = vunpack.i.l.bf16 %v9862_v52  ;;  %v9879_v24 = vunpack.i.h.bf16 %v9877_v34  ;;  %v9878_v11 = vunpack.i.l.bf16 %v9877_v34  ;;  %v4528_v52 = vld [vmem:[%s14758_s3] sm:$0xff]  ;;  %v4530_v13 = vld [vmem:[%s14758_s3 + $0x10] sm:$0xff]  ;;  %v4533_v49 = vld [vmem:[%s14758_s3 + $0x28] sm:$0xff] }
0x1714   :  { %8059 = vmatpush1.bf16.msra.mxu1 %v8058_v9  ;;  %v4333_v51 = vsel %vm3706_vm13, %v9863_v41, %v9864_v46  ;;  %v4337_v12 = vsel %vm3706_vm13, %v9878_v11, %v9879_v24  ;;  %v4529_v9 = vld [vmem:[%s14758_s3 + $0x8] sm:$0xff]  ;;  %v4535_v24 = vld [vmem:[%s14758_s3 + $0x38] sm:$0xff] }
0x1715   :  { %v9887_v19 = vpop.permute.xlu0 %9886  ;;  %v9872_v42 = vpop.permute.xlu1 %9871  ;;  %8061 = vmatprep.subr.bf16.mxu1 %v8060_v53  ;;  %v8064_v4 = vpack.c.bf16 %v4335_v44, %v4333_v51  ;;  %v8073_v60 = vpack.c.bf16 %v4529_v9, %v4528_v52  ;;  %v4532_v51 = vld [vmem:[%s14758_s3 + $0x20] sm:$0xff]  ;;  %v4534_v44 = vld [vmem:[%s14758_s3 + $0x30] sm:$0xff] }
0x1716   :  { %v9874_v8 = vunpack.i.h.bf16 %v9872_v42  ;;  %v9873_v40 = vunpack.i.l.bf16 %v9872_v42  ;;  %v9888_v56 = vunpack.i.l.bf16 %v9887_v19  ;;  %v9889_v10 = vunpack.i.h.bf16 %v9887_v19 }
0x1718   :  { %v4334_v18 = vsel %vm3706_vm13, %v9874_v8, %v9868_v26  ;;  %v4332_v6 = vsel %vm3706_vm13, %v9873_v40, %v9863_v41  ;;  %8063 = vmatpush1.bf16.msra.mxu1 %v8062_v47  ;;  %v4336_v29 = vsel %vm3706_vm13, %v9888_v56, %v9878_v11  ;;  %v4531_v26 = vld [vmem:[%s14758_s3 + $0x18] sm:$0xff]  ;;  %v8079_v40 = vpack.c.bf16 %v4533_v49, %v4532_v51  ;;  %v4536_v11 = vld [vmem:[%s14758_s3 + $0x40] sm:$0xff]  ;;  %v4537_v56 = vld [vmem:[%s14758_s3 + $0x48] sm:$0xff] }
0x1719   :  { %v9882_v31 = vpop.permute.xlu1 %9881  ;;  %8065 = vmatprep.subr.bf16.mxu1 %v8064_v4  ;;  %v8066_v16 = vpack.c.bf16 %v4334_v18, %v4332_v6  ;;  %v8076_v43 = vpack.c.bf16 %v4531_v26, %v4530_v13  ;;  %v8082_v4 = vpack.c.bf16 %v4535_v24, %v4534_v44  ;;  %v8085_v18 = vpack.c.bf16 %v4537_v56, %v4536_v11  ;;  %v4538_v6 = vld [vmem:[%s14758_s3 + $0x50] sm:$0xff] }
0x171a   :  { %v9884_v30 = vunpack.i.h.bf16 %v9882_v31  ;;  %v9883_v36 = vunpack.i.l.bf16 %v9882_v31  ;;  %v4539_v31 = vld [vmem:[%s14758_s3 + $0x58] sm:$0xff] }
0x171c   :  { %v4338_v15 = vsel %vm3706_vm13, %v9889_v10, %v9883_v36  ;;  %8067 = vmatpush1.bf16.msra.mxu1 %v8066_v16  ;;  %v4339_v50 = vsel %vm3706_vm13, %v9883_v36, %v9884_v30  ;;  %v8088_v16 = vpack.c.bf16 %v4539_v31, %v4538_v6  ;;  %v4540_v10 = vld [vmem:[%s14758_s3 + $0x60] sm:$0xff]  ;;  %v4541_v30 = vld [vmem:[%s14758_s3 + $0x68] sm:$0xff]  ;;  %vm14761_vm13 = vmmov %vm14760_vm1 }
0x171d   :  { %v8068_v17 = vpack.c.bf16 %v4339_v50, %v4337_v12  ;;  %v8070_v37 = vpack.c.bf16 %v4338_v15, %v4336_v29  ;;  %v8091_v36 = vpack.c.bf16 %v4541_v30, %v4540_v10  ;;  %v4542_v29 = vld [vmem:[%s14758_s3 + $0x70] sm:$0xff]  ;;  %v4543_v15 = vld [vmem:[%s14758_s3 + $0x78] sm:$0xff]  ;;  %v4544_v50 = vld [vmem:[%s14758_s3 + $0x80] sm:$0xff] }
0x171e   :  { %v8094_v12 = vpack.c.bf16 %v4543_v15, %v4542_v29 }
0x171f   :  { %8069 = vmatprep.subr.bf16.mxu1 %v8068_v17  ;;  %v4545_v17 = vld [vmem:[%s14758_s3 + $0x88] sm:$0xff] }
0x1720   :  { %8071 = vmatpush1.bf16.msra.mxu1 %v8070_v37  ;;  %v8097_v37 = vpack.c.bf16 %v4545_v17, %v4544_v50 }
0x1721   :  { %8072 = vmatprep.subr.bf16.mxu1 %v14757_v28 }
0x1723   :  { %4447 = vmatmul.mubr.f32.vlgmr.msra.gmra.mrb[28].mxu1 %v4180_v14  ;;  %v4546_v14 = vld [vmem:[%s14758_s3 + $0x90] sm:$0xff] }
0x1724   :  { %7219 = vmatprep.mubr.msk.f32.mxu1 %vm2628_vm15, %v4183_v62  ;;  %8074 = vmatpush1.bf16.msra.mxu1 %v8073_v60  ;;  %v4547_v62 = vld [vmem:[%s14758_s3 + $0x98] sm:$0xff] }
0x1725   :  { %8075 = vmatprep.subr.bf16.mxu1 %v14757_v28 }
0x1726   :  { %v4194_v27 = vpop.permute.xlu0 %4193 }
0x1727   :  { %4453 = vmatmul.mubr.f32.gmra.mrb[30].mxu1 %v4182_v7  ;;  %v8100_v7 = vpack.c.bf16 %v4547_v62, %v4546_v14 }
0x1728   :  { %8077 = vmatpush1.bf16.msra.mxu1 %v8076_v43 }
0x1729   :  { %8078 = vmatprep.subr.bf16.mxu1 %v14757_v28 }
0x172a   :  { %v4189_v61 = vpop.permute.xlu1 %4188 }
0x172c   :  { %8080 = vmatpush1.bf16.msra.mxu1 %v8079_v40 }
0x172d   :  { %8081 = vmatprep.subr.bf16.mxu1 %v14757_v28 }
0x1730   :  { %8083 = vmatpush1.bf16.msra.mxu1 %v8082_v4 }
0x1731   :  { %8084 = vmatprep.subr.bf16.mxu1 %v14757_v28 }
0x1734   :  { %8086 = vmatpush1.bf16.msra.mxu1 %v8085_v18 }
0x1735   :  { %8087 = vmatprep.subr.bf16.mxu1 %v14757_v28 }
0x1738   :  { %8089 = vmatpush1.bf16.msra.mxu1 %v8088_v16 }
0x1739   :  { %8090 = vmatprep.subr.bf16.mxu1 %v14757_v28 }
0x173c   :  { %8092 = vmatpush1.bf16.msra.mxu1 %v8091_v36 }
0x173d   :  { %8093 = vmatprep.subr.bf16.mxu1 %v14757_v28 }
0x1740   :  { %8095 = vmatpush1.bf16.msra.mxu1 %v8094_v12 }
0x1741   :  { %8096 = vmatprep.subr.bf16.mxu1 %v14757_v28 }
0x1744   :  { %8098 = vmatpush1.bf16.msra.mxu1 %v8097_v37 }
0x1745   :  { %8099 = vmatprep.subr.bf16.mxu1 %v14757_v28 }
0x1748   :  { %8101 = vmatpush1.bf16.msra.mxu1 %v8100_v7 }
0x1749   :  { %8102 = vmatprep.subr.bf16.mxu1 %v14757_v28 }
0x17f6   :  { %v4448_v35 = vpop.f32.mrb[28].mxu1 }
0x17f7   :  { %v4449_v33 = vadd.f32 %v4448_v35, %v4189_v61  ;;  %v4450_v58 = vpop.f32.mrb[29].mxu1  ;;  %v4549_v35 = vld [vmem:[%s14758_s3 + $0xa8] sm:$0xff] }
0x17f8   :  { %v4451_v55 = vadd.f32 %v4450_v58, %v4189_v61  ;;  %v4548_v61 = vld [vmem:[%s14758_s3 + $0xa0] sm:$0xff]  ;;  %v4551_v58 = vld [vmem:[%s14758_s3 + $0xb8] sm:$0xff] }
0x17f9   :  { %vm4459_vm0 = vcmp.ge.f32.partialorder %v4449_v33, 0.0  ;;  %v4464_v1 = vmul.f32 %v4463_v32, %v4449_v33 }
0x17fa   :  { %vm4460_vm11 = vcmp.ge.f32.partialorder %v4451_v55, 0.0  ;;  %v4465_v63 = vmul.f32 %v4463_v32, %v4451_v55  ;;  %v4454_v0 = vpop.f32.mrb[30].mxu1 }
0x17fb   :  { %v4455_v22 = vadd.f32 %v4454_v0, %v4194_v27  ;;  %v4456_v48 = vpop.f32.mrb[31].mxu1  ;;  %v4468_v45 = vsel %vm4459_vm0, %v4449_v33, %v4464_v1  ;;  %v4550_v33 = vld [vmem:[%s14758_s3 + $0xb0] sm:$0xff]  ;;  %v14759_v1 = vmov 0.0  }
0x17fc   :  { %v4457_v21 = vadd.f32 %v4456_v48, %v4194_v27  ;;  %4472 = vrot.lane.b32.xlu1 %v4468_v45, %s11010_s21  ;;  %v13977_v2 = vsel %vm4460_vm11, %v4451_v55, %v4465_v63  ;;  %v8106_v55 = vpack.c.bf16 %v4551_v58, %v4550_v33  ;;  %v4552_v27 = vld [vmem:[%s14758_s3 + $0xc0] sm:$0xff]  ;;  %s14780_s3 = sld [smem:[#allocation19_spill]] }
0x17fd   :  { %vm4461_vm10 = vcmp.ge.f32.partialorder %v4455_v22, 0.0  ;;  %v4466_v38 = vmul.f32 %v4463_v32, %v4455_v22 }
0x17fe   :  { %vm4462_vm12 = vcmp.ge.f32.partialorder %v4457_v21, 0.0  ;;  %v4467_v54 = vmul.f32 %v4463_v32, %v4457_v21  ;;  %v8103_v32 = vpack.c.bf16 %v4549_v35, %v4548_v61 }
0x17ff   :  { %v4470_v39 = vsel %vm4461_vm10, %v4455_v22, %v4466_v38 }
0x1800   :  { %4474 = vrot.lane.b32.xlu0 %v4470_v39, %s11010_s21  ;;  %4482 = vrot.lane.b32.xlu1 %v4468_v45, %s11000_s6  ;;  %v13981_v25 = vsel %vm4462_vm12, %v4457_v21, %v4467_v54 }
0x1801   :  { %8104 = vmatpush1.bf16.msra.mxu1 %v8103_v32 }
0x1802   :  { %8105 = vmatprep.subr.bf16.mxu1 %v14757_v28 }
0x1804   :  { %4486 = vrot.lane.b32.xlu1 %v4470_v39, %s11000_s6 }
0x1805   :  { %8107 = vmatpush1.bf16.msra.mxu1 %v8106_v55 }
0x1806   :  { %4607 = vmatprep.subr.mxu1 %v14759_v1 }
0x1809   :  { %4608 = vmatpush1.msra.mxu1 %v4552_v27 }
0x180a   :  { %8108 = vmatprep.subr.bf16.mxu1 %v14757_v28 }
0x186e   :  { %v4473_v3 = vpop.permute.xlu1 %4472 }
0x186f   :  { %v4476_v23 = vsel %vm3455_vm3, %v4473_v3, %v13977_v2 }
0x1870   :  { %4484 = vrot.lane.b32.xlu0 %v4476_v23, %s11000_s6 }
0x1872   :  { %v4475_v57 = vpop.permute.xlu0 %4474  ;;  %v4483_v34 = vpop.permute.xlu1 %4482 }
0x1873   :  { %v4477_v5 = vsel %vm3455_vm3, %v4475_v57, %v13981_v25 }
0x1874   :  { %4488 = vrot.lane.b32.xlu0 %v4477_v5, %s11000_s6 }
0x1876   :  { %v4487_v19 = vpop.permute.xlu1 %4486 }
0x18e2   :  { %v13994_v46 = vpop.permute.xlu0 %4484 }
0x18e3   :  { %v4490_v41 = vsel %vm740_vm9, %v4483_v34, %v13994_v46  ;;  %v4497_v63 = vmax.f32 %v13977_v2, %v13994_v46 }
0x18e4   :  { %v13998_v53 = vmax.f32 %v4468_v45, %v4490_v41 }
0x18e6   :  { %v14003_v42 = vpop.permute.xlu0 %4488  ;;  %4500 = vrot.lane.b32.xlu1 %v13998_v53, %s11010_s21 }
0x18e7   :  { %v4491_v8 = vsel %vm740_vm9, %v4487_v19, %v14003_v42  ;;  %v4499_v48 = vmax.f32 %v13981_v25, %v14003_v42 }
0x18e8   :  { %v14009_v47 = vmax.f32 %v4470_v39, %v4491_v8 }
0x18ea   :  { %4510 = vrot.lane.b32.xlu1 %v13998_v53, %s11011_s4  ;;  %4502 = vrot.lane.b32.xlu0 %v14009_v47, %s11010_s21 }
0x18ee   :  { %4514 = vrot.lane.b32.xlu1 %v14009_v47, %s11011_s4 }
0x1958   :  { %v4501_v0 = vpop.permute.xlu1 %4500 }
0x1959   :  { %v4504_v22 = vsel %vm3455_vm3, %v4501_v0, %v4497_v63 }
0x195a   :  { %4512 = vrot.lane.b32.xlu0 %v4504_v22, %s11011_s4 }
0x195c   :  { %v4503_v45 = vpop.permute.xlu0 %4502  ;;  %v4511_v38 = vpop.permute.xlu1 %4510 }
0x195d   :  { %v4505_v21 = vsel %vm3455_vm3, %v4503_v45, %v4499_v48 }
0x195e   :  { %4516 = vrot.lane.b32.xlu0 %v4505_v21, %s11011_s4  ;;  %s14770_s4 = sld [smem:[#allocation17_spill]] }
0x1960   :  { %v4515_v23 = vpop.permute.xlu1 %4514 }
0x19cc   :  { %v4513_v54 = vpop.permute.xlu0 %4512 }
0x19cd   :  { %v4518_v39 = vsel %vm3518_vm7, %v4511_v38, %v4513_v54  ;;  %v4525_v3 = vmax.f32 %v4497_v63, %v4513_v54 }
0x19ce   :  { %v4524_v2 = vmax.f32 %v13998_v53, %v4518_v39 }
0x19cf   :  { %7220 = vmatprep.mubr.msk.f32.mxu1 %vm14760_vm1, %v4525_v3  ;;  %vm5031_vm1 = vcmask 556032  }
0x19d0   :  { %v4517_v57 = vpop.permute.xlu0 %4516  ;;  %4624 = vmatmul.mubr.f32.vlgmr.msra.gmra.mrb[32].mxu1 %v4524_v2 }
0x19d1   :  { %v4519_v5 = vsel %vm3518_vm7, %v4515_v23, %v4517_v57  ;;  %v4527_v25 = vmax.f32 %v4499_v48, %v4517_v57  ;;  %vm4787_vm7 = vcmask 515072  }
0x19d2   :  { %v4526_v34 = vmax.f32 %v14009_v47, %v4519_v5  ;;  %v4711_v5 = vld [vmem:[%s14762_s23] sm:$0xff] }
0x19d3   :  { %7221 = vmatprep.mubr.msk.f32.mxu1 %vm14761_vm13, %v4527_v25 }
0x19d4   :  { %4629 = vmatmul.mubr.f32.gmra.mrb[34].mxu1 %v4526_v34 }
0x1aa3   :  { %v4625_v52 = vpop.f32.mrb[32].mxu1 }
0x1aa4   :  { %v4627_v9 = vpop.f32.mrb[33].mxu1 }
0x1aa5   :  { %v4704_v9 = vld [vmem:[%s14763_s9 + $0x8] sm:$0xff] }
0x1aa6   :  { %7223 = vmatprep.mubr.msk.f32.mxu1 %vm2628_vm15, %v4704_v9  ;;  %v4709_v9 = vld [vmem:[%s14763_s9 + $0x30] sm:$0xff] }
0x1aa7   :  { %v4630_v13 = vpop.f32.mrb[34].mxu1 }
0x1aa8   :  { %v9930_v60 = vpack.i.bf16 %v4630_v13, %v4625_v52  ;;  %v4632_v26 = vpop.f32.mrb[35].mxu1 }
0x1aa9   :  { %v4713_v26 = vld [vmem:[%s14762_s23 + $0x10] sm:$0xff] }
0x1aaa   :  { %9891 = vrot.lane.b32.xlu1 %v9930_v60, %s11010_s21 }
0x1b1c   :  { %v9892_v46 = vpop.permute.xlu1 %9891 }
0x1b1d   :  { %v9894_v41 = vunpack.i.h.bf16 %v9892_v46  ;;  %v9893_v43 = vunpack.i.l.bf16 %v9892_v46 }
0x1b1f   :  { %v4640_v53 = vsel %vm3455_vm3, %v9894_v41, %v4630_v13  ;;  %v4637_v51 = vsel %vm3455_vm3, %v9893_v43, %v4625_v52  ;;  %v4712_v41 = vld [vmem:[%s14762_s23 + $0x8] sm:$0xff]  ;;  %v4714_v43 = vld [vmem:[%s14762_s23 + $0x18] sm:$0xff] }
0x1b20   :  { %v9895_v49 = vpack.i.bf16 %v4640_v53, %v4637_v51 }
0x1b22   :  { %9896 = vrot.lane.b32.xlu0 %v9895_v49, %s11010_s21 }
0x1b94   :  { %v9897_v19 = vpop.permute.xlu0 %9896 }
0x1b95   :  { %v9899_v42 = vunpack.i.h.bf16 %v9897_v19  ;;  %v9898_v8 = vunpack.i.l.bf16 %v9897_v19 }
0x1b97   :  { %v4646_v40 = vsel %vm3455_vm3, %v9899_v42, %v4630_v13  ;;  %v4645_v47 = vsel %vm3455_vm3, %v9898_v8, %v4625_v52 }
0x1b98   :  { %v9915_v44 = vpack.i.bf16 %v9899_v42, %v4646_v40  ;;  %v9900_v24 = vpack.i.bf16 %v9898_v8, %v4645_v47  ;;  %v9935_v4 = vpack.i.bf16 %v4646_v40, %v4645_v47 }
0x1b9a   :  { %9916 = vrot.lane.b32.xlu0 %v9915_v44, %s11000_s6  ;;  %9901 = vrot.lane.b32.xlu1 %v9900_v24, %s11000_s6 }
0x1b9e   :  { %9921 = vrot.lane.b32.xlu0 %v9915_v44, %s11001_s15  ;;  %9906 = vrot.lane.b32.xlu1 %v9900_v24, %s11001_s15 }
0x1ba2   :  { %9926 = vrot.lane.b32.xlu0 %v9915_v44, %s11009_s26  ;;  %9911 = vrot.lane.b32.xlu1 %v9900_v24, %s11009_s26 }
0x1ba6   :  { %9936 = vrot.lane.b32.xlu0 %v9935_v4, %s11021_s5  ;;  %9931 = vrot.lane.b32.xlu1 %v9930_v60, %s11022_s30 }
0x1baa   :  { %9946 = vrot.lane.b32.xlu0 %v9935_v4, %s11023_s16  ;;  %9941 = vrot.lane.b32.xlu1 %v9935_v4, %s11013_s28 }
0x1bae   :  { %9956 = vrot.lane.b32.xlu0 %v9900_v24, %s11024_s18  ;;  %9951 = vrot.lane.b32.xlu1 %v9935_v4, %s11020_s0 }
0x1bb2   :  { %9961 = vrot.lane.b32.xlu1 %v9915_v44, %s11024_s18 }
0x1c0c   :  { %v9917_v11 = vpop.permute.xlu0 %9916  ;;  %v9902_v56 = vpop.permute.xlu1 %9901 }
0x1c0d   :  { %v9919_v18 = vunpack.i.h.bf16 %v9917_v11  ;;  %v9918_v6 = vunpack.i.l.bf16 %v9917_v11  ;;  %v9904_v31 = vunpack.i.h.bf16 %v9902_v56  ;;  %v9903_v16 = vunpack.i.l.bf16 %v9902_v56 }
0x1c0f   :  { %v4660_v10 = vsel %vm740_vm9, %v9918_v6, %v9919_v18  ;;  %v4659_v30 = vsel %vm740_vm9, %v9903_v16, %v9904_v31 }
0x1c10   :  { %v9980_v36 = vpack.i.bf16 %v9919_v18, %v4660_v10  ;;  %v9965_v29 = vpack.i.bf16 %v9904_v31, %v4659_v30  ;;  %v9922_v15 = vpop.permute.xlu0 %9921  ;;  %v9907_v12 = vpop.permute.xlu1 %9906 }
0x1c11   :  { %v9924_v50 = vunpack.i.h.bf16 %v9922_v15  ;;  %v9923_v17 = vunpack.i.l.bf16 %v9922_v15  ;;  %v9909_v37 = vunpack.i.h.bf16 %v9907_v12  ;;  %v9908_v14 = vunpack.i.l.bf16 %v9907_v12 }
0x1c12   :  { %9981 = vrot.lane.b32.xlu1 %v9980_v36, %s11024_s18  ;;  %9966 = vrot.lane.b32.xlu0 %v9965_v29, %s11024_s18 }
0x1c13   :  { %v4670_v62 = vsel %vm758_vm8, %v9923_v17, %v9924_v50  ;;  %v4669_v7 = vsel %vm758_vm8, %v9908_v14, %v9909_v37 }
0x1c14   :  { %v9985_v61 = vpack.i.bf16 %v9924_v50, %v4670_v62  ;;  %v9970_v35 = vpack.i.bf16 %v9909_v37, %v4669_v7  ;;  %v9927_v32 = vpop.permute.xlu0 %9926  ;;  %v9912_v33 = vpop.permute.xlu1 %9911 }
0x1c15   :  { %v9929_v58 = vunpack.i.h.bf16 %v9927_v32  ;;  %v9928_v55 = vunpack.i.l.bf16 %v9927_v32  ;;  %v9914_v27 = vunpack.i.h.bf16 %v9912_v33  ;;  %v9913_v63 = vunpack.i.l.bf16 %v9912_v33 }
0x1c16   :  { %9986 = vrot.lane.b32.xlu1 %v9985_v61, %s11024_s18  ;;  %9971 = vrot.lane.b32.xlu0 %v9970_v35, %s11024_s18 }
0x1c17   :  { %v4680_v0 = vsel %vm1830_vm14, %v9928_v55, %v9929_v58  ;;  %v4679_v22 = vsel %vm1830_vm14, %v9913_v63, %v9914_v27 }
0x1c18   :  { %v9990_v48 = vpack.i.bf16 %v9929_v58, %v4680_v0  ;;  %v9975_v45 = vpack.i.bf16 %v9914_v27, %v4679_v22  ;;  %v9937_v21 = vpop.permute.xlu0 %9936  ;;  %v9932_v38 = vpop.permute.xlu1 %9931 }
0x1c1a   :  { %9991 = vrot.lane.b32.xlu1 %v9990_v48, %s11024_s18  ;;  %9976 = vrot.lane.b32.xlu0 %v9975_v45, %s11024_s18 }
0x1c1c   :  { %v9947_v54 = vpop.permute.xlu0 %9946  ;;  %v9942_v39 = vpop.permute.xlu1 %9941 }
0x1c1e   :  { %10001 = vrot.lane.b32.xlu1 %v9937_v21, %s11024_s18  ;;  %9996 = vrot.lane.b32.xlu0 %v9932_v38, %s11024_s18 }
0x1c20   :  { %v9957_v3 = vpop.permute.xlu0 %9956  ;;  %v9952_v2 = vpop.permute.xlu1 %9951 }
0x1c21   :  { %v9959_v23 = vunpack.i.h.bf16 %v9957_v3  ;;  %v9958_v57 = vunpack.i.l.bf16 %v9957_v3 }
0x1c22   :  { %10011 = vrot.lane.b32.xlu1 %v9947_v54, %s11024_s18  ;;  %10006 = vrot.lane.b32.xlu0 %v9942_v39, %s11024_s18 }
0x1c23   :  { %v4788_v13 = vsel %vm4787_vm7, %v9958_v57, %v9959_v23  ;;  %v4703_v23 = vld [vmem:[%s14763_s9] sm:$0xff]  ;;  %v4706_v57 = vld [vmem:[%s14763_s9 + $0x18] sm:$0xff] }
0x1c24   :  { %v9962_v25 = vpop.permute.xlu1 %9961 }
0x1c25   :  { %v9964_v34 = vunpack.i.h.bf16 %v9962_v25  ;;  %v9963_v52 = vunpack.i.l.bf16 %v9962_v25  ;;  %v4708_v25 = vld [vmem:[%s14763_s9 + $0x28] sm:$0xff] }
0x1c26   :  { %4717 = vperm.xlu1 %8579, %v4711_v5   ;;  %10016 = vrot.lane.b32.xlu0 %v9952_v2, %s11024_s18  ;;  %v4705_v5 = vld [vmem:[%s14763_s9 + $0x10] sm:$0xff] }
0x1c27   :  { %v4789_v60 = vsel %vm4787_vm7, %v9963_v52, %v9964_v34  ;;  %v4707_v34 = vld [vmem:[%s14763_s9 + $0x20] sm:$0xff]  ;;  %v4710_v52 = vld [vmem:[%s14763_s9 + $0x38] sm:$0xff] }
0x1c28   :  { %v8109_v46 = vpack.c.bf16 %v4789_v60, %v4788_v13 }
0x1c2a   :  { %4727 = vperm.xlu1 %8579, %v4713_v26   ;;  %8110 = vmatpush1.bf16.msra.mxu1 %v8109_v46 }
0x1c2b   :  { %4722 = vperm.xlu0 %8578, %v4712_v41   ;;  %8111 = vmatprep.subr.bf16.mxu1 %v14757_v28  ;;  %v4915_v41 = vstv %s7222_s13 }
0x1c2f   :  { %4732 = vperm.xlu0 %8578, %v4714_v43  }
0x1c84   :  { %v9982_v53 = vpop.permute.xlu1 %9981  ;;  %v9967_v51 = vpop.permute.xlu0 %9966 }
0x1c85   :  { %v9984_v49 = vunpack.i.h.bf16 %v9982_v53  ;;  %v9983_v19 = vunpack.i.l.bf16 %v9982_v53  ;;  %v9969_v42 = vunpack.i.h.bf16 %v9967_v51  ;;  %v9968_v8 = vunpack.i.l.bf16 %v9967_v51 }
0x1c87   :  { %v4791_v40 = vsel %vm4787_vm7, %v9983_v19, %v9984_v49  ;;  %v4790_v47 = vsel %vm4787_vm7, %v9968_v8, %v9969_v42 }
0x1c88   :  { %v9987_v44 = vpop.permute.xlu1 %9986  ;;  %v9972_v24 = vpop.permute.xlu0 %9971  ;;  %v8112_v4 = vpack.c.bf16 %v4791_v40, %v4790_v47 }
0x1c89   :  { %v9989_v11 = vunpack.i.h.bf16 %v9987_v44  ;;  %v9988_v56 = vunpack.i.l.bf16 %v9987_v44  ;;  %v9974_v18 = vunpack.i.h.bf16 %v9972_v24  ;;  %v9973_v6 = vunpack.i.l.bf16 %v9972_v24 }
0x1c8a   :  { %8113 = vmatpush1.bf16.msra.mxu1 %v8112_v4 }
0x1c8b   :  { %v4793_v31 = vsel %vm4787_vm7, %v9988_v56, %v9989_v11  ;;  %v4792_v16 = vsel %vm4787_vm7, %v9973_v6, %v9974_v18  ;;  %8114 = vmatprep.subr.bf16.mxu1 %v14757_v28 }
0x1c8c   :  { %v9992_v10 = vpop.permute.xlu1 %9991  ;;  %v9977_v30 = vpop.permute.xlu0 %9976  ;;  %v8115_v36 = vpack.c.bf16 %v4793_v31, %v4792_v16 }
0x1c8d   :  { %v9994_v29 = vunpack.i.h.bf16 %v9992_v10  ;;  %v9993_v15 = vunpack.i.l.bf16 %v9992_v10  ;;  %v9979_v12 = vunpack.i.h.bf16 %v9977_v30  ;;  %v9978_v50 = vunpack.i.l.bf16 %v9977_v30 }
0x1c8e   :  { %8116 = vmatpush1.bf16.msra.mxu1 %v8115_v36 }
0x1c8f   :  { %v4795_v17 = vsel %vm4787_vm7, %v9993_v15, %v9994_v29  ;;  %v4794_v37 = vsel %vm4787_vm7, %v9978_v50, %v9979_v12  ;;  %8117 = vmatprep.subr.bf16.mxu1 %v14757_v28 }
0x1c90   :  { %v9997_v14 = vpop.permute.xlu0 %9996  ;;  %v8118_v62 = vpack.c.bf16 %v4795_v17, %v4794_v37  ;;  %v10002_v7 = vpop.permute.xlu1 %10001 }
0x1c91   :  { %v9999_v61 = vunpack.i.h.bf16 %v9997_v14  ;;  %v9998_v35 = vunpack.i.l.bf16 %v9997_v14  ;;  %v10004_v33 = vunpack.i.h.bf16 %v10002_v7  ;;  %v10003_v58 = vunpack.i.l.bf16 %v10002_v7 }
0x1c92   :  { %8119 = vmatpush1.bf16.msra.mxu1 %v8118_v62 }
0x1c93   :  { %v8121_v32 = vpack.c.bf16 %v9999_v61, %v9998_v35  ;;  %8120 = vmatprep.subr.bf16.mxu1 %v14757_v28  ;;  %v8124_v27 = vpack.c.bf16 %v10004_v33, %v10003_v58 }
0x1c94   :  { %v10007_v55 = vpop.permute.xlu0 %10006  ;;  %v10012_v22 = vpop.permute.xlu1 %10011 }
0x1c95   :  { %v10009_v63 = vunpack.i.h.bf16 %v10007_v55  ;;  %v10008_v0 = vunpack.i.l.bf16 %v10007_v55  ;;  %v10014_v48 = vunpack.i.h.bf16 %v10012_v22  ;;  %v10013_v45 = vunpack.i.l.bf16 %v10012_v22 }
0x1c96   :  { %8122 = vmatpush1.bf16.msra.mxu1 %v8121_v32 }
0x1c97   :  { %8123 = vmatprep.subr.bf16.mxu1 %v14757_v28  ;;  %v8127_v21 = vpack.c.bf16 %v10009_v63, %v10008_v0  ;;  %v8130_v54 = vpack.c.bf16 %v10014_v48, %v10013_v45 }
0x1c98   :  { %v10017_v38 = vpop.permute.xlu0 %10016 }
0x1c99   :  { %v10019_v39 = vunpack.i.h.bf16 %v10017_v38  ;;  %v10018_v3 = vunpack.i.l.bf16 %v10017_v38 }
0x1c9a   :  { %8125 = vmatpush1.bf16.msra.mxu1 %v8124_v27 }
0x1c9b   :  { %8126 = vmatprep.subr.bf16.mxu1 %v14757_v28  ;;  %v8133_v2 = vpack.c.bf16 %v10019_v39, %v10018_v3  ;;  %v14145_v3 = vld [vmem:[%s11176_s14] sm:$0x1]  ;;  %s11025_s14 = smov 68  }
0x1c9c   :  { %vm4925_vm0 = vcmp.eq.s32.totalorder %v14145_v3, 1  ;;  %vm4976_vm10 = vcmp.eq.s32.totalorder %v14145_v3, 2  ;;  %vm5044_vm13 = vcmp.eq.s32.totalorder %v14145_v3, 3 }
0x1c9e   :  { %8128 = vmatpush1.bf16.msra.mxu1 %v8127_v21 }
0x1c9f   :  { %8129 = vmatprep.subr.bf16.mxu1 %v14757_v28 }
0x1ca2   :  { %8131 = vmatpush1.bf16.msra.mxu1 %v8130_v54 }
0x1ca3   :  { %8132 = vmatprep.subr.bf16.mxu1 %v14757_v28 }
0x1ca5   :  { %v4718_v13 = vpop.permute.xlu1 %4717 }
0x1ca6   :  { %8134 = vmatpush1.bf16.msra.mxu1 %v8133_v2  ;;  %v4950_v2 = vsel %vm4925_vm0, 1, %v14754_v20 }
0x1ca9   :  { %4891 = vmatmul.mubr.f32.vlgmr.msra.gmra.mrb[36].mxu1 %v4703_v23  ;;  %v4728_v8 = vpop.permute.xlu1 %4727  ;;  %v4954_v23 = vrot.slane %v4950_v2, %v14755_v59 }
0x1caa   :  { %7224 = vmatprep.mubr.msk.f32.mxu1 %vm2628_vm15, %v4706_v57  ;;  %v4723_v43 = vpop.permute.xlu0 %4722 }
0x1cab   :  { %vm4955_vm11 = vcmp.eq.s32.totalorder %v4954_v23, 1 }
0x1cad   :  { %4896 = vmatmul.mubr.f32.gmra.mrb[38].mxu1 %v4705_v5 }
0x1cae   :  { %7225 = vmatprep.mubr.msk.f32.mxu1 %vm2628_vm15, %v4708_v25  ;;  %v4733_v56 = vpop.permute.xlu0 %4732 }
0x1cb1   :  { %4901 = vmatmul.mubr.f32.gmra.mrb[40].mxu1 %v4707_v34 }
0x1cb2   :  { %7226 = vmatprep.mubr.msk.f32.mxu1 %vm2628_vm15, %v4710_v52 }
0x1cb5   :  { %4906 = vmatmul.mubr.f32.gmra.mrb[42].mxu1 %v4709_v9 }
0x1d7c   :  { %v4892_v60 = vpop.f32.mrb[36].mxu1 }
0x1d7d   :  { %v4893_v26 = vadd.f32 %v4892_v60, %v4718_v13  ;;  %v4894_v46 = vpop.f32.mrb[37].mxu1 }
0x1d7f   :  { %v4916_v51 = vmul.f32 %v4915_v41, %v4893_v26  ;;  %vm4911_vm6 = vcmp.ge.f32.partialorder %v4893_v26, 0.0 }
0x1d80   :  { %v4897_v53 = vpop.f32.mrb[38].mxu1 }
0x1d81   :  { %v4898_v49 = vadd.f32 %v4897_v53, %v4723_v43  ;;  %v4899_v19 = vpop.f32.mrb[39].mxu1  ;;  %v4920_v47 = vsel %vm4911_vm6, %v4893_v26, %v4916_v51 }
0x1d83   :  { %vm4912_vm2 = vcmp.ge.f32.partialorder %v4898_v49, 0.0  ;;  %v4917_v42 = vmul.f32 %v4915_v41, %v4898_v49 }
0x1d84   :  { %v4902_v40 = vpop.f32.mrb[40].mxu1 }
0x1d85   :  { %v4921_v44 = vsel %vm4912_vm2, %v4898_v49, %v4917_v42  ;;  %v4903_v24 = vadd.f32 %v4902_v40, %v4728_v8  ;;  %v4904_v4 = vpop.f32.mrb[41].mxu1  ;;  %vm5095_vm2 = vcmp.eq.s32.totalorder %v14145_v3, 4 }
0x1d86   :  { %v10020_v11 = vpack.i.bf16 %v4921_v44, %v4920_v47 }
0x1d87   :  { %v4918_v6 = vmul.f32 %v4915_v41, %v4903_v24  ;;  %vm4913_vm15 = vcmp.ge.f32.partialorder %v4903_v24, 0.0 }
0x1d88   :  { %v4907_v18 = vpop.f32.mrb[42].mxu1  ;;  %10021 = vrot.lane.b32.xlu1 %v10020_v11, %s11010_s21 }
0x1d89   :  { %v4908_v31 = vadd.f32 %v4907_v18, %v4733_v56  ;;  %v4909_v16 = vpop.f32.mrb[43].mxu1  ;;  %v4922_v30 = vsel %vm4913_vm15, %v4903_v24, %v4918_v6 }
0x1d8b   :  { %vm4914_vm5 = vcmp.ge.f32.partialorder %v4908_v31, 0.0  ;;  %v4919_v10 = vmul.f32 %v4915_v41, %v4908_v31 }
0x1d8d   :  { %v4923_v36 = vsel %vm4914_vm5, %v4908_v31, %v4919_v10  ;;  %vm14771_vm5 = vcmask 588800  }
0x1d8e   :  { %v10025_v29 = vpack.i.bf16 %v4923_v36, %v4922_v30  ;;  %vm14772_vm0 = vmmov %vm14771_vm5 }
0x1d90   :  { %10026 = vrot.lane.b32.xlu0 %v10025_v29, %s11010_s21 }
0x1dfa   :  { %v10022_v15 = vpop.permute.xlu1 %10021 }
0x1dfb   :  { %v10024_v12 = vunpack.i.h.bf16 %v10022_v15  ;;  %v10023_v50 = vunpack.i.l.bf16 %v10022_v15 }
0x1dfd   :  { %v4931_v17 = vsel %vm3455_vm3, %v10024_v12, %v4921_v44  ;;  %v4928_v37 = vsel %vm3455_vm3, %v10023_v50, %v4920_v47 }
0x1dfe   :  { %v10030_v14 = vpack.i.bf16 %v4931_v17, %v4928_v37 }
0x1e00   :  { %10031 = vrot.lane.b32.xlu1 %v10030_v14, %s11010_s21  ;;  %v5001_v14 = vsel %vm4976_vm10, 1, %v14754_v20  ;;  %vm14774_vm10 = vmmov %vm14772_vm0 }
0x1e02   :  { %v10027_v62 = vpop.permute.xlu0 %10026 }
0x1e03   :  { %v10029_v7 = vunpack.i.h.bf16 %v10027_v62  ;;  %v10028_v61 = vunpack.i.l.bf16 %v10027_v62  ;;  %v5005_v62 = vrot.slane %v5001_v14, %v14755_v59 }
0x1e05   :  { %v4937_v35 = vsel %vm3455_vm3, %v10029_v7, %v4923_v36  ;;  %v4934_v32 = vsel %vm3455_vm3, %v10028_v61, %v4922_v30  ;;  %vm14175_vm12 = vcmp.eq.s32.totalorder %v5005_v62, 1 }
0x1e06   :  { %v10035_v33 = vpack.i.bf16 %v4937_v35, %v4934_v32 }
0x1e08   :  { %10036 = vrot.lane.b32.xlu0 %v10035_v33, %s11010_s21 }
0x1e72   :  { %v10032_v58 = vpop.permute.xlu1 %10031 }
0x1e73   :  { %v10034_v55 = vunpack.i.h.bf16 %v10032_v58  ;;  %v10033_v27 = vunpack.i.l.bf16 %v10032_v58 }
0x1e75   :  { %v4947_v63 = vsel %vm3455_vm3, %v10034_v55, %v4921_v44  ;;  %v4946_v0 = vsel %vm3455_vm3, %v10033_v27, %v4920_v47 }
0x1e76   :  { %v10040_v22 = vpack.i.bf16 %v4947_v63, %v4946_v0 }
0x1e78   :  { %10041 = vrot.lane.b32.xlu1 %v10040_v22, %s10998_s19 }
0x1e7a   :  { %v10037_v48 = vpop.permute.xlu0 %10036 }
0x1e7b   :  { %v10039_v45 = vunpack.i.h.bf16 %v10037_v48  ;;  %v10038_v21 = vunpack.i.l.bf16 %v10037_v48 }
0x1e7d   :  { %v4949_v38 = vsel %vm3455_vm3, %v10039_v45, %v4923_v36  ;;  %v4948_v54 = vsel %vm3455_vm3, %v10038_v21, %v4922_v30 }
0x1e7e   :  { %v10045_v39 = vpack.i.bf16 %v4949_v38, %v4948_v54 }
0x1e80   :  { %10046 = vrot.lane.b32.xlu0 %v10045_v39, %s10998_s19  ;;  %s14768_s19 = sld [smem:[#allocation10_spill]] }
0x1eea   :  { %v10042_v57 = vpop.permute.xlu1 %10041 }
0x1eeb   :  { %v10044_v5 = vunpack.i.h.bf16 %v10042_v57  ;;  %v10043_v25 = vunpack.i.l.bf16 %v10042_v57 }
0x1eed   :  { %v4973_v34 = vsel %vm4955_vm11, %v10044_v5, %v4921_v44  ;;  %v4972_v52 = vsel %vm4955_vm11, %v10043_v25, %v4920_v47 }
0x1eee   :  { %v10050_v9 = vpack.i.bf16 %v4973_v34, %v4972_v52 }
0x1ef0   :  { %10051 = vrot.lane.b32.xlu1 %v10050_v9, %s11010_s21 }
0x1ef2   :  { %v10047_v13 = vpop.permute.xlu0 %10046 }
0x1ef3   :  { %v10049_v60 = vunpack.i.h.bf16 %v10047_v13  ;;  %v10048_v26 = vunpack.i.l.bf16 %v10047_v13 }
0x1ef5   :  { %v14151_v46 = vsel %vm4955_vm11, %v10049_v60, %v4923_v36  ;;  %v14153_v41 = vsel %vm4955_vm11, %v10048_v26, %v4922_v30  ;;  %vm14773_vm11 = vmmov %vm14772_vm0 }
0x1ef6   :  { %v10055_v43 = vpack.i.bf16 %v14151_v46, %v14153_v41 }
0x1ef8   :  { %10056 = vrot.lane.b32.xlu0 %v10055_v43, %s11010_s21 }
0x1f62   :  { %v10052_v53 = vpop.permute.xlu1 %10051 }
0x1f63   :  { %v10054_v51 = vunpack.i.h.bf16 %v10052_v53  ;;  %v10053_v49 = vunpack.i.l.bf16 %v10052_v53 }
0x1f65   :  { %v4982_v19 = vsel %vm3455_vm3, %v10054_v51, %v4973_v34  ;;  %v4979_v42 = vsel %vm3455_vm3, %v10053_v49, %v4972_v52 }
0x1f66   :  { %v10060_v8 = vpack.i.bf16 %v4982_v19, %v4979_v42 }
0x1f68   :  { %10061 = vrot.lane.b32.xlu1 %v10060_v8, %s11010_s21 }
0x1f6a   :  { %v10057_v40 = vpop.permute.xlu0 %10056 }
0x1f6b   :  { %v10059_v47 = vunpack.i.h.bf16 %v10057_v40  ;;  %v10058_v44 = vunpack.i.l.bf16 %v10057_v40 }
0x1f6d   :  { %v4988_v24 = vsel %vm3455_vm3, %v10059_v47, %v14151_v46  ;;  %v4985_v4 = vsel %vm3455_vm3, %v10058_v44, %v14153_v41 }
0x1f6e   :  { %v10065_v11 = vpack.i.bf16 %v4988_v24, %v4985_v4 }
0x1f70   :  { %10066 = vrot.lane.b32.xlu0 %v10065_v11, %s11010_s21 }
0x1fda   :  { %v10062_v56 = vpop.permute.xlu1 %10061 }
0x1fdb   :  { %v10064_v18 = vunpack.i.h.bf16 %v10062_v56  ;;  %v10063_v6 = vunpack.i.l.bf16 %v10062_v56 }
0x1fdd   :  { %v4998_v31 = vsel %vm3455_vm3, %v10064_v18, %v4973_v34  ;;  %v4997_v16 = vsel %vm3455_vm3, %v10063_v6, %v4972_v52 }
0x1fde   :  { %v10075_v10 = vpack.i.bf16 %v10064_v18, %v4998_v31  ;;  %v10070_v30 = vpack.i.bf16 %v10063_v6, %v4997_v16  ;;  %v5069_v16 = vsel %vm5044_vm13, 1, %v14754_v20 }
0x1fe0   :  { %10076 = vrot.lane.b32.xlu0 %v10075_v10, %s11025_s14  ;;  %10071 = vrot.lane.b32.xlu1 %v10070_v30, %s11025_s14  ;;  %v5073_v10 = vrot.slane %v5069_v16, %v14755_v59 }
0x1fe2   :  { %v10067_v36 = vpop.permute.xlu0 %10066  ;;  %vm5074_vm6 = vcmp.eq.s32.totalorder %v5073_v10, 1 }
0x1fe3   :  { %v10069_v29 = vunpack.i.h.bf16 %v10067_v36  ;;  %v10068_v15 = vunpack.i.l.bf16 %v10067_v36 }
0x1fe5   :  { %v5000_v12 = vsel %vm3455_vm3, %v10069_v29, %v14151_v46  ;;  %v4999_v50 = vsel %vm3455_vm3, %v10068_v15, %v14153_v41 }
0x1fe6   :  { %v10085_v17 = vpack.i.bf16 %v10069_v29, %v5000_v12  ;;  %v10080_v37 = vpack.i.bf16 %v10068_v15, %v4999_v50 }
0x1fe8   :  { %10086 = vrot.lane.b32.xlu0 %v10085_v17, %s11025_s14  ;;  %10081 = vrot.lane.b32.xlu1 %v10080_v37, %s11025_s14 }
0x2052   :  { %v10077_v61 = vpop.permute.xlu0 %10076  ;;  %v10072_v35 = vpop.permute.xlu1 %10071 }
0x2053   :  { %v10079_v32 = vunpack.i.h.bf16 %v10077_v61  ;;  %v10078_v33 = vunpack.i.l.bf16 %v10077_v61  ;;  %v10074_v58 = vunpack.i.h.bf16 %v10072_v35  ;;  %v10073_v55 = vunpack.i.l.bf16 %v10072_v35 }
0x2055   :  { %v5033_v27 = vsel %vm5031_vm1, %v10078_v33, %v10079_v32  ;;  %v5032_v63 = vsel %vm5031_vm1, %v10073_v55, %v10074_v58 }
0x2056   :  { %v5041_v0 = vsel %vm14175_vm12, %v5033_v27, %v4973_v34  ;;  %v5040_v22 = vsel %vm14175_vm12, %v5032_v63, %v4972_v52 }
0x2057   :  { %v10090_v48 = vpack.i.bf16 %v5041_v0, %v5040_v22 }
0x2059   :  { %10091 = vrot.lane.b32.xlu1 %v10090_v48, %s11010_s21 }
0x205a   :  { %v10087_v45 = vpop.permute.xlu0 %10086  ;;  %v10082_v21 = vpop.permute.xlu1 %10081 }
0x205b   :  { %v10089_v38 = vunpack.i.h.bf16 %v10087_v45  ;;  %v10088_v54 = vunpack.i.l.bf16 %v10087_v45  ;;  %v10084_v39 = vunpack.i.h.bf16 %v10082_v21  ;;  %v10083_v2 = vunpack.i.l.bf16 %v10082_v21 }
0x205d   :  { %v5035_v23 = vsel %vm5031_vm1, %v10088_v54, %v10089_v38  ;;  %v5034_v57 = vsel %vm5031_vm1, %v10083_v2, %v10084_v39 }
0x205e   :  { %v5043_v5 = vsel %vm14175_vm12, %v5035_v23, %v14151_v46  ;;  %v5042_v25 = vsel %vm14175_vm12, %v5034_v57, %v14153_v41 }
0x205f   :  { %v10095_v34 = vpack.i.bf16 %v5043_v5, %v5042_v25 }
0x2061   :  { %10096 = vrot.lane.b32.xlu0 %v10095_v34, %s11010_s21 }
0x20cb   :  { %v10092_v52 = vpop.permute.xlu1 %10091 }
0x20cc   :  { %v10094_v9 = vunpack.i.h.bf16 %v10092_v52  ;;  %v10093_v13 = vunpack.i.l.bf16 %v10092_v52 }
0x20ce   :  { %v5050_v60 = vsel %vm3455_vm3, %v10094_v9, %v5041_v0  ;;  %v5047_v26 = vsel %vm3455_vm3, %v10093_v13, %v5040_v22 }
0x20cf   :  { %v10100_v43 = vpack.i.bf16 %v5050_v60, %v5047_v26 }
0x20d1   :  { %10101 = vrot.lane.b32.xlu1 %v10100_v43, %s11010_s21  ;;  %v5120_v43 = vsel %vm5095_vm2, 1, %v14754_v20 }
0x20d3   :  { %v10097_v53 = vpop.permute.xlu0 %10096 }
0x20d4   :  { %v10099_v51 = vunpack.i.h.bf16 %v10097_v53  ;;  %v10098_v46 = vunpack.i.l.bf16 %v10097_v53  ;;  %v5124_v53 = vrot.slane %v5120_v43, %v14755_v59 }
0x20d6   :  { %v5056_v49 = vsel %vm3455_vm3, %v10099_v51, %v5043_v5  ;;  %v5053_v41 = vsel %vm3455_vm3, %v10098_v46, %v5042_v25  ;;  %vm14229_vm15 = vcmp.eq.s32.totalorder %v5124_v53, 1 }
0x20d7   :  { %v10105_v19 = vpack.i.bf16 %v5056_v49, %v5053_v41 }
0x20d9   :  { %10106 = vrot.lane.b32.xlu0 %v10105_v19, %s11010_s21 }
0x2143   :  { %v10102_v42 = vpop.permute.xlu1 %10101 }
0x2144   :  { %v10104_v8 = vunpack.i.h.bf16 %v10102_v42  ;;  %v10103_v40 = vunpack.i.l.bf16 %v10102_v42 }
0x2146   :  { %v5066_v47 = vsel %vm3455_vm3, %v10104_v8, %v5041_v0  ;;  %v5065_v44 = vsel %vm3455_vm3, %v10103_v40, %v5040_v22 }
0x2147   :  { %v10110_v24 = vpack.i.bf16 %v5066_v47, %v5065_v44 }
0x2149   :  { %10111 = vrot.lane.b32.xlu1 %v10110_v24, %s11001_s15 }
0x214b   :  { %v10107_v4 = vpop.permute.xlu0 %10106 }
0x214c   :  { %v10109_v11 = vunpack.i.h.bf16 %v10107_v4  ;;  %v10108_v56 = vunpack.i.l.bf16 %v10107_v4 }
0x214e   :  { %v5068_v18 = vsel %vm3455_vm3, %v10109_v11, %v5043_v5  ;;  %v5067_v6 = vsel %vm3455_vm3, %v10108_v56, %v5042_v25 }
0x214f   :  { %v10115_v31 = vpack.i.bf16 %v5068_v18, %v5067_v6 }
0x2151   :  { %10116 = vrot.lane.b32.xlu0 %v10115_v31, %s11001_s15 }
0x21bb   :  { %v10112_v30 = vpop.permute.xlu1 %10111 }
0x21bc   :  { %v10114_v36 = vunpack.i.h.bf16 %v10112_v30  ;;  %v10113_v29 = vunpack.i.l.bf16 %v10112_v30 }
0x21be   :  { %v5092_v15 = vsel %vm5074_vm6, %v10114_v36, %v5041_v0  ;;  %v5091_v12 = vsel %vm5074_vm6, %v10113_v29, %v5040_v22 }
0x21bf   :  { %v10120_v50 = vpack.i.bf16 %v5092_v15, %v5091_v12 }
0x21c1   :  { %10121 = vrot.lane.b32.xlu1 %v10120_v50, %s11010_s21 }
0x21c3   :  { %v10117_v17 = vpop.permute.xlu0 %10116 }
0x21c4   :  { %v10119_v37 = vunpack.i.h.bf16 %v10117_v17  ;;  %v10118_v14 = vunpack.i.l.bf16 %v10117_v17 }
0x21c6   :  { %v5094_v62 = vsel %vm5074_vm6, %v10119_v37, %v5043_v5  ;;  %v5093_v7 = vsel %vm5074_vm6, %v10118_v14, %v5042_v25 }
0x21c7   :  { %v10125_v61 = vpack.i.bf16 %v5094_v62, %v5093_v7 }
0x21c9   :  { %10126 = vrot.lane.b32.xlu0 %v10125_v61, %s11010_s21 }
0x2233   :  { %v10122_v35 = vpop.permute.xlu1 %10121 }
0x2234   :  { %v10124_v32 = vunpack.i.h.bf16 %v10122_v35  ;;  %v10123_v33 = vunpack.i.l.bf16 %v10122_v35 }
0x2236   :  { %v5101_v58 = vsel %vm3455_vm3, %v10124_v32, %v5092_v15  ;;  %v5098_v55 = vsel %vm3455_vm3, %v10123_v33, %v5091_v12 }
0x2237   :  { %v10130_v27 = vpack.i.bf16 %v5101_v58, %v5098_v55 }
0x2239   :  { %10131 = vrot.lane.b32.xlu1 %v10130_v27, %s11010_s21 }
0x223b   :  { %v10127_v63 = vpop.permute.xlu0 %10126 }
0x223c   :  { %v10129_v0 = vunpack.i.h.bf16 %v10127_v63  ;;  %v10128_v22 = vunpack.i.l.bf16 %v10127_v63 }
0x223e   :  { %v5107_v48 = vsel %vm3455_vm3, %v10129_v0, %v5094_v62  ;;  %v5104_v45 = vsel %vm3455_vm3, %v10128_v22, %v5093_v7 }
0x223f   :  { %v10135_v21 = vpack.i.bf16 %v5107_v48, %v5104_v45 }
0x2241   :  { %10136 = vrot.lane.b32.xlu0 %v10135_v21, %s11010_s21 }
0x22ab   :  { %v10132_v38 = vpop.permute.xlu1 %10131 }
0x22ac   :  { %v10134_v54 = vunpack.i.h.bf16 %v10132_v38  ;;  %v10133_v39 = vunpack.i.l.bf16 %v10132_v38 }
0x22ae   :  { %v5117_v2 = vsel %vm3455_vm3, %v10134_v54, %v5092_v15  ;;  %v5116_v23 = vsel %vm3455_vm3, %v10133_v39, %v5091_v12 }
0x22af   :  { %v10145_v57 = vpack.i.bf16 %v10134_v54, %v5117_v2  ;;  %v10140_v5 = vpack.i.bf16 %v10133_v39, %v5116_v23 }
0x22b1   :  { %10146 = vrot.lane.b32.xlu0 %v10145_v57, %s11020_s0  ;;  %10141 = vrot.lane.b32.xlu1 %v10140_v5, %s11020_s0 }
0x22b3   :  { %v10137_v25 = vpop.permute.xlu0 %10136 }
0x22b4   :  { %v10139_v34 = vunpack.i.h.bf16 %v10137_v25  ;;  %v10138_v52 = vunpack.i.l.bf16 %v10137_v25 }
0x22b6   :  { %v5119_v9 = vsel %vm3455_vm3, %v10139_v34, %v5094_v62  ;;  %v5118_v13 = vsel %vm3455_vm3, %v10138_v52, %v5093_v7 }
0x22b7   :  { %v10155_v60 = vpack.i.bf16 %v10139_v34, %v5119_v9  ;;  %v10150_v26 = vpack.i.bf16 %v10138_v52, %v5118_v13 }
0x22b9   :  { %10156 = vrot.lane.b32.xlu0 %v10155_v60, %s11020_s0  ;;  %10151 = vrot.lane.b32.xlu1 %v10150_v26, %s11020_s0 }
0x2323   :  { %v10147_v46 = vpop.permute.xlu0 %10146  ;;  %v10142_v49 = vpop.permute.xlu1 %10141 }
0x2324   :  { %v10149_v41 = vunpack.i.h.bf16 %v10147_v46  ;;  %v10148_v19 = vunpack.i.l.bf16 %v10147_v46  ;;  %v10144_v42 = vunpack.i.h.bf16 %v10142_v49  ;;  %v10143_v8 = vunpack.i.l.bf16 %v10142_v49 }
0x2326   :  { %v5151_v40 = vsel %vm4046_vm4, %v10148_v19, %v10149_v41  ;;  %v5150_v47 = vsel %vm4046_vm4, %v10143_v8, %v10144_v42 }
0x2327   :  { %v5159_v3 = vsel %vm14229_vm15, %v5151_v40, %v5092_v15  ;;  %v5158_v44 = vsel %vm14229_vm15, %v5150_v47, %v5091_v12 }
0x2328   :  { %v10160_v24 = vpack.i.bf16 %v5159_v3, %v5158_v44 }
0x232a   :  { %10161 = vrot.lane.b32.xlu1 %v10160_v24, %s11010_s21 }
0x232b   :  { %v10157_v4 = vpop.permute.xlu0 %10156  ;;  %v10152_v11 = vpop.permute.xlu1 %10151 }
0x232c   :  { %v10159_v56 = vunpack.i.h.bf16 %v10157_v4  ;;  %v10158_v18 = vunpack.i.l.bf16 %v10157_v4  ;;  %v10154_v6 = vunpack.i.h.bf16 %v10152_v11  ;;  %v10153_v31 = vunpack.i.l.bf16 %v10152_v11 }
0x232e   :  { %v5153_v16 = vsel %vm4046_vm4, %v10158_v18, %v10159_v56  ;;  %v5152_v10 = vsel %vm4046_vm4, %v10153_v31, %v10154_v6 }
0x232f   :  { %v5161_v30 = vsel %vm14229_vm15, %v5153_v16, %v5094_v62  ;;  %v5160_v36 = vsel %vm14229_vm15, %v5152_v10, %v5093_v7 }
0x2330   :  { %v10165_v29 = vpack.i.bf16 %v5161_v30, %v5160_v36 }
0x2332   :  { %10166 = vrot.lane.b32.xlu0 %v10165_v29, %s11010_s21 }
0x239c   :  { %v10162_v15 = vpop.permute.xlu1 %10161 }
0x239d   :  { %v10164_v12 = vunpack.i.h.bf16 %v10162_v15  ;;  %v10163_v50 = vunpack.i.l.bf16 %v10162_v15 }
0x239f   :  { %v5168_v17 = vsel %vm3455_vm3, %v10164_v12, %v5159_v3  ;;  %v5165_v37 = vsel %vm3455_vm3, %v10163_v50, %v5158_v44 }
0x23a0   :  { %v10170_v14 = vpack.i.bf16 %v5168_v17, %v5165_v37 }
0x23a2   :  { %10171 = vrot.lane.b32.xlu1 %v10170_v14, %s11010_s21 }
0x23a4   :  { %v10167_v61 = vpop.permute.xlu0 %10166 }
0x23a5   :  { %v10169_v35 = vunpack.i.h.bf16 %v10167_v61  ;;  %v10168_v32 = vunpack.i.l.bf16 %v10167_v61 }
0x23a6   :  { %10181 = vrot.lane.b32.xlu1 %v10160_v24, %s11022_s30 }
0x23a7   :  { %v5174_v62 = vsel %vm3455_vm3, %v10169_v35, %v5161_v30  ;;  %v5171_v7 = vsel %vm3455_vm3, %v10168_v32, %v5160_v36 }
0x23a8   :  { %v10175_v33 = vpack.i.bf16 %v5174_v62, %v5171_v7 }
0x23aa   :  { %10176 = vrot.lane.b32.xlu0 %v10175_v33, %s11010_s21 }
0x23ae   :  { %10186 = vrot.lane.b32.xlu0 %v10165_v29, %s11022_s30 }
0x2414   :  { %v10172_v58 = vpop.permute.xlu1 %10171 }
0x2415   :  { %v10174_v55 = vunpack.i.h.bf16 %v10172_v58  ;;  %v10173_v27 = vunpack.i.l.bf16 %v10172_v58 }
0x2417   :  { %v5184_v63 = vsel %vm3455_vm3, %v10174_v55, %v5159_v3  ;;  %v5183_v0 = vsel %vm3455_vm3, %v10173_v27, %v5158_v44 }
0x2418   :  { %v10200_v22 = vpack.i.bf16 %v10174_v55, %v5184_v63  ;;  %v10190_v48 = vpack.i.bf16 %v10173_v27, %v5183_v0  ;;  %v10205_v39 = vpack.i.bf16 %v5184_v63, %v5183_v0  ;;  %v10182_v25 = vpop.permute.xlu1 %10181 }
0x241a   :  { %10201 = vrot.lane.b32.xlu0 %v10200_v22, %s11000_s6  ;;  %10191 = vrot.lane.b32.xlu1 %v10190_v48, %s11000_s6 }
0x241c   :  { %v10177_v45 = vpop.permute.xlu0 %10176 }
0x241d   :  { %v10178_v21 = vunpack.i.l.bf16 %v10177_v45  ;;  %v10179_v2 = vunpack.i.h.bf16 %v10177_v45 }
0x241e   :  { %10211 = vrot.lane.b32.xlu0 %v10200_v22, %s11001_s15  ;;  %10196 = vrot.lane.b32.xlu1 %v10190_v48, %s11001_s15 }
0x241f   :  { %v5185_v38 = vsel %vm3455_vm3, %v10178_v21, %v5160_v36  ;;  %v5186_v23 = vsel %vm3455_vm3, %v10179_v2, %v5161_v30 }
0x2420   :  { %v10220_v54 = vpack.i.bf16 %v10178_v21, %v5185_v38  ;;  %v10240_v57 = vpack.i.bf16 %v5186_v23, %v5185_v38  ;;  %v10230_v5 = vpack.i.bf16 %v10179_v2, %v5186_v23  ;;  %v10187_v34 = vpop.permute.xlu0 %10186 }
0x2422   :  { %10221 = vrot.lane.b32.xlu0 %v10220_v54, %s11000_s6  ;;  %10206 = vrot.lane.b32.xlu1 %v10205_v39, %s11021_s5 }
0x2426   :  { %10226 = vrot.lane.b32.xlu0 %v10220_v54, %s11001_s15  ;;  %10216 = vrot.lane.b32.xlu1 %v10205_v39, %s11013_s28 }
0x242a   :  { %10241 = vrot.lane.b32.xlu0 %v10240_v57, %s11021_s5  ;;  %10231 = vrot.lane.b32.xlu1 %v10230_v5, %s11000_s6  ;;  %s11037_s5 = smov [#allocation5]  }
0x242b   :  { %s7150_s30 = sshll.u32 %s11037_s5, 4  ;;  %s7151_s30 = int_to_ptr.vmem [resolvable:$true] %s7150_s30 }
0x242c   :  { %p10942_p6 = scmp.lt.s32.totalorder %s7151_s30, %s7151_s30 }
0x242e   :  { %10246 = vrot.lane.b32.xlu0 %v10200_v22, %s11009_s26  ;;  %10236 = vrot.lane.b32.xlu1 %v10190_v48, %s11009_s26 }
0x2432   :  { %10261 = vrot.lane.b32.xlu0 %v10240_v57, %s11013_s28  ;;  %10251 = vrot.lane.b32.xlu1 %v10230_v5, %s11001_s15  ;;  %s11029_s28 = smov 24  }
0x2436   :  { %10266 = vrot.lane.b32.xlu0 %v10220_v54, %s11009_s26  ;;  %10256 = vrot.lane.b32.xlu1 %v10205_v39, %s11023_s16 }
0x243a   :  { %10276 = vrot.lane.b32.xlu0 %v10240_v57, %s11023_s16  ;;  %10271 = vrot.lane.b32.xlu1 %v10230_v5, %s11009_s26  ;;  %s10937_s16 = scalar_lea.vmem %s7151_s30, 32 }
0x243b   :  { %p10938_p5 = scmp.ne.s32.totalorder %s7151_s30, %s10937_s16  ;;  %p10943_p7 = scmp.lt.s32.totalorder %s10937_s16, %s10937_s16 }
0x243d   :  { %p10944_p8 = por %p10943_p7, %p10942_p6 }
0x243e   :  { %10291 = vrot.lane.b32.xlu0 %v10240_v57, %s11020_s0  ;;  %10281 = vrot.lane.b32.xlu1 %v10205_v39, %s11020_s0  ;;  %s11034_s0 = smov 120  }
0x243f   :  { %p10945_p9 = pnand %p10944_p8, %p10938_p5 }
0x2442   :  { %10296 = vrot.lane.b32.xlu0 %v10200_v22, %s11024_s18  ;;  %10286 = vrot.lane.b32.xlu1 %v10190_v48, %s11024_s18 }
0x2446   :  { %10306 = vrot.lane.b32.xlu0 %v10220_v54, %s11024_s18  ;;  %10301 = vrot.lane.b32.xlu1 %v10182_v25, %s11024_s18 }
0x244a   :  { %10311 = vrot.lane.b32.xlu0 %v10187_v34, %s11024_s18  ;;  %10316 = vrot.lane.b32.xlu1 %v10230_v5, %s11024_s18 }
0x248c   :  { %v10202_v52 = vpop.permute.xlu0 %10201  ;;  %v10192_v9 = vpop.permute.xlu1 %10191 }
0x248d   :  { %v10204_v13 = vunpack.i.h.bf16 %v10202_v52  ;;  %v10203_v60 = vunpack.i.l.bf16 %v10202_v52  ;;  %v10194_v26 = vunpack.i.h.bf16 %v10192_v9  ;;  %v10193_v43 = vunpack.i.l.bf16 %v10192_v9 }
0x248f   :  { %v5212_v53 = vsel %vm740_vm9, %v10203_v60, %v10204_v13  ;;  %v5211_v51 = vsel %vm740_vm9, %v10193_v43, %v10194_v26  ;;  %v5300_v60 = vld [vmem:[%s14768_s19 + $0x8] sm:$0xff] }
0x2490   :  { %v10340_v46 = vpack.i.bf16 %v10204_v13, %v5212_v53  ;;  %v10320_v49 = vpack.i.bf16 %v10194_v26, %v5211_v51  ;;  %v10212_v41 = vpop.permute.xlu0 %10211  ;;  %v10197_v19 = vpop.permute.xlu1 %10196  ;;  %5568 = vmatprep.mubr.f32.mxu0 %v5300_v60 }
0x2491   :  { %v10214_v42 = vunpack.i.h.bf16 %v10212_v41  ;;  %v10213_v8 = vunpack.i.l.bf16 %v10212_v41  ;;  %v10199_v40 = vunpack.i.h.bf16 %v10197_v19  ;;  %v10198_v47 = vunpack.i.l.bf16 %v10197_v19  ;;  %v5301_v19 = vld [vmem:[%s14768_s19 + $0x10] sm:$0xff] }
0x2492   :  { %10341 = vrot.lane.b32.xlu0 %v10340_v46, %s11024_s18  ;;  %10321 = vrot.lane.b32.xlu1 %v10320_v49, %s11024_s18 }
0x2493   :  { %v5232_v3 = vsel %vm758_vm8, %v10213_v8, %v10214_v42  ;;  %v5231_v44 = vsel %vm758_vm8, %v10198_v47, %v10199_v40 }
0x2494   :  { %v10345_v24 = vpack.i.bf16 %v10214_v42, %v5232_v3  ;;  %v10325_v4 = vpack.i.bf16 %v10199_v40, %v5231_v44  ;;  %v10222_v11 = vpop.permute.xlu0 %10221  ;;  %v10207_v56 = vpop.permute.xlu1 %10206  ;;  %v5311_v3 = vld [vmem:[%s14769_s27] sm:$0xff] }
0x2495   :  { %v10224_v18 = vunpack.i.h.bf16 %v10222_v11  ;;  %v10223_v6 = vunpack.i.l.bf16 %v10222_v11 }
0x2496   :  { %10346 = vrot.lane.b32.xlu0 %v10345_v24, %s11024_s18  ;;  %10326 = vrot.lane.b32.xlu1 %v10325_v4, %s11024_s18 }
0x2497   :  { %v5213_v31 = vsel %vm740_vm9, %v10223_v6, %v10224_v18  ;;  %v5312_v6 = vld [vmem:[%s14769_s27 + $0x8] sm:$0xff] }
0x2498   :  { %v10350_v16 = vpack.i.bf16 %v10224_v18, %v5213_v31  ;;  %v10227_v10 = vpop.permute.xlu0 %10226  ;;  %v10217_v30 = vpop.permute.xlu1 %10216 }
0x2499   :  { %v10229_v36 = vunpack.i.h.bf16 %v10227_v10  ;;  %v10228_v29 = vunpack.i.l.bf16 %v10227_v10 }
0x249a   :  { %10351 = vrot.lane.b32.xlu0 %v10350_v16, %s11024_s18  ;;  %10331 = vrot.lane.b32.xlu1 %v10207_v56, %s11024_s18 }
0x249b   :  { %v5233_v15 = vsel %vm758_vm8, %v10228_v29, %v10229_v36 }
0x249c   :  { %v10355_v12 = vpack.i.bf16 %v10229_v36, %v5233_v15  ;;  %v10242_v50 = vpop.permute.xlu0 %10241  ;;  %v10232_v17 = vpop.permute.xlu1 %10231 }
0x249d   :  { %v10234_v37 = vunpack.i.h.bf16 %v10232_v17  ;;  %v10233_v14 = vunpack.i.l.bf16 %v10232_v17 }
0x249e   :  { %10356 = vrot.lane.b32.xlu0 %v10355_v12, %s11024_s18  ;;  %10336 = vrot.lane.b32.xlu1 %v10217_v30, %s11024_s18  ;;  %v5313_v30 = vld [vmem:[%s14769_s27 + $0x10] sm:$0xff] }
0x249f   :  { %v5214_v61 = vsel %vm740_vm9, %v10233_v14, %v10234_v37  ;;  %v5314_v14 = vld [vmem:[%s14769_s27 + $0x18] sm:$0xff] }
0x24a0   :  { %v10370_v35 = vpack.i.bf16 %v10234_v37, %v5214_v61  ;;  %v10247_v32 = vpop.permute.xlu0 %10246  ;;  %v10237_v62 = vpop.permute.xlu1 %10236 }
0x24a1   :  { %v10239_v7 = vunpack.i.h.bf16 %v10237_v62  ;;  %v10238_v33 = vunpack.i.l.bf16 %v10237_v62  ;;  %v10249_v55 = vunpack.i.h.bf16 %v10247_v32  ;;  %v10248_v27 = vunpack.i.l.bf16 %v10247_v32 }
0x24a2   :  { %10361 = vrot.lane.b32.xlu0 %v10242_v50, %s11024_s18  ;;  %10371 = vrot.lane.b32.xlu1 %v10370_v35, %s11024_s18 }
0x24a3   :  { %v5251_v58 = vsel %vm1830_vm14, %v10238_v33, %v10239_v7  ;;  %v5252_v38 = vsel %vm1830_vm14, %v10248_v27, %v10249_v55 }
0x24a4   :  { %v10375_v63 = vpack.i.bf16 %v10239_v7, %v5251_v58  ;;  %v10262_v0 = vpop.permute.xlu0 %10261  ;;  %v10252_v22 = vpop.permute.xlu1 %10251  ;;  %v10380_v5 = vpack.i.bf16 %v10249_v55, %v5252_v38 }
0x24a5   :  { %v10254_v48 = vunpack.i.h.bf16 %v10252_v22  ;;  %v10253_v45 = vunpack.i.l.bf16 %v10252_v22 }
0x24a6   :  { %10376 = vrot.lane.b32.xlu1 %v10375_v63, %s11024_s18  ;;  %10366 = vrot.lane.b32.xlu0 %v10262_v0, %s11024_s18 }
0x24a7   :  { %v5234_v21 = vsel %vm758_vm8, %v10253_v45, %v10254_v48  ;;  %vm5491_vm8 = vcmask 261120  }
0x24a8   :  { %v10385_v54 = vpack.i.bf16 %v10254_v48, %v5234_v21  ;;  %v10267_v39 = vpop.permute.xlu0 %10266  ;;  %v10257_v2 = vpop.permute.xlu1 %10256  ;;  %7513 = vmatprep.mubr.msk.f32.mxu1 %vm5491_vm8, %v5301_v19 }
0x24a9   :  { %v10269_v23 = vunpack.i.h.bf16 %v10267_v39  ;;  %v10268_v57 = vunpack.i.l.bf16 %v10267_v39 }
0x24aa   :  { %10386 = vrot.lane.b32.xlu1 %v10385_v54, %s11024_s18  ;;  %10381 = vrot.lane.b32.xlu0 %v10380_v5, %s11024_s18 }
0x24ab   :  { %v5253_v25 = vsel %vm1830_vm14, %v10268_v57, %v10269_v23 }
0x24ac   :  { %v10277_v34 = vpop.permute.xlu0 %10276  ;;  %v10272_v52 = vpop.permute.xlu1 %10271  ;;  %v10395_v26 = vpack.i.bf16 %v10269_v23, %v5253_v25 }
0x24ad   :  { %v10274_v9 = vunpack.i.h.bf16 %v10272_v52  ;;  %v10273_v13 = vunpack.i.l.bf16 %v10272_v52 }
0x24ae   :  { %10391 = vrot.lane.b32.xlu1 %v10257_v2, %s11024_s18  ;;  %10396 = vrot.lane.b32.xlu0 %v10395_v26, %s11024_s18 }
0x24af   :  { %v5254_v43 = vsel %vm1830_vm14, %v10273_v13, %v10274_v9 }
0x24b0   :  { %v10400_v53 = vpack.i.bf16 %v10274_v9, %v5254_v43  ;;  %v10292_v51 = vpop.permute.xlu0 %10291  ;;  %v10282_v46 = vpop.permute.xlu1 %10281 }
0x24b2   :  { %10401 = vrot.lane.b32.xlu1 %v10400_v53, %s11024_s18  ;;  %10406 = vrot.lane.b32.xlu0 %v10277_v34, %s11024_s18 }
0x24b4   :  { %v10297_v49 = vpop.permute.xlu0 %10296  ;;  %v10287_v41 = vpop.permute.xlu1 %10286 }
0x24b5   :  { %v10299_v42 = vunpack.i.h.bf16 %v10297_v49  ;;  %v10298_v8 = vunpack.i.l.bf16 %v10297_v49  ;;  %v10289_v40 = vunpack.i.h.bf16 %v10287_v41  ;;  %v10288_v47 = vunpack.i.l.bf16 %v10287_v41 }
0x24b6   :  { %10411 = vrot.lane.b32.xlu1 %v10282_v46, %s11024_s18  ;;  %10416 = vrot.lane.b32.xlu0 %v10292_v51, %s11024_s18 }
0x24b7   :  { %v5440_v4 = vsel %vm4787_vm7, %v10298_v8, %v10299_v42  ;;  %v5439_v11 = vsel %vm4787_vm7, %v10288_v47, %v10289_v40 }
0x24b8   :  { %v10307_v44 = vpop.permute.xlu0 %10306  ;;  %v10302_v24 = vpop.permute.xlu1 %10301  ;;  %v8137_v15 = vpack.c.bf16 %v5440_v4, %v5439_v11 }
0x24b9   :  { %v10304_v56 = vunpack.i.h.bf16 %v10302_v24  ;;  %v10303_v18 = vunpack.i.l.bf16 %v10302_v24  ;;  %v10309_v31 = vunpack.i.h.bf16 %v10307_v44  ;;  %v10308_v16 = vunpack.i.l.bf16 %v10307_v44 }
0x24ba   :  { %5317 = vperm.xlu1 %8579, %v5311_v3   ;;  %5322 = vperm.xlu0 %8578, %v5312_v6  }
0x24bb   :  { %v8135_v10 = vpack.c.bf16 %v10304_v56, %v10303_v18  ;;  %v5441_v61 = vsel %vm4787_vm7, %v10308_v16, %v10309_v31 }
0x24bc   :  { %v10312_v36 = vpop.permute.xlu0 %10311  ;;  %v10317_v29 = vpop.permute.xlu1 %10316 }
0x24bd   :  { %v10314_v12 = vunpack.i.h.bf16 %v10312_v36  ;;  %v10313_v50 = vunpack.i.l.bf16 %v10312_v36  ;;  %v10319_v17 = vunpack.i.h.bf16 %v10317_v29  ;;  %v10318_v37 = vunpack.i.l.bf16 %v10317_v29  ;;  %8136 = vmatprep.subr.bf16.mxu0 %v8135_v10 }
0x24be   :  { %8138 = vmatpush3.bf16.msra.mxu0 %v8137_v15  ;;  %5327 = vperm.xlu1 %8579, %v5313_v30  }
0x24bf   :  { %v5442_v35 = vsel %vm4787_vm7, %v10318_v37, %v10319_v17  ;;  %v8139_v32 = vpack.c.bf16 %v10314_v12, %v10313_v50  ;;  %5332 = vperm.xlu0 %8578, %v5314_v14  }
0x24c0   :  { %v8141_v62 = vpack.c.bf16 %v5442_v35, %v5441_v61 }
0x24c1   :  { %8140 = vmatprep.subr.bf16.mxu0 %v8139_v32 }
0x24c2   :  { %8142 = vmatpush3.bf16.msra.mxu0 %v8141_v62 }
0x2504   :  { %v10342_v7 = vpop.permute.xlu0 %10341  ;;  %v10322_v33 = vpop.permute.xlu1 %10321 }
0x2505   :  { %v10344_v27 = vunpack.i.h.bf16 %v10342_v7  ;;  %v10343_v63 = vunpack.i.l.bf16 %v10342_v7  ;;  %v10324_v0 = vunpack.i.h.bf16 %v10322_v33  ;;  %v10323_v22 = vunpack.i.l.bf16 %v10322_v33 }
0x2507   :  { %v5444_v21 = vsel %vm4787_vm7, %v10343_v63, %v10344_v27  ;;  %v5443_v38 = vsel %vm4787_vm7, %v10323_v22, %v10324_v0 }
0x2508   :  { %v10347_v58 = vpop.permute.xlu0 %10346  ;;  %v10327_v55 = vpop.permute.xlu1 %10326  ;;  %v8145_v5 = vpack.c.bf16 %v5444_v21, %v5443_v38 }
0x2509   :  { %v10349_v25 = vunpack.i.h.bf16 %v10347_v58  ;;  %v10348_v34 = vunpack.i.l.bf16 %v10347_v58  ;;  %v10329_v13 = vunpack.i.h.bf16 %v10327_v55  ;;  %v10328_v60 = vunpack.i.l.bf16 %v10327_v55 }
0x250b   :  { %v5448_v44 = vsel %vm4787_vm7, %v10348_v34, %v10349_v25  ;;  %v5447_v24 = vsel %vm4787_vm7, %v10328_v60, %v10329_v13 }
0x250c   :  { %v10352_v48 = vpop.permute.xlu0 %10351  ;;  %v10332_v45 = vpop.permute.xlu1 %10331  ;;  %v8153_v10 = vpack.c.bf16 %v5448_v44, %v5447_v24 }
0x250d   :  { %v10334_v54 = vunpack.i.h.bf16 %v10332_v45  ;;  %v10333_v39 = vunpack.i.l.bf16 %v10332_v45  ;;  %v10354_v52 = vunpack.i.h.bf16 %v10352_v48  ;;  %v10353_v9 = vunpack.i.l.bf16 %v10352_v48 }
0x250f   :  { %v8143_v2 = vpack.c.bf16 %v10334_v54, %v10333_v39  ;;  %v5445_v42 = vsel %vm4787_vm7, %v10353_v9, %v10354_v52 }
0x2510   :  { %v10357_v23 = vpop.permute.xlu0 %10356  ;;  %v10337_v57 = vpop.permute.xlu1 %10336 }
0x2511   :  { %8144 = vmatprep.subr.bf16.mxu0 %v8143_v2  ;;  %v10339_v26 = vunpack.i.h.bf16 %v10337_v57  ;;  %v10338_v43 = vunpack.i.l.bf16 %v10337_v57  ;;  %v10359_v11 = vunpack.i.h.bf16 %v10357_v23  ;;  %v10358_v56 = vunpack.i.l.bf16 %v10357_v23 }
0x2512   :  { %8146 = vmatpush3.bf16.msra.mxu0 %v8145_v5 }
0x2513   :  { %v8151_v4 = vpack.c.bf16 %v10339_v26, %v10338_v43  ;;  %v5449_v50 = vsel %vm4787_vm7, %v10358_v56, %v10359_v11  ;;  %v5299_v43 = vld [vmem:[%s14768_s19] sm:$0xff] }
0x2514   :  { %v10362_v53 = vpop.permute.xlu0 %10361  ;;  %v10372_v51 = vpop.permute.xlu1 %10371 }
0x2515   :  { %v10364_v46 = vunpack.i.h.bf16 %v10362_v53  ;;  %v10363_v49 = vunpack.i.l.bf16 %v10362_v53  ;;  %v10374_v41 = vunpack.i.h.bf16 %v10372_v51  ;;  %v10373_v19 = vunpack.i.l.bf16 %v10372_v51  ;;  %v5303_v51 = vld [vmem:[%s14768_s19 + $0x20] sm:$0xff] }
0x2517   :  { %v5446_v8 = vsel %vm4787_vm7, %v10373_v19, %v10374_v41  ;;  %v8147_v40 = vpack.c.bf16 %v10364_v46, %v10363_v49  ;;  %v5302_v46 = vld [vmem:[%s14768_s19 + $0x18] sm:$0xff]  ;;  %v5304_v49 = vld [vmem:[%s14768_s19 + $0x28] sm:$0xff]  ;;  %v5307_v19 = vld [vmem:[%s14768_s19 + $0x40] sm:$0xff] }
0x2518   :  { %v10377_v47 = vpop.permute.xlu1 %10376  ;;  %v8149_v3 = vpack.c.bf16 %v5446_v8, %v5445_v42  ;;  %v10367_v18 = vpop.permute.xlu0 %10366  ;;  %v5306_v41 = vld [vmem:[%s14768_s19 + $0x38] sm:$0xff]  ;;  %v5305_v42 = vld [vmem:[%s14768_s19 + $0x30] sm:$0xff] }
0x2519   :  { %8148 = vmatprep.subr.bf16.mxu0 %v8147_v40  ;;  %v10369_v6 = vunpack.i.h.bf16 %v10367_v18  ;;  %v10368_v31 = vunpack.i.l.bf16 %v10367_v18  ;;  %v10379_v29 = vunpack.i.h.bf16 %v10377_v47  ;;  %v10378_v15 = vunpack.i.l.bf16 %v10377_v47  ;;  %v5309_v8 = vld [vmem:[%s14768_s19 + $0x50] sm:$0xff]  ;;  %v5310_v40 = vld [vmem:[%s14768_s19 + $0x58] sm:$0xff]  ;;  %v5308_v47 = vld [vmem:[%s14768_s19 + $0x48] sm:$0xff] }
0x251a   :  { %8150 = vmatpush3.bf16.msra.mxu0 %v8149_v3 }
0x251b   :  { %8152 = vmatprep.subr.bf16.mxu0 %v8151_v4  ;;  %v8155_v12 = vpack.c.bf16 %v10369_v6, %v10368_v31  ;;  %v5451_v33 = vsel %vm4787_vm7, %v10378_v15, %v10379_v29 }
0x251c   :  { %v10387_v16 = vpop.permute.xlu1 %10386  ;;  %v10382_v37 = vpop.permute.xlu0 %10381 }
0x251d   :  { %v10389_v30 = vunpack.i.h.bf16 %v10387_v16  ;;  %v10388_v36 = vunpack.i.l.bf16 %v10387_v16  ;;  %v10384_v14 = vunpack.i.h.bf16 %v10382_v37  ;;  %v10383_v61 = vunpack.i.l.bf16 %v10382_v37 }
0x251e   :  { %8154 = vmatpush3.bf16.msra.mxu0 %v8153_v10  ;;  %v5678_v16 = vstv %s7227_s17 }
0x251f   :  { %v5450_v17 = vsel %vm4787_vm7, %v10388_v36, %v10389_v30  ;;  %8156 = vmatprep.subr.bf16.mxu0 %v8155_v12  ;;  %v5452_v58 = vsel %vm4787_vm7, %v10383_v61, %v10384_v14 }
0x2520   :  { %v10392_v35 = vpop.permute.xlu1 %10391  ;;  %v8157_v32 = vpack.c.bf16 %v5450_v17, %v5449_v50  ;;  %v10397_v55 = vpop.permute.xlu0 %10396  ;;  %v8161_v63 = vpack.c.bf16 %v5452_v58, %v5451_v33 }
0x2521   :  { %v10394_v62 = vunpack.i.h.bf16 %v10392_v35  ;;  %v10393_v7 = vunpack.i.l.bf16 %v10392_v35  ;;  %v10399_v0 = vunpack.i.h.bf16 %v10397_v55  ;;  %v10398_v22 = vunpack.i.l.bf16 %v10397_v55 }
0x2522   :  { %8158 = vmatpush3.bf16.msra.mxu0 %v8157_v32 }
0x2523   :  { %v8159_v27 = vpack.c.bf16 %v10394_v62, %v10393_v7  ;;  %v5453_v54 = vsel %vm4787_vm7, %v10398_v22, %v10399_v0 }
0x2524   :  { %v10402_v48 = vpop.permute.xlu1 %10401  ;;  %v10407_v38 = vpop.permute.xlu0 %10406 }
0x2525   :  { %v10404_v45 = vunpack.i.h.bf16 %v10402_v48  ;;  %v10403_v21 = vunpack.i.l.bf16 %v10402_v48  ;;  %8160 = vmatprep.subr.bf16.mxu0 %v8159_v27  ;;  %v10409_v2 = vunpack.i.h.bf16 %v10407_v38  ;;  %v10408_v23 = vunpack.i.l.bf16 %v10407_v38 }
0x2526   :  { %8162 = vmatpush3.bf16.msra.mxu0 %v8161_v63 }
0x2527   :  { %v5454_v39 = vsel %vm4787_vm7, %v10403_v21, %v10404_v45  ;;  %v8163_v34 = vpack.c.bf16 %v10409_v2, %v10408_v23 }
0x2528   :  { %v10412_v57 = vpop.permute.xlu1 %10411  ;;  %v10417_v52 = vpop.permute.xlu0 %10416  ;;  %v8165_v9 = vpack.c.bf16 %v5454_v39, %v5453_v54 }
0x2529   :  { %v10414_v5 = vunpack.i.h.bf16 %v10412_v57  ;;  %v10413_v25 = vunpack.i.l.bf16 %v10412_v57  ;;  %v10419_v60 = vunpack.i.h.bf16 %v10417_v52  ;;  %v10418_v26 = vunpack.i.l.bf16 %v10417_v52  ;;  %8164 = vmatprep.subr.bf16.mxu0 %v8163_v34 }
0x252a   :  { %8166 = vmatpush3.bf16.msra.mxu0 %v8165_v9 }
0x252b   :  { %v8167_v13 = vpack.c.bf16 %v10414_v5, %v10413_v25  ;;  %v8171_v53 = vpack.c.bf16 %v10419_v60, %v10418_v26 }
0x252d   :  { %8168 = vmatprep.subr.bf16.mxu1 %v8167_v13  ;;  %5569 = vmatmul.mubr.f32.vlgmr.msra.gmra.mrb[16].mxu0 %v5299_v43 }
0x252e   :  { %8170 = vmatpush3.bf16.msra.mxu1 %v8167_v13  ;;  %5573 = vmatprep.mubr.f32.mxu0 %v5303_v51 }
0x252f   :  { %8172 = vmatprep.subr.bf16.mxu1 %v8171_v53 }
0x2531   :  { %5574 = vmatmul.mubr.f32.gmra.mrb[18].mxu0 %v5302_v46 }
0x2532   :  { %8174 = vmatpush3.bf16.msra.mxu1 %v8171_v53  ;;  %5578 = vmatprep.mubr.f32.mxu0 %v5306_v41 }
0x2535   :  { %7514 = vmatmul.mubr.msk.f32.vlgmr.msra.gmra.mrb[44].mxu1 %vm5491_vm8, %v5304_v49  ;;  %5579 = vmatmul.mubr.f32.gmra.mrb[20].mxu0 %v5305_v42 }
0x2536   :  { %7516 = vmatprep.mubr.msk.f32.mxu1 %vm5491_vm8, %v5307_v19  ;;  %5583 = vmatprep.mubr.f32.mxu0 %v5309_v8 }
0x2539   :  { %7517 = vmatmul.mubr.msk.f32.gmra.mrb[46].mxu1 %vm5491_vm8, %v5310_v40  ;;  %5584 = vmatmul.mubr.f32.gmra.mrb[22].mxu0 %v5308_v47  ;;  %v5318_v4 = vpop.permute.xlu1 %5317  ;;  %v5323_v30 = vpop.permute.xlu0 %5322 }
0x253d   :  { %v5328_v35 = vpop.permute.xlu1 %5327 }
0x253e   :  { %v5333_v0 = vpop.permute.xlu0 %5332 }
0x2600   :  { %v7355_v3 = vpop.f32.mrb[16].mxu0 }
0x2601   :  { %v7356_v44 = vpop.f32.mrb[17].mxu0 }
0x2602   :  { %v7357_v24 = vadd.f32 %v7356_v44, %v7355_v3 }
0x2604   :  { %v7358_v11 = vpop.f32.mrb[18].mxu0  ;;  %v5571_v56 = vadd.f32 %v7357_v24, %v5318_v4  ;;  %v5775_v4 = vld [vmem:[%s14770_s4] sm:$0xff] }
0x2605   :  { %v7359_v18 = vpop.f32.mrb[19].mxu0 }
0x2606   :  { %v7360_v31 = vadd.f32 %v7359_v18, %v7358_v11  ;;  %v5776_v11 = vld [vmem:[%s14770_s4 + $0x8] sm:$0xff] }
0x2607   :  { %v8175_v18 = vpack.c.bf16 %v5776_v11, %v5775_v4 }
0x2608   :  { %v7515_v6 = vpop.f32.mrb[44].mxu1  ;;  %v5576_v29 = vadd.f32 %v7360_v31, %v5323_v30  ;;  %v7361_v15 = vpop.f32.mrb[20].mxu0  ;;  %v5780_v30 = vld [vmem:[%s14770_s4 + $0x28] sm:$0xff] }
0x2609   :  { %v5655_v10 = vpop.f32.mrb[45].mxu1  ;;  %v7362_v50 = vpop.f32.mrb[21].mxu0  ;;  %8176 = vmatprep.subr.bf16.mxu0 %v8175_v18 }
0x260a   :  { %v5656_v36 = vadd.f32 %v5655_v10, %v5571_v56  ;;  %v5661_v37 = vadd.f32 %v7515_v6, %v5576_v29  ;;  %v7363_v14 = vadd.f32 %v7362_v50, %v7361_v15  ;;  %v5777_v56 = vld [vmem:[%s14770_s4 + $0x10] sm:$0xff]  ;;  %v5778_v6 = vld [vmem:[%s14770_s4 + $0x18] sm:$0xff]  ;;  %v5779_v10 = vld [vmem:[%s14770_s4 + $0x20] sm:$0xff]  ;;  %8178 = vmatpush3.bf16.msra.mxu0 %v8175_v18 }
0x260b   :  { %v8183_v29 = vpack.c.bf16 %v5780_v30, %v5779_v10  ;;  %v5782_v50 = vld [vmem:[%s14770_s4 + $0x38] sm:$0xff] }
0x260c   :  { %vm5674_vm9 = vcmp.ge.f32.partialorder %v5656_v36, 0.0  ;;  %v5679_v12 = vmul.f32 %v5678_v16, %v5656_v36  ;;  %v7518_v17 = vpop.f32.mrb[46].mxu1  ;;  %vm5675_vm14 = vcmp.ge.f32.partialorder %v5661_v37, 0.0  ;;  %v5680_v62 = vmul.f32 %v5678_v16, %v5661_v37  ;;  %v7364_v7 = vpop.f32.mrb[22].mxu0 }
0x260d   :  { %v5665_v61 = vpop.f32.mrb[47].mxu1  ;;  %v5581_v33 = vadd.f32 %v7363_v14, %v5328_v35  ;;  %v7365_v58 = vpop.f32.mrb[23].mxu0  ;;  %v5783_v35 = vld [vmem:[%s14770_s4 + $0x40] sm:$0xff] }
0x260e   :  { %v5683_v32 = vsel %vm5674_vm9, %v5656_v36, %v5679_v12  ;;  %v7366_v55 = vadd.f32 %v7365_v58, %v7364_v7  ;;  %v5684_v63 = vsel %vm5675_vm14, %v5661_v37, %v5680_v62  ;;  %v5781_v12 = vld [vmem:[%s14770_s4 + $0x30] sm:$0xff] }
0x260f   :  { %5687 = vrot.lane.b32.xlu1 %v5683_v32, %s11010_s21  ;;  %v5666_v27 = vadd.f32 %v5665_v61, %v5581_v33  ;;  %5690 = vrot.lane.b32.xlu0 %v5684_v63, %s11010_s21  ;;  %v8187_v37 = vpack.c.bf16 %v5782_v50, %v5781_v12 }
0x2610   :  { %v5586_v22 = vadd.f32 %v7366_v55, %v5333_v0 }
0x2611   :  { %vm5676_vm4 = vcmp.ge.f32.partialorder %v5666_v27, 0.0  ;;  %v5681_v48 = vmul.f32 %v5678_v16, %v5666_v27 }
0x2612   :  { %v5671_v45 = vadd.f32 %v7518_v17, %v5586_v22 }
0x2613   :  { %v5685_v21 = vsel %vm5676_vm4, %v5666_v27, %v5681_v48 }
0x2614   :  { %5693 = vrot.lane.b32.xlu1 %v5685_v21, %s11010_s21  ;;  %vm5677_vm7 = vcmp.ge.f32.partialorder %v5671_v45, 0.0  ;;  %v5682_v38 = vmul.f32 %v5678_v16, %v5671_v45  ;;  %v8179_v16 = vpack.c.bf16 %v5778_v6, %v5777_v56 }
0x2616   :  { %v5686_v54 = vsel %vm5677_vm7, %v5671_v45, %v5682_v38  ;;  %8180 = vmatprep.subr.bf16.mxu0 %v8179_v16 }
0x2617   :  { %5696 = vrot.lane.b32.xlu0 %v5686_v54, %s11010_s21  ;;  %8182 = vmatpush3.bf16.msra.mxu0 %v8179_v16 }
0x2618   :  { %8184 = vmatprep.subr.bf16.mxu0 %v8183_v29 }
0x261b   :  { %8186 = vmatpush3.bf16.msra.mxu0 %v8183_v29 }
0x261c   :  { %8188 = vmatprep.subr.bf16.mxu0 %v8187_v37 }
0x261f   :  { %8190 = vmatpush3.bf16.msra.mxu0 %v8187_v37 }
0x2620   :  { %7535 = vmatprep.subr.mxu0 %v5783_v35 }
0x2623   :  { %7536 = vmatpush3.msra.mxu0 %v5783_v35 }
0x2681   :  { %v5688_v39 = vpop.permute.xlu1 %5687  ;;  %v5691_v23 = vpop.permute.xlu0 %5690 }
0x2682   :  { %v5689_v2 = vsel %vm3455_vm3, %v5688_v39, %v5683_v32  ;;  %v5692_v57 = vsel %vm3455_vm3, %v5691_v23, %v5684_v63 }
0x2683   :  { %5699 = vrot.lane.b32.xlu1 %v5689_v2, %s11010_s21  ;;  %5701 = vrot.lane.b32.xlu0 %v5692_v57, %s11010_s21 }
0x2686   :  { %v5694_v5 = vpop.permute.xlu1 %5693 }
0x2687   :  { %v5695_v25 = vsel %vm3455_vm3, %v5694_v5, %v5685_v21 }
0x2688   :  { %5703 = vrot.lane.b32.xlu1 %v5695_v25, %s11010_s21 }
0x2689   :  { %v5697_v34 = vpop.permute.xlu0 %5696 }
0x268a   :  { %v5698_v52 = vsel %vm3455_vm3, %v5697_v34, %v5686_v54 }
0x268b   :  { %5705 = vrot.lane.b32.xlu0 %v5698_v52, %s11010_s21 }
0x26f5   :  { %v5700_v9 = vpop.permute.xlu1 %5699  ;;  %v5702_v60 = vpop.permute.xlu0 %5701 }
0x26f6   :  { %v5707_v13 = vsel %vm3455_vm3, %v5700_v9, %v5683_v32  ;;  %v5708_v26 = vsel %vm3455_vm3, %v5702_v60, %v5684_v63 }
0x26f7   :  { %5715 = vrot.lane.b32.xlu1 %v5707_v13, %s11000_s6  ;;  %5717 = vrot.lane.b32.xlu0 %v5708_v26, %s11000_s6 }
0x26fa   :  { %v5704_v43 = vpop.permute.xlu1 %5703 }
0x26fb   :  { %v5709_v53 = vsel %vm3455_vm3, %v5704_v43, %v5685_v21 }
0x26fc   :  { %5719 = vrot.lane.b32.xlu1 %v5709_v53, %s11000_s6 }
0x26fd   :  { %v5706_v51 = vpop.permute.xlu0 %5705 }
0x26fe   :  { %v5710_v46 = vsel %vm3455_vm3, %v5706_v51, %v5686_v54 }
0x26ff   :  { %5721 = vrot.lane.b32.xlu0 %v5710_v46, %s11000_s6 }
0x2769   :  { %v5716_v49 = vpop.permute.xlu1 %5715  ;;  %v5718_v19 = vpop.permute.xlu0 %5717 }
0x276a   :  { %v5727_v41 = vmax.f32 %v5683_v32, %v5716_v49  ;;  %v5728_v42 = vmax.f32 %v5684_v63, %v5718_v19 }
0x276c   :  { %5731 = vrot.lane.b32.xlu1 %v5727_v41, %s11010_s21  ;;  %5734 = vrot.lane.b32.xlu0 %v5728_v42, %s11010_s21 }
0x276e   :  { %v5720_v8 = vpop.permute.xlu1 %5719 }
0x276f   :  { %v5729_v40 = vmax.f32 %v5685_v21, %v5720_v8 }
0x2771   :  { %5737 = vrot.lane.b32.xlu1 %v5729_v40, %s11010_s21  ;;  %v5722_v47 = vpop.permute.xlu0 %5721 }
0x2772   :  { %v5730_v3 = vmax.f32 %v5686_v54, %v5722_v47 }
0x2774   :  { %5740 = vrot.lane.b32.xlu0 %v5730_v3, %s11010_s21 }
0x27de   :  { %v5732_v44 = vpop.permute.xlu1 %5731  ;;  %v5735_v31 = vpop.permute.xlu0 %5734 }
0x27df   :  { %v5733_v24 = vsel %vm3455_vm3, %v5732_v44, %v5727_v41  ;;  %v5736_v36 = vsel %vm3455_vm3, %v5735_v31, %v5728_v42 }
0x27e0   :  { %5743 = vrot.lane.b32.xlu1 %v5733_v24, %s11010_s21  ;;  %5745 = vrot.lane.b32.xlu0 %v5736_v36, %s11010_s21 }
0x27e3   :  { %v5738_v15 = vpop.permute.xlu1 %5737 }
0x27e4   :  { %v5739_v17 = vsel %vm3455_vm3, %v5738_v15, %v5729_v40 }
0x27e5   :  { %5747 = vrot.lane.b32.xlu1 %v5739_v17, %s11010_s21 }
0x27e6   :  { %v5741_v14 = vpop.permute.xlu0 %5740 }
0x27e7   :  { %v5742_v61 = vsel %vm3455_vm3, %v5741_v14, %v5730_v3 }
0x27e8   :  { %5749 = vrot.lane.b32.xlu0 %v5742_v61, %s11010_s21  ;;  %s11027_s21 = smov 27   ;;  %v5980_v61 = vld [vmem:[%s14775_s29 + $0x8] sm:$0xff] }
0x27e9   :  { %6199 = vmatprep.mubr.f32.mxu1 %v5980_v61 }
0x2852   :  { %v5744_v32 = vpop.permute.xlu1 %5743  ;;  %v5746_v7 = vpop.permute.xlu0 %5745 }
0x2853   :  { %v5751_v62 = vsel %vm3455_vm3, %v5744_v32, %v5727_v41  ;;  %v5752_v33 = vsel %vm3455_vm3, %v5746_v7, %v5728_v42 }
0x2854   :  { %5759 = vrot.lane.b32.xlu1 %v5751_v62, %s11009_s26  ;;  %5761 = vrot.lane.b32.xlu0 %v5752_v33, %s11009_s26  ;;  %v5981_v33 = vld [vmem:[%s14775_s29 + $0x10] sm:$0xff] }
0x2857   :  { %v5748_v58 = vpop.permute.xlu1 %5747 }
0x2858   :  { %v5753_v55 = vsel %vm3455_vm3, %v5748_v58, %v5729_v40 }
0x2859   :  { %5763 = vrot.lane.b32.xlu1 %v5753_v55, %s11009_s26 }
0x285a   :  { %v5750_v27 = vpop.permute.xlu0 %5749 }
0x285b   :  { %v5754_v63 = vsel %vm3455_vm3, %v5750_v27, %v5730_v3  ;;  %vm5882_vm3 = vcmask 1047808  }
0x285c   :  { %5765 = vrot.lane.b32.xlu0 %v5754_v63, %s11009_s26  ;;  %s11026_s26 = smov 32  }
0x28c6   :  { %v5760_v0 = vpop.permute.xlu1 %5759  ;;  %v5762_v48 = vpop.permute.xlu0 %5761 }
0x28c7   :  { %v5771_v22 = vmax.f32 %v5727_v41, %v5760_v0  ;;  %v5772_v45 = vmax.f32 %v5728_v42, %v5762_v48  ;;  %v5992_v48 = vld [vmem:[%s14776_s25 + $0x8] sm:$0xff] }
0x28c9   :  { %7537 = vmatprep.mubr.msk.f32.mxu0 %vm14771_vm5, %v5771_v22 }
0x28ca   :  { %7538 = vmatmul.mubr.msk.f32.vlgmr.msra.gmra.mrb[24].mxu0 %vm14772_vm0, %v5772_v45 }
0x28cb   :  { %v5764_v21 = vpop.permute.xlu1 %5763 }
0x28cc   :  { %v5773_v38 = vmax.f32 %v5729_v40, %v5764_v21 }
0x28ce   :  { %7540 = vmatprep.mubr.msk.f32.mxu0 %vm14773_vm11, %v5773_v38  ;;  %v5766_v54 = vpop.permute.xlu0 %5765  ;;  %v5991_v38 = vld [vmem:[%s14776_s25] sm:$0xff] }
0x28cf   :  { %v5774_v39 = vmax.f32 %v5730_v3, %v5766_v54 }
0x28d1   :  { %7541 = vmatmul.mubr.msk.f32.gmra.mrb[26].mxu0 %vm14774_vm10, %v5774_v39 }
0x28d2   :  { %7551 = vmatprep.mubr.msk.f32.mxu0 %vm5491_vm8, %v5981_v33 }
0x299d   :  { %v7539_v2 = vpop.f32.mrb[24].mxu0 }
0x299e   :  { %v5862_v23 = vpop.f32.mrb[25].mxu0 }
0x299f   :  { %v10440_v57 = vpack.i.bf16 %v7539_v2, %v5862_v23 }
0x29a1   :  { %10421 = vrot.lane.b32.xlu1 %v10440_v57, %s11026_s26 }
0x29a4   :  { %v7542_v5 = vpop.f32.mrb[26].mxu0 }
0x29a5   :  { %v5872_v25 = vpop.f32.mrb[27].mxu0 }
0x29a6   :  { %v10445_v34 = vpack.i.bf16 %v7542_v5, %v5872_v25 }
0x29a8   :  { %10426 = vrot.lane.b32.xlu0 %v10445_v34, %s11026_s26 }
0x2a13   :  { %v10422_v52 = vpop.permute.xlu1 %10421 }
0x2a14   :  { %v10424_v9 = vunpack.i.h.bf16 %v10422_v52  ;;  %v10423_v13 = vunpack.i.l.bf16 %v10422_v52 }
0x2a16   :  { %v5888_v60 = vsel %vm5882_vm3, %v10424_v9, %v7539_v2  ;;  %v5885_v26 = vsel %vm5882_vm3, %v10423_v13, %v5862_v23  ;;  %v5993_v9 = vld [vmem:[%s14776_s25 + $0x10] sm:$0xff] }
0x2a17   :  { %v10430_v43 = vpack.i.bf16 %v5888_v60, %v5885_v26 }
0x2a19   :  { %10431 = vrot.lane.b32.xlu1 %v10430_v43, %s11026_s26 }
0x2a1a   :  { %v10427_v53 = vpop.permute.xlu0 %10426 }
0x2a1b   :  { %v10429_v51 = vunpack.i.h.bf16 %v10427_v53  ;;  %v10428_v46 = vunpack.i.l.bf16 %v10427_v53 }
0x2a1d   :  { %10441 = vrot.lane.b32.xlu1 %v10440_v57, %s11027_s21  ;;  %v5894_v49 = vsel %vm5882_vm3, %v10429_v51, %v7542_v5  ;;  %v5891_v41 = vsel %vm5882_vm3, %v10428_v46, %v5872_v25 }
0x2a1e   :  { %v10435_v19 = vpack.i.bf16 %v5894_v49, %v5891_v41 }
0x2a20   :  { %10436 = vrot.lane.b32.xlu0 %v10435_v19, %s11026_s26 }
0x2a24   :  { %10446 = vrot.lane.b32.xlu0 %v10445_v34, %s11027_s21 }
0x2a8b   :  { %v10432_v42 = vpop.permute.xlu1 %10431 }
0x2a8c   :  { %v10434_v8 = vunpack.i.h.bf16 %v10432_v42  ;;  %v10433_v40 = vunpack.i.l.bf16 %v10432_v42 }
0x2a8e   :  { %v5904_v47 = vsel %vm5882_vm3, %v10434_v8, %v7539_v2  ;;  %v5903_v3 = vsel %vm5882_vm3, %v10433_v40, %v5862_v23 }
0x2a8f   :  { %v10455_v44 = vpack.i.bf16 %v5904_v47, %v5903_v3  ;;  %v10442_v31 = vpop.permute.xlu1 %10441 }
0x2a91   :  { %10456 = vrot.lane.b32.xlu0 %v10455_v44, %s11000_s6  ;;  %10451 = vrot.lane.b32.xlu1 %v10455_v44, %s11028_s1 }
0x2a92   :  { %v10437_v24 = vpop.permute.xlu0 %10436 }
0x2a93   :  { %v10439_v4 = vunpack.i.h.bf16 %v10437_v24  ;;  %v10438_v11 = vunpack.i.l.bf16 %v10437_v24 }
0x2a95   :  { %v5906_v56 = vsel %vm5882_vm3, %v10439_v4, %v7542_v5  ;;  %v5905_v18 = vsel %vm5882_vm3, %v10438_v11, %v5872_v25  ;;  %v5994_v25 = vld [vmem:[%s14776_s25 + $0x18] sm:$0xff] }
0x2a96   :  { %v10470_v6 = vpack.i.bf16 %v5906_v56, %v5905_v18  ;;  %v10447_v16 = vpop.permute.xlu0 %10446 }
0x2a98   :  { %10471 = vrot.lane.b32.xlu0 %v10470_v6, %s11000_s6  ;;  %10461 = vrot.lane.b32.xlu1 %v10470_v6, %s11028_s1 }
0x2a9c   :  { %10476 = vrot.lane.b32.xlu0 %v10455_v44, %s11001_s15  ;;  %10466 = vrot.lane.b32.xlu1 %v10455_v44, %s11029_s28 }
0x2aa0   :  { %10491 = vrot.lane.b32.xlu0 %v10470_v6, %s11001_s15  ;;  %10481 = vrot.lane.b32.xlu1 %v10470_v6, %s11029_s28 }
0x2aa4   :  { %10496 = vrot.lane.b32.xlu0 %v10455_v44, %s11030_s2  ;;  %10486 = vrot.lane.b32.xlu1 %v10455_v44, %s11031_s7 }
0x2aa8   :  { %10506 = vrot.lane.b32.xlu0 %v10470_v6, %s11030_s2  ;;  %10501 = vrot.lane.b32.xlu1 %v10470_v6, %s11031_s7 }
0x2aac   :  { %10516 = vrot.lane.b32.xlu0 %v10470_v6, %s11032_s10  ;;  %10511 = vrot.lane.b32.xlu1 %v10455_v44, %s11032_s10 }
0x2ab0   :  { %10526 = vrot.lane.b32.xlu0 %v10455_v44, %s11033_s11  ;;  %10521 = vrot.lane.b32.xlu1 %v10442_v31, %s11033_s11 }
0x2ab4   :  { %10536 = vrot.lane.b32.xlu0 %v10470_v6, %s11033_s11  ;;  %10531 = vrot.lane.b32.xlu1 %v10447_v16, %s11033_s11 }
0x2b03   :  { %v10457_v10 = vpop.permute.xlu0 %10456  ;;  %v10452_v30 = vpop.permute.xlu1 %10451 }
0x2b04   :  { %10546 = vrot.lane.b32.xlu0 %v10457_v10, %s11033_s11  ;;  %10541 = vrot.lane.b32.xlu1 %v10452_v30, %s11033_s11 }
0x2b0a   :  { %v10472_v36 = vpop.permute.xlu0 %10471  ;;  %v10462_v29 = vpop.permute.xlu1 %10461 }
0x2b0b   :  { %10561 = vrot.lane.b32.xlu0 %v10472_v36, %s11033_s11  ;;  %10551 = vrot.lane.b32.xlu1 %v10462_v29, %s11033_s11 }
0x2b0e   :  { %v10477_v15 = vpop.permute.xlu0 %10476  ;;  %v10467_v12 = vpop.permute.xlu1 %10466 }
0x2b0f   :  { %10566 = vrot.lane.b32.xlu0 %v10477_v15, %s11033_s11  ;;  %10556 = vrot.lane.b32.xlu1 %v10467_v12, %s11033_s11 }
0x2b12   :  { %v10492_v50 = vpop.permute.xlu0 %10491  ;;  %v10482_v17 = vpop.permute.xlu1 %10481 }
0x2b13   :  { %10581 = vrot.lane.b32.xlu0 %v10492_v50, %s11033_s11  ;;  %10571 = vrot.lane.b32.xlu1 %v10482_v17, %s11033_s11 }
0x2b16   :  { %v10497_v37 = vpop.permute.xlu0 %10496  ;;  %v10487_v14 = vpop.permute.xlu1 %10486 }
0x2b17   :  { %10586 = vrot.lane.b32.xlu0 %v10497_v37, %s11033_s11  ;;  %10576 = vrot.lane.b32.xlu1 %v10487_v14, %s11033_s11 }
0x2b1a   :  { %v10507_v35 = vpop.permute.xlu0 %10506  ;;  %v10502_v32 = vpop.permute.xlu1 %10501 }
0x2b1b   :  { %10596 = vrot.lane.b32.xlu0 %v10507_v35, %s11033_s11  ;;  %10591 = vrot.lane.b32.xlu1 %v10502_v32, %s11033_s11 }
0x2b1e   :  { %v10517_v62 = vpop.permute.xlu0 %10516  ;;  %v10512_v7 = vpop.permute.xlu1 %10511 }
0x2b1f   :  { %10606 = vrot.lane.b32.xlu0 %v10517_v62, %s11033_s11  ;;  %10601 = vrot.lane.b32.xlu1 %v10512_v7, %s11033_s11 }
0x2b22   :  { %v10527_v58 = vpop.permute.xlu0 %10526  ;;  %v10522_v55 = vpop.permute.xlu1 %10521 }
0x2b23   :  { %v10529_v27 = vunpack.i.h.bf16 %v10527_v58  ;;  %v10528_v63 = vunpack.i.l.bf16 %v10527_v58  ;;  %v10524_v0 = vunpack.i.h.bf16 %v10522_v55  ;;  %v10523_v22 = vunpack.i.l.bf16 %v10522_v55  ;;  %6002 = vperm.xlu0 %8578, %v5992_v48   ;;  %5997 = vperm.xlu1 %8579, %v5991_v38  }
0x2b25   :  { %v8193_v45 = vpack.c.bf16 %v10529_v27, %v10528_v63  ;;  %v8191_v21 = vpack.c.bf16 %v10524_v0, %v10523_v22 }
0x2b26   :  { %v10537_v54 = vpop.permute.xlu0 %10536  ;;  %v10532_v39 = vpop.permute.xlu1 %10531 }
0x2b27   :  { %v10539_v2 = vunpack.i.h.bf16 %v10537_v54  ;;  %v10538_v23 = vunpack.i.l.bf16 %v10537_v54  ;;  %v10534_v57 = vunpack.i.h.bf16 %v10532_v39  ;;  %v10533_v5 = vunpack.i.l.bf16 %v10532_v39  ;;  %8192 = vmatprep.subr.bf16.mxu1 %v8191_v21  ;;  %6012 = vperm.xlu0 %8578, %v5994_v25   ;;  %v5983_v25 = vld [vmem:[%s14775_s29 + $0x20] sm:$0xff] }
0x2b28   :  { %8194 = vmatpush3.bf16.msra.mxu1 %v8193_v45  ;;  %6007 = vperm.xlu1 %8579, %v5993_v9   ;;  %v5986_v9 = vld [vmem:[%s14775_s29 + $0x38] sm:$0xff] }
0x2b29   :  { %v8197_v34 = vpack.c.bf16 %v10539_v2, %v10538_v23  ;;  %v8195_v52 = vpack.c.bf16 %v10534_v57, %v10533_v5  ;;  %v5979_v57 = vld [vmem:[%s14775_s29] sm:$0xff] }
0x2b2b   :  { %8196 = vmatprep.subr.bf16.mxu1 %v8195_v52  ;;  %v5982_v52 = vld [vmem:[%s14775_s29 + $0x18] sm:$0xff] }
0x2b2c   :  { %8198 = vmatpush3.bf16.msra.mxu1 %v8197_v34 }
0x2b76   :  { %v10547_v13 = vpop.permute.xlu0 %10546  ;;  %v10542_v60 = vpop.permute.xlu1 %10541 }
0x2b77   :  { %v10549_v26 = vunpack.i.h.bf16 %v10547_v13  ;;  %v10548_v43 = vunpack.i.l.bf16 %v10547_v13  ;;  %v10544_v53 = vunpack.i.h.bf16 %v10542_v60  ;;  %v10543_v51 = vunpack.i.l.bf16 %v10542_v60  ;;  %v5985_v13 = vld [vmem:[%s14775_s29 + $0x30] sm:$0xff]  ;;  %v5984_v60 = vld [vmem:[%s14775_s29 + $0x28] sm:$0xff] }
0x2b79   :  { %v8201_v46 = vpack.c.bf16 %v10549_v26, %v10548_v43  ;;  %v8199_v49 = vpack.c.bf16 %v10544_v53, %v10543_v51  ;;  %v5989_v26 = vld [vmem:[%s14775_s29 + $0x50] sm:$0xff]  ;;  %v5987_v43 = vld [vmem:[%s14775_s29 + $0x40] sm:$0xff]  ;;  %v5988_v53 = vld [vmem:[%s14775_s29 + $0x48] sm:$0xff] }
0x2b7a   :  { %v5990_v51 = vld [vmem:[%s14775_s29 + $0x58] sm:$0xff] }
0x2b7b   :  { %8200 = vmatprep.subr.bf16.mxu1 %v8199_v49 }
0x2b7c   :  { %8202 = vmatpush3.bf16.msra.mxu1 %v8201_v46 }
0x2b7d   :  { %v10562_v41 = vpop.permute.xlu0 %10561  ;;  %v10552_v19 = vpop.permute.xlu1 %10551 }
0x2b7e   :  { %v10564_v42 = vunpack.i.h.bf16 %v10562_v41  ;;  %v10563_v8 = vunpack.i.l.bf16 %v10562_v41  ;;  %v10554_v40 = vunpack.i.h.bf16 %v10552_v19  ;;  %v10553_v47 = vunpack.i.l.bf16 %v10552_v19 }
0x2b80   :  { %v8205_v3 = vpack.c.bf16 %v10564_v42, %v10563_v8  ;;  %v8203_v44 = vpack.c.bf16 %v10554_v40, %v10553_v47 }
0x2b81   :  { %v10567_v24 = vpop.permute.xlu0 %10566  ;;  %v10557_v4 = vpop.permute.xlu1 %10556 }
0x2b82   :  { %v10569_v11 = vunpack.i.h.bf16 %v10567_v24  ;;  %v10568_v56 = vunpack.i.l.bf16 %v10567_v24  ;;  %v10559_v18 = vunpack.i.h.bf16 %v10557_v4  ;;  %v10558_v6 = vunpack.i.l.bf16 %v10557_v4  ;;  %8204 = vmatprep.subr.bf16.mxu1 %v8203_v44 }
0x2b83   :  { %8206 = vmatpush3.bf16.msra.mxu1 %v8205_v3 }
0x2b84   :  { %v8209_v31 = vpack.c.bf16 %v10569_v11, %v10568_v56  ;;  %v8207_v16 = vpack.c.bf16 %v10559_v18, %v10558_v6  ;;  %v6309_v11 = vstv %s7236_s24 }
0x2b85   :  { %v10582_v10 = vpop.permute.xlu0 %10581  ;;  %v10572_v30 = vpop.permute.xlu1 %10571 }
0x2b86   :  { %v10584_v36 = vunpack.i.h.bf16 %v10582_v10  ;;  %v10583_v29 = vunpack.i.l.bf16 %v10582_v10  ;;  %v10574_v15 = vunpack.i.h.bf16 %v10572_v30  ;;  %v10573_v12 = vunpack.i.l.bf16 %v10572_v30  ;;  %8208 = vmatprep.subr.bf16.mxu1 %v8207_v16 }
0x2b87   :  { %8210 = vmatpush3.bf16.msra.mxu1 %v8209_v31 }
0x2b88   :  { %v8213_v50 = vpack.c.bf16 %v10584_v36, %v10583_v29  ;;  %v8211_v17 = vpack.c.bf16 %v10574_v15, %v10573_v12 }
0x2b89   :  { %v10587_v37 = vpop.permute.xlu0 %10586  ;;  %v10577_v14 = vpop.permute.xlu1 %10576 }
0x2b8a   :  { %v10589_v61 = vunpack.i.h.bf16 %v10587_v37  ;;  %v10588_v35 = vunpack.i.l.bf16 %v10587_v37  ;;  %v10579_v32 = vunpack.i.h.bf16 %v10577_v14  ;;  %v10578_v62 = vunpack.i.l.bf16 %v10577_v14  ;;  %8212 = vmatprep.subr.bf16.mxu1 %v8211_v17 }
0x2b8b   :  { %8214 = vmatpush3.bf16.msra.mxu1 %v8213_v50 }
0x2b8c   :  { %v8217_v7 = vpack.c.bf16 %v10589_v61, %v10588_v35  ;;  %v8215_v33 = vpack.c.bf16 %v10579_v32, %v10578_v62 }
0x2b8d   :  { %v10597_v58 = vpop.permute.xlu0 %10596  ;;  %v10592_v55 = vpop.permute.xlu1 %10591 }
0x2b8e   :  { %v10599_v27 = vunpack.i.h.bf16 %v10597_v58  ;;  %v10598_v63 = vunpack.i.l.bf16 %v10597_v58  ;;  %v10594_v0 = vunpack.i.h.bf16 %v10592_v55  ;;  %v10593_v22 = vunpack.i.l.bf16 %v10592_v55  ;;  %8216 = vmatprep.subr.bf16.mxu1 %v8215_v33 }
0x2b8f   :  { %8218 = vmatpush3.bf16.msra.mxu1 %v8217_v7 }
0x2b90   :  { %v8221_v48 = vpack.c.bf16 %v10599_v27, %v10598_v63  ;;  %v8219_v45 = vpack.c.bf16 %v10594_v0, %v10593_v22 }
0x2b91   :  { %v10607_v21 = vpop.permute.xlu0 %10606  ;;  %v10602_v38 = vpop.permute.xlu1 %10601 }
0x2b92   :  { %v10609_v54 = vunpack.i.h.bf16 %v10607_v21  ;;  %v10608_v39 = vunpack.i.l.bf16 %v10607_v21  ;;  %v10604_v2 = vunpack.i.h.bf16 %v10602_v38  ;;  %v10603_v23 = vunpack.i.l.bf16 %v10602_v38  ;;  %8220 = vmatprep.subr.bf16.mxu1 %v8219_v45 }
0x2b93   :  { %8222 = vmatpush3.bf16.msra.mxu1 %v8221_v48 }
0x2b94   :  { %v8223_v5 = vpack.c.bf16 %v10604_v2, %v10603_v23  ;;  %v8227_v34 = vpack.c.bf16 %v10609_v54, %v10608_v39 }
0x2b96   :  { %6200 = vmatmul.mubr.f32.vlgmr.msra.gmra.mrb[48].mxu1 %v5979_v57  ;;  %8224 = vmatprep.subr.bf16.mxu0 %v8223_v5 }
0x2b97   :  { %8226 = vmatpush3.bf16.msra.mxu0 %v8223_v5  ;;  %6204 = vmatprep.mubr.f32.mxu1 %v5983_v25 }
0x2b98   :  { %8228 = vmatprep.subr.bf16.mxu0 %v8227_v34 }
0x2b9a   :  { %6205 = vmatmul.mubr.f32.gmra.mrb[50].mxu1 %v5982_v52 }
0x2b9b   :  { %8230 = vmatpush3.bf16.msra.mxu0 %v8227_v34  ;;  %6209 = vmatprep.mubr.f32.mxu1 %v5986_v9 }
0x2b9e   :  { %6210 = vmatmul.mubr.f32.gmra.mrb[52].mxu1 %v5985_v13  ;;  %7552 = vmatmul.mubr.msk.f32.vlgmr.msra.gmra.mrb[28].mxu0 %vm5491_vm8, %v5984_v60 }
0x2b9f   :  { %6214 = vmatprep.mubr.f32.mxu1 %v5989_v26  ;;  %7554 = vmatprep.mubr.msk.f32.mxu0 %vm5491_vm8, %v5987_v43 }
0x2ba2   :  { %6215 = vmatmul.mubr.f32.gmra.mrb[54].mxu1 %v5988_v53  ;;  %7555 = vmatmul.mubr.msk.f32.gmra.mrb[30].mxu0 %vm5491_vm8, %v5990_v51  ;;  %v5998_v42 = vpop.permute.xlu1 %5997  ;;  %v6003_v47 = vpop.permute.xlu0 %6002 }
0x2ba6   :  { %v6013_v35 = vpop.permute.xlu0 %6012 }
0x2ba7   :  { %v6008_v10 = vpop.permute.xlu1 %6007 }
0x2c69   :  { %v7420_v46 = vpop.f32.mrb[48].mxu1 }
0x2c6a   :  { %v7421_v49 = vpop.f32.mrb[49].mxu1 }
0x2c6b   :  { %v7422_v41 = vadd.f32 %v7421_v49, %v7420_v46 }
0x2c6d   :  { %v7423_v19 = vpop.f32.mrb[50].mxu1  ;;  %v6202_v4 = vadd.f32 %v7422_v41, %v5998_v42 }
0x2c6e   :  { %v7424_v8 = vpop.f32.mrb[51].mxu1 }
0x2c6f   :  { %v7425_v40 = vadd.f32 %v7424_v8, %v7423_v19  ;;  %v14485_v19 = vld [vmem:[%s11181_s20] sm:$0x1]  ;;  %s11035_s20 = smov 104  }
0x2c70   :  { %vm6319_vm2 = vcmp.eq.s32.totalorder %v14485_v19, 1  ;;  %vm6370_vm9 = vcmp.eq.s32.totalorder %v14485_v19, 2  ;;  %vm6421_vm4 = vcmp.eq.s32.totalorder %v14485_v19, 3  ;;  %vm6472_vm5 = vcmp.eq.s32.totalorder %v14485_v19, 4 }
0x2c71   :  { %v7426_v3 = vpop.f32.mrb[52].mxu1  ;;  %v6207_v44 = vadd.f32 %v7425_v40, %v6003_v47  ;;  %v7553_v24 = vpop.f32.mrb[28].mxu0  ;;  %v6344_v42 = vsel %vm6319_vm2, 1, %v14754_v20 }
0x2c72   :  { %v7427_v56 = vpop.f32.mrb[53].mxu1  ;;  %v6286_v18 = vpop.f32.mrb[29].mxu0  ;;  %v6348_v8 = vrot.slane %v6344_v42, %v14755_v59 }
0x2c73   :  { %v6292_v6 = vadd.f32 %v7553_v24, %v6207_v44  ;;  %v7428_v31 = vadd.f32 %v7427_v56, %v7426_v3  ;;  %v6287_v16 = vadd.f32 %v6286_v18, %v6202_v4 }
0x2c74   :  { %vm6349_vm15 = vcmp.eq.s32.totalorder %v6348_v8, 1 }
0x2c75   :  { %vm6306_vm12 = vcmp.ge.f32.partialorder %v6292_v6, 0.0  ;;  %v6311_v30 = vmul.f32 %v6309_v11, %v6292_v6  ;;  %vm6305_vm1 = vcmp.ge.f32.partialorder %v6287_v16, 0.0  ;;  %v6310_v36 = vmul.f32 %v6309_v11, %v6287_v16  ;;  %v7429_v29 = vpop.f32.mrb[54].mxu1  ;;  %v7556_v15 = vpop.f32.mrb[30].mxu0 }
0x2c76   :  { %v7430_v12 = vpop.f32.mrb[55].mxu1  ;;  %v6212_v50 = vadd.f32 %v7428_v31, %v6008_v10  ;;  %v6296_v17 = vpop.f32.mrb[31].mxu0 }
0x2c77   :  { %v6315_v37 = vsel %vm6306_vm12, %v6292_v6, %v6311_v30  ;;  %v6314_v14 = vsel %vm6305_vm1, %v6287_v16, %v6310_v36  ;;  %v7431_v61 = vadd.f32 %v7430_v12, %v7429_v29  ;;  %vm11036_vm1 = vmmov 0  }
0x2c78   :  { %v6297_v32 = vadd.f32 %v6296_v17, %v6212_v50  ;;  %v10610_v62 = vpack.i.bf16 %v6315_v37, %v6314_v14 }
0x2c79   :  { %v6217_v7 = vadd.f32 %v7431_v61, %v6013_v35 }
0x2c7a   :  { %10611 = vrot.lane.b32.xlu1 %v10610_v62, %s11026_s26  ;;  %v6312_v58 = vmul.f32 %v6309_v11, %v6297_v32  ;;  %vm6307_vm13 = vcmp.ge.f32.partialorder %v6297_v32, 0.0 }
0x2c7b   :  { %v6302_v33 = vadd.f32 %v7556_v15, %v6217_v7 }
0x2c7c   :  { %v6316_v63 = vsel %vm6307_vm13, %v6297_v32, %v6312_v58  ;;  %vm7142_vm13 = vcmask 9216  }
0x2c7d   :  { %vm6308_vm6 = vcmp.ge.f32.partialorder %v6302_v33, 0.0  ;;  %v6313_v55 = vmul.f32 %v6309_v11, %v6302_v33 }
0x2c7f   :  { %v6317_v27 = vsel %vm6308_vm6, %v6302_v33, %v6313_v55 }
0x2c80   :  { %v10615_v0 = vpack.i.bf16 %v6317_v27, %v6316_v63 }
0x2c82   :  { %10616 = vrot.lane.b32.xlu0 %v10615_v0, %s11026_s26 }
0x2cec   :  { %v10612_v22 = vpop.permute.xlu1 %10611 }
0x2ced   :  { %v10614_v48 = vunpack.i.h.bf16 %v10612_v22  ;;  %v10613_v45 = vunpack.i.l.bf16 %v10612_v22 }
0x2cef   :  { %v6325_v21 = vsel %vm5882_vm3, %v10614_v48, %v6315_v37  ;;  %v6322_v38 = vsel %vm5882_vm3, %v10613_v45, %v6314_v14 }
0x2cf0   :  { %v10620_v54 = vpack.i.bf16 %v6325_v21, %v6322_v38  ;;  %v6395_v21 = vsel %vm6370_vm9, 1, %v14754_v20 }
0x2cf1   :  { %v6399_v38 = vrot.slane %v6395_v21, %v14755_v59 }
0x2cf2   :  { %10621 = vrot.lane.b32.xlu1 %v10620_v54, %s11026_s26 }
0x2cf3   :  { %vm6400_vm14 = vcmp.eq.s32.totalorder %v6399_v38, 1 }
0x2cf4   :  { %v10617_v39 = vpop.permute.xlu0 %10616 }
0x2cf5   :  { %v10619_v2 = vunpack.i.h.bf16 %v10617_v39  ;;  %v10618_v23 = vunpack.i.l.bf16 %v10617_v39 }
0x2cf7   :  { %v6331_v57 = vsel %vm5882_vm3, %v10619_v2, %v6317_v27  ;;  %v6328_v5 = vsel %vm5882_vm3, %v10618_v23, %v6316_v63 }
0x2cf8   :  { %v10625_v25 = vpack.i.bf16 %v6331_v57, %v6328_v5 }
0x2cfa   :  { %10626 = vrot.lane.b32.xlu0 %v10625_v25, %s11026_s26 }
0x2d64   :  { %v10622_v34 = vpop.permute.xlu1 %10621 }
0x2d65   :  { %v10624_v52 = vunpack.i.h.bf16 %v10622_v34  ;;  %v10623_v9 = vunpack.i.l.bf16 %v10622_v34 }
0x2d67   :  { %v6341_v13 = vsel %vm5882_vm3, %v10624_v52, %v6315_v37  ;;  %v6340_v60 = vsel %vm5882_vm3, %v10623_v9, %v6314_v14 }
0x2d68   :  { %v10630_v26 = vpack.i.bf16 %v6341_v13, %v6340_v60 }
0x2d6a   :  { %10631 = vrot.lane.b32.xlu1 %v10630_v26, %s11034_s0 }
0x2d6c   :  { %v10627_v43 = vpop.permute.xlu0 %10626 }
0x2d6d   :  { %v10629_v53 = vunpack.i.h.bf16 %v10627_v43  ;;  %v10628_v51 = vunpack.i.l.bf16 %v10627_v43 }
0x2d6f   :  { %v6343_v46 = vsel %vm5882_vm3, %v10629_v53, %v6317_v27  ;;  %v6342_v49 = vsel %vm5882_vm3, %v10628_v51, %v6316_v63 }
0x2d70   :  { %v10635_v41 = vpack.i.bf16 %v6343_v46, %v6342_v49 }
0x2d72   :  { %10636 = vrot.lane.b32.xlu0 %v10635_v41, %s11034_s0 }
0x2ddc   :  { %v10632_v40 = vpop.permute.xlu1 %10631 }
0x2ddd   :  { %v10634_v47 = vunpack.i.h.bf16 %v10632_v40  ;;  %v10633_v3 = vunpack.i.l.bf16 %v10632_v40 }
0x2ddf   :  { %v6367_v44 = vsel %vm6349_vm15, %v10634_v47, %v6315_v37  ;;  %v6366_v24 = vsel %vm6349_vm15, %v10633_v3, %v6314_v14 }
0x2de0   :  { %v10640_v4 = vpack.i.bf16 %v6367_v44, %v6366_v24 }
0x2de2   :  { %10641 = vrot.lane.b32.xlu1 %v10640_v4, %s11026_s26 }
0x2de4   :  { %v10637_v11 = vpop.permute.xlu0 %10636 }
0x2de5   :  { %v10639_v56 = vunpack.i.h.bf16 %v10637_v11  ;;  %v10638_v18 = vunpack.i.l.bf16 %v10637_v11 }
0x2de7   :  { %v6369_v6 = vsel %vm6349_vm15, %v10639_v56, %v6317_v27  ;;  %v6368_v31 = vsel %vm6349_vm15, %v10638_v18, %v6316_v63 }
0x2de8   :  { %v10645_v16 = vpack.i.bf16 %v6369_v6, %v6368_v31 }
0x2dea   :  { %10646 = vrot.lane.b32.xlu0 %v10645_v16, %s11026_s26 }
0x2e54   :  { %v10642_v10 = vpop.permute.xlu1 %10641 }
0x2e55   :  { %v10644_v30 = vunpack.i.h.bf16 %v10642_v10  ;;  %v10643_v36 = vunpack.i.l.bf16 %v10642_v10 }
0x2e57   :  { %v6376_v29 = vsel %vm5882_vm3, %v10644_v30, %v6367_v44  ;;  %v6373_v15 = vsel %vm5882_vm3, %v10643_v36, %v6366_v24 }
0x2e58   :  { %v10650_v12 = vpack.i.bf16 %v6376_v29, %v6373_v15  ;;  %v6446_v29 = vsel %vm6421_vm4, 1, %v14754_v20 }
0x2e59   :  { %v6450_v15 = vrot.slane %v6446_v29, %v14755_v59 }
0x2e5a   :  { %10651 = vrot.lane.b32.xlu1 %v10650_v12, %s11026_s26 }
0x2e5b   :  { %vm6451_vm7 = vcmp.eq.s32.totalorder %v6450_v15, 1 }
0x2e5c   :  { %v10647_v50 = vpop.permute.xlu0 %10646 }
0x2e5d   :  { %v10649_v17 = vunpack.i.h.bf16 %v10647_v50  ;;  %v10648_v37 = vunpack.i.l.bf16 %v10647_v50 }
0x2e5f   :  { %v6382_v14 = vsel %vm5882_vm3, %v10649_v17, %v6369_v6  ;;  %v6379_v61 = vsel %vm5882_vm3, %v10648_v37, %v6368_v31 }
0x2e60   :  { %v10655_v35 = vpack.i.bf16 %v6382_v14, %v6379_v61 }
0x2e62   :  { %10656 = vrot.lane.b32.xlu0 %v10655_v35, %s11026_s26 }
0x2ecc   :  { %v10652_v32 = vpop.permute.xlu1 %10651 }
0x2ecd   :  { %v10654_v62 = vunpack.i.h.bf16 %v10652_v32  ;;  %v10653_v7 = vunpack.i.l.bf16 %v10652_v32 }
0x2ecf   :  { %v6392_v33 = vsel %vm5882_vm3, %v10654_v62, %v6367_v44  ;;  %v6391_v58 = vsel %vm5882_vm3, %v10653_v7, %v6366_v24 }
0x2ed0   :  { %v10660_v55 = vpack.i.bf16 %v6392_v33, %v6391_v58 }
0x2ed2   :  { %10661 = vrot.lane.b32.xlu1 %v10660_v55, %s11035_s20 }
0x2ed4   :  { %v10657_v27 = vpop.permute.xlu0 %10656 }
0x2ed5   :  { %v10659_v63 = vunpack.i.h.bf16 %v10657_v27  ;;  %v10658_v0 = vunpack.i.l.bf16 %v10657_v27 }
0x2ed7   :  { %v6394_v22 = vsel %vm5882_vm3, %v10659_v63, %v6369_v6  ;;  %v6393_v48 = vsel %vm5882_vm3, %v10658_v0, %v6368_v31 }
0x2ed8   :  { %v10665_v45 = vpack.i.bf16 %v6394_v22, %v6393_v48 }
0x2eda   :  { %10666 = vrot.lane.b32.xlu0 %v10665_v45, %s11035_s20 }
0x2f44   :  { %v10662_v54 = vpop.permute.xlu1 %10661 }
0x2f45   :  { %v10664_v39 = vunpack.i.h.bf16 %v10662_v54  ;;  %v10663_v2 = vunpack.i.l.bf16 %v10662_v54 }
0x2f47   :  { %v6418_v23 = vsel %vm6400_vm14, %v10664_v39, %v6367_v44  ;;  %v6417_v57 = vsel %vm6400_vm14, %v10663_v2, %v6366_v24 }
0x2f48   :  { %v10670_v5 = vpack.i.bf16 %v6418_v23, %v6417_v57 }
0x2f4a   :  { %10671 = vrot.lane.b32.xlu1 %v10670_v5, %s11026_s26 }
0x2f4c   :  { %v10667_v25 = vpop.permute.xlu0 %10666 }
0x2f4d   :  { %v10669_v34 = vunpack.i.h.bf16 %v10667_v25  ;;  %v10668_v52 = vunpack.i.l.bf16 %v10667_v25 }
0x2f4f   :  { %v6420_v9 = vsel %vm6400_vm14, %v10669_v34, %v6369_v6  ;;  %v6419_v13 = vsel %vm6400_vm14, %v10668_v52, %v6368_v31 }
0x2f50   :  { %v10675_v60 = vpack.i.bf16 %v6420_v9, %v6419_v13 }
0x2f52   :  { %10676 = vrot.lane.b32.xlu0 %v10675_v60, %s11026_s26 }
0x2fbc   :  { %v10672_v26 = vpop.permute.xlu1 %10671 }
0x2fbd   :  { %v10674_v43 = vunpack.i.h.bf16 %v10672_v26  ;;  %v10673_v53 = vunpack.i.l.bf16 %v10672_v26 }
0x2fbf   :  { %v6427_v51 = vsel %vm5882_vm3, %v10674_v43, %v6418_v23  ;;  %v6424_v46 = vsel %vm5882_vm3, %v10673_v53, %v6417_v57 }
0x2fc0   :  { %v10680_v49 = vpack.i.bf16 %v6427_v51, %v6424_v46  ;;  %v6497_v51 = vsel %vm6472_vm5, 1, %v14754_v20 }
0x2fc1   :  { %v6501_v46 = vrot.slane %v6497_v51, %v14755_v59 }
0x2fc2   :  { %10681 = vrot.lane.b32.xlu1 %v10680_v49, %s11026_s26 }
0x2fc3   :  { %vm6502_vm0 = vcmp.eq.s32.totalorder %v6501_v46, 1 }
0x2fc4   :  { %v10677_v41 = vpop.permute.xlu0 %10676 }
0x2fc5   :  { %v10679_v42 = vunpack.i.h.bf16 %v10677_v41  ;;  %v10678_v8 = vunpack.i.l.bf16 %v10677_v41 }
0x2fc7   :  { %v6433_v40 = vsel %vm5882_vm3, %v10679_v42, %v6420_v9  ;;  %v6430_v47 = vsel %vm5882_vm3, %v10678_v8, %v6419_v13 }
0x2fc8   :  { %v10685_v3 = vpack.i.bf16 %v6433_v40, %v6430_v47 }
0x2fca   :  { %10686 = vrot.lane.b32.xlu0 %v10685_v3, %s11026_s26 }
0x3034   :  { %v10682_v44 = vpop.permute.xlu1 %10681 }
0x3035   :  { %v10684_v24 = vunpack.i.h.bf16 %v10682_v44  ;;  %v10683_v4 = vunpack.i.l.bf16 %v10682_v44 }
0x3037   :  { %v6443_v11 = vsel %vm5882_vm3, %v10684_v24, %v6418_v23  ;;  %v6442_v56 = vsel %vm5882_vm3, %v10683_v4, %v6417_v57 }
0x3038   :  { %v10690_v18 = vpack.i.bf16 %v6443_v11, %v6442_v56 }
0x303a   :  { %10691 = vrot.lane.b32.xlu1 %v10690_v18, %s11001_s15 }
0x303c   :  { %v10687_v6 = vpop.permute.xlu0 %10686 }
0x303d   :  { %v10689_v31 = vunpack.i.h.bf16 %v10687_v6  ;;  %v10688_v16 = vunpack.i.l.bf16 %v10687_v6 }
0x303f   :  { %v6445_v10 = vsel %vm5882_vm3, %v10689_v31, %v6420_v9  ;;  %v6444_v30 = vsel %vm5882_vm3, %v10688_v16, %v6419_v13 }
0x3040   :  { %v10695_v36 = vpack.i.bf16 %v6445_v10, %v6444_v30 }
0x3042   :  { %10696 = vrot.lane.b32.xlu0 %v10695_v36, %s11001_s15 }
0x30ac   :  { %v10692_v12 = vpop.permute.xlu1 %10691 }
0x30ad   :  { %v10694_v50 = vunpack.i.h.bf16 %v10692_v12  ;;  %v10693_v17 = vunpack.i.l.bf16 %v10692_v12 }
0x30af   :  { %v6469_v37 = vsel %vm6451_vm7, %v10694_v50, %v6418_v23  ;;  %v6468_v14 = vsel %vm6451_vm7, %v10693_v17, %v6417_v57 }
0x30b0   :  { %v10700_v61 = vpack.i.bf16 %v6469_v37, %v6468_v14 }
0x30b2   :  { %10701 = vrot.lane.b32.xlu1 %v10700_v61, %s11026_s26 }
0x30b4   :  { %v10697_v35 = vpop.permute.xlu0 %10696 }
0x30b5   :  { %v10699_v32 = vunpack.i.h.bf16 %v10697_v35  ;;  %v10698_v62 = vunpack.i.l.bf16 %v10697_v35 }
0x30b7   :  { %v6471_v7 = vsel %vm6451_vm7, %v10699_v32, %v6420_v9  ;;  %v6470_v33 = vsel %vm6451_vm7, %v10698_v62, %v6419_v13 }
0x30b8   :  { %v10705_v58 = vpack.i.bf16 %v6471_v7, %v6470_v33 }
0x30ba   :  { %10706 = vrot.lane.b32.xlu0 %v10705_v58, %s11026_s26 }
0x3124   :  { %v10702_v55 = vpop.permute.xlu1 %10701 }
0x3125   :  { %v10704_v27 = vunpack.i.h.bf16 %v10702_v55  ;;  %v10703_v63 = vunpack.i.l.bf16 %v10702_v55 }
0x3127   :  { %v6478_v0 = vsel %vm5882_vm3, %v10704_v27, %v6469_v37  ;;  %v6475_v22 = vsel %vm5882_vm3, %v10703_v63, %v6468_v14 }
0x3128   :  { %v10710_v48 = vpack.i.bf16 %v6478_v0, %v6475_v22 }
0x312a   :  { %10711 = vrot.lane.b32.xlu1 %v10710_v48, %s11026_s26 }
0x312c   :  { %v10707_v45 = vpop.permute.xlu0 %10706 }
0x312d   :  { %v10709_v21 = vunpack.i.h.bf16 %v10707_v45  ;;  %v10708_v38 = vunpack.i.l.bf16 %v10707_v45 }
0x312f   :  { %v6484_v54 = vsel %vm5882_vm3, %v10709_v21, %v6471_v7  ;;  %v6481_v39 = vsel %vm5882_vm3, %v10708_v38, %v6470_v33 }
0x3130   :  { %v10715_v2 = vpack.i.bf16 %v6484_v54, %v6481_v39 }
0x3132   :  { %10716 = vrot.lane.b32.xlu0 %v10715_v2, %s11026_s26 }
0x319c   :  { %v10712_v23 = vpop.permute.xlu1 %10711 }
0x319d   :  { %v10714_v57 = vunpack.i.h.bf16 %v10712_v23  ;;  %v10713_v5 = vunpack.i.l.bf16 %v10712_v23 }
0x319f   :  { %v6494_v25 = vsel %vm5882_vm3, %v10714_v57, %v6469_v37  ;;  %v6493_v34 = vsel %vm5882_vm3, %v10713_v5, %v6468_v14 }
0x31a0   :  { %v10720_v52 = vpack.i.bf16 %v6494_v25, %v6493_v34 }
0x31a2   :  { %10721 = vrot.lane.b32.xlu1 %v10720_v52, %s11004_s22 }
0x31a4   :  { %v10717_v9 = vpop.permute.xlu0 %10716 }
0x31a5   :  { %v10719_v13 = vunpack.i.h.bf16 %v10717_v9  ;;  %v10718_v60 = vunpack.i.l.bf16 %v10717_v9 }
0x31a7   :  { %v6496_v26 = vsel %vm5882_vm3, %v10719_v13, %v6471_v7  ;;  %v6495_v43 = vsel %vm5882_vm3, %v10718_v60, %v6470_v33 }
0x31a8   :  { %v10725_v53 = vpack.i.bf16 %v6496_v26, %v6495_v43 }
0x31aa   :  { %10726 = vrot.lane.b32.xlu0 %v10725_v53, %s11004_s22  ;;  %s14779_s22 = sld [smem:[#allocation18_spill]] }
0x3214   :  { %v10722_v49 = vpop.permute.xlu1 %10721 }
0x3215   :  { %v10724_v41 = vunpack.i.h.bf16 %v10722_v49  ;;  %v10723_v42 = vunpack.i.l.bf16 %v10722_v49 }
0x3217   :  { %v6520_v8 = vsel %vm6502_vm0, %v10724_v41, %v6469_v37  ;;  %v6519_v40 = vsel %vm6502_vm0, %v10723_v42, %v6468_v14 }
0x3218   :  { %v10730_v47 = vpack.i.bf16 %v6520_v8, %v6519_v40 }
0x321a   :  { %10731 = vrot.lane.b32.xlu1 %v10730_v47, %s11026_s26 }
0x321c   :  { %v10727_v3 = vpop.permute.xlu0 %10726 }
0x321d   :  { %v10729_v44 = vunpack.i.h.bf16 %v10727_v3  ;;  %v10728_v24 = vunpack.i.l.bf16 %v10727_v3 }
0x321f   :  { %v6522_v4 = vsel %vm6502_vm0, %v10729_v44, %v6471_v7  ;;  %v6521_v11 = vsel %vm6502_vm0, %v10728_v24, %v6470_v33 }
0x3220   :  { %v10735_v56 = vpack.i.bf16 %v6522_v4, %v6521_v11 }
0x3222   :  { %10736 = vrot.lane.b32.xlu0 %v10735_v56, %s11026_s26 }
0x328c   :  { %v10732_v20 = vpop.permute.xlu1 %10731 }
0x328d   :  { %v10734_v19 = vunpack.i.h.bf16 %v10732_v20  ;;  %v10733_v59 = vunpack.i.l.bf16 %v10732_v20 }
0x328f   :  { %v6529_v18 = vsel %vm5882_vm3, %v10734_v19, %v6520_v8  ;;  %v6526_v6 = vsel %vm5882_vm3, %v10733_v59, %v6519_v40 }
0x3290   :  { %v10740_v31 = vpack.i.bf16 %v6529_v18, %v6526_v6 }
0x3292   :  { %10741 = vrot.lane.b32.xlu1 %v10740_v31, %s11026_s26 }
0x3294   :  { %v10737_v16 = vpop.permute.xlu0 %10736 }
0x3295   :  { %v10739_v10 = vunpack.i.h.bf16 %v10737_v16  ;;  %v10738_v30 = vunpack.i.l.bf16 %v10737_v16 }
0x3296   :  { %10751 = vrot.lane.b32.xlu1 %v10730_v47, %s11027_s21 }
0x3297   :  { %v6535_v36 = vsel %vm5882_vm3, %v10739_v10, %v6522_v4  ;;  %v6532_v29 = vsel %vm5882_vm3, %v10738_v30, %v6521_v11 }
0x3298   :  { %v10745_v15 = vpack.i.bf16 %v6535_v36, %v6532_v29 }
0x329a   :  { %10746 = vrot.lane.b32.xlu0 %v10745_v15, %s11026_s26 }
0x329e   :  { %10756 = vrot.lane.b32.xlu0 %v10735_v56, %s11027_s21 }
0x3304   :  { %v10742_v12 = vpop.permute.xlu1 %10741 }
0x3305   :  { %v10744_v50 = vunpack.i.h.bf16 %v10742_v12  ;;  %v10743_v17 = vunpack.i.l.bf16 %v10742_v12 }
0x3307   :  { %v6545_v37 = vsel %vm5882_vm3, %v10744_v50, %v6520_v8  ;;  %v6544_v14 = vsel %vm5882_vm3, %v10743_v17, %v6519_v40 }
0x3308   :  { %v10765_v61 = vpack.i.bf16 %v6545_v37, %v6544_v14  ;;  %v10752_v55 = vpop.permute.xlu1 %10751 }
0x330a   :  { %10766 = vrot.lane.b32.xlu0 %v10765_v61, %s11000_s6  ;;  %10761 = vrot.lane.b32.xlu1 %v10765_v61, %s11028_s1 }
0x330c   :  { %v10747_v35 = vpop.permute.xlu0 %10746 }
0x330d   :  { %v10749_v32 = vunpack.i.h.bf16 %v10747_v35  ;;  %v10748_v62 = vunpack.i.l.bf16 %v10747_v35 }
0x330f   :  { %v6547_v7 = vsel %vm5882_vm3, %v10749_v32, %v6522_v4  ;;  %v6546_v33 = vsel %vm5882_vm3, %v10748_v62, %v6521_v11 }
0x3310   :  { %v10780_v58 = vpack.i.bf16 %v6547_v7, %v6546_v33  ;;  %v10757_v27 = vpop.permute.xlu0 %10756 }
0x3312   :  { %10781 = vrot.lane.b32.xlu0 %v10780_v58, %s11000_s6  ;;  %10771 = vrot.lane.b32.xlu1 %v10780_v58, %s11028_s1  ;;  %s14777_s6 = sld [smem:[#allocation14_spill]] }
0x3316   :  { %10786 = vrot.lane.b32.xlu0 %v10765_v61, %s11001_s15  ;;  %10776 = vrot.lane.b32.xlu1 %v10765_v61, %s11029_s28 }
0x3318   :  { %v6621_v23 = vld [vmem:[%s14777_s6 + $0x8] sm:$0xff]  ;;  %v6622_v52 = vld [vmem:[%s14777_s6 + $0x10] sm:$0xff] }
0x3319   :  { %6840 = vmatprep.mubr.f32.mxu0 %v6621_v23  ;;  %7565 = vmatprep.mubr.msk.f32.mxu1 %vm5491_vm8, %v6622_v52 }
0x331a   :  { %10801 = vrot.lane.b32.xlu0 %v10780_v58, %s11001_s15  ;;  %10791 = vrot.lane.b32.xlu1 %v10780_v58, %s11029_s28  ;;  %s14778_s15 = sld [smem:[#allocation15_spill]] }
0x331e   :  { %10806 = vrot.lane.b32.xlu0 %v10765_v61, %s11030_s2  ;;  %10796 = vrot.lane.b32.xlu1 %v10765_v61, %s11031_s7 }
0x3320   :  { %v6633_v51 = vld [vmem:[%s14778_s15 + $0x8] sm:$0xff]  ;;  %v6632_v41 = vld [vmem:[%s14778_s15] sm:$0xff]  ;;  %v6635_v24 = vld [vmem:[%s14778_s15 + $0x18] sm:$0xff] }
0x3321   :  { %v6634_v56 = vld [vmem:[%s14778_s15 + $0x10] sm:$0xff] }
0x3322   :  { %10816 = vrot.lane.b32.xlu0 %v10780_v58, %s11030_s2  ;;  %10811 = vrot.lane.b32.xlu1 %v10780_v58, %s11031_s7 }
0x3326   :  { %10826 = vrot.lane.b32.xlu0 %v10780_v58, %s11032_s10  ;;  %10821 = vrot.lane.b32.xlu1 %v10765_v61, %s11032_s10 }
0x332a   :  { %10836 = vrot.lane.b32.xlu0 %v10765_v61, %s11033_s11  ;;  %10831 = vrot.lane.b32.xlu1 %v10752_v55, %s11033_s11 }
0x332e   :  { %10846 = vrot.lane.b32.xlu0 %v10780_v58, %s11033_s11  ;;  %10841 = vrot.lane.b32.xlu1 %v10757_v27, %s11033_s11 }
0x337c   :  { %v10767_v63 = vpop.permute.xlu0 %10766  ;;  %v10762_v0 = vpop.permute.xlu1 %10761 }
0x337d   :  { %10856 = vrot.lane.b32.xlu0 %v10767_v63, %s11033_s11  ;;  %10851 = vrot.lane.b32.xlu1 %v10762_v0, %s11033_s11 }
0x3384   :  { %v10782_v22 = vpop.permute.xlu0 %10781  ;;  %v10772_v48 = vpop.permute.xlu1 %10771 }
0x3385   :  { %10871 = vrot.lane.b32.xlu0 %v10782_v22, %s11033_s11  ;;  %10861 = vrot.lane.b32.xlu1 %v10772_v48, %s11033_s11 }
0x3388   :  { %v10787_v45 = vpop.permute.xlu0 %10786  ;;  %v10777_v21 = vpop.permute.xlu1 %10776 }
0x3389   :  { %10876 = vrot.lane.b32.xlu0 %v10787_v45, %s11033_s11  ;;  %10866 = vrot.lane.b32.xlu1 %v10777_v21, %s11033_s11 }
0x338c   :  { %v10802_v38 = vpop.permute.xlu0 %10801  ;;  %v10792_v54 = vpop.permute.xlu1 %10791 }
0x338d   :  { %10891 = vrot.lane.b32.xlu0 %v10802_v38, %s11033_s11  ;;  %10881 = vrot.lane.b32.xlu1 %v10792_v54, %s11033_s11 }
0x3390   :  { %v10807_v39 = vpop.permute.xlu0 %10806  ;;  %v10797_v2 = vpop.permute.xlu1 %10796 }
0x3391   :  { %10896 = vrot.lane.b32.xlu0 %v10807_v39, %s11033_s11  ;;  %10886 = vrot.lane.b32.xlu1 %v10797_v2, %s11033_s11 }
0x3394   :  { %v10817_v57 = vpop.permute.xlu0 %10816  ;;  %v10812_v5 = vpop.permute.xlu1 %10811 }
0x3395   :  { %10906 = vrot.lane.b32.xlu0 %v10817_v57, %s11033_s11  ;;  %10901 = vrot.lane.b32.xlu1 %v10812_v5, %s11033_s11 }
0x3398   :  { %v10827_v25 = vpop.permute.xlu0 %10826  ;;  %v10822_v34 = vpop.permute.xlu1 %10821 }
0x3399   :  { %10916 = vrot.lane.b32.xlu0 %v10827_v25, %s11033_s11  ;;  %10911 = vrot.lane.b32.xlu1 %v10822_v34, %s11033_s11 }
0x339c   :  { %v10837_v9 = vpop.permute.xlu0 %10836  ;;  %v10832_v13 = vpop.permute.xlu1 %10831 }
0x339d   :  { %v10839_v60 = vunpack.i.h.bf16 %v10837_v9  ;;  %v10838_v26 = vunpack.i.l.bf16 %v10837_v9  ;;  %v10834_v43 = vunpack.i.h.bf16 %v10832_v13  ;;  %v10833_v53 = vunpack.i.l.bf16 %v10832_v13  ;;  %6643 = vperm.xlu0 %8578, %v6633_v51   ;;  %6638 = vperm.xlu1 %8579, %v6632_v41  }
0x339f   :  { %v8233_v46 = vpack.c.bf16 %v10839_v60, %v10838_v26  ;;  %v8231_v49 = vpack.c.bf16 %v10834_v43, %v10833_v53 }
0x33a0   :  { %v10847_v42 = vpop.permute.xlu0 %10846  ;;  %v10842_v8 = vpop.permute.xlu1 %10841 }
0x33a1   :  { %v10849_v40 = vunpack.i.h.bf16 %v10847_v42  ;;  %v10848_v47 = vunpack.i.l.bf16 %v10847_v42  ;;  %v10844_v3 = vunpack.i.h.bf16 %v10842_v8  ;;  %v10843_v44 = vunpack.i.l.bf16 %v10842_v8  ;;  %8232 = vmatprep.subr.bf16.mxu0 %v8231_v49  ;;  %6653 = vperm.xlu0 %8578, %v6635_v24   ;;  %v6623_v24 = vld [vmem:[%s14777_s6 + $0x18] sm:$0xff] }
0x33a2   :  { %8234 = vmatpush3.bf16.msra.mxu0 %v8233_v46  ;;  %6648 = vperm.xlu1 %8579, %v6634_v56   ;;  %v6625_v56 = vld [vmem:[%s14777_s6 + $0x28] sm:$0xff] }
0x33a3   :  { %v8237_v4 = vpack.c.bf16 %v10849_v40, %v10848_v47  ;;  %v8235_v11 = vpack.c.bf16 %v10844_v3, %v10843_v44  ;;  %v6620_v40 = vld [vmem:[%s14777_s6] sm:$0xff] }
0x33a4   :  { %v6624_v3 = vld [vmem:[%s14777_s6 + $0x20] sm:$0xff] }
0x33a5   :  { %8236 = vmatprep.subr.bf16.mxu0 %v8235_v11  ;;  %v6626_v11 = vld [vmem:[%s14777_s6 + $0x30] sm:$0xff] }
0x33a6   :  { %8238 = vmatpush3.bf16.msra.mxu0 %v8237_v4  ;;  %v6627_v4 = vld [vmem:[%s14777_s6 + $0x38] sm:$0xff] }
0x33ef   :  { %v10857_v20 = vpop.permute.xlu0 %10856  ;;  %v10852_v19 = vpop.permute.xlu1 %10851 }
0x33f0   :  { %v10859_v59 = vunpack.i.h.bf16 %v10857_v20  ;;  %v10858_v18 = vunpack.i.l.bf16 %v10857_v20  ;;  %v10854_v6 = vunpack.i.h.bf16 %v10852_v19  ;;  %v10853_v31 = vunpack.i.l.bf16 %v10852_v19  ;;  %v6630_v20 = vld [vmem:[%s14777_s6 + $0x50] sm:$0xff]  ;;  %v6628_v19 = vld [vmem:[%s14777_s6 + $0x40] sm:$0xff] }
0x33f2   :  { %v8241_v16 = vpack.c.bf16 %v10859_v59, %v10858_v18  ;;  %v8239_v10 = vpack.c.bf16 %v10854_v6, %v10853_v31  ;;  %v6629_v59 = vld [vmem:[%s14777_s6 + $0x48] sm:$0xff]  ;;  %v6631_v18 = vld [vmem:[%s14777_s6 + $0x58] sm:$0xff]  ;;  %v6959_v6 = vld [vmem:[%s14779_s22] sm:$0xff] }
0x33f3   :  { %v6960_v31 = vld [vmem:[%s14779_s22 + $0x8] sm:$0xff] }
0x33f4   :  { %8240 = vmatprep.subr.bf16.mxu0 %v8239_v10  ;;  %v6961_v10 = vld [vmem:[%s14779_s22 + $0x10] sm:$0xff] }
0x33f5   :  { %8242 = vmatpush3.bf16.msra.mxu0 %v8241_v16  ;;  %v8271_v16 = vpack.c.bf16 %v6960_v31, %v6959_v6 }
0x33f7   :  { %v10872_v30 = vpop.permute.xlu0 %10871  ;;  %v10862_v36 = vpop.permute.xlu1 %10861 }
0x33f8   :  { %v10874_v29 = vunpack.i.h.bf16 %v10872_v30  ;;  %v10873_v15 = vunpack.i.l.bf16 %v10872_v30  ;;  %v10864_v12 = vunpack.i.h.bf16 %v10862_v36  ;;  %v10863_v50 = vunpack.i.l.bf16 %v10862_v36  ;;  %v6962_v30 = vld [vmem:[%s14779_s22 + $0x18] sm:$0xff] }
0x33f9   :  { %v8275_v36 = vpack.c.bf16 %v6962_v30, %v6961_v10 }
0x33fa   :  { %v8245_v17 = vpack.c.bf16 %v10874_v29, %v10873_v15  ;;  %v8243_v37 = vpack.c.bf16 %v10864_v12, %v10863_v50 }
0x33fb   :  { %v10877_v14 = vpop.permute.xlu0 %10876  ;;  %v10867_v61 = vpop.permute.xlu1 %10866 }
0x33fc   :  { %v10879_v35 = vunpack.i.h.bf16 %v10877_v14  ;;  %v10878_v32 = vunpack.i.l.bf16 %v10877_v14  ;;  %v10869_v62 = vunpack.i.h.bf16 %v10867_v61  ;;  %v10868_v7 = vunpack.i.l.bf16 %v10867_v61  ;;  %8244 = vmatprep.subr.bf16.mxu0 %v8243_v37 }
0x33fd   :  { %8246 = vmatpush3.bf16.msra.mxu0 %v8245_v17 }
0x33fe   :  { %v8249_v33 = vpack.c.bf16 %v10879_v35, %v10878_v32  ;;  %v8247_v58 = vpack.c.bf16 %v10869_v62, %v10868_v7 }
0x33ff   :  { %v10892_v55 = vpop.permute.xlu0 %10891  ;;  %v10882_v27 = vpop.permute.xlu1 %10881 }
0x3400   :  { %v10894_v63 = vunpack.i.h.bf16 %v10892_v55  ;;  %v10893_v0 = vunpack.i.l.bf16 %v10892_v55  ;;  %v10884_v22 = vunpack.i.h.bf16 %v10882_v27  ;;  %v10883_v48 = vunpack.i.l.bf16 %v10882_v27  ;;  %8248 = vmatprep.subr.bf16.mxu0 %v8247_v58 }
0x3401   :  { %8250 = vmatpush3.bf16.msra.mxu0 %v8249_v33  ;;  %v6950_v33 = vstv %s7241_s8 }
0x3402   :  { %v8253_v45 = vpack.c.bf16 %v10894_v63, %v10893_v0  ;;  %v8251_v21 = vpack.c.bf16 %v10884_v22, %v10883_v48 }
0x3403   :  { %v10897_v38 = vpop.permute.xlu0 %10896  ;;  %v10887_v54 = vpop.permute.xlu1 %10886 }
0x3404   :  { %v10899_v39 = vunpack.i.h.bf16 %v10897_v38  ;;  %v10898_v2 = vunpack.i.l.bf16 %v10897_v38  ;;  %v10889_v23 = vunpack.i.h.bf16 %v10887_v54  ;;  %v10888_v57 = vunpack.i.l.bf16 %v10887_v54  ;;  %8252 = vmatprep.subr.bf16.mxu0 %v8251_v21 }
0x3405   :  { %8254 = vmatpush3.bf16.msra.mxu0 %v8253_v45 }
0x3406   :  { %v8257_v5 = vpack.c.bf16 %v10899_v39, %v10898_v2  ;;  %v8255_v25 = vpack.c.bf16 %v10889_v23, %v10888_v57 }
0x3407   :  { %v10907_v34 = vpop.permute.xlu0 %10906  ;;  %v10902_v52 = vpop.permute.xlu1 %10901 }
0x3408   :  { %v10909_v9 = vunpack.i.h.bf16 %v10907_v34  ;;  %v10908_v13 = vunpack.i.l.bf16 %v10907_v34  ;;  %v10904_v60 = vunpack.i.h.bf16 %v10902_v52  ;;  %v10903_v26 = vunpack.i.l.bf16 %v10902_v52  ;;  %8256 = vmatprep.subr.bf16.mxu0 %v8255_v25 }
0x3409   :  { %8258 = vmatpush3.bf16.msra.mxu0 %v8257_v5 }
0x340a   :  { %v8261_v43 = vpack.c.bf16 %v10909_v9, %v10908_v13  ;;  %v8259_v53 = vpack.c.bf16 %v10904_v60, %v10903_v26 }
0x340b   :  { %v10917_v51 = vpop.permute.xlu0 %10916  ;;  %v10912_v46 = vpop.permute.xlu1 %10911 }
0x340c   :  { %v10919_v49 = vunpack.i.h.bf16 %v10917_v51  ;;  %v10918_v41 = vunpack.i.l.bf16 %v10917_v51  ;;  %v10914_v42 = vunpack.i.h.bf16 %v10912_v46  ;;  %v10913_v8 = vunpack.i.l.bf16 %v10912_v46  ;;  %8260 = vmatprep.subr.bf16.mxu0 %v8259_v53 }
0x340d   :  { %8262 = vmatpush3.bf16.msra.mxu0 %v8261_v43 }
0x340e   :  { %v8263_v47 = vpack.c.bf16 %v10914_v42, %v10913_v8  ;;  %8279 = vmatprep.subr.bf16.mxu0 %v14757_v28  ;;  %v8267_v44 = vpack.c.bf16 %v10919_v49, %v10918_v41  ;;  %v7060_v8 = vld [vmem:[%s14780_s3] sm:$0x3] }
0x3410   :  { %6841 = vmatmul.mubr.f32.vlgmr.msra.gmra.mrb[32].mxu0 %v6620_v40  ;;  %8264 = vmatprep.subr.bf16.mxu1 %v8263_v47 }
0x3411   :  { %8266 = vmatpush3.bf16.msra.mxu1 %v8263_v47  ;;  %6845 = vmatprep.mubr.f32.mxu0 %v6624_v3 }
0x3412   :  { %8268 = vmatprep.subr.bf16.mxu1 %v8267_v44 }
0x3414   :  { %6846 = vmatmul.mubr.f32.gmra.mrb[34].mxu0 %v6623_v24 }
0x3415   :  { %8270 = vmatpush3.bf16.msra.mxu1 %v8267_v44  ;;  %6850 = vmatprep.mubr.f32.mxu0 %v6627_v4 }
0x3416   :  { %8272 = vmatprep.subr.bf16.mxu1 %v8271_v16 }
0x3418   :  { %6851 = vmatmul.mubr.f32.gmra.mrb[36].mxu0 %v6626_v11  ;;  %7566 = vmatmul.mubr.msk.f32.vlgmr.msra.gmra.mrb[56].mxu1 %vm5491_vm8, %v6625_v56 }
0x3419   :  { %6855 = vmatprep.mubr.f32.mxu0 %v6630_v20  ;;  %7568 = vmatprep.mubr.msk.f32.mxu1 %vm5491_vm8, %v6628_v19 }
0x341a   :  { %8274 = vmatpush3.bf16.msra.mxu1 %v8271_v16 }
0x341b   :  { %8276 = vmatprep.subr.bf16.mxu1 %v8275_v36 }
0x341c   :  { %6856 = vmatmul.mubr.f32.gmra.mrb[38].mxu0 %v6629_v59  ;;  %7569 = vmatmul.mubr.msk.f32.gmra.mrb[58].mxu1 %vm5491_vm8, %v6631_v18  ;;  %v6639_v17 = vpop.permute.xlu1 %6638  ;;  %v6644_v61 = vpop.permute.xlu0 %6643 }
0x341d   :  { %7593 = vmatprep.mubr.msk.f32.mxu0 %vm11036_vm1, %v14759_v1 }
0x341e   :  { %8278 = vmatpush3.bf16.msra.mxu1 %v8275_v36 }
0x3420   :  { %v6654_v25 = vpop.permute.xlu0 %6653 }
0x3421   :  { %v6649_v22 = vpop.permute.xlu1 %6648 }
0x34e3   :  { %v7472_v29 = vpop.f32.mrb[32].mxu0 }
0x34e4   :  { %v7473_v15 = vpop.f32.mrb[33].mxu0 }
0x34e5   :  { %v7474_v12 = vadd.f32 %v7473_v15, %v7472_v29 }
0x34e7   :  { %v7475_v50 = vpop.f32.mrb[34].mxu0  ;;  %v6843_v7 = vadd.f32 %v7474_v12, %v6639_v17 }
0x34e8   :  { %v7476_v37 = vpop.f32.mrb[35].mxu0 }
0x34e9   :  { %v7477_v14 = vadd.f32 %v7476_v37, %v7475_v50 }
0x34eb   :  { %v7478_v35 = vpop.f32.mrb[36].mxu0  ;;  %v6848_v32 = vadd.f32 %v7477_v14, %v6644_v61  ;;  %v7567_v62 = vpop.f32.mrb[56].mxu1 }
0x34ec   :  { %v7479_v58 = vpop.f32.mrb[37].mxu0  ;;  %v6927_v55 = vpop.f32.mrb[57].mxu1 }
0x34ed   :  { %v6933_v27 = vadd.f32 %v7567_v62, %v6848_v32  ;;  %v7480_v63 = vadd.f32 %v7479_v58, %v7478_v35  ;;  %v6928_v0 = vadd.f32 %v6927_v55, %v6843_v7 }
0x34ef   :  { %vm6947_vm11 = vcmp.ge.f32.partialorder %v6933_v27, 0.0  ;;  %v6952_v48 = vmul.f32 %v6950_v33, %v6933_v27  ;;  %vm6946_vm10 = vcmp.ge.f32.partialorder %v6928_v0, 0.0  ;;  %v6951_v45 = vmul.f32 %v6950_v33, %v6928_v0  ;;  %v7481_v21 = vpop.f32.mrb[38].mxu0  ;;  %v7570_v38 = vpop.f32.mrb[58].mxu1 }
0x34f0   :  { %v7482_v54 = vpop.f32.mrb[39].mxu0  ;;  %v6853_v39 = vadd.f32 %v7480_v63, %v6649_v22  ;;  %v6937_v2 = vpop.f32.mrb[59].mxu1 }
0x34f1   :  { %v6956_v23 = vsel %vm6947_vm11, %v6933_v27, %v6952_v48  ;;  %v7483_v57 = vadd.f32 %v7482_v54, %v7481_v21  ;;  %v6955_v5 = vsel %vm6946_vm10, %v6928_v0, %v6951_v45 }
0x34f2   :  { %v6938_v34 = vadd.f32 %v6937_v2, %v6853_v39  ;;  %7579 = vmatprep.mubr.msk.f32.mxu1 %vm5491_vm8, %v6955_v5 }
0x34f3   :  { %v6858_v52 = vadd.f32 %v7483_v57, %v6654_v25  ;;  %7580 = vmatmul.mubr.msk.f32.vlgmr.msra.gmra.mrb[60].mxu1 %vm5491_vm8, %v6956_v23 }
0x34f4   :  { %vm6948_vm3 = vcmp.ge.f32.partialorder %v6938_v34, 0.0  ;;  %v6953_v9 = vmul.f32 %v6950_v33, %v6938_v34 }
0x34f5   :  { %v6943_v13 = vadd.f32 %v7570_v38, %v6858_v52 }
0x34f6   :  { %v6957_v60 = vsel %vm6948_vm3, %v6938_v34, %v6953_v9 }
0x34f7   :  { %7582 = vmatprep.mubr.msk.f32.mxu1 %vm5491_vm8, %v6957_v60  ;;  %vm6949_vm12 = vcmp.ge.f32.partialorder %v6943_v13, 0.0  ;;  %v6954_v26 = vmul.f32 %v6950_v33, %v6943_v13 }
0x34f9   :  { %v6958_v43 = vsel %vm6949_vm12, %v6943_v13, %v6954_v26 }
0x34fa   :  { %7583 = vmatmul.mubr.msk.f32.gmra.mrb[62].mxu1 %vm5491_vm8, %v6958_v43 }
0x35c6   :  { %v7581_v53 = vpop.f32.mrb[60].mxu1 }
0x35c7   :  { %v7041_v51 = vpop.f32.mrb[61].mxu1 }
0x35c8   :  { %v8280_v46 = vpack.c.bf16 %v7581_v53, %v7041_v51 }
0x35ca   :  { %8281 = vmatpush3.bf16.msra.mxu0 %v8280_v46 }
0x35cb   :  { %8282 = vmatprep.subr.bf16.mxu0 %v14757_v28 }
0x35cd   :  { %v7584_v49 = vpop.f32.mrb[62].mxu1 }
0x35ce   :  { %v7051_v41 = vpop.f32.mrb[63].mxu1 }
0x35cf   :  { %v8283_v42 = vpack.c.bf16 %v7584_v49, %v7051_v41 }
0x35d1   :  { %8284 = vmatpush3.bf16.msra.mxu0 %v8283_v42 }
0x35d4   :  { %7594 = vmatmul.mubr.msk.f32.vlgmr.msra.gmra.mrb[40].mxu0 %vm5491_vm8, %v7060_v8 }
0x36a7   :  { %v7130_v40 = vpop.f32.mrb[40].mxu0 }
0x36a8   :  { %v7251_v47 = vmul.f32 -1.442695, %v7130_v40  ;;  %v7595_v3 = vpop.f32.mrb[41].mxu0 }
0x36aa   :  { %10921 = vpow2.f32 %v7251_v47 }
0x36b4   :  { %v10922_v44 = vpop.eup %10921 }
0x36b5   :  { %v7137_v24 = vadd.f32 1.0, %v10922_v44 }
0x36b7   :  { %10923 = vrcp.f32 %v7137_v24 }
0x36c1   :  { %v10924_v1 = vpop.eup %10923 }
0x36c2   :  { %v7140_v4 = vmul.f32 2.0, %v10924_v1 }
0x36c4   :  { %v7252_v28 = vadd.f32 -1.0, %v7140_v4 }
0x36c6   :  { %7143 = vst.msk [vmem:[#allocation5] sm:$0x3] %vm7142_vm13, %v7252_v28 }
0x36c7   :  { %10948 = shalt.err (!%p10945_p9)
}
0x36c8   :  { %s10949_s18 = scalar_lea.hbm %s11189_s12, 32 }
0x36c9   :  { %p10950_p10 = scmp.ne.s32.totalorder %s11189_s12, %s10949_s18  ;;  %p10953_p11 = scmp.lt.u32.totalorder %s10949_s18, %s11189_s12 }
0x36cb   :  { %p10955_p12 = pnand %p10953_p11, %p10950_p10 }
0x36cd   :  { %10958 = shalt.err (!%p10955_p12)
}
0x36ce   :  { %7153 = dma.vmem_to_hbm [thread:$0]  %s7151_s30, 32, %s11189_s12, [#allocation3]  }
0x36cf   :  { %10961 = dma.done.wait [#allocation3], 32  }
0x36d0   :  { %10962 = vsyncadd [#allocation3], 4294967264 }
0x36d1   :  { %7157 = vsyncpa [#allocation3], 1 }
0x36d2   :  { %7158 = vsyncpa [#allocation4], 1 }

</bundles_post_ra>
